<compile_context>
chip_gen: v6e
topology: v6e:2x2x1
jax: 0.10.0
libtpu: 0.0.40
codegen_flags: <defaults>
</compile_context>

<pallas_src>
import math

import jax
import jax.numpy as jnp
from jax.experimental import pallas as pl
from jax.experimental.pallas import tpu as pltpu


BN_EPS = 1e-5

# Static architecture description (kept OUT of the jitted params pytree so
# kernel/grid shapes stay Python ints at trace time).
ARCH = dict(
    cconv1=dict(cin=1, cout=20, k=5, stride=2),
    cconv2=dict(cin=20, cout=20, k=5, stride=2),
    conv1=dict(cin=20, cout=25, kh=4, kw=4, stride=1),
    conv2=dict(cin=25, cout=30, kh=5, kw=5, stride=3),
    conv3=dict(cin=30, cout=35, kh=2, kw=2, stride=1),
    lin2=dict(fin=35, fout=20),
    lin4=dict(fin=20, fout=10),
)


# ----------------------------------------------------------------------------
# Pallas kernels
# ----------------------------------------------------------------------------

def _mm_bias_kernel(a_ref, b_ref, c_ref, o_ref):
    y = jnp.dot(a_ref[...], b_ref[...], preferred_element_type=jnp.float32)
    o_ref[...] = y + c_ref[...]


def _mm_bias_relu_kernel(a_ref, b_ref, c_ref, o_ref):
    y = jnp.dot(a_ref[...], b_ref[...], preferred_element_type=jnp.float32)
    o_ref[...] = jnp.maximum(y + c_ref[...], 0.0)


def _maxpool_kernel(x_ref, o_ref):
    # x_ref: (4, M, C) stacked 2x2 window taps -> elementwise max reduction.
    o_ref[...] = jnp.max(x_ref[...], axis=0)


def _dist_transform_kernel(re_ref, im_ref, wr_ref, wi_ref, o_ref):
    # per-pixel complex distance to a learned per-channel point.
    dr = re_ref[...] - wr_ref[...]
    di = im_ref[...] - wi_ref[...]
    o_ref[...] = jnp.sqrt(dr * dr + di * di)


# ----------------------------------------------------------------------------
# Pallas wrappers
# ----------------------------------------------------------------------------

def _round_up(x, m):
    return (x + m - 1) // m * m


def matmul_bias(a, w_p, b_p, n_out, relu=False):
    """out[:M, :n_out] = relu?( a @ W + bias ).

    a:   (M, K)  f32 activation (un-padded, padded+cast to bf16 here)
    w_p: (Kp, Np) bf16 weight, pre-transposed / pre-padded / BN-folded at init
    b_p: (1, Np)  f32 bias row
    Single K step (Kp <= 1024 for this net), single 128-wide N tile, M tiled.
    """
    M, K = a.shape
    Kp, Np = w_p.shape
    Mp8 = _round_up(max(M, 8), 8)
    n_blk = -(-Mp8 // 1024)                      # cdiv: keep tiles <= ~1024 rows
    tm = _round_up(-(-Mp8 // n_blk), 8)
    Mp = tm * n_blk

    a_p = jnp.pad(a, ((0, Mp - M), (0, Kp - K))).astype(jnp.bfloat16)

    kernel = _mm_bias_relu_kernel if relu else _mm_bias_kernel
    flops = 2 * Mp * Kp * Np
    bytes_accessed = a_p.size * 2 + w_p.size * 2 + b_p.size * 4 + Mp * Np * 4

    out = pl.pallas_call(
        kernel,
        out_shape=jax.ShapeDtypeStruct((Mp, Np), jnp.float32),
        grid_spec=pltpu.PrefetchScalarGridSpec(
            num_scalar_prefetch=0,
            grid=(n_blk,),
            in_specs=[
                pl.BlockSpec((tm, Kp), lambda i: (i, 0)),
                pl.BlockSpec((Kp, Np), lambda i: (0, 0)),
                pl.BlockSpec((1, Np), lambda i: (0, 0)),
            ],
            out_specs=pl.BlockSpec((tm, Np), lambda i: (i, 0)),
        ),
        compiler_params=pltpu.CompilerParams(
            dimension_semantics=("parallel",),
            vmem_limit_bytes=32 * 1024 * 1024),
        cost_estimate=pl.CostEstimate(flops=flops, transcendentals=0,
                                      bytes_accessed=bytes_accessed),
    )(a_p, w_p, b_p)
    return out[:M, :n_out]


def _im2col(x, kh, kw, stride):
    """NHWC -> (N*Ho*Wo, kh*kw*C) patches, 'valid' padding."""
    N, H, W, C = x.shape
    Ho = (H - kh) // stride + 1
    Wo = (W - kw) // stride + 1
    cols = []
    for ki in range(kh):
        for kj in range(kw):
            cols.append(x[:, ki:ki + (Ho - 1) * stride + 1:stride,
                          kj:kj + (Wo - 1) * stride + 1:stride, :])
    patches = jnp.concatenate(cols, axis=-1).reshape(N * Ho * Wo, kh * kw * C)
    return patches, Ho, Wo


def conv_bias(x, w_p, b_p, kh, kw, stride, cout, relu=False):
    """Conv2d (valid) with BN/bias folded into (w_p, b_p); optional ReLU."""
    N = x.shape[0]
    patches, Ho, Wo = _im2col(x, kh, kw, stride)
    out = matmul_bias(patches, w_p, b_p, cout, relu=relu)
    return out.reshape(N, Ho, Wo, cout)


def complex_conv_diff_trelu(xr, xi, w_p, b_p, k, stride, cout):
    """ComplexConv + DifferenceLayer + tangentReLU, fused into one matmul.

    The weight matrix is the block form [[Wr, Wi], [-Wi, Wr]] so a single GEMM
    on [P_re | P_im] yields [real | imag] output columns; the DifferenceLayer
    centre is folded into the bias row and tangentReLU is the ReLU epilogue.
    """
    N = xr.shape[0]
    pr, Ho, Wo = _im2col(xr, k, k, stride)
    pi, _, _ = _im2col(xi, k, k, stride)
    patches = jnp.concatenate([pr, pi], axis=1)            # (M, 2*k*k*Cin)
    out = matmul_bias(patches, w_p, b_p, 2 * cout, relu=True)
    yr = out[:, :cout].reshape(N, Ho, Wo, cout)
    yi = out[:, cout:].reshape(N, Ho, Wo, cout)
    return yr, yi


def maxpool_2x2(x):
    """MaxPool2d((2,2)), NHWC, via a Pallas max-reduction over 4 stacked taps."""
    N, H, W, C = x.shape
    Ho, Wo = H // 2, W // 2
    taps = []
    for ki in range(2):
        for kj in range(2):
            taps.append(x[:, ki:ki + 2 * Ho:2, kj:kj + 2 * Wo:2, :]
                        .reshape(N * Ho * Wo, C))
    stacked = jnp.stack(taps, axis=0)                       # (4, M, C)
    M = N * Ho * Wo
    out = pl.pallas_call(
        _maxpool_kernel,
        out_shape=jax.ShapeDtypeStruct((M, C), jnp.float32),
    )(stacked)
    return out.reshape(N, Ho, Wo, C)


def distance_transform(xr, xi, wr, wi):
    """DistanceTransform: complex (re, im) NHWC -> real NHWC, per-pixel |x-w|."""
    N, H, W, C = xr.shape
    M = N * H * W
    out = pl.pallas_call(
        _dist_transform_kernel,
        out_shape=jax.ShapeDtypeStruct((M, C), jnp.float32),
    )(xr.reshape(M, C), xi.reshape(M, C),
      wr.reshape(1, C), wi.reshape(1, C))
    return out.reshape(N, H, W, C)


# ----------------------------------------------------------------------------
# Parameter construction (deterministic; weights land in final matmul layout)
# ----------------------------------------------------------------------------

def _pad_wb(wm, bias):
    """Pad (K,N) weight to (Kp,Np) bf16 and (N,) bias to (1,Np) f32."""
    K, N = wm.shape
    Kp = _round_up(K, 128)
    Np = _round_up(N, 128)
    w_p = jnp.pad(wm, ((0, Kp - K), (0, Np - N))).astype(jnp.bfloat16)
    b_p = jnp.pad(bias.reshape(1, N), ((0, 0), (0, Np - N))).astype(jnp.float32)
    return w_p, b_p


def _conv_weight_to_mm(w):
    # (Cout, Cin, kh, kw) -> (kh*kw*Cin, Cout), matching the im2col tap order.
    cout, cin, kh, kw = w.shape
    return jnp.transpose(w, (2, 3, 1, 0)).reshape(kh * kw * cin, cout)


def _init_complex_block(key, cin, cout, k, stride):
    k1, k2, k3, k4 = jax.random.split(key, 4)
    fan_in = cin * k * k
    std = 1.0 / math.sqrt(fan_in)
    wr = std * jax.random.normal(k1, (cout, cin, k, k), jnp.float32)
    wi = std * jax.random.normal(k2, (cout, cin, k, k), jnp.float32)
    # DifferenceLayer: learned per-channel complex reference point.
    cr = 0.1 * jax.random.normal(k3, (cout,), jnp.float32)
    ci = 0.1 * jax.random.normal(k4, (cout,), jnp.float32)
    wr_m = _conv_weight_to_mm(wr)                       # (k*k*cin, cout)
    wi_m = _conv_weight_to_mm(wi)
    top = jnp.concatenate([wr_m, wi_m], axis=1)
    bot = jnp.concatenate([-wi_m, wr_m], axis=1)
    wm = jnp.concatenate([top, bot], axis=0)            # (2*k*k*cin, 2*cout)
    bias = jnp.concatenate([-cr, -ci], axis=0)          # DifferenceLayer folded
    return _pad_wb(wm, bias)


def _init_conv_bn(key, cin, cout, kh, kw, stride):
    kw_key, kb_key = jax.random.split(key)
    fan_in = cin * kh * kw
    bound = 1.0 / math.sqrt(fan_in)
    w = jax.random.uniform(kw_key, (cout, cin, kh, kw), jnp.float32,
                           -bound, bound)
    b = jax.random.uniform(kb_key, (cout,), jnp.float32, -bound, bound)
    # BN (inference mode, fresh stats): y = (conv + b) / sqrt(1+eps); fold it.
    bn_scale = 1.0 / math.sqrt(1.0 + BN_EPS)
    wm = _conv_weight_to_mm(w) * bn_scale
    bias = b * bn_scale
    return _pad_wb(wm, bias)


def _init_linear(key, fin, fout):
    kw_key, kb_key = jax.random.split(key)
    bound = 1.0 / math.sqrt(fin)
    w = jax.random.uniform(kw_key, (fout, fin), jnp.float32, -bound, bound)
    b = jax.random.uniform(kb_key, (fout,), jnp.float32, -bound, bound)
    return _pad_wb(w.T, b)


def init_params(key):
    keys = jax.random.split(key, 8)
    p = {}
    c1, c2 = ARCH["cconv1"], ARCH["cconv2"]
    p["cconv1_w"], p["cconv1_b"] = _init_complex_block(
        keys[0], c1["cin"], c1["cout"], c1["k"], c1["stride"])
    p["cconv2_w"], p["cconv2_b"] = _init_complex_block(
        keys[1], c2["cin"], c2["cout"], c2["k"], c2["stride"])
    # DistanceTransform: learned per-channel complex point.
    kr, ki = jax.random.split(keys[2])
    p["dt_wr"] = 0.1 * jax.random.normal(kr, (20,), jnp.float32)
    p["dt_wi"] = 0.1 * jax.random.normal(ki, (20,), jnp.float32)
    for name in ("conv1", "conv2", "conv3"):
        a = ARCH[name]
        idx = {"conv1": 3, "conv2": 4, "conv3": 5}[name]
        p[name + "_w"], p[name + "_b"] = _init_conv_bn(
            keys[idx], a["cin"], a["cout"], a["kh"], a["kw"], a["stride"])
    p["lin2_w"], p["lin2_b"] = _init_linear(keys[6], ARCH["lin2"]["fin"],
                                            ARCH["lin2"]["fout"])
    p["lin4_w"], p["lin4_b"] = _init_linear(keys[7], ARCH["lin4"]["fin"],
                                            ARCH["lin4"]["fout"])
    return p


# ----------------------------------------------------------------------------
# Forward pass
# ----------------------------------------------------------------------------

def dis_tan_forward(params, x):
    """x: (N, 2, H, W) real/imag parts of a 1-channel complex image (NCHW)."""
    xr = jnp.transpose(x[:, 0:1], (0, 2, 3, 1)).astype(jnp.float32)  # NHWC, C=1
    xi = jnp.transpose(x[:, 1:2], (0, 2, 3, 1)).astype(jnp.float32)

    # complex_conv1 -> distance1 -> tangentReLU   (one fused Pallas matmul)
    c1 = ARCH["cconv1"]
    xr, xi = complex_conv_diff_trelu(xr, xi, params["cconv1_w"],
                                     params["cconv1_b"],
                                     c1["k"], c1["stride"], c1["cout"])
    # complex_conv2 -> distance2 -> tangentReLU   (one fused Pallas matmul)
    c2 = ARCH["cconv2"]
    xr, xi = complex_conv_diff_trelu(xr, xi, params["cconv2_w"],
                                     params["cconv2_b"],
                                     c2["k"], c2["stride"], c2["cout"])

    # linear_1 = DistanceTransform: complex -> real
    x5 = distance_transform(xr, xi, params["dt_wr"], params["dt_wi"])

    # conv_1 + bn_1   (relu only feeds the unused x_res in the reference)
    a = ARCH["conv1"]
    h = conv_bias(x5, params["conv1_w"], params["conv1_b"],
                  a["kh"], a["kw"], a["stride"], a["cout"], relu=False)
    # mp_1
    h = maxpool_2x2(h)
    # conv_2 + bn_2   (relu again only feeds the unused x_res)
    a = ARCH["conv2"]
    h = conv_bias(h, params["conv2_w"], params["conv2_b"],
                  a["kh"], a["kw"], a["stride"], a["cout"], relu=False)
    # conv_3 + bn_3 + relu  (fused)
    a = ARCH["conv3"]
    h = conv_bias(h, params["conv3_w"], params["conv3_b"],
                  a["kh"], a["kw"], a["stride"], a["cout"], relu=True)

    # squeeze(-1).squeeze(-1): spatial is 1x1 here -> (N, 35)
    feat = h.reshape(h.shape[0], h.shape[-1])

    # linear_2 + relu  (fused), then linear_4
    h = matmul_bias(feat, params["lin2_w"], params["lin2_b"],
                    ARCH["lin2"]["fout"], relu=True)
    logits = matmul_bias(h, params["lin4_w"], params["lin4_b"],
                         ARCH["lin4"]["fout"], relu=False)
    return logits


# ----------------------------------------------------------------------------
# Main
# ----------------------------------------------------------------------------

if __name__ == "__main__":
    key = jax.random.PRNGKey(0)
    pkey, xkey = jax.random.split(key)
    params = init_params(pkey)

    # (batch=2, [real, imag] of one complex channel, 85x85): the smallest
    # spatial size for which conv_3's output is 1x1 so the squeeze()/linear_2
    # chain in the reference forward is well-defined.
    x = jax.random.normal(xkey, (2, 2, 85, 85), dtype=jnp.float32)

    fwd = jax.jit(dis_tan_forward)
    logits = fwd(params, x)
    jax.block_until_ready(logits)

    assert logits.shape == (2, 10), logits.shape
    assert bool(jnp.all(jnp.isfinite(logits)))
    print("KERNEL_OK")
</pallas_src>

<mosaic_0001>
module attributes {stable_mosaic.version = 11 : i64} {
  func.func @_mm_bias_relu_kernel(%arg0: i32, %arg1: memref<848x128xbf16, #tpu.memory_space<vmem>>, %arg2: memref<128x128xbf16, #tpu.memory_space<vmem>>, %arg3: memref<1x128xf32, #tpu.memory_space<vmem>>, %arg4: memref<848x128xf32, #tpu.memory_space<vmem>>) attributes {dimension_semantics = [#tpu.dimension_semantics<parallel>], iteration_bounds = array<i64: 4>, scalar_prefetch = 0 : i64, scratch_operands = 0 : i64, tpu.core_type = #tpu.core_type<tc>, window_params = [{transform_indices = @transform_0, window_bounds = array<i64: 848, 128>}, {pipeline_mode = #tpu.pipeline_mode<synchronous>, transform_indices = @transform_1, window_bounds = array<i64: 128, 128>}, {pipeline_mode = #tpu.pipeline_mode<synchronous>, transform_indices = @transform_2, window_bounds = array<i64: 1, 128>}, {transform_indices = @transform_3, window_bounds = array<i64: 848, 128>}]} {
    %c0 = arith.constant 0 : index
    %c0_0 = arith.constant 0 : index
    %0 = vector.load %arg1[%c0, %c0_0] : memref<848x128xbf16, #tpu.memory_space<vmem>>, vector<848x128xbf16>
    %c0_1 = arith.constant 0 : index
    %c0_2 = arith.constant 0 : index
    %1 = vector.load %arg2[%c0_1, %c0_2] : memref<128x128xbf16, #tpu.memory_space<vmem>>, vector<128x128xbf16>
    %cst = arith.constant dense<0.000000e+00> : vector<848x128xf32>
    %2 = tpu.matmul %0, %1, %cst {dimension_numbers = #tpu.dot_dimension_numbers<[1], [0], [0], [1], [0, 0, 1, 1], [], []>} : vector<848x128xbf16>, vector<128x128xbf16>, vector<848x128xf32> -> vector<848x128xf32>
    %c0_3 = arith.constant 0 : index
    %c0_4 = arith.constant 0 : index
    %3 = vector.load %arg3[%c0_3, %c0_4] : memref<1x128xf32, #tpu.memory_space<vmem>>, vector<1x128xf32>
    %4 = vector.broadcast %3 : vector<1x128xf32> to vector<848x128xf32>
    %5 = arith.addf %2, %4 : vector<848x128xf32>
    %cst_5 = arith.constant 0.000000e+00 : f32
    %6 = vector.broadcast %cst_5 : f32 to vector<848x128xf32>
    %7 = arith.maximumf %5, %6 : vector<848x128xf32>
    %c0_6 = arith.constant 0 : index
    %c0_7 = arith.constant 0 : index
    %8 = vector.load %arg4[%c0_6, %c0_7] : memref<848x128xf32, #tpu.memory_space<vmem>>, vector<848x128xf32>
    tpu.vector_store %arg4[%c0_6, %c0_7], %7 {strides = array<i32>} : memref<848x128xf32, #tpu.memory_space<vmem>>, vector<848x128xf32>,
    return
  }
  func.func @transform_0(%arg0: i32) -> (i32, i32) {
    %c0_i32 = arith.constant 0 : i32
    %c0_i32_0 = arith.constant 0 : i32
    return %arg0, %c0_i32 : i32, i32
  }
  func.func @transform_1(%arg0: i32) -> (i32, i32) {
    %c0_i32 = arith.constant 0 : i32
    %c0_i32_0 = arith.constant 0 : i32
    %c0_i32_1 = arith.constant 0 : i32
    return %c0_i32, %c0_i32_0 : i32, i32
  }
  func.func @transform_2(%arg0: i32) -> (i32, i32) {
    %c0_i32 = arith.constant 0 : i32
    %c0_i32_0 = arith.constant 0 : i32
    %c0_i32_1 = arith.constant 0 : i32
    return %c0_i32, %c0_i32_0 : i32, i32
  }
  func.func @transform_3(%arg0: i32) -> (i32, i32) {
    %c0_i32 = arith.constant 0 : i32
    %c0_i32_0 = arith.constant 0 : i32
    return %arg0, %c0_i32 : i32, i32
  }
}

module attributes {stable_mosaic.version = 11 : i64} {
  func.func @_mm_bias_relu_kernel(%arg0: i32, %arg1: memref<728x1024xbf16, #tpu.memory_space<vmem>>, %arg2: memref<1024x128xbf16, #tpu.memory_space<vmem>>, %arg3: memref<1x128xf32, #tpu.memory_space<vmem>>, %arg4: memref<728x128xf32, #tpu.memory_space<vmem>>) attributes {dimension_semantics = [#tpu.dimension_semantics<parallel>], iteration_bounds = array<i64: 1>, scalar_prefetch = 0 : i64, scratch_operands = 0 : i64, tpu.core_type = #tpu.core_type<tc>, window_params = [{transform_indices = @transform_0, window_bounds = array<i64: 728, 1024>}, {pipeline_mode = #tpu.pipeline_mode<synchronous>, transform_indices = @transform_1, window_bounds = array<i64: 1024, 128>}, {pipeline_mode = #tpu.pipeline_mode<synchronous>, transform_indices = @transform_2, window_bounds = array<i64: 1, 128>}, {transform_indices = @transform_3, window_bounds = array<i64: 728, 128>}]} {
    %c0 = arith.constant 0 : index
    %c0_0 = arith.constant 0 : index
    %0 = vector.load %arg1[%c0, %c0_0] : memref<728x1024xbf16, #tpu.memory_space<vmem>>, vector<728x1024xbf16>
    %c0_1 = arith.constant 0 : index
    %c0_2 = arith.constant 0 : index
    %1 = vector.load %arg2[%c0_1, %c0_2] : memref<1024x128xbf16, #tpu.memory_space<vmem>>, vector<1024x128xbf16>
    %cst = arith.constant dense<0.000000e+00> : vector<728x128xf32>
    %2 = tpu.matmul %0, %1, %cst {dimension_numbers = #tpu.dot_dimension_numbers<[1], [0], [0], [1], [0, 0, 1, 1], [], []>} : vector<728x1024xbf16>, vector<1024x128xbf16>, vector<728x128xf32> -> vector<728x128xf32>
    %c0_3 = arith.constant 0 : index
    %c0_4 = arith.constant 0 : index
    %3 = vector.load %arg3[%c0_3, %c0_4] : memref<1x128xf32, #tpu.memory_space<vmem>>, vector<1x128xf32>
    %4 = vector.broadcast %3 : vector<1x128xf32> to vector<728x128xf32>
    %5 = arith.addf %2, %4 : vector<728x128xf32>
    %cst_5 = arith.constant 0.000000e+00 : f32
    %6 = vector.broadcast %cst_5 : f32 to vector<728x128xf32>
    %7 = arith.maximumf %5, %6 : vector<728x128xf32>
    %c0_6 = arith.constant 0 : index
    %c0_7 = arith.constant 0 : index
    %8 = vector.load %arg4[%c0_6, %c0_7] : memref<728x128xf32, #tpu.memory_space<vmem>>, vector<728x128xf32>
    tpu.vector_store %arg4[%c0_6, %c0_7], %7 {strides = array<i32>} : memref<728x128xf32, #tpu.memory_space<vmem>>, vector<728x128xf32>,
    return
  }
  func.func @transform_0(%arg0: i32) -> (i32, i32) {
    %c0_i32 = arith.constant 0 : i32
    %c0_i32_0 = arith.constant 0 : i32
    return %arg0, %c0_i32 : i32, i32
  }
  func.func @transform_1(%arg0: i32) -> (i32, i32) {
    %c0_i32 = arith.constant 0 : i32
    %c0_i32_0 = arith.constant 0 : i32
    %c0_i32_1 = arith.constant 0 : i32
    return %c0_i32, %c0_i32_0 : i32, i32
  }
  func.func @transform_2(%arg0: i32) -> (i32, i32) {
    %c0_i32 = arith.constant 0 : i32
    %c0_i32_0 = arith.constant 0 : i32
    %c0_i32_1 = arith.constant 0 : i32
    return %c0_i32, %c0_i32_0 : i32, i32
  }
  func.func @transform_3(%arg0: i32) -> (i32, i32) {
    %c0_i32 = arith.constant 0 : i32
    %c0_i32_0 = arith.constant 0 : i32
    return %arg0, %c0_i32 : i32, i32
  }
}

module attributes {stable_mosaic.version = 11 : i64} {
  func.func @_dist_transform_kernel(%arg0: memref<722x20xf32, #tpu.memory_space<vmem>>, %arg1: memref<722x20xf32, #tpu.memory_space<vmem>>, %arg2: memref<1x20xf32, #tpu.memory_space<vmem>>, %arg3: memref<1x20xf32, #tpu.memory_space<vmem>>, %arg4: memref<722x20xf32, #tpu.memory_space<vmem>>) attributes {dimension_semantics = [], scalar_prefetch = 0 : i64, scratch_operands = 0 : i64, tpu.core_type = #tpu.core_type<tc>} {
    %c0 = arith.constant 0 : index
    %c0_0 = arith.constant 0 : index
    %0 = vector.load %arg0[%c0, %c0_0] : memref<722x20xf32, #tpu.memory_space<vmem>>, vector<722x20xf32>
    %c0_1 = arith.constant 0 : index
    %c0_2 = arith.constant 0 : index
    %1 = vector.load %arg2[%c0_1, %c0_2] : memref<1x20xf32, #tpu.memory_space<vmem>>, vector<1x20xf32>
    %2 = vector.broadcast %1 : vector<1x20xf32> to vector<722x20xf32>
    %3 = arith.subf %0, %2 : vector<722x20xf32>
    %c0_3 = arith.constant 0 : index
    %c0_4 = arith.constant 0 : index
    %4 = vector.load %arg1[%c0_3, %c0_4] : memref<722x20xf32, #tpu.memory_space<vmem>>, vector<722x20xf32>
    %c0_5 = arith.constant 0 : index
    %c0_6 = arith.constant 0 : index
    %5 = vector.load %arg3[%c0_5, %c0_6] : memref<1x20xf32, #tpu.memory_space<vmem>>, vector<1x20xf32>
    %6 = vector.broadcast %5 : vector<1x20xf32> to vector<722x20xf32>
    %7 = arith.subf %4, %6 : vector<722x20xf32>
    %8 = arith.mulf %3, %3 : vector<722x20xf32>
    %9 = arith.mulf %7, %7 : vector<722x20xf32>
    %10 = arith.addf %8, %9 : vector<722x20xf32>
    %11 = math.sqrt %10 : vector<722x20xf32>
    %c0_7 = arith.constant 0 : index
    %c0_8 = arith.constant 0 : index
    %12 = vector.load %arg4[%c0_7, %c0_8] : memref<722x20xf32, #tpu.memory_space<vmem>>, vector<722x20xf32>
    tpu.vector_store %arg4[%c0_7, %c0_8], %11 {strides = array<i32>} : memref<722x20xf32, #tpu.memory_space<vmem>>, vector<722x20xf32>,
    return
  }
}

module attributes {stable_mosaic.version = 11 : i64} {
  func.func @_mm_bias_kernel(%arg0: i32, %arg1: memref<512x384xbf16, #tpu.memory_space<vmem>>, %arg2: memref<384x128xbf16, #tpu.memory_space<vmem>>, %arg3: memref<1x128xf32, #tpu.memory_space<vmem>>, %arg4: memref<512x128xf32, #tpu.memory_space<vmem>>) attributes {dimension_semantics = [#tpu.dimension_semantics<parallel>], iteration_bounds = array<i64: 1>, scalar_prefetch = 0 : i64, scratch_operands = 0 : i64, tpu.core_type = #tpu.core_type<tc>, window_params = [{transform_indices = @transform_0, window_bounds = array<i64: 512, 384>}, {pipeline_mode = #tpu.pipeline_mode<synchronous>, transform_indices = @transform_1, window_bounds = array<i64: 384, 128>}, {pipeline_mode = #tpu.pipeline_mode<synchronous>, transform_indices = @transform_2, window_bounds = array<i64: 1, 128>}, {transform_indices = @transform_3, window_bounds = array<i64: 512, 128>}]} {
    %c0 = arith.constant 0 : index
    %c0_0 = arith.constant 0 : index
    %0 = vector.load %arg1[%c0, %c0_0] : memref<512x384xbf16, #tpu.memory_space<vmem>>, vector<512x384xbf16>
    %c0_1 = arith.constant 0 : index
    %c0_2 = arith.constant 0 : index
    %1 = vector.load %arg2[%c0_1, %c0_2] : memref<384x128xbf16, #tpu.memory_space<vmem>>, vector<384x128xbf16>
    %cst = arith.constant dense<0.000000e+00> : vector<512x128xf32>
    %2 = tpu.matmul %0, %1, %cst {dimension_numbers = #tpu.dot_dimension_numbers<[1], [0], [0], [1], [0, 0, 1, 1], [], []>} : vector<512x384xbf16>, vector<384x128xbf16>, vector<512x128xf32> -> vector<512x128xf32>
    %c0_3 = arith.constant 0 : index
    %c0_4 = arith.constant 0 : index
    %3 = vector.load %arg3[%c0_3, %c0_4] : memref<1x128xf32, #tpu.memory_space<vmem>>, vector<1x128xf32>
    %4 = vector.broadcast %3 : vector<1x128xf32> to vector<512x128xf32>
    %5 = arith.addf %2, %4 : vector<512x128xf32>
    %c0_5 = arith.constant 0 : index
    %c0_6 = arith.constant 0 : index
    %6 = vector.load %arg4[%c0_5, %c0_6] : memref<512x128xf32, #tpu.memory_space<vmem>>, vector<512x128xf32>
    tpu.vector_store %arg4[%c0_5, %c0_6], %5 {strides = array<i32>} : memref<512x128xf32, #tpu.memory_space<vmem>>, vector<512x128xf32>,
    return
  }
  func.func @transform_0(%arg0: i32) -> (i32, i32) {
    %c0_i32 = arith.constant 0 : i32
    %c0_i32_0 = arith.constant 0 : i32
    return %arg0, %c0_i32 : i32, i32
  }
  func.func @transform_1(%arg0: i32) -> (i32, i32) {
    %c0_i32 = arith.constant 0 : i32
    %c0_i32_0 = arith.constant 0 : i32
    %c0_i32_1 = arith.constant 0 : i32
    return %c0_i32, %c0_i32_0 : i32, i32
  }
  func.func @transform_2(%arg0: i32) -> (i32, i32) {
    %c0_i32 = arith.constant 0 : i32
    %c0_i32_0 = arith.constant 0 : i32
    %c0_i32_1 = arith.constant 0 : i32
    return %c0_i32, %c0_i32_0 : i32, i32
  }
  func.func @transform_3(%arg0: i32) -> (i32, i32) {
    %c0_i32 = arith.constant 0 : i32
    %c0_i32_0 = arith.constant 0 : i32
    return %arg0, %c0_i32 : i32, i32
  }
}

module attributes {stable_mosaic.version = 11 : i64} {
  func.func @_maxpool_kernel(%arg0: memref<4x128x25xf32, #tpu.memory_space<vmem>>, %arg1: memref<128x25xf32, #tpu.memory_space<vmem>>) attributes {dimension_semantics = [], scalar_prefetch = 0 : i64, scratch_operands = 0 : i64, tpu.core_type = #tpu.core_type<tc>} {
    %c0 = arith.constant 0 : index
    %c0_0 = arith.constant 0 : index
    %c0_1 = arith.constant 0 : index
    %0 = vector.load %arg0[%c0, %c0_0, %c0_1] : memref<4x128x25xf32, #tpu.memory_space<vmem>>, vector<4x128x25xf32>
    %cst = arith.constant dense<0xFF800000> : vector<128x25xf32>
    %1 = vector.multi_reduction <maximumf>, %0, %cst [0] : vector<4x128x25xf32> to vector<128x25xf32>
    %c0_2 = arith.constant 0 : index
    %c0_3 = arith.constant 0 : index
    %2 = vector.load %arg1[%c0_2, %c0_3] : memref<128x25xf32, #tpu.memory_space<vmem>>, vector<128x25xf32>
    tpu.vector_store %arg1[%c0_2, %c0_3], %1 {strides = array<i32>} : memref<128x25xf32, #tpu.memory_space<vmem>>, vector<128x25xf32>,
    return
  }
}

module attributes {stable_mosaic.version = 11 : i64} {
  func.func @_mm_bias_kernel(%arg0: i32, %arg1: memref<8x640xbf16, #tpu.memory_space<vmem>>, %arg2: memref<640x128xbf16, #tpu.memory_space<vmem>>, %arg3: memref<1x128xf32, #tpu.memory_space<vmem>>, %arg4: memref<8x128xf32, #tpu.memory_space<vmem>>) attributes {dimension_semantics = [#tpu.dimension_semantics<parallel>], iteration_bounds = array<i64: 1>, scalar_prefetch = 0 : i64, scratch_operands = 0 : i64, tpu.core_type = #tpu.core_type<tc>, window_params = [{transform_indices = @transform_0, window_bounds = array<i64: 8, 640>}, {pipeline_mode = #tpu.pipeline_mode<synchronous>, transform_indices = @transform_1, window_bounds = array<i64: 640, 128>}, {pipeline_mode = #tpu.pipeline_mode<synchronous>, transform_indices = @transform_2, window_bounds = array<i64: 1, 128>}, {transform_indices = @transform_3, window_bounds = array<i64: 8, 128>}]} {
    %c0 = arith.constant 0 : index
    %c0_0 = arith.constant 0 : index
    %0 = vector.load %arg1[%c0, %c0_0] : memref<8x640xbf16, #tpu.memory_space<vmem>>, vector<8x640xbf16>
    %c0_1 = arith.constant 0 : index
    %c0_2 = arith.constant 0 : index
    %1 = vector.load %arg2[%c0_1, %c0_2] : memref<640x128xbf16, #tpu.memory_space<vmem>>, vector<640x128xbf16>
    %cst = arith.constant dense<0.000000e+00> : vector<8x128xf32>
    %2 = tpu.matmul %0, %1, %cst {dimension_numbers = #tpu.dot_dimension_numbers<[1], [0], [0], [1], [0, 0, 1, 1], [], []>} : vector<8x640xbf16>, vector<640x128xbf16>, vector<8x128xf32> -> vector<8x128xf32>
    %c0_3 = arith.constant 0 : index
    %c0_4 = arith.constant 0 : index
    %3 = vector.load %arg3[%c0_3, %c0_4] : memref<1x128xf32, #tpu.memory_space<vmem>>, vector<1x128xf32>
    %4 = vector.broadcast %3 : vector<1x128xf32> to vector<8x128xf32>
    %5 = arith.addf %2, %4 : vector<8x128xf32>
    %c0_5 = arith.constant 0 : index
    %c0_6 = arith.constant 0 : index
    %6 = vector.load %arg4[%c0_5, %c0_6] : memref<8x128xf32, #tpu.memory_space<vmem>>, vector<8x128xf32>
    tpu.vector_store %arg4[%c0_5, %c0_6], %5 {strides = array<i32>} : memref<8x128xf32, #tpu.memory_space<vmem>>, vector<8x128xf32>,
    return
  }
  func.func @transform_0(%arg0: i32) -> (i32, i32) {
    %c0_i32 = arith.constant 0 : i32
    %c0_i32_0 = arith.constant 0 : i32
    return %arg0, %c0_i32 : i32, i32
  }
  func.func @transform_1(%arg0: i32) -> (i32, i32) {
    %c0_i32 = arith.constant 0 : i32
    %c0_i32_0 = arith.constant 0 : i32
    %c0_i32_1 = arith.constant 0 : i32
    return %c0_i32, %c0_i32_0 : i32, i32
  }
  func.func @transform_2(%arg0: i32) -> (i32, i32) {
    %c0_i32 = arith.constant 0 : i32
    %c0_i32_0 = arith.constant 0 : i32
    %c0_i32_1 = arith.constant 0 : i32
    return %c0_i32, %c0_i32_0 : i32, i32
  }
  func.func @transform_3(%arg0: i32) -> (i32, i32) {
    %c0_i32 = arith.constant 0 : i32
    %c0_i32_0 = arith.constant 0 : i32
    return %arg0, %c0_i32 : i32, i32
  }
}

module attributes {stable_mosaic.version = 11 : i64} {
  func.func @_mm_bias_relu_kernel(%arg0: i32, %arg1: memref<8x128xbf16, #tpu.memory_space<vmem>>, %arg2: memref<128x128xbf16, #tpu.memory_space<vmem>>, %arg3: memref<1x128xf32, #tpu.memory_space<vmem>>, %arg4: memref<8x128xf32, #tpu.memory_space<vmem>>) attributes {dimension_semantics = [#tpu.dimension_semantics<parallel>], iteration_bounds = array<i64: 1>, scalar_prefetch = 0 : i64, scratch_operands = 0 : i64, tpu.core_type = #tpu.core_type<tc>, window_params = [{transform_indices = @transform_0, window_bounds = array<i64: 8, 128>}, {pipeline_mode = #tpu.pipeline_mode<synchronous>, transform_indices = @transform_1, window_bounds = array<i64: 128, 128>}, {pipeline_mode = #tpu.pipeline_mode<synchronous>, transform_indices = @transform_2, window_bounds = array<i64: 1, 128>}, {transform_indices = @transform_3, window_bounds = array<i64: 8, 128>}]} {
    %c0 = arith.constant 0 : index
    %c0_0 = arith.constant 0 : index
    %0 = vector.load %arg1[%c0, %c0_0] : memref<8x128xbf16, #tpu.memory_space<vmem>>, vector<8x128xbf16>
    %c0_1 = arith.constant 0 : index
    %c0_2 = arith.constant 0 : index
    %1 = vector.load %arg2[%c0_1, %c0_2] : memref<128x128xbf16, #tpu.memory_space<vmem>>, vector<128x128xbf16>
    %cst = arith.constant dense<0.000000e+00> : vector<8x128xf32>
    %2 = tpu.matmul %0, %1, %cst {dimension_numbers = #tpu.dot_dimension_numbers<[1], [0], [0], [1], [0, 0, 1, 1], [], []>} : vector<8x128xbf16>, vector<128x128xbf16>, vector<8x128xf32> -> vector<8x128xf32>
    %c0_3 = arith.constant 0 : index
    %c0_4 = arith.constant 0 : index
    %3 = vector.load %arg3[%c0_3, %c0_4] : memref<1x128xf32, #tpu.memory_space<vmem>>, vector<1x128xf32>
    %4 = vector.broadcast %3 : vector<1x128xf32> to vector<8x128xf32>
    %5 = arith.addf %2, %4 : vector<8x128xf32>
    %cst_5 = arith.constant 0.000000e+00 : f32
    %6 = vector.broadcast %cst_5 : f32 to vector<8x128xf32>
    %7 = arith.maximumf %5, %6 : vector<8x128xf32>
    %c0_6 = arith.constant 0 : index
    %c0_7 = arith.constant 0 : index
    %8 = vector.load %arg4[%c0_6, %c0_7] : memref<8x128xf32, #tpu.memory_space<vmem>>, vector<8x128xf32>
    tpu.vector_store %arg4[%c0_6, %c0_7], %7 {strides = array<i32>} : memref<8x128xf32, #tpu.memory_space<vmem>>, vector<8x128xf32>,
    return
  }
  func.func @transform_0(%arg0: i32) -> (i32, i32) {
    %c0_i32 = arith.constant 0 : i32
    %c0_i32_0 = arith.constant 0 : i32
    return %arg0, %c0_i32 : i32, i32
  }
  func.func @transform_1(%arg0: i32) -> (i32, i32) {
    %c0_i32 = arith.constant 0 : i32
    %c0_i32_0 = arith.constant 0 : i32
    %c0_i32_1 = arith.constant 0 : i32
    return %c0_i32, %c0_i32_0 : i32, i32
  }
  func.func @transform_2(%arg0: i32) -> (i32, i32) {
    %c0_i32 = arith.constant 0 : i32
    %c0_i32_0 = arith.constant 0 : i32
    %c0_i32_1 = arith.constant 0 : i32
    return %c0_i32, %c0_i32_0 : i32, i32
  }
  func.func @transform_3(%arg0: i32) -> (i32, i32) {
    %c0_i32 = arith.constant 0 : i32
    %c0_i32_0 = arith.constant 0 : i32
    return %arg0, %c0_i32 : i32, i32
  }
}

module attributes {stable_mosaic.version = 11 : i64} {
  func.func @_mm_bias_kernel(%arg0: i32, %arg1: memref<8x128xbf16, #tpu.memory_space<vmem>>, %arg2: memref<128x128xbf16, #tpu.memory_space<vmem>>, %arg3: memref<1x128xf32, #tpu.memory_space<vmem>>, %arg4: memref<8x128xf32, #tpu.memory_space<vmem>>) attributes {dimension_semantics = [#tpu.dimension_semantics<parallel>], iteration_bounds = array<i64: 1>, scalar_prefetch = 0 : i64, scratch_operands = 0 : i64, tpu.core_type = #tpu.core_type<tc>, window_params = [{transform_indices = @transform_0, window_bounds = array<i64: 8, 128>}, {pipeline_mode = #tpu.pipeline_mode<synchronous>, transform_indices = @transform_1, window_bounds = array<i64: 128, 128>}, {pipeline_mode = #tpu.pipeline_mode<synchronous>, transform_indices = @transform_2, window_bounds = array<i64: 1, 128>}, {transform_indices = @transform_3, window_bounds = array<i64: 8, 128>}]} {
    %c0 = arith.constant 0 : index
    %c0_0 = arith.constant 0 : index
    %0 = vector.load %arg1[%c0, %c0_0] : memref<8x128xbf16, #tpu.memory_space<vmem>>, vector<8x128xbf16>
    %c0_1 = arith.constant 0 : index
    %c0_2 = arith.constant 0 : index
    %1 = vector.load %arg2[%c0_1, %c0_2] : memref<128x128xbf16, #tpu.memory_space<vmem>>, vector<128x128xbf16>
    %cst = arith.constant dense<0.000000e+00> : vector<8x128xf32>
    %2 = tpu.matmul %0, %1, %cst {dimension_numbers = #tpu.dot_dimension_numbers<[1], [0], [0], [1], [0, 0, 1, 1], [], []>} : vector<8x128xbf16>, vector<128x128xbf16>, vector<8x128xf32> -> vector<8x128xf32>
    %c0_3 = arith.constant 0 : index
    %c0_4 = arith.constant 0 : index
    %3 = vector.load %arg3[%c0_3, %c0_4] : memref<1x128xf32, #tpu.memory_space<vmem>>, vector<1x128xf32>
    %4 = vector.broadcast %3 : vector<1x128xf32> to vector<8x128xf32>
    %5 = arith.addf %2, %4 : vector<8x128xf32>
    %c0_5 = arith.constant 0 : index
    %c0_6 = arith.constant 0 : index
    %6 = vector.load %arg4[%c0_5, %c0_6] : memref<8x128xf32, #tpu.memory_space<vmem>>, vector<8x128xf32>
    tpu.vector_store %arg4[%c0_5, %c0_6], %5 {strides = array<i32>} : memref<8x128xf32, #tpu.memory_space<vmem>>, vector<8x128xf32>,
    return
  }
  func.func @transform_0(%arg0: i32) -> (i32, i32) {
    %c0_i32 = arith.constant 0 : i32
    %c0_i32_0 = arith.constant 0 : i32
    return %arg0, %c0_i32 : i32, i32
  }
  func.func @transform_1(%arg0: i32) -> (i32, i32) {
    %c0_i32 = arith.constant 0 : i32
    %c0_i32_0 = arith.constant 0 : i32
    %c0_i32_1 = arith.constant 0 : i32
    return %c0_i32, %c0_i32_0 : i32, i32
  }
  func.func @transform_2(%arg0: i32) -> (i32, i32) {
    %c0_i32 = arith.constant 0 : i32
    %c0_i32_0 = arith.constant 0 : i32
    %c0_i32_1 = arith.constant 0 : i32
    return %c0_i32, %c0_i32_0 : i32, i32
  }
  func.func @transform_3(%arg0: i32) -> (i32, i32) {
    %c0_i32 = arith.constant 0 : i32
    %c0_i32_0 = arith.constant 0 : i32
    return %arg0, %c0_i32 : i32, i32
  }
}

</mosaic_0001>

<bundles_post_ra>
// kernel: dis_tan_forward.9
= control target key start
LH: loop header
LB: loop body
LE: loop exit
PB: predicated region body
PF: predicated region fallthrough
CT: control target
= control target key end

     0   :  { %s1873_s12 = smov 0   ;;  %s2311_s0 = inlined_call_operand.vmem [shape: bf16[3392,128], index: 0, kind: input, shape index: {}]   ;;  %s2312_s1 = inlined_call_operand.vmem [shape: bf16[128,128], index: 1, kind: input, shape index: {}]   ;;  %s2313_s2 = inlined_call_operand.vmem [shape: f32[1,128], index: 2, kind: input, shape index: {}]   ;;  %s2314_s3 = inlined_call_operand.vmem [shape: f32[3392,128], index: 3, kind: output, shape index: {}]  }
   0x1 LB: > { %s1395_s13 = sadd.s32 4294967295, %s1849_s12   ;;  %p1399_p0 = scmp.ge.s32.totalorder %s1849_s12, 1  ;;  %s1849_s12 = sphi %s1873_s12, %s13_s12  }
   0x2   : > { %p138_p1 = scmp.lt.s32.totalorder %s1849_s12, 5 }
   0x4   : > { %p139_p2 = pnand %p1399_p0, %p138_p1 }
   0x5   : > { %s162_s18 = smul.u32 (!%p139_p2), 106, %s1395_s13 }
   0x6   : > { %142 = sbr.rel (%p139_p2) target bundleno = 454 (0x1c6), region = 32 }
   0x7   : > { %p163_p3 = scmp.lt.s32.totalorder (!%p139_p2), %s162_s18, 423 }
   0xb   : > { %v1781_v0 = vld [vmem:[%s2312_s1 + $0x38] sm:$0xff]   ;;  %v1851_v1 = vmov 0.0   ;;  %v1782_v2 = vld [vmem:[%s2312_s1 + $0x30] sm:$0xff]   ;;  %vm1852_vm0 = vmmov 0   ;;  %v1783_v3 = vld [vmem:[%s2312_s1 + $0x28] sm:$0xff]   ;;  %s2316_s18 = smov (!%p163_p3, %s162_s18), 423 }
   0xc   : > { %1527 = vmatprep.subr.bf16.mxu0 %v1851_v1  ;;  %1755 = vmatprep.subr.bf16.mxu1 %v1851_v1  ;;  %s1400_s21 = sshll.u32 %s2316_s18, 2  ;;  %v1784_v4 = vld [vmem:[%s2312_s1 + $0x20] sm:$0xff]   ;;  %v1785_v5 = vld [vmem:[%s2312_s1 + $0x18] sm:$0xff]   ;;  %v1786_v6 = vld [vmem:[%s2312_s1 + $0x10] sm:$0xff]   ;;  %s1401_s10 = sshll.u32 %s2316_s18, 3 }
   0xd   : > { %1528 = vmatpush3.bf16.msra.mxu0 %v1781_v0  ;;  %1763 = vmatpush3.bf16.msra.mxu1 %v1781_v0  ;;  %s1906_s24 = scalar_lea.vmem %s2311_s0, %s1400_s21  ;;  %v1787_v7 = vld [vmem:[%s2312_s1 + $0x8] sm:$0xff]   ;;  %v1788_v8 = vld [vmem:[%s2312_s1] sm:$0xff]   ;;  %s2094_s14 = scalar_lea.vmem %s2314_s3, %s1401_s10 }
   0xe   : > { %1529 = vmatprep.subr.bf16.mxu0 %v1851_v1  ;;  %1756 = vmatprep.subr.bf16.mxu1 %v1851_v1  ;;  %v1789_v9 = vld [vmem:[%s1906_s24] sm:$0xff]   ;;  %v1790_v10 = vld [vmem:[%s1906_s24 + $0xd8] sm:$0xff]   ;;  %v1791_v11 = vld [vmem:[%s1906_s24 + $0x8] sm:$0xff]  }
   0xf   : > { %1543 = vmatprep.mubr.msk.bf16.mxu0 %vm1852_vm0, %v1851_v1  ;;  %1651 = vmatprep.mubr.msk.bf16.mxu1 %vm1852_vm0, %v1851_v1  ;;  %v1792_v12 = vld [vmem:[%s1906_s24 + $0xe0] sm:$0xff]   ;;  %v1793_v13 = vld [vmem:[%s1906_s24 + $0x10] sm:$0xff]   ;;  %v1794_v14 = vld [vmem:[%s1906_s24 + $0xe8] sm:$0xff]  }
  0x10   : > { %v1795_v15 = vld [vmem:[%s1906_s24 + $0x18] sm:$0xff]   ;;  %v1796_v16 = vld [vmem:[%s1906_s24 + $0xf0] sm:$0xff]   ;;  %v1797_v17 = vld [vmem:[%s1906_s24 + $0x20] sm:$0xff]  }
  0x11   : > { %1530 = vmatpush3.bf16.msra.mxu0 %v1782_v2  ;;  %1764 = vmatpush3.bf16.msra.mxu1 %v1782_v2  ;;  %v1798_v18 = vld [vmem:[%s1906_s24 + $0xf8] sm:$0xff]   ;;  %v1799_v19 = vld [vmem:[%s1906_s24 + $0x28] sm:$0xff]   ;;  %v1800_v20 = vld [vmem:[%s1906_s24 + $0x100] sm:$0xff]  }
  0x12   : > { %1531 = vmatprep.subr.bf16.mxu0 %v1851_v1  ;;  %1757 = vmatprep.subr.bf16.mxu1 %v1851_v1  ;;  %v1801_v21 = vld [vmem:[%s1906_s24 + $0x30] sm:$0xff]   ;;  %v1802_v22 = vld [vmem:[%s1906_s24 + $0x108] sm:$0xff]   ;;  %v1803_v23 = vld [vmem:[%s1906_s24 + $0x38] sm:$0xff]  }
  0x13   : > { %v1804_v24 = vld [vmem:[%s1906_s24 + $0x110] sm:$0xff]   ;;  %v1805_v25 = vld [vmem:[%s1906_s24 + $0x40] sm:$0xff]   ;;  %v1806_v26 = vld [vmem:[%s1906_s24 + $0x118] sm:$0xff]  }
  0x14   : > { %v1807_v27 = vld [vmem:[%s1906_s24 + $0x48] sm:$0xff]   ;;  %v1808_v28 = vld [vmem:[%s1906_s24 + $0x120] sm:$0xff]   ;;  %v1809_v29 = vld [vmem:[%s1906_s24 + $0x50] sm:$0xff]  }
  0x15   : > { %1532 = vmatpush3.bf16.msra.mxu0 %v1783_v3  ;;  %1765 = vmatpush3.bf16.msra.mxu1 %v1783_v3  ;;  %v1810_v30 = vld [vmem:[%s1906_s24 + $0x128] sm:$0xff]   ;;  %v1811_v31 = vld [vmem:[%s1906_s24 + $0x58] sm:$0xff]   ;;  %v1812_v32 = vld [vmem:[%s1906_s24 + $0x130] sm:$0xff]  }
  0x16   : > { %1533 = vmatprep.subr.bf16.mxu0 %v1851_v1  ;;  %1758 = vmatprep.subr.bf16.mxu1 %v1851_v1  ;;  %v1813_v33 = vld [vmem:[%s1906_s24 + $0x60] sm:$0xff]   ;;  %v1814_v34 = vld [vmem:[%s1906_s24 + $0x138] sm:$0xff]   ;;  %v1815_v35 = vld [vmem:[%s1906_s24 + $0x68] sm:$0xff]  }
  0x17   : > { %v1816_v36 = vld [vmem:[%s1906_s24 + $0x140] sm:$0xff]   ;;  %v1817_v37 = vld [vmem:[%s1906_s24 + $0x70] sm:$0xff]   ;;  %v1818_v38 = vld [vmem:[%s1906_s24 + $0x148] sm:$0xff]  }
  0x18   : > { %v1819_v39 = vld [vmem:[%s1906_s24 + $0x78] sm:$0xff]   ;;  %v1820_v40 = vld [vmem:[%s1906_s24 + $0x150] sm:$0xff]   ;;  %v1821_v41 = vld [vmem:[%s1906_s24 + $0x80] sm:$0xff]  }
  0x19   : > { %1534 = vmatpush3.bf16.msra.mxu0 %v1784_v4  ;;  %1766 = vmatpush3.bf16.msra.mxu1 %v1784_v4  ;;  %v1822_v42 = vld [vmem:[%s1906_s24 + $0x158] sm:$0xff]   ;;  %v1823_v43 = vld [vmem:[%s1906_s24 + $0x88] sm:$0xff]   ;;  %v1824_v44 = vld [vmem:[%s1906_s24 + $0x160] sm:$0xff]  }
  0x1a   : > { %1535 = vmatprep.subr.bf16.mxu0 %v1851_v1  ;;  %1759 = vmatprep.subr.bf16.mxu1 %v1851_v1  ;;  %v1825_v45 = vld [vmem:[%s1906_s24 + $0x90] sm:$0xff]   ;;  %v1826_v46 = vld [vmem:[%s1906_s24 + $0x168] sm:$0xff]   ;;  %v1827_v47 = vld [vmem:[%s1906_s24 + $0x98] sm:$0xff]  }
  0x1b   : > { %v1828_v48 = vld [vmem:[%s1906_s24 + $0x170] sm:$0xff]   ;;  %v1829_v49 = vld [vmem:[%s1906_s24 + $0xa0] sm:$0xff]   ;;  %v1830_v50 = vld [vmem:[%s1906_s24 + $0x178] sm:$0xff]  }
  0x1c   : > { %v1831_v51 = vld [vmem:[%s1906_s24 + $0xa8] sm:$0xff]   ;;  %v1832_v52 = vld [vmem:[%s1906_s24 + $0x180] sm:$0xff]   ;;  %v1833_v53 = vld [vmem:[%s1906_s24 + $0xb0] sm:$0xff]  }
  0x1d   : > { %1536 = vmatpush3.bf16.msra.mxu0 %v1785_v5  ;;  %1767 = vmatpush3.bf16.msra.mxu1 %v1785_v5  ;;  %v1834_v54 = vld [vmem:[%s1906_s24 + $0x188] sm:$0xff]   ;;  %v1835_v55 = vld [vmem:[%s1906_s24 + $0xb8] sm:$0xff]   ;;  %v1836_v56 = vld [vmem:[%s1906_s24 + $0x190] sm:$0xff]  }
  0x1e   : > { %1537 = vmatprep.subr.bf16.mxu0 %v1851_v1  ;;  %1760 = vmatprep.subr.bf16.mxu1 %v1851_v1  ;;  %v1837_v57 = vld [vmem:[%s1906_s24 + $0xc0] sm:$0xff]   ;;  %v1838_v58 = vld [vmem:[%s1906_s24 + $0x198] sm:$0xff]  }
  0x1f   : > { %v2082_v59 = vld [vmem:[%s2313_s2] ss:$0 sm:$0xff] }
  0x21   : > { %1538 = vmatpush3.bf16.msra.mxu0 %v1786_v6  ;;  %1768 = vmatpush3.bf16.msra.mxu1 %v1786_v6 }
  0x22   : > { %1539 = vmatprep.subr.bf16.mxu0 %v1851_v1  ;;  %1761 = vmatprep.subr.bf16.mxu1 %v1851_v1 }
  0x25   : > { %1540 = vmatpush3.bf16.msra.mxu0 %v1787_v7  ;;  %1769 = vmatpush3.bf16.msra.mxu1 %v1787_v7  ;;  %v1839_v7 = vld [vmem:[%s1906_s24 + $0xc8] sm:$0xff]  }
  0x26   : > { %1541 = vmatprep.subr.bf16.mxu0 %v1851_v1  ;;  %1762 = vmatprep.subr.bf16.mxu1 %v1851_v1 }
  0x29   : > { %1542 = vmatpush3.bf16.msra.mxu0 %v1788_v8  ;;  %1770 = vmatpush3.bf16.msra.mxu1 %v1788_v8  ;;  %v1840_v8 = vld [vmem:[%s1906_s24 + $0x1a0] sm:$0xff]  }
  0x2c   : > { %1544 = vmatmul.mubr.bf16.vlgmr.msra.gmra.mxu0 %v1789_v9  ;;  %1652 = vmatmul.mubr.bf16.vlgmr.msra.gmra.mxu1 %v1790_v10 }
  0x2d   : > { %1547 = vmatprep.mubr.msk.bf16.mxu0 %vm1852_vm0, %v1851_v1  ;;  %1655 = vmatprep.mubr.msk.bf16.mxu1 %vm1852_vm0, %v1851_v1 }
  0x34   : > { %1548 = vmatmul.mubr.bf16.gmra.mxu0 %v1791_v11  ;;  %1656 = vmatmul.mubr.bf16.gmra.mxu1 %v1792_v12 }
  0x35   : > { %1551 = vmatprep.mubr.msk.bf16.mxu0 %vm1852_vm0, %v1851_v1  ;;  %1659 = vmatprep.mubr.msk.bf16.mxu1 %vm1852_vm0, %v1851_v1 }
  0x3c   : > { %1552 = vmatmul.mubr.bf16.gmra.mxu0 %v1793_v13  ;;  %1660 = vmatmul.mubr.bf16.gmra.mxu1 %v1794_v14 }
  0x3d   : > { %1555 = vmatprep.mubr.msk.bf16.mxu0 %vm1852_vm0, %v1851_v1  ;;  %1663 = vmatprep.mubr.msk.bf16.mxu1 %vm1852_vm0, %v1851_v1 }
  0x44   : > { %1556 = vmatmul.mubr.bf16.gmra.mxu0 %v1795_v15  ;;  %1664 = vmatmul.mubr.bf16.gmra.mxu1 %v1796_v16 }
  0x45   : > { %1559 = vmatprep.mubr.msk.bf16.mxu0 %vm1852_vm0, %v1851_v1  ;;  %1667 = vmatprep.mubr.msk.bf16.mxu1 %vm1852_vm0, %v1851_v1 }
  0x4c   : > { %1560 = vmatmul.mubr.bf16.gmra.mxu0 %v1797_v17  ;;  %1668 = vmatmul.mubr.bf16.gmra.mxu1 %v1798_v18 }
  0x4d   : > { %1563 = vmatprep.mubr.msk.bf16.mxu0 %vm1852_vm0, %v1851_v1  ;;  %1671 = vmatprep.mubr.msk.bf16.mxu1 %vm1852_vm0, %v1851_v1 }
  0x54   : > { %1564 = vmatmul.mubr.bf16.gmra.mxu0 %v1799_v19  ;;  %1672 = vmatmul.mubr.bf16.gmra.mxu1 %v1800_v20 }
  0x55   : > { %1567 = vmatprep.mubr.msk.bf16.mxu0 %vm1852_vm0, %v1851_v1  ;;  %1675 = vmatprep.mubr.msk.bf16.mxu1 %vm1852_vm0, %v1851_v1 }
  0x5c   : > { %1568 = vmatmul.mubr.bf16.gmra.mxu0 %v1801_v21  ;;  %1676 = vmatmul.mubr.bf16.gmra.mxu1 %v1802_v22 }
  0x5d   : > { %1571 = vmatprep.mubr.msk.bf16.mxu0 %vm1852_vm0, %v1851_v1  ;;  %1679 = vmatprep.mubr.msk.bf16.mxu1 %vm1852_vm0, %v1851_v1 }
  0x64   : > { %1572 = vmatmul.mubr.bf16.gmra.mxu0 %v1803_v23  ;;  %1680 = vmatmul.mubr.bf16.gmra.mxu1 %v1804_v24 }
  0x65   : > { %1575 = vmatprep.mubr.msk.bf16.mxu0 %vm1852_vm0, %v1851_v1  ;;  %1683 = vmatprep.mubr.msk.bf16.mxu1 %vm1852_vm0, %v1851_v1 }
  0x6c   : > { %1576 = vmatmul.mubr.bf16.gmra.mxu0 %v1805_v25  ;;  %1684 = vmatmul.mubr.bf16.gmra.mxu1 %v1806_v26  ;;  %v1841_v25 = vld [vmem:[%s1906_s24 + $0xd0] sm:$0xff]  }
  0x6d   : > { %1579 = vmatprep.mubr.msk.bf16.mxu0 %vm1852_vm0, %v1851_v1  ;;  %1687 = vmatprep.mubr.msk.bf16.mxu1 %vm1852_vm0, %v1851_v1 }
  0x74   : > { %1580 = vmatmul.mubr.bf16.gmra.mxu0 %v1807_v27  ;;  %1688 = vmatmul.mubr.bf16.gmra.mxu1 %v1808_v28 }
  0x75   : > { %1583 = vmatprep.mubr.msk.bf16.mxu0 %vm1852_vm0, %v1851_v1  ;;  %1691 = vmatprep.mubr.msk.bf16.mxu1 %vm1852_vm0, %v1851_v1 }
  0x7c   : > { %1584 = vmatmul.mubr.bf16.gmra.mxu0 %v1809_v29  ;;  %1692 = vmatmul.mubr.bf16.gmra.mxu1 %v1810_v30 }
  0x7d   : > { %1587 = vmatprep.mubr.msk.bf16.mxu0 %vm1852_vm0, %v1851_v1  ;;  %1695 = vmatprep.mubr.msk.bf16.mxu1 %vm1852_vm0, %v1851_v1 }
  0x84   : > { %1588 = vmatmul.mubr.bf16.gmra.mxu0 %v1811_v31  ;;  %1696 = vmatmul.mubr.bf16.gmra.mxu1 %v1812_v32 }
  0x85   : > { %1591 = vmatprep.mubr.msk.bf16.mxu0 %vm1852_vm0, %v1851_v1  ;;  %1699 = vmatprep.mubr.msk.bf16.mxu1 %vm1852_vm0, %v1851_v1 }
  0x8c   : > { %1592 = vmatmul.mubr.bf16.gmra.mxu0 %v1813_v33  ;;  %1700 = vmatmul.mubr.bf16.gmra.mxu1 %v1814_v34 }
  0x8d   : > { %1595 = vmatprep.mubr.msk.bf16.mxu0 %vm1852_vm0, %v1851_v1  ;;  %1703 = vmatprep.mubr.msk.bf16.mxu1 %vm1852_vm0, %v1851_v1 }
  0x94   : > { %1596 = vmatmul.mubr.bf16.gmra.mxu0 %v1815_v35  ;;  %1704 = vmatmul.mubr.bf16.gmra.mxu1 %v1816_v36 }
  0x95   : > { %1599 = vmatprep.mubr.msk.bf16.mxu0 %vm1852_vm0, %v1851_v1  ;;  %1707 = vmatprep.mubr.msk.bf16.mxu1 %vm1852_vm0, %v1851_v1 }
  0x9c   : > { %1600 = vmatmul.mubr.bf16.gmra.mxu0 %v1817_v37  ;;  %1708 = vmatmul.mubr.bf16.gmra.mxu1 %v1818_v38 }
  0x9d   : > { %1603 = vmatprep.mubr.msk.bf16.mxu0 %vm1852_vm0, %v1851_v1  ;;  %1711 = vmatprep.mubr.msk.bf16.mxu1 %vm1852_vm0, %v1851_v1 }
  0xa4   : > { %1604 = vmatmul.mubr.bf16.gmra.mxu0 %v1819_v39  ;;  %1712 = vmatmul.mubr.bf16.gmra.mxu1 %v1820_v40 }
  0xa5   : > { %1607 = vmatprep.mubr.msk.bf16.mxu0 %vm1852_vm0, %v1851_v1  ;;  %1715 = vmatprep.mubr.msk.bf16.mxu1 %vm1852_vm0, %v1851_v1 }
  0xac   : > { %1608 = vmatmul.mubr.bf16.gmra.mxu0 %v1821_v41  ;;  %1716 = vmatmul.mubr.bf16.gmra.mxu1 %v1822_v42 }
  0xad   : > { %1611 = vmatprep.mubr.msk.bf16.mxu0 %vm1852_vm0, %v1851_v1  ;;  %1719 = vmatprep.mubr.msk.bf16.mxu1 %vm1852_vm0, %v1851_v1 }
  0xb4   : > { %1612 = vmatmul.mubr.bf16.gmra.mxu0 %v1823_v43  ;;  %1720 = vmatmul.mubr.bf16.gmra.mxu1 %v1824_v44 }
  0xb5   : > { %1615 = vmatprep.mubr.msk.bf16.mxu0 %vm1852_vm0, %v1851_v1  ;;  %1723 = vmatprep.mubr.msk.bf16.mxu1 %vm1852_vm0, %v1851_v1 }
  0xbc   : > { %1616 = vmatmul.mubr.bf16.gmra.mxu0 %v1825_v45  ;;  %1724 = vmatmul.mubr.bf16.gmra.mxu1 %v1826_v46 }
  0xbd   : > { %1619 = vmatprep.mubr.msk.bf16.mxu0 %vm1852_vm0, %v1851_v1  ;;  %1727 = vmatprep.mubr.msk.bf16.mxu1 %vm1852_vm0, %v1851_v1 }
  0xc4   : > { %1620 = vmatmul.mubr.bf16.gmra.mxu0 %v1827_v47  ;;  %1728 = vmatmul.mubr.bf16.gmra.mxu1 %v1828_v48 }
  0xc5   : > { %1623 = vmatprep.mubr.msk.bf16.mxu0 %vm1852_vm0, %v1851_v1  ;;  %1731 = vmatprep.mubr.msk.bf16.mxu1 %vm1852_vm0, %v1851_v1 }
  0xcc   : > { %1624 = vmatmul.mubr.bf16.gmra.mxu0 %v1829_v49  ;;  %1732 = vmatmul.mubr.bf16.gmra.mxu1 %v1830_v50 }
  0xcd   : > { %1627 = vmatprep.mubr.msk.bf16.mxu0 %vm1852_vm0, %v1851_v1  ;;  %1735 = vmatprep.mubr.msk.bf16.mxu1 %vm1852_vm0, %v1851_v1 }
  0xd4   : > { %1628 = vmatmul.mubr.bf16.gmra.mxu0 %v1831_v51  ;;  %1736 = vmatmul.mubr.bf16.gmra.mxu1 %v1832_v52 }
  0xd5   : > { %1631 = vmatprep.mubr.msk.bf16.mxu0 %vm1852_vm0, %v1851_v1  ;;  %1739 = vmatprep.mubr.msk.bf16.mxu1 %vm1852_vm0, %v1851_v1 }
  0xdc   : > { %1632 = vmatmul.mubr.bf16.gmra.mxu0 %v1833_v53  ;;  %1740 = vmatmul.mubr.bf16.gmra.mxu1 %v1834_v54 }
  0xdd   : > { %1635 = vmatprep.mubr.msk.bf16.mxu0 %vm1852_vm0, %v1851_v1  ;;  %1743 = vmatprep.mubr.msk.bf16.mxu1 %vm1852_vm0, %v1851_v1 }
  0xe4   : > { %1636 = vmatmul.mubr.bf16.gmra.mxu0 %v1835_v55  ;;  %1744 = vmatmul.mubr.bf16.gmra.mxu1 %v1836_v56 }
  0xe5   : > { %1639 = vmatprep.mubr.msk.bf16.mxu0 %vm1852_vm0, %v1851_v1  ;;  %1747 = vmatprep.mubr.msk.bf16.mxu1 %vm1852_vm0, %v1851_v1 }
  0xec   : > { %v704_v60 = vpop.f32.mrf.mxu0  ;;  %1640 = vmatmul.mubr.bf16.gmra.mxu0 %v1837_v57  ;;  %v920_v61 = vpop.f32.mrf.mxu1  ;;  %1748 = vmatmul.mubr.bf16.gmra.mxu1 %v1838_v58 }
  0xed   : > { %v705_v62 = vadd.f32 %v2082_v59, %v704_v60  ;;  %v921_v63 = vadd.f32 %v2082_v59, %v920_v61  ;;  %1643 = vmatprep.mubr.msk.bf16.mxu0 %vm1852_vm0, %v1851_v1  ;;  %1751 = vmatprep.mubr.msk.bf16.mxu1 %vm1852_vm0, %v1851_v1 }
  0xee   : > { %v1545_v0 = vpop.f32.mrf.mxu0  ;;  %v1653_v2 = vpop.f32.mrf.mxu1 }
  0xef   : > { %v1127_v3 = vmax.f32 %v705_v62, 0.0  ;;  %v1181_v4 = vmax.f32 %v921_v63, 0.0 }
  0xf0   : > { %v707_v5 = vpop.f32.mrf.mxu0  ;;  %v923_v6 = vpop.f32.mrf.mxu1 }
  0xf1   : > { %1233 = vst [vmem:[%s2094_s14] sm:$0xff] %v1127_v3  ;;  %1287 = vst [vmem:[%s2094_s14 + $0x1b0] sm:$0xff] %v1181_v4  ;;  %v708_v9 = vadd.f32 %v2082_v59, %v707_v5  ;;  %v924_v10 = vadd.f32 %v2082_v59, %v923_v6 }
  0xf2   : > { %v1546_v11 = vpop.f32.mrf.mxu0  ;;  %v1654_v12 = vpop.f32.mrf.mxu1 }
  0xf3   : > { %v1128_v13 = vmax.f32 %v708_v9, 0.0  ;;  %v1182_v14 = vmax.f32 %v924_v10, 0.0 }
  0xf4   : > { %v712_v15 = vpop.f32.mrf.mxu0  ;;  %1644 = vmatmul.mubr.bf16.gmra.mxu0 %v1839_v7  ;;  %v928_v16 = vpop.f32.mrf.mxu1  ;;  %1752 = vmatmul.mubr.bf16.gmra.mxu1 %v1840_v8 }
  0xf5   : > { %1234 = vst [vmem:[%s2094_s14 + $0x8] sm:$0xff] %v1128_v13  ;;  %1288 = vst [vmem:[%s2094_s14 + $0x1b8] sm:$0xff] %v1182_v14  ;;  %v713_v17 = vadd.f32 %v2082_v59, %v712_v15  ;;  %v929_v18 = vadd.f32 %v2082_v59, %v928_v16  ;;  %1647 = vmatprep.mubr.msk.bf16.mxu0 %vm1852_vm0, %v1851_v1 }
  0xf6   : > { %v1549_v19 = vpop.f32.mrf.mxu0  ;;  %v1657_v20 = vpop.f32.mrf.mxu1 }
  0xf7   : > { %v1129_v21 = vmax.f32 %v713_v17, 0.0  ;;  %v1183_v22 = vmax.f32 %v929_v18, 0.0 }
  0xf8   : > { %v715_v23 = vpop.f32.mrf.mxu0  ;;  %v931_v24 = vpop.f32.mrf.mxu1 }
  0xf9   : > { %1235 = vst [vmem:[%s2094_s14 + $0x10] sm:$0xff] %v1129_v21  ;;  %1289 = vst [vmem:[%s2094_s14 + $0x1c0] sm:$0xff] %v1183_v22  ;;  %v716_v26 = vadd.f32 %v2082_v59, %v715_v23  ;;  %v932_v27 = vadd.f32 %v2082_v59, %v931_v24 }
  0xfa   : > { %v1550_v28 = vpop.f32.mrf.mxu0  ;;  %v1658_v29 = vpop.f32.mrf.mxu1 }
  0xfb   : > { %v1130_v30 = vmax.f32 %v716_v26, 0.0  ;;  %v1184_v1 = vmax.f32 %v932_v27, 0.0 }
  0xfc   : > { %v720_v31 = vpop.f32.mrf.mxu0  ;;  %1648 = vmatmul.mubr.bf16.gmra.mxu0 %v1841_v25  ;;  %v936_v32 = vpop.f32.mrf.mxu1 }
  0xfd   : > { %1236 = vst [vmem:[%s2094_s14 + $0x18] sm:$0xff] %v1130_v30  ;;  %1290 = vst [vmem:[%s2094_s14 + $0x1c8] sm:$0xff] %v1184_v1  ;;  %v721_v33 = vadd.f32 %v2082_v59, %v720_v31  ;;  %v937_v34 = vadd.f32 %v2082_v59, %v936_v32 }
  0xfe   : > { %v1553_v35 = vpop.f32.mrf.mxu0  ;;  %v1661_v36 = vpop.f32.mrf.mxu1 }
  0xff   : > { %v1131_v37 = vmax.f32 %v721_v33, 0.0  ;;  %v1185_v38 = vmax.f32 %v937_v34, 0.0 }
 0x100   : > { %v723_v39 = vpop.f32.mrf.mxu0  ;;  %v939_v40 = vpop.f32.mrf.mxu1 }
 0x101   : > { %1237 = vst [vmem:[%s2094_s14 + $0x20] sm:$0xff] %v1131_v37  ;;  %1291 = vst [vmem:[%s2094_s14 + $0x1d0] sm:$0xff] %v1185_v38  ;;  %v724_v41 = vadd.f32 %v2082_v59, %v723_v39  ;;  %v940_v42 = vadd.f32 %v2082_v59, %v939_v40 }
 0x102   : > { %v1554_v43 = vpop.f32.mrf.mxu0  ;;  %v1662_v44 = vpop.f32.mrf.mxu1 }
 0x103   : > { %v1132_v45 = vmax.f32 %v724_v41, 0.0  ;;  %v1186_v46 = vmax.f32 %v940_v42, 0.0 }
 0x104   : > { %v728_v47 = vpop.f32.mrf.mxu0  ;;  %v944_v48 = vpop.f32.mrf.mxu1 }
 0x105   : > { %1238 = vst [vmem:[%s2094_s14 + $0x28] sm:$0xff] %v1132_v45  ;;  %1292 = vst [vmem:[%s2094_s14 + $0x1d8] sm:$0xff] %v1186_v46  ;;  %v729_v49 = vadd.f32 %v2082_v59, %v728_v47  ;;  %v945_v50 = vadd.f32 %v2082_v59, %v944_v48 }
 0x106   : > { %v1557_v51 = vpop.f32.mrf.mxu0  ;;  %v1665_v52 = vpop.f32.mrf.mxu1 }
 0x107   : > { %v1133_v53 = vmax.f32 %v729_v49, 0.0  ;;  %v1187_v54 = vmax.f32 %v945_v50, 0.0 }
 0x108   : > { %v731_v55 = vpop.f32.mrf.mxu0  ;;  %v947_v56 = vpop.f32.mrf.mxu1 }
 0x109   : > { %1239 = vst [vmem:[%s2094_s14 + $0x30] sm:$0xff] %v1133_v53  ;;  %1293 = vst [vmem:[%s2094_s14 + $0x1e0] sm:$0xff] %v1187_v54  ;;  %v732_v57 = vadd.f32 %v2082_v59, %v731_v55  ;;  %v948_v58 = vadd.f32 %v2082_v59, %v947_v56 }
 0x10a   : > { %v1558_v60 = vpop.f32.mrf.mxu0  ;;  %v1666_v61 = vpop.f32.mrf.mxu1 }
 0x10b   : > { %v1134_v62 = vmax.f32 %v732_v57, 0.0  ;;  %v1188_v63 = vmax.f32 %v948_v58, 0.0 }
 0x10c   : > { %v736_v0 = vpop.f32.mrf.mxu0  ;;  %v952_v2 = vpop.f32.mrf.mxu1 }
 0x10d   : > { %1240 = vst [vmem:[%s2094_s14 + $0x38] sm:$0xff] %v1134_v62  ;;  %1294 = vst [vmem:[%s2094_s14 + $0x1e8] sm:$0xff] %v1188_v63  ;;  %v737_v3 = vadd.f32 %v2082_v59, %v736_v0  ;;  %v953_v4 = vadd.f32 %v2082_v59, %v952_v2 }
 0x10e   : > { %v1561_v5 = vpop.f32.mrf.mxu0  ;;  %v1669_v6 = vpop.f32.mrf.mxu1 }
 0x10f   : > { %v1135_v7 = vmax.f32 %v737_v3, 0.0  ;;  %v1189_v8 = vmax.f32 %v953_v4, 0.0 }
 0x110   : > { %v739_v9 = vpop.f32.mrf.mxu0  ;;  %v955_v10 = vpop.f32.mrf.mxu1 }
 0x111   : > { %1241 = vst [vmem:[%s2094_s14 + $0x40] sm:$0xff] %v1135_v7  ;;  %1295 = vst [vmem:[%s2094_s14 + $0x1f0] sm:$0xff] %v1189_v8  ;;  %v740_v11 = vadd.f32 %v2082_v59, %v739_v9  ;;  %v956_v12 = vadd.f32 %v2082_v59, %v955_v10 }
 0x112   : > { %v1562_v13 = vpop.f32.mrf.mxu0  ;;  %v1670_v14 = vpop.f32.mrf.mxu1 }
 0x113   : > { %v1136_v15 = vmax.f32 %v740_v11, 0.0  ;;  %v1190_v16 = vmax.f32 %v956_v12, 0.0 }
 0x114   : > { %v744_v17 = vpop.f32.mrf.mxu0  ;;  %v960_v18 = vpop.f32.mrf.mxu1 }
 0x115   : > { %1242 = vst [vmem:[%s2094_s14 + $0x48] sm:$0xff] %v1136_v15  ;;  %1296 = vst [vmem:[%s2094_s14 + $0x1f8] sm:$0xff] %v1190_v16  ;;  %v745_v19 = vadd.f32 %v2082_v59, %v744_v17  ;;  %v961_v20 = vadd.f32 %v2082_v59, %v960_v18 }
 0x116   : > { %v1565_v21 = vpop.f32.mrf.mxu0  ;;  %v1673_v22 = vpop.f32.mrf.mxu1 }
 0x117   : > { %v1137_v23 = vmax.f32 %v745_v19, 0.0  ;;  %v1191_v24 = vmax.f32 %v961_v20, 0.0 }
 0x118   : > { %v747_v25 = vpop.f32.mrf.mxu0  ;;  %v963_v26 = vpop.f32.mrf.mxu1 }
 0x119   : > { %1243 = vst [vmem:[%s2094_s14 + $0x50] sm:$0xff] %v1137_v23  ;;  %1297 = vst [vmem:[%s2094_s14 + $0x200] sm:$0xff] %v1191_v24  ;;  %v748_v27 = vadd.f32 %v2082_v59, %v747_v25  ;;  %v964_v28 = vadd.f32 %v2082_v59, %v963_v26 }
 0x11a   : > { %v1566_v29 = vpop.f32.mrf.mxu0  ;;  %v1674_v30 = vpop.f32.mrf.mxu1 }
 0x11b   : > { %v1138_v1 = vmax.f32 %v748_v27, 0.0  ;;  %v1192_v31 = vmax.f32 %v964_v28, 0.0 }
 0x11c   : > { %v752_v32 = vpop.f32.mrf.mxu0  ;;  %v968_v33 = vpop.f32.mrf.mxu1 }
 0x11d   : > { %1244 = vst [vmem:[%s2094_s14 + $0x58] sm:$0xff] %v1138_v1  ;;  %1298 = vst [vmem:[%s2094_s14 + $0x208] sm:$0xff] %v1192_v31  ;;  %v753_v34 = vadd.f32 %v2082_v59, %v752_v32  ;;  %v969_v35 = vadd.f32 %v2082_v59, %v968_v33 }
 0x11e   : > { %v1569_v36 = vpop.f32.mrf.mxu0  ;;  %v1677_v37 = vpop.f32.mrf.mxu1 }
 0x11f   : > { %v1139_v38 = vmax.f32 %v753_v34, 0.0  ;;  %v1193_v39 = vmax.f32 %v969_v35, 0.0 }
 0x120   : > { %v755_v40 = vpop.f32.mrf.mxu0  ;;  %v971_v41 = vpop.f32.mrf.mxu1 }
 0x121   : > { %1245 = vst [vmem:[%s2094_s14 + $0x60] sm:$0xff] %v1139_v38  ;;  %1299 = vst [vmem:[%s2094_s14 + $0x210] sm:$0xff] %v1193_v39  ;;  %v756_v42 = vadd.f32 %v2082_v59, %v755_v40  ;;  %v972_v43 = vadd.f32 %v2082_v59, %v971_v41 }
 0x122   : > { %v1570_v44 = vpop.f32.mrf.mxu0  ;;  %v1678_v45 = vpop.f32.mrf.mxu1 }
 0x123   : > { %v1140_v46 = vmax.f32 %v756_v42, 0.0  ;;  %v1194_v47 = vmax.f32 %v972_v43, 0.0 }
 0x124   : > { %v760_v48 = vpop.f32.mrf.mxu0  ;;  %v976_v49 = vpop.f32.mrf.mxu1 }
 0x125   : > { %1246 = vst [vmem:[%s2094_s14 + $0x68] sm:$0xff] %v1140_v46  ;;  %1300 = vst [vmem:[%s2094_s14 + $0x218] sm:$0xff] %v1194_v47  ;;  %v761_v50 = vadd.f32 %v2082_v59, %v760_v48  ;;  %v977_v51 = vadd.f32 %v2082_v59, %v976_v49 }
 0x126   : > { %v1573_v52 = vpop.f32.mrf.mxu0  ;;  %v1681_v53 = vpop.f32.mrf.mxu1 }
 0x127   : > { %v1141_v54 = vmax.f32 %v761_v50, 0.0  ;;  %v1195_v55 = vmax.f32 %v977_v51, 0.0 }
 0x128   : > { %v763_v56 = vpop.f32.mrf.mxu0  ;;  %v979_v57 = vpop.f32.mrf.mxu1 }
 0x129   : > { %1247 = vst [vmem:[%s2094_s14 + $0x70] sm:$0xff] %v1141_v54  ;;  %1301 = vst [vmem:[%s2094_s14 + $0x220] sm:$0xff] %v1195_v55  ;;  %v764_v58 = vadd.f32 %v2082_v59, %v763_v56  ;;  %v980_v60 = vadd.f32 %v2082_v59, %v979_v57 }
 0x12a   : > { %v1574_v61 = vpop.f32.mrf.mxu0  ;;  %v1682_v62 = vpop.f32.mrf.mxu1 }
 0x12b   : > { %v1142_v63 = vmax.f32 %v764_v58, 0.0  ;;  %v1196_v0 = vmax.f32 %v980_v60, 0.0 }
 0x12c   : > { %v768_v2 = vpop.f32.mrf.mxu0  ;;  %v984_v3 = vpop.f32.mrf.mxu1 }
 0x12d   : > { %1248 = vst [vmem:[%s2094_s14 + $0x78] sm:$0xff] %v1142_v63  ;;  %1302 = vst [vmem:[%s2094_s14 + $0x228] sm:$0xff] %v1196_v0  ;;  %v769_v4 = vadd.f32 %v2082_v59, %v768_v2  ;;  %v985_v5 = vadd.f32 %v2082_v59, %v984_v3 }
 0x12e   : > { %v1577_v6 = vpop.f32.mrf.mxu0  ;;  %v1685_v7 = vpop.f32.mrf.mxu1 }
 0x12f   : > { %v1143_v8 = vmax.f32 %v769_v4, 0.0  ;;  %v1197_v9 = vmax.f32 %v985_v5, 0.0 }
 0x130   : > { %v771_v10 = vpop.f32.mrf.mxu0  ;;  %v987_v11 = vpop.f32.mrf.mxu1 }
 0x131   : > { %1249 = vst [vmem:[%s2094_s14 + $0x80] sm:$0xff] %v1143_v8  ;;  %1303 = vst [vmem:[%s2094_s14 + $0x230] sm:$0xff] %v1197_v9  ;;  %v772_v12 = vadd.f32 %v2082_v59, %v771_v10  ;;  %v988_v13 = vadd.f32 %v2082_v59, %v987_v11 }
 0x132   : > { %v1578_v14 = vpop.f32.mrf.mxu0  ;;  %v1686_v15 = vpop.f32.mrf.mxu1 }
 0x133   : > { %v1144_v16 = vmax.f32 %v772_v12, 0.0  ;;  %v1198_v17 = vmax.f32 %v988_v13, 0.0 }
 0x134   : > { %v776_v18 = vpop.f32.mrf.mxu0  ;;  %v992_v19 = vpop.f32.mrf.mxu1 }
 0x135   : > { %1250 = vst [vmem:[%s2094_s14 + $0x88] sm:$0xff] %v1144_v16  ;;  %1304 = vst [vmem:[%s2094_s14 + $0x238] sm:$0xff] %v1198_v17  ;;  %v777_v20 = vadd.f32 %v2082_v59, %v776_v18  ;;  %v993_v21 = vadd.f32 %v2082_v59, %v992_v19 }
 0x136   : > { %v1581_v22 = vpop.f32.mrf.mxu0  ;;  %v1689_v23 = vpop.f32.mrf.mxu1 }
 0x137   : > { %v1145_v24 = vmax.f32 %v777_v20, 0.0  ;;  %v1199_v25 = vmax.f32 %v993_v21, 0.0 }
 0x138   : > { %v779_v26 = vpop.f32.mrf.mxu0  ;;  %v995_v27 = vpop.f32.mrf.mxu1 }
 0x139   : > { %1251 = vst [vmem:[%s2094_s14 + $0x90] sm:$0xff] %v1145_v24  ;;  %1305 = vst [vmem:[%s2094_s14 + $0x240] sm:$0xff] %v1199_v25  ;;  %v780_v28 = vadd.f32 %v2082_v59, %v779_v26  ;;  %v996_v29 = vadd.f32 %v2082_v59, %v995_v27 }
 0x13a   : > { %v1582_v30 = vpop.f32.mrf.mxu0  ;;  %v1690_v1 = vpop.f32.mrf.mxu1 }
 0x13b   : > { %v1146_v31 = vmax.f32 %v780_v28, 0.0  ;;  %v1200_v32 = vmax.f32 %v996_v29, 0.0 }
 0x13c   : > { %v784_v33 = vpop.f32.mrf.mxu0  ;;  %v1000_v34 = vpop.f32.mrf.mxu1 }
 0x13d   : > { %1252 = vst [vmem:[%s2094_s14 + $0x98] sm:$0xff] %v1146_v31  ;;  %1306 = vst [vmem:[%s2094_s14 + $0x248] sm:$0xff] %v1200_v32  ;;  %v785_v35 = vadd.f32 %v2082_v59, %v784_v33  ;;  %v1001_v36 = vadd.f32 %v2082_v59, %v1000_v34 }
 0x13e   : > { %v1585_v37 = vpop.f32.mrf.mxu0  ;;  %v1693_v38 = vpop.f32.mrf.mxu1 }
 0x13f   : > { %v1147_v39 = vmax.f32 %v785_v35, 0.0  ;;  %v1201_v40 = vmax.f32 %v1001_v36, 0.0 }
 0x140   : > { %v787_v41 = vpop.f32.mrf.mxu0  ;;  %v1003_v42 = vpop.f32.mrf.mxu1 }
 0x141   : > { %1253 = vst [vmem:[%s2094_s14 + $0xa0] sm:$0xff] %v1147_v39  ;;  %1307 = vst [vmem:[%s2094_s14 + $0x250] sm:$0xff] %v1201_v40  ;;  %v788_v43 = vadd.f32 %v2082_v59, %v787_v41  ;;  %v1004_v44 = vadd.f32 %v2082_v59, %v1003_v42 }
 0x142   : > { %v1586_v45 = vpop.f32.mrf.mxu0  ;;  %v1694_v46 = vpop.f32.mrf.mxu1 }
 0x143   : > { %v1148_v47 = vmax.f32 %v788_v43, 0.0  ;;  %v1202_v48 = vmax.f32 %v1004_v44, 0.0 }
 0x144   : > { %v792_v49 = vpop.f32.mrf.mxu0  ;;  %v1008_v50 = vpop.f32.mrf.mxu1 }
 0x145   : > { %1254 = vst [vmem:[%s2094_s14 + $0xa8] sm:$0xff] %v1148_v47  ;;  %1308 = vst [vmem:[%s2094_s14 + $0x258] sm:$0xff] %v1202_v48  ;;  %v793_v51 = vadd.f32 %v2082_v59, %v792_v49  ;;  %v1009_v52 = vadd.f32 %v2082_v59, %v1008_v50 }
 0x146   : > { %v1589_v53 = vpop.f32.mrf.mxu0  ;;  %v1697_v54 = vpop.f32.mrf.mxu1 }
 0x147   : > { %v1149_v55 = vmax.f32 %v793_v51, 0.0  ;;  %v1203_v56 = vmax.f32 %v1009_v52, 0.0 }
 0x148   : > { %v795_v57 = vpop.f32.mrf.mxu0  ;;  %v1011_v58 = vpop.f32.mrf.mxu1 }
 0x149   : > { %1255 = vst [vmem:[%s2094_s14 + $0xb0] sm:$0xff] %v1149_v55  ;;  %1309 = vst [vmem:[%s2094_s14 + $0x260] sm:$0xff] %v1203_v56  ;;  %v796_v60 = vadd.f32 %v2082_v59, %v795_v57  ;;  %v1012_v61 = vadd.f32 %v2082_v59, %v1011_v58 }
 0x14a   : > { %v1590_v62 = vpop.f32.mrf.mxu0  ;;  %v1698_v63 = vpop.f32.mrf.mxu1 }
 0x14b   : > { %v1150_v0 = vmax.f32 %v796_v60, 0.0  ;;  %v1204_v2 = vmax.f32 %v1012_v61, 0.0 }
 0x14c   : > { %v800_v3 = vpop.f32.mrf.mxu0  ;;  %v1016_v4 = vpop.f32.mrf.mxu1 }
 0x14d   : > { %1256 = vst [vmem:[%s2094_s14 + $0xb8] sm:$0xff] %v1150_v0  ;;  %1310 = vst [vmem:[%s2094_s14 + $0x268] sm:$0xff] %v1204_v2  ;;  %v801_v5 = vadd.f32 %v2082_v59, %v800_v3  ;;  %v1017_v6 = vadd.f32 %v2082_v59, %v1016_v4 }
 0x14e   : > { %v1593_v7 = vpop.f32.mrf.mxu0  ;;  %v1701_v8 = vpop.f32.mrf.mxu1 }
 0x14f   : > { %v1151_v9 = vmax.f32 %v801_v5, 0.0  ;;  %v1205_v10 = vmax.f32 %v1017_v6, 0.0 }
 0x150   : > { %v803_v11 = vpop.f32.mrf.mxu0  ;;  %v1019_v12 = vpop.f32.mrf.mxu1 }
 0x151   : > { %1257 = vst [vmem:[%s2094_s14 + $0xc0] sm:$0xff] %v1151_v9  ;;  %1311 = vst [vmem:[%s2094_s14 + $0x270] sm:$0xff] %v1205_v10  ;;  %v804_v13 = vadd.f32 %v2082_v59, %v803_v11  ;;  %v1020_v14 = vadd.f32 %v2082_v59, %v1019_v12 }
 0x152   : > { %v1594_v15 = vpop.f32.mrf.mxu0  ;;  %v1702_v16 = vpop.f32.mrf.mxu1 }
 0x153   : > { %v1152_v17 = vmax.f32 %v804_v13, 0.0  ;;  %v1206_v18 = vmax.f32 %v1020_v14, 0.0 }
 0x154   : > { %v808_v19 = vpop.f32.mrf.mxu0  ;;  %v1024_v20 = vpop.f32.mrf.mxu1 }
 0x155   : > { %1258 = vst [vmem:[%s2094_s14 + $0xc8] sm:$0xff] %v1152_v17  ;;  %1312 = vst [vmem:[%s2094_s14 + $0x278] sm:$0xff] %v1206_v18  ;;  %v809_v21 = vadd.f32 %v2082_v59, %v808_v19  ;;  %v1025_v22 = vadd.f32 %v2082_v59, %v1024_v20 }
 0x156   : > { %v1597_v23 = vpop.f32.mrf.mxu0  ;;  %v1705_v24 = vpop.f32.mrf.mxu1 }
 0x157   : > { %v1153_v25 = vmax.f32 %v809_v21, 0.0  ;;  %v1207_v26 = vmax.f32 %v1025_v22, 0.0 }
 0x158   : > { %v811_v27 = vpop.f32.mrf.mxu0  ;;  %v1027_v28 = vpop.f32.mrf.mxu1 }
 0x159   : > { %1259 = vst [vmem:[%s2094_s14 + $0xd0] sm:$0xff] %v1153_v25  ;;  %1313 = vst [vmem:[%s2094_s14 + $0x280] sm:$0xff] %v1207_v26  ;;  %v812_v29 = vadd.f32 %v2082_v59, %v811_v27  ;;  %v1028_v30 = vadd.f32 %v2082_v59, %v1027_v28 }
 0x15a   : > { %v1598_v1 = vpop.f32.mrf.mxu0  ;;  %v1706_v31 = vpop.f32.mrf.mxu1 }
 0x15b   : > { %v1154_v32 = vmax.f32 %v812_v29, 0.0  ;;  %v1208_v33 = vmax.f32 %v1028_v30, 0.0 }
 0x15c   : > { %v816_v34 = vpop.f32.mrf.mxu0  ;;  %v1032_v35 = vpop.f32.mrf.mxu1 }
 0x15d   : > { %1260 = vst [vmem:[%s2094_s14 + $0xd8] sm:$0xff] %v1154_v32  ;;  %1314 = vst [vmem:[%s2094_s14 + $0x288] sm:$0xff] %v1208_v33  ;;  %v817_v36 = vadd.f32 %v2082_v59, %v816_v34  ;;  %v1033_v37 = vadd.f32 %v2082_v59, %v1032_v35 }
 0x15e   : > { %v1601_v38 = vpop.f32.mrf.mxu0  ;;  %v1709_v39 = vpop.f32.mrf.mxu1 }
 0x15f   : > { %v1155_v40 = vmax.f32 %v817_v36, 0.0  ;;  %v1209_v41 = vmax.f32 %v1033_v37, 0.0 }
 0x160   : > { %v819_v42 = vpop.f32.mrf.mxu0  ;;  %v1035_v43 = vpop.f32.mrf.mxu1 }
 0x161   : > { %1261 = vst [vmem:[%s2094_s14 + $0xe0] sm:$0xff] %v1155_v40  ;;  %1315 = vst [vmem:[%s2094_s14 + $0x290] sm:$0xff] %v1209_v41  ;;  %v820_v44 = vadd.f32 %v2082_v59, %v819_v42  ;;  %v1036_v45 = vadd.f32 %v2082_v59, %v1035_v43 }
 0x162   : > { %v1602_v46 = vpop.f32.mrf.mxu0  ;;  %v1710_v47 = vpop.f32.mrf.mxu1 }
 0x163   : > { %v1156_v48 = vmax.f32 %v820_v44, 0.0  ;;  %v1210_v49 = vmax.f32 %v1036_v45, 0.0 }
 0x164   : > { %v824_v50 = vpop.f32.mrf.mxu0  ;;  %v1040_v51 = vpop.f32.mrf.mxu1 }
 0x165   : > { %1262 = vst [vmem:[%s2094_s14 + $0xe8] sm:$0xff] %v1156_v48  ;;  %1316 = vst [vmem:[%s2094_s14 + $0x298] sm:$0xff] %v1210_v49  ;;  %v825_v52 = vadd.f32 %v2082_v59, %v824_v50  ;;  %v1041_v53 = vadd.f32 %v2082_v59, %v1040_v51 }
 0x166   : > { %v1605_v54 = vpop.f32.mrf.mxu0  ;;  %v1713_v55 = vpop.f32.mrf.mxu1 }
 0x167   : > { %v1157_v56 = vmax.f32 %v825_v52, 0.0  ;;  %v1211_v57 = vmax.f32 %v1041_v53, 0.0 }
 0x168   : > { %v827_v58 = vpop.f32.mrf.mxu0  ;;  %v1043_v60 = vpop.f32.mrf.mxu1 }
 0x169   : > { %1263 = vst [vmem:[%s2094_s14 + $0xf0] sm:$0xff] %v1157_v56  ;;  %1317 = vst [vmem:[%s2094_s14 + $0x2a0] sm:$0xff] %v1211_v57  ;;  %v828_v61 = vadd.f32 %v2082_v59, %v827_v58  ;;  %v1044_v62 = vadd.f32 %v2082_v59, %v1043_v60 }
 0x16a   : > { %v1606_v63 = vpop.f32.mrf.mxu0  ;;  %v1714_v0 = vpop.f32.mrf.mxu1 }
 0x16b   : > { %v1158_v2 = vmax.f32 %v828_v61, 0.0  ;;  %v1212_v3 = vmax.f32 %v1044_v62, 0.0 }
 0x16c   : > { %v832_v4 = vpop.f32.mrf.mxu0  ;;  %v1048_v5 = vpop.f32.mrf.mxu1 }
 0x16d   : > { %1264 = vst [vmem:[%s2094_s14 + $0xf8] sm:$0xff] %v1158_v2  ;;  %1318 = vst [vmem:[%s2094_s14 + $0x2a8] sm:$0xff] %v1212_v3  ;;  %v833_v6 = vadd.f32 %v2082_v59, %v832_v4  ;;  %v1049_v7 = vadd.f32 %v2082_v59, %v1048_v5 }
 0x16e   : > { %v1609_v8 = vpop.f32.mrf.mxu0  ;;  %v1717_v9 = vpop.f32.mrf.mxu1 }
 0x16f   : > { %v1159_v10 = vmax.f32 %v833_v6, 0.0  ;;  %v1213_v11 = vmax.f32 %v1049_v7, 0.0 }
 0x170   : > { %v835_v12 = vpop.f32.mrf.mxu0  ;;  %v1051_v13 = vpop.f32.mrf.mxu1 }
 0x171   : > { %1265 = vst [vmem:[%s2094_s14 + $0x100] sm:$0xff] %v1159_v10  ;;  %1319 = vst [vmem:[%s2094_s14 + $0x2b0] sm:$0xff] %v1213_v11  ;;  %v836_v14 = vadd.f32 %v2082_v59, %v835_v12  ;;  %v1052_v15 = vadd.f32 %v2082_v59, %v1051_v13 }
 0x172   : > { %v1610_v16 = vpop.f32.mrf.mxu0  ;;  %v1718_v17 = vpop.f32.mrf.mxu1 }
 0x173   : > { %v1160_v18 = vmax.f32 %v836_v14, 0.0  ;;  %v1214_v19 = vmax.f32 %v1052_v15, 0.0 }
 0x174   : > { %v840_v20 = vpop.f32.mrf.mxu0  ;;  %v1056_v21 = vpop.f32.mrf.mxu1 }
 0x175   : > { %1266 = vst [vmem:[%s2094_s14 + $0x108] sm:$0xff] %v1160_v18  ;;  %1320 = vst [vmem:[%s2094_s14 + $0x2b8] sm:$0xff] %v1214_v19  ;;  %v841_v22 = vadd.f32 %v2082_v59, %v840_v20  ;;  %v1057_v23 = vadd.f32 %v2082_v59, %v1056_v21 }
 0x176   : > { %v1613_v24 = vpop.f32.mrf.mxu0  ;;  %v1721_v25 = vpop.f32.mrf.mxu1 }
 0x177   : > { %v1161_v26 = vmax.f32 %v841_v22, 0.0  ;;  %v1215_v27 = vmax.f32 %v1057_v23, 0.0 }
 0x178   : > { %v843_v28 = vpop.f32.mrf.mxu0  ;;  %v1059_v29 = vpop.f32.mrf.mxu1 }
 0x179   : > { %1267 = vst [vmem:[%s2094_s14 + $0x110] sm:$0xff] %v1161_v26  ;;  %1321 = vst [vmem:[%s2094_s14 + $0x2c0] sm:$0xff] %v1215_v27  ;;  %v844_v30 = vadd.f32 %v2082_v59, %v843_v28  ;;  %v1060_v1 = vadd.f32 %v2082_v59, %v1059_v29 }
 0x17a   : > { %v1614_v31 = vpop.f32.mrf.mxu0  ;;  %v1722_v32 = vpop.f32.mrf.mxu1 }
 0x17b   : > { %v1162_v33 = vmax.f32 %v844_v30, 0.0  ;;  %v1216_v34 = vmax.f32 %v1060_v1, 0.0 }
 0x17c   : > { %v848_v35 = vpop.f32.mrf.mxu0  ;;  %v1064_v36 = vpop.f32.mrf.mxu1 }
 0x17d   : > { %1268 = vst [vmem:[%s2094_s14 + $0x118] sm:$0xff] %v1162_v33  ;;  %1322 = vst [vmem:[%s2094_s14 + $0x2c8] sm:$0xff] %v1216_v34  ;;  %v849_v37 = vadd.f32 %v2082_v59, %v848_v35  ;;  %v1065_v38 = vadd.f32 %v2082_v59, %v1064_v36 }
 0x17e   : > { %v1617_v39 = vpop.f32.mrf.mxu0  ;;  %v1725_v40 = vpop.f32.mrf.mxu1 }
 0x17f   : > { %v1163_v41 = vmax.f32 %v849_v37, 0.0  ;;  %v1217_v42 = vmax.f32 %v1065_v38, 0.0 }
 0x180   : > { %v851_v43 = vpop.f32.mrf.mxu0  ;;  %v1067_v44 = vpop.f32.mrf.mxu1 }
 0x181   : > { %1269 = vst [vmem:[%s2094_s14 + $0x120] sm:$0xff] %v1163_v41  ;;  %1323 = vst [vmem:[%s2094_s14 + $0x2d0] sm:$0xff] %v1217_v42  ;;  %v852_v45 = vadd.f32 %v2082_v59, %v851_v43  ;;  %v1068_v46 = vadd.f32 %v2082_v59, %v1067_v44 }
 0x182   : > { %v1618_v47 = vpop.f32.mrf.mxu0  ;;  %v1726_v48 = vpop.f32.mrf.mxu1 }
 0x183   : > { %v1164_v49 = vmax.f32 %v852_v45, 0.0  ;;  %v1218_v50 = vmax.f32 %v1068_v46, 0.0 }
 0x184   : > { %v856_v51 = vpop.f32.mrf.mxu0  ;;  %v1072_v52 = vpop.f32.mrf.mxu1 }
 0x185   : > { %1270 = vst [vmem:[%s2094_s14 + $0x128] sm:$0xff] %v1164_v49  ;;  %1324 = vst [vmem:[%s2094_s14 + $0x2d8] sm:$0xff] %v1218_v50  ;;  %v857_v53 = vadd.f32 %v2082_v59, %v856_v51  ;;  %v1073_v54 = vadd.f32 %v2082_v59, %v1072_v52 }
 0x186   : > { %v1621_v55 = vpop.f32.mrf.mxu0  ;;  %v1729_v56 = vpop.f32.mrf.mxu1 }
 0x187   : > { %v1165_v57 = vmax.f32 %v857_v53, 0.0  ;;  %v1219_v58 = vmax.f32 %v1073_v54, 0.0 }
 0x188   : > { %v859_v60 = vpop.f32.mrf.mxu0  ;;  %v1075_v61 = vpop.f32.mrf.mxu1 }
 0x189   : > { %1271 = vst [vmem:[%s2094_s14 + $0x130] sm:$0xff] %v1165_v57  ;;  %1325 = vst [vmem:[%s2094_s14 + $0x2e0] sm:$0xff] %v1219_v58  ;;  %v860_v62 = vadd.f32 %v2082_v59, %v859_v60  ;;  %v1076_v63 = vadd.f32 %v2082_v59, %v1075_v61 }
 0x18a   : > { %v1622_v0 = vpop.f32.mrf.mxu0  ;;  %v1730_v2 = vpop.f32.mrf.mxu1 }
 0x18b   : > { %v1166_v3 = vmax.f32 %v860_v62, 0.0  ;;  %v1220_v4 = vmax.f32 %v1076_v63, 0.0 }
 0x18c   : > { %v864_v5 = vpop.f32.mrf.mxu0  ;;  %v1080_v6 = vpop.f32.mrf.mxu1 }
 0x18d   : > { %1272 = vst [vmem:[%s2094_s14 + $0x138] sm:$0xff] %v1166_v3  ;;  %1326 = vst [vmem:[%s2094_s14 + $0x2e8] sm:$0xff] %v1220_v4  ;;  %v865_v7 = vadd.f32 %v2082_v59, %v864_v5  ;;  %v1081_v8 = vadd.f32 %v2082_v59, %v1080_v6 }
 0x18e   : > { %v1625_v9 = vpop.f32.mrf.mxu0  ;;  %v1733_v10 = vpop.f32.mrf.mxu1 }
 0x18f   : > { %v1167_v11 = vmax.f32 %v865_v7, 0.0  ;;  %v1221_v12 = vmax.f32 %v1081_v8, 0.0 }
 0x190   : > { %v867_v13 = vpop.f32.mrf.mxu0  ;;  %v1083_v14 = vpop.f32.mrf.mxu1 }
 0x191   : > { %1273 = vst [vmem:[%s2094_s14 + $0x140] sm:$0xff] %v1167_v11  ;;  %1327 = vst [vmem:[%s2094_s14 + $0x2f0] sm:$0xff] %v1221_v12  ;;  %v868_v15 = vadd.f32 %v2082_v59, %v867_v13  ;;  %v1084_v16 = vadd.f32 %v2082_v59, %v1083_v14 }
 0x192   : > { %v1626_v17 = vpop.f32.mrf.mxu0  ;;  %v1734_v18 = vpop.f32.mrf.mxu1 }
 0x193   : > { %v1168_v19 = vmax.f32 %v868_v15, 0.0  ;;  %v1222_v20 = vmax.f32 %v1084_v16, 0.0 }
 0x194   : > { %v872_v21 = vpop.f32.mrf.mxu0  ;;  %v1088_v22 = vpop.f32.mrf.mxu1 }
 0x195   : > { %1274 = vst [vmem:[%s2094_s14 + $0x148] sm:$0xff] %v1168_v19  ;;  %1328 = vst [vmem:[%s2094_s14 + $0x2f8] sm:$0xff] %v1222_v20  ;;  %v873_v23 = vadd.f32 %v2082_v59, %v872_v21  ;;  %v1089_v24 = vadd.f32 %v2082_v59, %v1088_v22 }
 0x196   : > { %v1629_v25 = vpop.f32.mrf.mxu0  ;;  %v1737_v26 = vpop.f32.mrf.mxu1 }
 0x197   : > { %v1169_v27 = vmax.f32 %v873_v23, 0.0  ;;  %v1223_v28 = vmax.f32 %v1089_v24, 0.0  ;;  %v1842_v24 = vld [vmem:[%s2313_s2] ss:$0 sm:$0xff] }
 0x198   : > { %v875_v29 = vpop.f32.mrf.mxu0  ;;  %v1091_v30 = vpop.f32.mrf.mxu1 }
 0x199   : > { %1275 = vst [vmem:[%s2094_s14 + $0x150] sm:$0xff] %v1169_v27  ;;  %1329 = vst [vmem:[%s2094_s14 + $0x300] sm:$0xff] %v1223_v28  ;;  %v876_v1 = vadd.f32 %v2082_v59, %v875_v29  ;;  %v1092_v31 = vadd.f32 %v2082_v59, %v1091_v30 }
 0x19a   : > { %v1630_v32 = vpop.f32.mrf.mxu0  ;;  %v1738_v33 = vpop.f32.mrf.mxu1 }
 0x19b   : > { %v1170_v34 = vmax.f32 %v876_v1, 0.0  ;;  %v1224_v35 = vmax.f32 %v1092_v31, 0.0 }
 0x19c   : > { %v880_v36 = vpop.f32.mrf.mxu0  ;;  %v1096_v37 = vpop.f32.mrf.mxu1 }
 0x19d   : > { %1276 = vst [vmem:[%s2094_s14 + $0x158] sm:$0xff] %v1170_v34  ;;  %1330 = vst [vmem:[%s2094_s14 + $0x308] sm:$0xff] %v1224_v35  ;;  %v881_v38 = vadd.f32 %v2082_v59, %v880_v36  ;;  %v1097_v39 = vadd.f32 %v2082_v59, %v1096_v37 }
 0x19e   : > { %v1633_v40 = vpop.f32.mrf.mxu0  ;;  %v1741_v41 = vpop.f32.mrf.mxu1 }
 0x19f   : > { %v1171_v42 = vmax.f32 %v881_v38, 0.0  ;;  %v1225_v43 = vmax.f32 %v1097_v39, 0.0 }
 0x1a0   : > { %v883_v44 = vpop.f32.mrf.mxu0  ;;  %v1099_v45 = vpop.f32.mrf.mxu1 }
 0x1a1   : > { %1277 = vst [vmem:[%s2094_s14 + $0x160] sm:$0xff] %v1171_v42  ;;  %1331 = vst [vmem:[%s2094_s14 + $0x310] sm:$0xff] %v1225_v43  ;;  %v884_v46 = vadd.f32 %v2082_v59, %v883_v44  ;;  %v1100_v47 = vadd.f32 %v2082_v59, %v1099_v45 }
 0x1a2   : > { %v1634_v48 = vpop.f32.mrf.mxu0  ;;  %v1742_v49 = vpop.f32.mrf.mxu1 }
 0x1a3   : > { %v1172_v50 = vmax.f32 %v884_v46, 0.0  ;;  %v1226_v51 = vmax.f32 %v1100_v47, 0.0 }
 0x1a4   : > { %v888_v52 = vpop.f32.mrf.mxu0  ;;  %v1104_v53 = vpop.f32.mrf.mxu1 }
 0x1a5   : > { %1278 = vst [vmem:[%s2094_s14 + $0x168] sm:$0xff] %v1172_v50  ;;  %1332 = vst [vmem:[%s2094_s14 + $0x318] sm:$0xff] %v1226_v51  ;;  %v889_v54 = vadd.f32 %v2082_v59, %v888_v52  ;;  %v1105_v55 = vadd.f32 %v2082_v59, %v1104_v53 }
 0x1a6   : > { %v1637_v56 = vpop.f32.mrf.mxu0  ;;  %v1745_v57 = vpop.f32.mrf.mxu1 }
 0x1a7   : > { %v1173_v58 = vmax.f32 %v889_v54, 0.0  ;;  %v1227_v60 = vmax.f32 %v1105_v55, 0.0 }
 0x1a8   : > { %v891_v61 = vpop.f32.mrf.mxu0  ;;  %v1107_v62 = vpop.f32.mrf.mxu1 }
 0x1a9   : > { %1279 = vst [vmem:[%s2094_s14 + $0x170] sm:$0xff] %v1173_v58  ;;  %1333 = vst [vmem:[%s2094_s14 + $0x320] sm:$0xff] %v1227_v60  ;;  %v892_v63 = vadd.f32 %v2082_v59, %v891_v61  ;;  %v1108_v0 = vadd.f32 %v2082_v59, %v1107_v62 }
 0x1aa   : > { %v1638_v2 = vpop.f32.mrf.mxu0  ;;  %v1746_v3 = vpop.f32.mrf.mxu1 }
 0x1ab   : > { %v1174_v4 = vmax.f32 %v892_v63, 0.0  ;;  %v1228_v5 = vmax.f32 %v1108_v0, 0.0 }
 0x1ac   : > { %v896_v6 = vpop.f32.mrf.mxu0  ;;  %v1112_v7 = vpop.f32.mrf.mxu1 }
 0x1ad   : > { %1280 = vst [vmem:[%s2094_s14 + $0x178] sm:$0xff] %v1174_v4  ;;  %1334 = vst [vmem:[%s2094_s14 + $0x328] sm:$0xff] %v1228_v5  ;;  %v897_v8 = vadd.f32 %v2082_v59, %v896_v6  ;;  %v1113_v9 = vadd.f32 %v2082_v59, %v1112_v7 }
 0x1ae   : > { %v1641_v10 = vpop.f32.mrf.mxu0  ;;  %v1749_v11 = vpop.f32.mrf.mxu1 }
 0x1af   : > { %v1175_v12 = vmax.f32 %v897_v8, 0.0  ;;  %v1229_v13 = vmax.f32 %v1113_v9, 0.0 }
 0x1b0   : > { %v899_v14 = vpop.f32.mrf.mxu0  ;;  %v1115_v15 = vpop.f32.mrf.mxu1 }
 0x1b1   : > { %1281 = vst [vmem:[%s2094_s14 + $0x180] sm:$0xff] %v1175_v12  ;;  %1335 = vst [vmem:[%s2094_s14 + $0x330] sm:$0xff] %v1229_v13  ;;  %v900_v16 = vadd.f32 %v2082_v59, %v899_v14  ;;  %v1116_v17 = vadd.f32 %v2082_v59, %v1115_v15 }
 0x1b2   : > { %v1642_v18 = vpop.f32.mrf.mxu0  ;;  %v1750_v19 = vpop.f32.mrf.mxu1 }
 0x1b3   : > { %v1176_v20 = vmax.f32 %v900_v16, 0.0  ;;  %v1230_v21 = vmax.f32 %v1116_v17, 0.0 }
 0x1b4   : > { %v904_v22 = vpop.f32.mrf.mxu0  ;;  %v1120_v23 = vpop.f32.mrf.mxu1 }
 0x1b5   : > { %1282 = vst [vmem:[%s2094_s14 + $0x188] sm:$0xff] %v1176_v20  ;;  %1336 = vst [vmem:[%s2094_s14 + $0x338] sm:$0xff] %v1230_v21  ;;  %v905_v25 = vadd.f32 %v1842_v24, %v904_v22  ;;  %v1121_v26 = vadd.f32 %v1842_v24, %v1120_v23 }
 0x1b6   : > { %v1645_v27 = vpop.f32.mrf.mxu0  ;;  %v1753_v59 = vpop.f32.mrf.mxu1 }
 0x1b7   : > { %v1177_v28 = vmax.f32 %v905_v25, 0.0  ;;  %v1231_v29 = vmax.f32 %v1121_v26, 0.0 }
 0x1b8   : > { %v907_v30 = vpop.f32.mrf.mxu0  ;;  %v1123_v1 = vpop.f32.mrf.mxu1 }
 0x1b9   : > { %1283 = vst [vmem:[%s2094_s14 + $0x190] sm:$0xff] %v1177_v28  ;;  %1337 = vst [vmem:[%s2094_s14 + $0x340] sm:$0xff] %v1231_v29  ;;  %v908_v31 = vadd.f32 %v1842_v24, %v907_v30  ;;  %v1124_v32 = vadd.f32 %v1842_v24, %v1123_v1 }
 0x1ba   : > { %v1646_v33 = vpop.f32.mrf.mxu0  ;;  %v1754_v34 = vpop.f32.mrf.mxu1 }
 0x1bb   : > { %v1178_v35 = vmax.f32 %v908_v31, 0.0  ;;  %v1232_v36 = vmax.f32 %v1124_v32, 0.0 }
 0x1bc   : > { %v912_v37 = vpop.f32.mrf.mxu0 }
 0x1bd   : > { %1284 = vst [vmem:[%s2094_s14 + $0x198] sm:$0xff] %v1178_v35  ;;  %1338 = vst [vmem:[%s2094_s14 + $0x348] sm:$0xff] %v1232_v36  ;;  %v913_v38 = vadd.f32 %v1842_v24, %v912_v37 }
 0x1be   : > { %v1649_v39 = vpop.f32.mrf.mxu0 }
 0x1bf   : > { %v1179_v40 = vmax.f32 %v913_v38, 0.0 }
 0x1c0   : > { %v915_v41 = vpop.f32.mrf.mxu0 }
 0x1c1   : > { %1285 = vst [vmem:[%s2094_s14 + $0x1a0] sm:$0xff] %v1179_v40  ;;  %v916_v42 = vadd.f32 %v1842_v24, %v915_v41 }
 0x1c2   : > { %v1650_v43 = vpop.f32.mrf.mxu0 }
 0x1c3   : > { %v1180_v44 = vmax.f32 %v916_v42, 0.0 }
 0x1c5   : > { %1286 = vst [vmem:[%s2094_s14 + $0x1a8] sm:$0xff] %v1180_v44 }
 0x1c6 PF: > { %s13_s12 = sadd.s32 1, %s1849_s12  }
 0x1c7   : > { %p10_p4 = scmp.ge.s32.totalorder %s13_s12, 6  }
 0x1c9   :  { %12 = sbr.rel (!%p10_p4) target bundleno = 1 (0x1), region = 62 }

// kernel: dis_tan_forward.10
= control target key start
LH: loop header
LB: loop body
LE: loop exit
PB: predicated region body
PF: predicated region fallthrough
CT: control target
= control target key end

     0   :  { %v5020_v0 = vmov 0   ;;  %s7045_s1 = inlined_call_operand.vmem [shape: bf16[1024,128], index: 1, kind: input, shape index: {}]   ;;  %s7046_s0 = inlined_call_operand.vmem [shape: bf16[728,1024], index: 0, kind: input, shape index: {}]   ;;  %s7047_s2 = inlined_call_operand.vmem [shape: f32[1,128], index: 2, kind: input, shape index: {}]   ;;  %s7048_s3 = inlined_call_operand.vmem [shape: f32[728,128], index: 3, kind: output, shape index: {}]  }
   0x1   :  { %2726 = vmatprep.subr.bf16.mxu0 %v5020_v0  ;;  %3126 = vmatprep.subr.bf16.mxu1 %v5020_v0  ;;  %v4946_v1 = vld [vmem:[%s7045_s1 + $0x38] sm:$0xff]   ;;  %v4948_v3 = vld [vmem:[%s7045_s1 + $0x30] sm:$0xff]   ;;  %v4950_v5 = vld [vmem:[%s7045_s1 + $0x28] sm:$0xff]  }
   0x2   :  { %v4947_v2 = vld [vmem:[%s7045_s1 + $0xb8] sm:$0xff]   ;;  %2727 = vmatpush1.bf16.msra.mxu0 %v4946_v1  ;;  %v4949_v4 = vld [vmem:[%s7045_s1 + $0xb0] sm:$0xff]   ;;  %v4951_v6 = vld [vmem:[%s7045_s1 + $0xa8] sm:$0xff]  }
   0x3   :  { %3127 = vmatpush1.bf16.msra.mxu1 %v4947_v2  ;;  %2728 = vmatprep.subr.bf16.mxu0 %v5020_v0  ;;  %v4952_v7 = vld [vmem:[%s7045_s1 + $0x20] sm:$0xff]   ;;  %v4954_v9 = vld [vmem:[%s7045_s1 + $0x18] sm:$0xff]   ;;  %v4956_v11 = vld [vmem:[%s7045_s1 + $0x10] sm:$0xff]  }
   0x4   :  { %3128 = vmatprep.subr.bf16.mxu1 %v5020_v0  ;;  %v4953_v8 = vld [vmem:[%s7045_s1 + $0xa0] sm:$0xff]   ;;  %v4955_v10 = vld [vmem:[%s7045_s1 + $0x98] sm:$0xff]   ;;  %v4957_v12 = vld [vmem:[%s7045_s1 + $0x90] sm:$0xff]  }
   0x5   :  { %v4958_v13 = vld [vmem:[%s7045_s1 + $0x8] sm:$0xff]   ;;  %v4960_v15 = vld [vmem:[%s7045_s1] sm:$0xff]   ;;  %v4962_v17 = vld [vmem:[%s7045_s1 + $0x78] sm:$0xff]  }
   0x6   :  { %2729 = vmatpush1.bf16.msra.mxu0 %v4948_v3  ;;  %v4959_v14 = vld [vmem:[%s7045_s1 + $0x88] sm:$0xff]   ;;  %v4961_v16 = vld [vmem:[%s7045_s1 + $0x80] sm:$0xff]   ;;  %v4963_v18 = vld [vmem:[%s7045_s1 + $0xf8] sm:$0xff]  }
   0x7   :  { %3129 = vmatpush1.bf16.msra.mxu1 %v4949_v4  ;;  %2730 = vmatprep.subr.bf16.mxu0 %v5020_v0  ;;  %v5116_v19 = vld [vmem:[%s7046_s0] sm:$0xff]  ;;  %v5126_v21 = vld [vmem:[%s7046_s0 + $0x8] sm:$0xff]  ;;  %v4964_v24 = vld [vmem:[%s7045_s1 + $0x70] sm:$0xff]  }
   0x8   :  { %3130 = vmatprep.subr.bf16.mxu1 %v5020_v0  ;;  %v5121_v20 = vld [vmem:[%s7046_s0 + $0x20] sm:$0xff]  ;;  %v20_v23 = vld [vmem:[%s7046_s0 + $0x28] sm:$0xff]  ;;  %v4965_v26 = vld [vmem:[%s7045_s1 + $0xf0] sm:$0xff]  }
   0x9   :  { %v4514_v22 = vcombine.high %v5116_v19, %v5121_v20  ;;  %v4516_v25 = vcombine.high %v5126_v21, %v20_v23  ;;  %v4966_v27 = vld [vmem:[%s7045_s1 + $0x68] sm:$0xff]   ;;  %v4968_v29 = vld [vmem:[%s7045_s1 + $0x60] sm:$0xff]   ;;  %v4970_v31 = vld [vmem:[%s7045_s1 + $0x58] sm:$0xff]   ;;  %v4513_v41 = vcombine.low %v5116_v19, %v5121_v20  ;;  %v4515_v44 = vcombine.low %v5126_v21, %v20_v23 }
   0xa   :  { %2731 = vmatpush1.bf16.msra.mxu0 %v4950_v5  ;;  %v4967_v28 = vld [vmem:[%s7045_s1 + $0xe8] sm:$0xff]   ;;  %v4969_v30 = vld [vmem:[%s7045_s1 + $0xe0] sm:$0xff]   ;;  %v4971_v32 = vld [vmem:[%s7045_s1 + $0xd8] sm:$0xff]  }
   0xb   :  { %3131 = vmatpush1.bf16.msra.mxu1 %v4951_v6  ;;  %2732 = vmatprep.subr.bf16.mxu0 %v5020_v0  ;;  %v4972_v33 = vld [vmem:[%s7045_s1 + $0x50] sm:$0xff]   ;;  %v4974_v35 = vld [vmem:[%s7045_s1 + $0x48] sm:$0xff]   ;;  %v4976_v37 = vld [vmem:[%s7045_s1 + $0x40] sm:$0xff]  }
   0xc   :  { %3132 = vmatprep.subr.bf16.mxu1 %v5020_v0  ;;  %2758 = vmatprep.mubr.bf16.mxu0 %v4514_v22  ;;  %v4973_v34 = vld [vmem:[%s7045_s1 + $0xd0] sm:$0xff]   ;;  %v4975_v36 = vld [vmem:[%s7045_s1 + $0xc8] sm:$0xff]   ;;  %v4977_v38 = vld [vmem:[%s7045_s1 + $0xc0] sm:$0xff]  }
   0xd   :  { %3158 = vmatprep.mubr.bf16.mxu1 %v4516_v25  ;;  %v23_v39 = vld [vmem:[%s7046_s0 + $0x40] sm:$0xff]  ;;  %v24_v42 = vld [vmem:[%s7046_s0 + $0x48] sm:$0xff]  ;;  %v4978_v45 = vld [vmem:[%s7045_s1 + $0x138] sm:$0xff]  }
   0xe   :  { %2733 = vmatpush1.bf16.msra.mxu0 %v4952_v7  ;;  %v27_v40 = vld [vmem:[%s7046_s0 + $0x60] sm:$0xff]  ;;  %v28_v43 = vld [vmem:[%s7046_s0 + $0x68] sm:$0xff]  ;;  %v4979_v46 = vld [vmem:[%s7045_s1 + $0x1b8] sm:$0xff]  }
   0xf   :  { %3133 = vmatpush1.bf16.msra.mxu1 %v4953_v8  ;;  %2734 = vmatprep.subr.bf16.mxu0 %v5020_v0  ;;  %v4522_v47 = vcombine.high %v23_v39, %v27_v40  ;;  %v4524_v48 = vcombine.high %v24_v42, %v28_v43  ;;  %v31_v49 = vld [vmem:[%s7046_s0 + $0x80] sm:$0xff]  ;;  %v4980_v51 = vld [vmem:[%s7045_s1 + $0x130] sm:$0xff]   ;;  %v32_v52 = vld [vmem:[%s7046_s0 + $0x88] sm:$0xff]  ;;  %v4521_v55 = vcombine.low %v23_v39, %v27_v40 }
  0x10   :  { %3134 = vmatprep.subr.bf16.mxu1 %v5020_v0  ;;  %v35_v50 = vld [vmem:[%s7046_s0 + $0xa0] sm:$0xff]  ;;  %v36_v53 = vld [vmem:[%s7046_s0 + $0xa8] sm:$0xff]  ;;  %v4981_v54 = vld [vmem:[%s7045_s1 + $0x1b0] sm:$0xff]   ;;  %v4523_v57 = vcombine.low %v24_v42, %v28_v43 }
  0x11   :  { %v4982_v56 = vld [vmem:[%s7045_s1 + $0x128] sm:$0xff]   ;;  %v4530_v58 = vcombine.high %v31_v49, %v35_v50  ;;  %v4532_v60 = vcombine.high %v32_v52, %v36_v53  ;;  %v39_v61 = vld [vmem:[%s7046_s0 + $0xc0] sm:$0xff]  ;;  %v4529_v4 = vcombine.low %v31_v49, %v35_v50  ;;  %v4986_v5 = vld [vmem:[%s7045_s1 + $0x118] sm:$0xff]   ;;  %v4531_v6 = vcombine.low %v32_v52, %v36_v53 }
  0x12   :  { %2735 = vmatpush1.bf16.msra.mxu0 %v4954_v9  ;;  %v4983_v59 = vld [vmem:[%s7045_s1 + $0x1a8] sm:$0xff]   ;;  %v43_v62 = vld [vmem:[%s7046_s0 + $0xe0] sm:$0xff]  ;;  %v4987_v8 = vld [vmem:[%s7045_s1 + $0x198] sm:$0xff]  }
  0x13   :  { %3135 = vmatpush1.bf16.msra.mxu1 %v4955_v10  ;;  %2736 = vmatprep.subr.bf16.mxu0 %v5020_v0  ;;  %v40_v63 = vld [vmem:[%s7046_s0 + $0xc8] sm:$0xff]  ;;  %v4984_v2 = vld [vmem:[%s7045_s1 + $0x120] sm:$0xff]   ;;  %v4538_v7 = vcombine.high %v39_v61, %v43_v62 }
  0x14   :  { %3136 = vmatprep.subr.bf16.mxu1 %v5020_v0  ;;  %v44_v1 = vld [vmem:[%s7046_s0 + $0xe8] sm:$0xff]  ;;  %v4985_v3 = vld [vmem:[%s7045_s1 + $0x1a0] sm:$0xff]  }
  0x15   :  { %v4540_v9 = vcombine.high %v40_v63, %v44_v1  ;;  %v47_v10 = vld [vmem:[%s7046_s0 + $0x100] sm:$0xff]  ;;  %v4990_v20 = vld [vmem:[%s7045_s1 + $0x108] sm:$0xff]  }
  0x16   :  { %2737 = vmatpush1.bf16.msra.mxu0 %v4956_v11  ;;  %v51_v11 = vld [vmem:[%s7046_s0 + $0x120] sm:$0xff]  ;;  %v4991_v21 = vld [vmem:[%s7045_s1 + $0x188] sm:$0xff]  }
  0x17   :  { %3137 = vmatpush1.bf16.msra.mxu1 %v4957_v12  ;;  %2738 = vmatprep.subr.bf16.mxu0 %v5020_v0  ;;  %v48_v12 = vld [vmem:[%s7046_s0 + $0x108] sm:$0xff]  ;;  %v55_v22 = vld [vmem:[%s7046_s0 + $0x140] sm:$0xff] }
  0x18   :  { %3138 = vmatprep.subr.bf16.mxu1 %v5020_v0  ;;  %v59_v23 = vld [vmem:[%s7046_s0 + $0x160] sm:$0xff]  ;;  %v60_v25 = vld [vmem:[%s7046_s0 + $0x168] sm:$0xff] }
  0x19   :  { %v71_v40 = vld [vmem:[%s7046_s0 + $0x1c0] sm:$0xff]  ;;  %v72_v42 = vld [vmem:[%s7046_s0 + $0x1c8] sm:$0xff] }
  0x1a   :  { %2739 = vmatpush1.bf16.msra.mxu0 %v4958_v13  ;;  %v52_v13 = vld [vmem:[%s7046_s0 + $0x128] sm:$0xff]  ;;  %v83_v49 = vld [vmem:[%s7046_s0 + $0x220] sm:$0xff] }
  0x1b   :  { %3139 = vmatpush1.bf16.msra.mxu1 %v4959_v14  ;;  %2740 = vmatprep.subr.bf16.mxu0 %v5020_v0  ;;  %v4988_v14 = vld [vmem:[%s7045_s1 + $0x110] sm:$0xff]   ;;  %v4548_v19 = vcombine.high %v48_v12, %v52_v13  ;;  %v76_v43 = vld [vmem:[%s7046_s0 + $0x1e8] sm:$0xff] }
  0x1c   :  { %3140 = vmatprep.subr.bf16.mxu1 %v5020_v0  ;;  %v80_v50 = vld [vmem:[%s7046_s0 + $0x208] sm:$0xff]  ;;  %v4571_v53 = vcombine.low %v72_v42, %v76_v43 }
  0x1e   :  { %2741 = vmatpush1.bf16.msra.mxu0 %v4960_v15  ;;  %v4989_v15 = vld [vmem:[%s7045_s1 + $0x190] sm:$0xff]  }
  0x1f   :  { %3141 = vmatpush1.bf16.msra.mxu1 %v4961_v16  ;;  %2742 = vmatprep.subr.bf16.mxu0 %v5020_v0  ;;  %v4537_v16 = vcombine.low %v39_v61, %v43_v62  ;;  %v92_v61 = vld [vmem:[%s7046_s0 + $0x268] sm:$0xff] }
  0x20   :  { %3142 = vmatprep.subr.bf16.mxu1 %v5020_v0 }
  0x22   :  { %2743 = vmatpush2.bf16.msra.mxu0 %v4962_v17  ;;  %v4539_v17 = vcombine.low %v40_v63, %v44_v1 }
  0x23   :  { %3143 = vmatpush2.bf16.msra.mxu1 %v4963_v18  ;;  %2744 = vmatprep.subr.bf16.mxu0 %v5020_v0  ;;  %v4546_v18 = vcombine.high %v47_v10, %v51_v11 }
  0x24   :  { %3144 = vmatprep.subr.bf16.mxu1 %v5020_v0 }
  0x26   :  { %2745 = vmatpush2.bf16.msra.mxu0 %v4964_v24  ;;  %v56_v24 = vld [vmem:[%s7046_s0 + $0x148] sm:$0xff] }
  0x27   :  { %3145 = vmatpush2.bf16.msra.mxu1 %v4965_v26  ;;  %2746 = vmatprep.subr.bf16.mxu0 %v5020_v0  ;;  %v4545_v26 = vcombine.low %v47_v10, %v51_v11  ;;  %v103_v11 = vld [vmem:[%s7046_s0 + $0x2c0] sm:$0xff] }
  0x28   :  { %3146 = vmatprep.subr.bf16.mxu1 %v5020_v0 }
  0x2a   :  { %2747 = vmatpush2.bf16.msra.mxu0 %v4966_v27  ;;  %v4547_v27 = vcombine.low %v48_v12, %v52_v13  ;;  %v107_v12 = vld [vmem:[%s7046_s0 + $0x2e0] sm:$0xff]  ;;  %v104_v13 = vld [vmem:[%s7046_s0 + $0x2c8] sm:$0xff] }
  0x2b   :  { %3147 = vmatpush2.bf16.msra.mxu1 %v4967_v28  ;;  %2748 = vmatprep.subr.bf16.mxu0 %v5020_v0  ;;  %v4554_v28 = vcombine.high %v55_v22, %v59_v23 }
  0x2c   :  { %3148 = vmatprep.subr.bf16.mxu1 %v5020_v0 }
  0x2e   :  { %2749 = vmatpush2.bf16.msra.mxu0 %v4968_v29  ;;  %v4556_v29 = vcombine.high %v56_v24, %v60_v25 }
  0x2f   :  { %3149 = vmatpush2.bf16.msra.mxu1 %v4969_v30  ;;  %2750 = vmatprep.subr.bf16.mxu0 %v5020_v0  ;;  %v4992_v30 = vld [vmem:[%s7045_s1 + $0x100] sm:$0xff]  }
  0x30   :  { %3150 = vmatprep.subr.bf16.mxu1 %v5020_v0 }
  0x32   :  { %2751 = vmatpush2.bf16.msra.mxu0 %v4970_v31  ;;  %v4993_v31 = vld [vmem:[%s7045_s1 + $0x180] sm:$0xff]  }
  0x33   :  { %3151 = vmatpush2.bf16.msra.mxu1 %v4971_v32  ;;  %2752 = vmatprep.subr.bf16.mxu0 %v5020_v0  ;;  %v63_v32 = vld [vmem:[%s7046_s0 + $0x180] sm:$0xff] }
  0x34   :  { %3152 = vmatprep.subr.bf16.mxu1 %v5020_v0 }
  0x36   :  { %2753 = vmatpush2.bf16.msra.mxu0 %v4972_v33  ;;  %v67_v33 = vld [vmem:[%s7046_s0 + $0x1a0] sm:$0xff] }
  0x37   :  { %3153 = vmatpush2.bf16.msra.mxu1 %v4973_v34  ;;  %2754 = vmatprep.subr.bf16.mxu0 %v5020_v0  ;;  %v64_v34 = vld [vmem:[%s7046_s0 + $0x188] sm:$0xff] }
  0x38   :  { %3154 = vmatprep.subr.bf16.mxu1 %v5020_v0 }
  0x3a   :  { %2755 = vmatpush2.bf16.msra.mxu0 %v4974_v35  ;;  %v68_v35 = vld [vmem:[%s7046_s0 + $0x1a8] sm:$0xff] }
  0x3b   :  { %3155 = vmatpush2.bf16.msra.mxu1 %v4975_v36  ;;  %2756 = vmatprep.subr.bf16.mxu0 %v5020_v0  ;;  %v4553_v36 = vcombine.low %v55_v22, %v59_v23  ;;  %v4564_v39 = vcombine.high %v64_v34, %v68_v35  ;;  %v116_v22 = vld [vmem:[%s7046_s0 + $0x328] sm:$0xff]  ;;  %v4996_v23 = vld [vmem:[%s7045_s1 + $0x170] sm:$0xff]  }
  0x3c   :  { %3156 = vmatprep.subr.bf16.mxu1 %v5020_v0 }
  0x3e   :  { %2757 = vmatpush2.bf16.msra.mxu0 %v4976_v37  ;;  %v4555_v37 = vcombine.low %v56_v24, %v60_v25  ;;  %v4997_v24 = vld [vmem:[%s7045_s1 + $0x1f0] sm:$0xff]   ;;  %v4601_v25 = vcombine.low %v103_v11, %v107_v12 }
  0x3f   :  { %3157 = vmatpush2.bf16.msra.mxu1 %v4977_v38  ;;  %3526 = vmatprep.subr.bf16.mxu0 %v5020_v0  ;;  %v4562_v38 = vcombine.high %v63_v32, %v67_v33 }
  0x40   :  { %3926 = vmatprep.subr.bf16.mxu1 %v5020_v0 }
  0x41   :  { %2759 = vmatmul.mubr.bf16.vlgmr.msra.gmra.mxu0 %v4513_v41  ;;  %v75_v41 = vld [vmem:[%s7046_s0 + $0x1e0] sm:$0xff] }
  0x42   :  { %3159 = vmatmul.mubr.bf16.vlgmr.msra.gmra.mxu1 %v4515_v44  ;;  %3527 = vmatpush1.bf16.msra.mxu0 %v4978_v45  ;;  %v4561_v44 = vcombine.low %v63_v32, %v67_v33  ;;  %v4563_v45 = vcombine.low %v64_v34, %v68_v35  ;;  %v4569_v52 = vcombine.low %v71_v40, %v75_v41  ;;  %v124_v32 = vld [vmem:[%s7046_s0 + $0x368] sm:$0xff] }
  0x43   :  { %3927 = vmatpush1.bf16.msra.mxu1 %v4979_v46  ;;  %2766 = vmatprep.mubr.bf16.mxu0 %v4522_v47  ;;  %v4570_v46 = vcombine.high %v71_v40, %v75_v41  ;;  %v4572_v47 = vcombine.high %v72_v42, %v76_v43  ;;  %v132_v40 = vld [vmem:[%s7046_s0 + $0x3a8] sm:$0xff] }
  0x44   :  { %3166 = vmatprep.mubr.bf16.mxu1 %v4524_v48  ;;  %3528 = vmatprep.subr.bf16.mxu0 %v5020_v0  ;;  %v79_v48 = vld [vmem:[%s7046_s0 + $0x200] sm:$0xff] }
  0x45   :  { %3928 = vmatprep.subr.bf16.mxu1 %v5020_v0  ;;  %v4577_v62 = vcombine.low %v79_v48, %v83_v49 }
  0x46   :  { %3529 = vmatpush1.bf16.msra.mxu0 %v4980_v51  ;;  %v84_v51 = vld [vmem:[%s7046_s0 + $0x228] sm:$0xff] }
  0x47   :  { %3929 = vmatpush1.bf16.msra.mxu1 %v4981_v54  ;;  %3530 = vmatprep.subr.bf16.mxu0 %v5020_v0  ;;  %v4578_v54 = vcombine.high %v79_v48, %v83_v49  ;;  %v4579_v63 = vcombine.low %v80_v50, %v84_v51  ;;  %v136_v48 = vld [vmem:[%s7046_s0 + $0x3c8] sm:$0xff] }
  0x48   :  { %3930 = vmatprep.subr.bf16.mxu1 %v5020_v0  ;;  %v140_v49 = vld [vmem:[%s7046_s0 + $0x3e8] sm:$0xff] }
  0x49   :  { %2767 = vmatmul.mubr.bf16.gmra.mxu0 %v4521_v55  ;;  %v4580_v55 = vcombine.high %v80_v50, %v84_v51  ;;  %v4999_v50 = vld [vmem:[%s7045_s1 + $0x1e8] sm:$0xff]  }
  0x4a   :  { %3167 = vmatmul.mubr.bf16.gmra.mxu1 %v4523_v57  ;;  %2774 = vmatprep.mubr.bf16.mxu0 %v4530_v58  ;;  %v4995_v57 = vld [vmem:[%s7045_s1 + $0x1f8] sm:$0xff]   ;;  %v87_v58 = vld [vmem:[%s7046_s0 + $0x240] sm:$0xff] }
  0x4b   :  { %3174 = vmatprep.mubr.bf16.mxu1 %v4532_v60  ;;  %3531 = vmatpush1.bf16.msra.mxu0 %v4982_v56  ;;  %v4994_v56 = vld [vmem:[%s7045_s1 + $0x178] sm:$0xff]   ;;  %v88_v60 = vld [vmem:[%s7046_s0 + $0x248] sm:$0xff] }
  0x4c   :  { %3931 = vmatpush1.bf16.msra.mxu1 %v4983_v59  ;;  %3532 = vmatprep.subr.bf16.mxu0 %v5020_v0  ;;  %v91_v59 = vld [vmem:[%s7046_s0 + $0x260] sm:$0xff] }
  0x4d   :  { %3932 = vmatprep.subr.bf16.mxu1 %v5020_v0  ;;  %v4586_v1 = vcombine.high %v87_v58, %v91_v59 }
  0x4f   :  { %3533 = vmatpush1.bf16.msra.mxu0 %v4984_v2  ;;  %v4588_v2 = vcombine.high %v88_v60, %v92_v61 }
  0x50   :  { %3933 = vmatpush1.bf16.msra.mxu1 %v4985_v3  ;;  %3534 = vmatprep.subr.bf16.mxu0 %v5020_v0  ;;  %v95_v3 = vld [vmem:[%s7046_s0 + $0x280] sm:$0xff] }
  0x51   :  { %2775 = vmatmul.mubr.bf16.gmra.mxu0 %v4529_v4  ;;  %3934 = vmatprep.subr.bf16.mxu1 %v5020_v0  ;;  %v99_v4 = vld [vmem:[%s7046_s0 + $0x2a0] sm:$0xff] }
  0x52   :  { %3175 = vmatmul.mubr.bf16.gmra.mxu1 %v4531_v6  ;;  %2782 = vmatprep.mubr.bf16.mxu0 %v4538_v7  ;;  %v100_v6 = vld [vmem:[%s7046_s0 + $0x2a8] sm:$0xff]  ;;  %v4585_v7 = vcombine.low %v87_v58, %v91_v59 }
  0x53   :  { %3182 = vmatprep.mubr.bf16.mxu1 %v4540_v9  ;;  %3535 = vmatpush1.bf16.msra.mxu0 %v4986_v5  ;;  %v96_v5 = vld [vmem:[%s7046_s0 + $0x288] sm:$0xff]  ;;  %v4594_v9 = vcombine.high %v95_v3, %v99_v4 }
  0x54   :  { %3935 = vmatpush1.bf16.msra.mxu1 %v4987_v8  ;;  %3536 = vmatprep.subr.bf16.mxu0 %v5020_v0  ;;  %v4587_v8 = vcombine.low %v88_v60, %v92_v61  ;;  %v4596_v10 = vcombine.high %v96_v5, %v100_v6  ;;  %v148_v58 = vld [vmem:[%s7046_s0 + $0x428] sm:$0xff]  ;;  %v4635_v60 = vcombine.low %v136_v48, %v140_v49 }
  0x55   :  { %3936 = vmatprep.subr.bf16.mxu1 %v5020_v0 }
  0x57   :  { %3537 = vmatpush1.bf16.msra.mxu0 %v4988_v14  ;;  %v108_v14 = vld [vmem:[%s7046_s0 + $0x2e8] sm:$0xff] }
  0x58   :  { %3937 = vmatpush1.bf16.msra.mxu1 %v4989_v15  ;;  %3538 = vmatprep.subr.bf16.mxu0 %v5020_v0  ;;  %v4593_v15 = vcombine.low %v95_v3, %v99_v4  ;;  %v156_v3 = vld [vmem:[%s7046_s0 + $0x468] sm:$0xff] }
  0x59   :  { %2783 = vmatmul.mubr.bf16.gmra.mxu0 %v4537_v16  ;;  %3938 = vmatprep.subr.bf16.mxu1 %v5020_v0  ;;  %v4595_v16 = vcombine.low %v96_v5, %v100_v6 }
  0x5a   :  { %3183 = vmatmul.mubr.bf16.gmra.mxu1 %v4539_v17  ;;  %2790 = vmatprep.mubr.bf16.mxu0 %v4546_v18  ;;  %v4602_v17 = vcombine.high %v103_v11, %v107_v12  ;;  %v4604_v18 = vcombine.high %v104_v13, %v108_v14  ;;  %v163_v11 = vld [vmem:[%s7046_s0 + $0x4a0] sm:$0xff]  ;;  %v160_v12 = vld [vmem:[%s7046_s0 + $0x488] sm:$0xff] }
  0x5b   :  { %3190 = vmatprep.mubr.bf16.mxu1 %v4548_v19  ;;  %3539 = vmatpush1.bf16.msra.mxu0 %v4990_v20  ;;  %v111_v19 = vld [vmem:[%s7046_s0 + $0x300] sm:$0xff] }
  0x5c   :  { %3939 = vmatpush1.bf16.msra.mxu1 %v4991_v21  ;;  %3540 = vmatprep.subr.bf16.mxu0 %v5020_v0  ;;  %v115_v20 = vld [vmem:[%s7046_s0 + $0x320] sm:$0xff]  ;;  %v112_v21 = vld [vmem:[%s7046_s0 + $0x308] sm:$0xff] }
  0x5d   :  { %3940 = vmatprep.subr.bf16.mxu1 %v5020_v0  ;;  %v4609_v33 = vcombine.low %v111_v19, %v115_v20  ;;  %v4611_v34 = vcombine.low %v112_v21, %v116_v22 }
  0x5f   :  { %3541 = vmatpush1.bf16.msra.mxu0 %v4992_v30  ;;  %v123_v30 = vld [vmem:[%s7046_s0 + $0x360] sm:$0xff] }
  0x60   :  { %3941 = vmatpush1.bf16.msra.mxu1 %v4993_v31  ;;  %3542 = vmatprep.subr.bf16.mxu0 %v5020_v0  ;;  %v120_v31 = vld [vmem:[%s7046_s0 + $0x348] sm:$0xff] }
  0x61   :  { %2791 = vmatmul.mubr.bf16.gmra.mxu0 %v4545_v26  ;;  %3942 = vmatprep.subr.bf16.mxu1 %v5020_v0  ;;  %v4603_v26 = vcombine.low %v104_v13, %v108_v14  ;;  %v4619_v42 = vcombine.low %v120_v31, %v124_v32  ;;  %v164_v13 = vld [vmem:[%s7046_s0 + $0x4a8] sm:$0xff] }
  0x62   :  { %3191 = vmatmul.mubr.bf16.gmra.mxu1 %v4547_v27  ;;  %2798 = vmatprep.mubr.bf16.mxu0 %v4554_v28  ;;  %v4610_v27 = vcombine.high %v111_v19, %v115_v20  ;;  %v4612_v28 = vcombine.high %v112_v21, %v116_v22  ;;  %v171_v19 = vld [vmem:[%s7046_s0 + $0x4e0] sm:$0xff]  ;;  %v168_v20 = vld [vmem:[%s7046_s0 + $0x4c8] sm:$0xff] }
  0x63   :  { %3198 = vmatprep.mubr.bf16.mxu1 %v4556_v29  ;;  %3543 = vmatpush2.bf16.msra.mxu0 %v4994_v56  ;;  %v119_v29 = vld [vmem:[%s7046_s0 + $0x340] sm:$0xff]  ;;  %v172_v21 = vld [vmem:[%s7046_s0 + $0x4e8] sm:$0xff] }
  0x64   :  { %3943 = vmatpush2.bf16.msra.mxu1 %v4995_v57  ;;  %3544 = vmatprep.subr.bf16.mxu0 %v5020_v0  ;;  %v4618_v35 = vcombine.high %v119_v29, %v123_v30  ;;  %v4617_v41 = vcombine.low %v119_v29, %v123_v30  ;;  %v147_v56 = vld [vmem:[%s7046_s0 + $0x420] sm:$0xff]  ;;  %v144_v57 = vld [vmem:[%s7046_s0 + $0x408] sm:$0xff] }
  0x65   :  { %3944 = vmatprep.subr.bf16.mxu1 %v5020_v0  ;;  %v4643_v5 = vcombine.low %v144_v57, %v148_v58  ;;  %v180_v29 = vld [vmem:[%s7046_s0 + $0x528] sm:$0xff] }
  0x67   :  { %3545 = vmatpush2.bf16.msra.mxu0 %v4996_v23  ;;  %v4659_v23 = vcombine.low %v160_v12, %v164_v13 }
  0x68   :  { %3945 = vmatpush2.bf16.msra.mxu1 %v4997_v24  ;;  %3546 = vmatprep.subr.bf16.mxu0 %v5020_v0 }
  0x69   :  { %2799 = vmatmul.mubr.bf16.gmra.mxu0 %v4553_v36  ;;  %3946 = vmatprep.subr.bf16.mxu1 %v5020_v0  ;;  %v4620_v36 = vcombine.high %v120_v31, %v124_v32  ;;  %v4667_v31 = vcombine.low %v168_v20, %v172_v21 }
  0x6a   :  { %3199 = vmatmul.mubr.bf16.gmra.mxu1 %v4555_v37  ;;  %2806 = vmatprep.mubr.bf16.mxu0 %v4562_v38  ;;  %v127_v37 = vld [vmem:[%s7046_s0 + $0x380] sm:$0xff] }
  0x6b   :  { %3206 = vmatprep.mubr.bf16.mxu1 %v4564_v39  ;;  %v131_v38 = vld [vmem:[%s7046_s0 + $0x3a0] sm:$0xff]  ;;  %v128_v39 = vld [vmem:[%s7046_s0 + $0x388] sm:$0xff] }
  0x6c   :  { %v4626_v43 = vcombine.high %v127_v37, %v131_v38  ;;  %v4625_v51 = vcombine.low %v127_v37, %v131_v38  ;;  %3947 = vmatpush2.bf16.msra.mxu1 %v4999_v50  ;;  %v187_v37 = vld [vmem:[%s7046_s0 + $0x560] sm:$0xff]  ;;  %v184_v38 = vld [vmem:[%s7046_s0 + $0x548] sm:$0xff] }
  0x6d   :  { %3948 = vmatprep.subr.bf16.mxu1 %v5020_v0 }
  0x71   :  { %2807 = vmatmul.mubr.bf16.gmra.mxu0 %v4561_v44  ;;  %v4628_v44 = vcombine.high %v128_v39, %v132_v40 }
  0x72   :  { %3207 = vmatmul.mubr.bf16.gmra.mxu1 %v4563_v45  ;;  %2814 = vmatprep.mubr.bf16.mxu0 %v4570_v46  ;;  %v4998_v45 = vld [vmem:[%s7045_s1 + $0x168] sm:$0xff]   ;;  %v135_v46 = vld [vmem:[%s7046_s0 + $0x3c0] sm:$0xff] }
  0x73   :  { %3214 = vmatprep.mubr.bf16.mxu1 %v4572_v47  ;;  %v139_v47 = vld [vmem:[%s7046_s0 + $0x3e0] sm:$0xff]  ;;  %3547 = vmatpush2.bf16.msra.mxu0 %v4998_v45 }
  0x74   :  { %3548 = vmatprep.subr.bf16.mxu0 %v5020_v0  ;;  %v4633_v59 = vcombine.low %v135_v46, %v139_v47  ;;  %v195_v45 = vld [vmem:[%s7046_s0 + $0x5a0] sm:$0xff] }
  0x79   :  { %2815 = vmatmul.mubr.bf16.gmra.mxu0 %v4569_v52  ;;  %v4627_v52 = vcombine.low %v128_v39, %v132_v40  ;;  %v188_v39 = vld [vmem:[%s7046_s0 + $0x568] sm:$0xff] }
  0x7a   :  { %3215 = vmatmul.mubr.bf16.gmra.mxu1 %v4571_v53  ;;  %2822 = vmatprep.mubr.bf16.mxu0 %v4578_v54  ;;  %v4634_v53 = vcombine.high %v135_v46, %v139_v47  ;;  %v4636_v54 = vcombine.high %v136_v48, %v140_v49  ;;  %v192_v46 = vld [vmem:[%s7046_s0 + $0x588] sm:$0xff]  ;;  %v4683_v49 = vcombine.low %v184_v38, %v188_v39 }
  0x7b   :  { %3222 = vmatprep.mubr.bf16.mxu1 %v4580_v55  ;;  %v143_v55 = vld [vmem:[%s7046_s0 + $0x400] sm:$0xff]  ;;  %v196_v47 = vld [vmem:[%s7046_s0 + $0x5a8] sm:$0xff] }
  0x7c   :  { %v4642_v61 = vcombine.high %v143_v55, %v147_v56  ;;  %v4641_v4 = vcombine.low %v143_v55, %v147_v56  ;;  %v204_v55 = vld [vmem:[%s7046_s0 + $0x5e8] sm:$0xff] }
  0x81   :  { %2823 = vmatmul.mubr.bf16.gmra.mxu0 %v4577_v62  ;;  %v4644_v62 = vcombine.high %v144_v57, %v148_v58  ;;  %v4691_v57 = vcombine.low %v192_v46, %v196_v47 }
  0x82   :  { %3223 = vmatmul.mubr.bf16.gmra.mxu1 %v4579_v63  ;;  %2830 = vmatprep.mubr.bf16.mxu0 %v4586_v1  ;;  %v151_v63 = vld [vmem:[%s7046_s0 + $0x440] sm:$0xff] }
  0x83   :  { %3230 = vmatprep.mubr.bf16.mxu1 %v4588_v2  ;;  %v155_v1 = vld [vmem:[%s7046_s0 + $0x460] sm:$0xff]  ;;  %v152_v2 = vld [vmem:[%s7046_s0 + $0x448] sm:$0xff] }
  0x84   :  { %v4650_v6 = vcombine.high %v151_v63, %v155_v1  ;;  %v4649_v14 = vcombine.low %v151_v63, %v155_v1  ;;  %v211_v63 = vld [vmem:[%s7046_s0 + $0x620] sm:$0xff]  ;;  %v208_v1 = vld [vmem:[%s7046_s0 + $0x608] sm:$0xff] }
  0x89   :  { %2831 = vmatmul.mubr.bf16.gmra.mxu0 %v4585_v7  ;;  %v4652_v7 = vcombine.high %v152_v2, %v156_v3 }
  0x8a   :  { %3231 = vmatmul.mubr.bf16.gmra.mxu1 %v4587_v8  ;;  %2838 = vmatprep.mubr.bf16.mxu0 %v4594_v9  ;;  %v5000_v8 = vld [vmem:[%s7045_s1 + $0x160] sm:$0xff]  }
  0x8b   :  { %3238 = vmatprep.mubr.bf16.mxu1 %v4596_v10  ;;  %v5001_v9 = vld [vmem:[%s7045_s1 + $0x1e0] sm:$0xff]   ;;  %3549 = vmatpush2.bf16.msra.mxu0 %v5000_v8 }
  0x8c   :  { %v159_v10 = vld [vmem:[%s7046_s0 + $0x480] sm:$0xff]  ;;  %3949 = vmatpush2.bf16.msra.mxu1 %v5001_v9  ;;  %3550 = vmatprep.subr.bf16.mxu0 %v5020_v0  ;;  %v216_v9 = vld [vmem:[%s7046_s0 + $0x648] sm:$0xff] }
  0x8d   :  { %3950 = vmatprep.subr.bf16.mxu1 %v5020_v0  ;;  %v4657_v22 = vcombine.low %v159_v10, %v163_v11  ;;  %v219_v8 = vld [vmem:[%s7046_s0 + $0x660] sm:$0xff] }
  0x91   :  { %2839 = vmatmul.mubr.bf16.gmra.mxu0 %v4593_v15  ;;  %v4651_v15 = vcombine.low %v152_v2, %v156_v3  ;;  %v212_v2 = vld [vmem:[%s7046_s0 + $0x628] sm:$0xff] }
  0x92   :  { %3239 = vmatmul.mubr.bf16.gmra.mxu1 %v4595_v16  ;;  %2846 = vmatprep.mubr.bf16.mxu0 %v4602_v17  ;;  %v4658_v16 = vcombine.high %v159_v10, %v163_v11  ;;  %v4660_v17 = vcombine.high %v160_v12, %v164_v13  ;;  %v220_v10 = vld [vmem:[%s7046_s0 + $0x668] sm:$0xff]  ;;  %v4707_v12 = vcombine.low %v208_v1, %v212_v2 }
  0x93   :  { %3246 = vmatprep.mubr.bf16.mxu1 %v4604_v18  ;;  %v167_v18 = vld [vmem:[%s7046_s0 + $0x4c0] sm:$0xff] }
  0x94   :  { %v4666_v24 = vcombine.high %v167_v18, %v171_v19  ;;  %v4665_v30 = vcombine.low %v167_v18, %v171_v19 }
  0x99   :  { %2847 = vmatmul.mubr.bf16.gmra.mxu0 %v4601_v25  ;;  %v4668_v25 = vcombine.high %v168_v20, %v172_v21  ;;  %v223_v20 = vld [vmem:[%s7046_s0 + $0x680] sm:$0xff] }
  0x9a   :  { %3247 = vmatmul.mubr.bf16.gmra.mxu1 %v4603_v26  ;;  %2854 = vmatprep.mubr.bf16.mxu0 %v4610_v27  ;;  %v175_v26 = vld [vmem:[%s7046_s0 + $0x500] sm:$0xff] }
  0x9b   :  { %3254 = vmatprep.mubr.bf16.mxu1 %v4612_v28  ;;  %v179_v27 = vld [vmem:[%s7046_s0 + $0x520] sm:$0xff]  ;;  %v176_v28 = vld [vmem:[%s7046_s0 + $0x508] sm:$0xff] }
  0x9c   :  { %v4674_v32 = vcombine.high %v175_v26, %v179_v27  ;;  %v4673_v40 = vcombine.low %v175_v26, %v179_v27  ;;  %v227_v21 = vld [vmem:[%s7046_s0 + $0x6a0] sm:$0xff]  ;;  %v5006_v26 = vld [vmem:[%s7045_s1 + $0x148] sm:$0xff]  }
  0xa1   :  { %2855 = vmatmul.mubr.bf16.gmra.mxu0 %v4609_v33  ;;  %v4676_v33 = vcombine.high %v176_v28, %v180_v29 }
  0xa2   :  { %3255 = vmatmul.mubr.bf16.gmra.mxu1 %v4611_v34  ;;  %2862 = vmatprep.mubr.bf16.mxu0 %v4618_v35  ;;  %v5002_v34 = vld [vmem:[%s7045_s1 + $0x158] sm:$0xff]  }
  0xa3   :  { %3262 = vmatprep.mubr.bf16.mxu1 %v4620_v36  ;;  %v5003_v35 = vld [vmem:[%s7045_s1 + $0x1d8] sm:$0xff]   ;;  %v183_v36 = vld [vmem:[%s7046_s0 + $0x540] sm:$0xff]  ;;  %3551 = vmatpush2.bf16.msra.mxu0 %v5002_v34 }
  0xa4   :  { %3951 = vmatpush2.bf16.msra.mxu1 %v5003_v35  ;;  %3552 = vmatprep.subr.bf16.mxu0 %v5020_v0  ;;  %v4681_v48 = vcombine.low %v183_v36, %v187_v37 }
  0xa5   :  { %3952 = vmatprep.subr.bf16.mxu1 %v5020_v0 }
  0xa9   :  { %2863 = vmatmul.mubr.bf16.gmra.mxu0 %v4617_v41  ;;  %v4675_v41 = vcombine.low %v176_v28, %v180_v29 }
  0xaa   :  { %3263 = vmatmul.mubr.bf16.gmra.mxu1 %v4619_v42  ;;  %2870 = vmatprep.mubr.bf16.mxu0 %v4626_v43  ;;  %v4682_v42 = vcombine.high %v183_v36, %v187_v37  ;;  %v4684_v43 = vcombine.high %v184_v38, %v188_v39  ;;  %v5007_v37 = vld [vmem:[%s7045_s1 + $0x1c8] sm:$0xff]  }
  0xab   :  { %3270 = vmatprep.mubr.bf16.mxu1 %v4628_v44  ;;  %v191_v44 = vld [vmem:[%s7046_s0 + $0x580] sm:$0xff] }
  0xac   :  { %v4690_v50 = vcombine.high %v191_v44, %v195_v45  ;;  %v4689_v56 = vcombine.low %v191_v44, %v195_v45 }
  0xb1   :  { %2871 = vmatmul.mubr.bf16.gmra.mxu0 %v4625_v51  ;;  %v4692_v51 = vcombine.high %v192_v46, %v196_v47  ;;  %v232_v46 = vld [vmem:[%s7046_s0 + $0x6c8] sm:$0xff] }
  0xb2   :  { %3271 = vmatmul.mubr.bf16.gmra.mxu1 %v4627_v52  ;;  %2878 = vmatprep.mubr.bf16.mxu0 %v4634_v53  ;;  %v199_v52 = vld [vmem:[%s7046_s0 + $0x5c0] sm:$0xff]  ;;  %v236_v47 = vld [vmem:[%s7046_s0 + $0x6e8] sm:$0xff] }
  0xb3   :  { %3278 = vmatprep.mubr.bf16.mxu1 %v4636_v54  ;;  %v203_v53 = vld [vmem:[%s7046_s0 + $0x5e0] sm:$0xff]  ;;  %v200_v54 = vld [vmem:[%s7046_s0 + $0x5c8] sm:$0xff] }
  0xb4   :  { %v4698_v58 = vcombine.high %v199_v52, %v203_v53  ;;  %v4697_v3 = vcombine.low %v199_v52, %v203_v53 }
  0xb9   :  { %2879 = vmatmul.mubr.bf16.gmra.mxu0 %v4633_v59  ;;  %v4700_v59 = vcombine.high %v200_v54, %v204_v55 }
  0xba   :  { %3279 = vmatmul.mubr.bf16.gmra.mxu1 %v4635_v60  ;;  %2886 = vmatprep.mubr.bf16.mxu0 %v4642_v61  ;;  %v5004_v60 = vld [vmem:[%s7045_s1 + $0x150] sm:$0xff]  }
  0xbb   :  { %3286 = vmatprep.mubr.bf16.mxu1 %v4644_v62  ;;  %v5005_v61 = vld [vmem:[%s7045_s1 + $0x1d0] sm:$0xff]   ;;  %v207_v62 = vld [vmem:[%s7046_s0 + $0x600] sm:$0xff]  ;;  %3553 = vmatpush2.bf16.msra.mxu0 %v5004_v60 }
  0xbc   :  { %3953 = vmatpush2.bf16.msra.mxu1 %v5005_v61  ;;  %3554 = vmatprep.subr.bf16.mxu0 %v5020_v0  ;;  %v4705_v11 = vcombine.low %v207_v62, %v211_v63  ;;  %v239_v61 = vld [vmem:[%s7046_s0 + $0x700] sm:$0xff] }
  0xbd   :  { %3954 = vmatprep.subr.bf16.mxu1 %v5020_v0 }
  0xbf   :  { %3555 = vmatpush2.bf16.msra.mxu0 %v5006_v26  ;;  %v5008_v26 = vld [vmem:[%s7045_s1 + $0x140] sm:$0xff]  }
  0xc0   :  { %3556 = vmatprep.subr.bf16.mxu0 %v5020_v0  ;;  %3955 = vmatpush2.bf16.msra.mxu1 %v5007_v37 }
  0xc1   :  { %2887 = vmatmul.mubr.bf16.gmra.mxu0 %v4641_v4  ;;  %v4699_v4 = vcombine.low %v200_v54, %v204_v55  ;;  %3956 = vmatprep.subr.bf16.mxu1 %v5020_v0  ;;  %v4732_v55 = vcombine.high %v232_v46, %v236_v47 }
  0xc2   :  { %3287 = vmatmul.mubr.bf16.gmra.mxu1 %v4643_v5  ;;  %2894 = vmatprep.mubr.bf16.mxu0 %v4650_v6  ;;  %v4706_v5 = vcombine.high %v207_v62, %v211_v63  ;;  %v4708_v6 = vcombine.high %v208_v1, %v212_v2  ;;  %v243_v62 = vld [vmem:[%s7046_s0 + $0x720] sm:$0xff]  ;;  %v240_v2 = vld [vmem:[%s7046_s0 + $0x708] sm:$0xff] }
  0xc3   :  { %3294 = vmatprep.mubr.bf16.mxu1 %v4652_v7  ;;  %v215_v7 = vld [vmem:[%s7046_s0 + $0x640] sm:$0xff]  ;;  %3557 = vmatpush2.bf16.msra.mxu0 %v5008_v26 }
  0xc4   :  { %v4714_v13 = vcombine.high %v215_v7, %v219_v8  ;;  %v4713_v28 = vcombine.low %v215_v7, %v219_v8  ;;  %v4731_v8 = vcombine.low %v232_v46, %v236_v47  ;;  %v271_v26 = vld [vmem:[%s7046_s0 + $0x800] sm:$0xff] }
  0xc9   :  { %2895 = vmatmul.mubr.bf16.gmra.mxu0 %v4649_v14  ;;  %v5610_v14 = vld [vmem:[%s7047_s2] ss:$0 sm:$0xff] }
  0xca   :  { %3295 = vmatmul.mubr.bf16.gmra.mxu1 %v4651_v15  ;;  %2902 = vmatprep.mubr.bf16.mxu0 %v4658_v16  ;;  %v4716_v15 = vcombine.high %v216_v9, %v220_v10 }
  0xcb   :  { %3302 = vmatprep.mubr.bf16.mxu1 %v4660_v17 }
  0xd1   :  { %2903 = vmatmul.mubr.bf16.gmra.mxu0 %v4657_v22 }
  0xd2   :  { %3303 = vmatmul.mubr.bf16.gmra.mxu1 %v4659_v23  ;;  %2910 = vmatprep.mubr.bf16.mxu0 %v4666_v24  ;;  %v224_v24 = vld [vmem:[%s7046_s0 + $0x688] sm:$0xff] }
  0xd3   :  { %3310 = vmatprep.mubr.bf16.mxu1 %v4668_v25  ;;  %v228_v25 = vld [vmem:[%s7046_s0 + $0x6a8] sm:$0xff] }
  0xd4   :  { %v4724_v34 = vcombine.high %v224_v24, %v228_v25  ;;  %v4723_v52 = vcombine.low %v224_v24, %v228_v25  ;;  %v252_v25 = vld [vmem:[%s7046_s0 + $0x768] sm:$0xff] }
  0xd9   :  { %2911 = vmatmul.mubr.bf16.gmra.mxu0 %v4665_v30 }
  0xda   :  { %3311 = vmatmul.mubr.bf16.gmra.mxu1 %v4667_v31  ;;  %2918 = vmatprep.mubr.bf16.mxu0 %v4674_v32  ;;  %v4715_v31 = vcombine.low %v216_v9, %v220_v10  ;;  %v4722_v32 = vcombine.high %v223_v20, %v227_v21  ;;  %v4738_v9 = vcombine.high %v239_v61, %v243_v62 }
  0xdb   :  { %3318 = vmatprep.mubr.bf16.mxu1 %v4676_v33 }
  0xe1   :  { %2919 = vmatmul.mubr.bf16.gmra.mxu0 %v4673_v40 }
  0xe2   :  { %3319 = vmatmul.mubr.bf16.gmra.mxu1 %v4675_v41  ;;  %2926 = vmatprep.mubr.bf16.mxu0 %v4682_v42  ;;  %v231_v42 = vld [vmem:[%s7046_s0 + $0x6c0] sm:$0xff] }
  0xe3   :  { %3326 = vmatprep.mubr.bf16.mxu1 %v4684_v43  ;;  %v235_v43 = vld [vmem:[%s7046_s0 + $0x6e0] sm:$0xff] }
  0xe4   :  { %v4730_v53 = vcombine.high %v231_v42, %v235_v43 }
  0xe9   :  { %2927 = vmatmul.mubr.bf16.gmra.mxu0 %v4681_v48 }
  0xea   :  { %3327 = vmatmul.mubr.bf16.gmra.mxu1 %v4683_v49  ;;  %2934 = vmatprep.mubr.bf16.mxu0 %v4690_v50  ;;  %v4721_v49 = vcombine.low %v223_v20, %v227_v21  ;;  %v251_v20 = vld [vmem:[%s7046_s0 + $0x760] sm:$0xff]  ;;  %v248_v21 = vld [vmem:[%s7046_s0 + $0x748] sm:$0xff] }
  0xeb   :  { %3334 = vmatprep.mubr.bf16.mxu1 %v4692_v51 }
  0xf1   :  { %2935 = vmatmul.mubr.bf16.gmra.mxu0 %v4689_v56 }
  0xf2   :  { %3335 = vmatmul.mubr.bf16.gmra.mxu1 %v4691_v57  ;;  %2942 = vmatprep.mubr.bf16.mxu0 %v4698_v58 }
  0xf3   :  { %3342 = vmatprep.mubr.bf16.mxu1 %v4700_v59 }
  0xf9   :  { %2943 = vmatmul.mubr.bf16.gmra.mxu0 %v4697_v3  ;;  %v244_v3 = vld [vmem:[%s7046_s0 + $0x728] sm:$0xff] }
  0xfa   :  { %3343 = vmatmul.mubr.bf16.gmra.mxu1 %v4699_v4  ;;  %2950 = vmatprep.mubr.bf16.mxu0 %v4706_v5  ;;  %v4729_v5 = vcombine.low %v231_v42, %v235_v43  ;;  %v255_v43 = vld [vmem:[%s7046_s0 + $0x780] sm:$0xff] }
  0xfb   :  { %3350 = vmatprep.mubr.bf16.mxu1 %v4708_v6 }
 0x101   :  { %v2760_v16 = vpop.f32.mrf.mxu0  ;;  %2951 = vmatmul.mubr.bf16.gmra.mxu0 %v4705_v11  ;;  %v4740_v11 = vcombine.high %v240_v2, %v244_v3 }
 0x102   :  { %v2761_v17 = vadd.f32 %v5610_v14, %v2760_v16  ;;  %v3160_v18 = vpop.f32.mrf.mxu1  ;;  %3351 = vmatmul.mubr.bf16.gmra.mxu1 %v4707_v12  ;;  %2958 = vmatprep.mubr.bf16.mxu0 %v4714_v13 }
 0x103   :  { %v2762_v19 = vpop.f32.mrf.mxu0  ;;  %3358 = vmatprep.mubr.bf16.mxu1 %v4716_v15 }
 0x104   :  { %v5619_v22 = vadd.f32 %v3160_v18, %v2761_v17  ;;  %v3162_v23 = vpop.f32.mrf.mxu1  ;;  %v247_v19 = vld [vmem:[%s7046_s0 + $0x740] sm:$0xff] }
 0x105   :  { %v2763_v27 = vpop.f32.mrf.mxu0 }
 0x106   :  { %v2764_v29 = vadd.f32 %v5610_v14, %v2763_v27  ;;  %v3163_v30 = vpop.f32.mrf.mxu1  ;;  %v5009_v27 = vld [vmem:[%s7045_s1 + $0x1c0] sm:$0xff]  }
 0x107   :  { %v2765_v33 = vpop.f32.mrf.mxu0  ;;  %3957 = vmatpush2.bf16.msra.mxu1 %v5009_v27  ;;  %v275_v27 = vld [vmem:[%s7046_s0 + $0x820] sm:$0xff] }
 0x108   :  { %v5632_v35 = vadd.f32 %v3163_v30, %v2764_v29  ;;  %v3165_v36 = vpop.f32.mrf.mxu1  ;;  %v4737_v29 = vcombine.low %v239_v61, %v243_v62  ;;  %v4746_v33 = vcombine.high %v247_v19, %v251_v20 }
 0x109   :  { %v2768_v38 = vpop.f32.mrf.mxu0  ;;  %2959 = vmatmul.mubr.bf16.gmra.mxu0 %v4713_v28  ;;  %v4748_v36 = vcombine.high %v248_v21, %v252_v25 }
 0x10a   :  { %v2769_v39 = vadd.f32 %v5610_v14, %v2768_v38  ;;  %v3168_v40 = vpop.f32.mrf.mxu1  ;;  %3359 = vmatmul.mubr.bf16.gmra.mxu1 %v4715_v31  ;;  %2966 = vmatprep.mubr.bf16.mxu0 %v4722_v32  ;;  %v4739_v32 = vcombine.low %v240_v2, %v244_v3  ;;  %v263_v2 = vld [vmem:[%s7046_s0 + $0x7c0] sm:$0xff] }
 0x10b   :  { %v2770_v41 = vpop.f32.mrf.mxu0  ;;  %3366 = vmatprep.mubr.bf16.mxu1 %v4724_v34  ;;  %v267_v3 = vld [vmem:[%s7046_s0 + $0x7e0] sm:$0xff] }
 0x10c   :  { %v5644_v44 = vadd.f32 %v3168_v40, %v2769_v39  ;;  %v3170_v45 = vpop.f32.mrf.mxu1 }
 0x10d   :  { %v2771_v48 = vpop.f32.mrf.mxu0  ;;  %v259_v45 = vld [vmem:[%s7046_s0 + $0x7a0] sm:$0xff] }
 0x10e   :  { %v2772_v50 = vadd.f32 %v5610_v14, %v2771_v48  ;;  %v3171_v51 = vpop.f32.mrf.mxu1  ;;  %v256_v48 = vld [vmem:[%s7046_s0 + $0x788] sm:$0xff] }
 0x10f   :  { %v2773_v54 = vpop.f32.mrf.mxu0 }
 0x110   :  { %v5654_v56 = vadd.f32 %v3171_v51, %v2772_v50  ;;  %v3173_v57 = vpop.f32.mrf.mxu1  ;;  %v4745_v51 = vcombine.low %v247_v19, %v251_v20  ;;  %v4747_v54 = vcombine.low %v248_v21, %v252_v25 }
 0x111   :  { %v2776_v58 = vpop.f32.mrf.mxu0  ;;  %2967 = vmatmul.mubr.bf16.gmra.mxu0 %v4721_v49  ;;  %v260_v49 = vld [vmem:[%s7046_s0 + $0x7a8] sm:$0xff] }
 0x112   :  { %v2777_v59 = vadd.f32 %v5610_v14, %v2776_v58  ;;  %v3176_v60 = vpop.f32.mrf.mxu1  ;;  %3367 = vmatmul.mubr.bf16.gmra.mxu1 %v4723_v52  ;;  %2974 = vmatprep.mubr.bf16.mxu0 %v4730_v53  ;;  %v4756_v58 = vcombine.high %v256_v48, %v260_v49 }
 0x113   :  { %v2778_v0 = vpop.f32.mrf.mxu0  ;;  %3374 = vmatprep.mubr.bf16.mxu1 %v4732_v55  ;;  %v4754_v55 = vcombine.high %v255_v43, %v259_v45 }
 0x114   :  { %v5663_v63 = vadd.f32 %v3176_v60, %v2777_v59  ;;  %v3178_v1 = vpop.f32.mrf.mxu1 }
 0x115   :  { %v2779_v4 = vpop.f32.mrf.mxu0 }
 0x116   :  { %v2780_v6 = vadd.f32 %v5610_v14, %v2779_v4  ;;  %v3179_v7 = vpop.f32.mrf.mxu1 }
 0x117   :  { %v2781_v10 = vpop.f32.mrf.mxu0 }
 0x118   :  { %v5672_v12 = vadd.f32 %v3179_v7, %v2780_v6  ;;  %v3181_v13 = vpop.f32.mrf.mxu1  ;;  %v264_v6 = vld [vmem:[%s7046_s0 + $0x7c8] sm:$0xff] }
 0x119   :  { %v2784_v15 = vpop.f32.mrf.mxu0  ;;  %2975 = vmatmul.mubr.bf16.gmra.mxu0 %v4729_v5  ;;  %v268_v7 = vld [vmem:[%s7046_s0 + $0x7e8] sm:$0xff]  ;;  %v4755_v13 = vcombine.low %v256_v48, %v260_v49 }
 0x11a   :  { %v2785_v16 = vadd.f32 %v5610_v14, %v2784_v15  ;;  %v3184_v17 = vpop.f32.mrf.mxu1  ;;  %3375 = vmatmul.mubr.bf16.gmra.mxu1 %v4731_v8  ;;  %2982 = vmatprep.mubr.bf16.mxu0 %v4738_v9  ;;  %v4753_v9 = vcombine.low %v255_v43, %v259_v45  ;;  %v4762_v15 = vcombine.high %v263_v2, %v267_v3 }
 0x11b   :  { %v2786_v18 = vpop.f32.mrf.mxu0  ;;  %3382 = vmatprep.mubr.bf16.mxu1 %v4740_v11 }
 0x11c   :  { %v5684_v23 = vadd.f32 %v3184_v17, %v2785_v16  ;;  %v3186_v24 = vpop.f32.mrf.mxu1  ;;  %v4764_v17 = vcombine.high %v264_v6, %v268_v7 }
 0x11d   :  { %v2787_v28 = vpop.f32.mrf.mxu0 }
 0x11e   :  { %v2788_v30 = vadd.f32 %v5610_v14, %v2787_v28  ;;  %v3187_v31 = vpop.f32.mrf.mxu1 }
 0x11f   :  { %v2789_v34 = vpop.f32.mrf.mxu0 }
 0x120   :  { %v5696_v37 = vadd.f32 %v3187_v31, %v2788_v30  ;;  %v3189_v38 = vpop.f32.mrf.mxu1  ;;  %v272_v30 = vld [vmem:[%s7046_s0 + $0x808] sm:$0xff] }
 0x121   :  { %v2792_v39 = vpop.f32.mrf.mxu0  ;;  %2983 = vmatmul.mubr.bf16.gmra.mxu0 %v4737_v29  ;;  %v276_v31 = vld [vmem:[%s7046_s0 + $0x828] sm:$0xff]  ;;  %v4763_v38 = vcombine.low %v264_v6, %v268_v7 }
 0x122   :  { %v2793_v40 = vadd.f32 %v5610_v14, %v2792_v39  ;;  %v3192_v41 = vpop.f32.mrf.mxu1  ;;  %3383 = vmatmul.mubr.bf16.gmra.mxu1 %v4739_v32  ;;  %2990 = vmatprep.mubr.bf16.mxu0 %v4746_v33  ;;  %v4761_v33 = vcombine.low %v263_v2, %v267_v3  ;;  %v4770_v39 = vcombine.high %v271_v26, %v275_v27 }
 0x123   :  { %v2794_v42 = vpop.f32.mrf.mxu0  ;;  %3390 = vmatprep.mubr.bf16.mxu1 %v4748_v36 }
 0x124   :  { %v5705_v46 = vadd.f32 %v3192_v41, %v2793_v40  ;;  %v3194_v47 = vpop.f32.mrf.mxu1  ;;  %v4772_v41 = vcombine.high %v272_v30, %v276_v31 }
 0x125   :  { %v2795_v50 = vpop.f32.mrf.mxu0 }
 0x126   :  { %v2796_v52 = vadd.f32 %v5610_v14, %v2795_v50  ;;  %v3195_v53 = vpop.f32.mrf.mxu1  ;;  %v279_v50 = vld [vmem:[%s7046_s0 + $0x840] sm:$0xff] }
 0x127   :  { %v2797_v57 = vpop.f32.mrf.mxu0 }
 0x128   :  { %v5714_v59 = vadd.f32 %v3195_v53, %v2796_v52  ;;  %v3197_v60 = vpop.f32.mrf.mxu1 }
 0x129   :  { %v2800_v0 = vpop.f32.mrf.mxu0  ;;  %2991 = vmatmul.mubr.bf16.gmra.mxu0 %v4745_v51  ;;  %v283_v51 = vld [vmem:[%s7046_s0 + $0x860] sm:$0xff] }
 0x12a   :  { %v2801_v61 = vadd.f32 %v5610_v14, %v2800_v0  ;;  %v3200_v62 = vpop.f32.mrf.mxu1  ;;  %3391 = vmatmul.mubr.bf16.gmra.mxu1 %v4747_v54  ;;  %2998 = vmatprep.mubr.bf16.mxu0 %v4754_v55  ;;  %v280_v54 = vld [vmem:[%s7046_s0 + $0x848] sm:$0xff] }
 0x12b   :  { %v2802_v1 = vpop.f32.mrf.mxu0  ;;  %3398 = vmatprep.mubr.bf16.mxu1 %v4756_v58  ;;  %v284_v55 = vld [vmem:[%s7046_s0 + $0x868] sm:$0xff]  ;;  %v4769_v58 = vcombine.low %v271_v26, %v275_v27 }
 0x12c   :  { %v5723_v4 = vadd.f32 %v3200_v62, %v2801_v61  ;;  %v3202_v5 = vpop.f32.mrf.mxu1  ;;  %v4771_v61 = vcombine.low %v272_v30, %v276_v31  ;;  %v4778_v62 = vcombine.high %v279_v50, %v283_v51  ;;  %v4780_v2 = vcombine.high %v280_v54, %v284_v55 }
 0x12d   :  { %v2803_v8 = vpop.f32.mrf.mxu0 }
 0x12e   :  { %v2804_v10 = vadd.f32 %v5610_v14, %v2803_v8  ;;  %v3203_v11 = vpop.f32.mrf.mxu1 }
 0x12f   :  { %v2805_v16 = vpop.f32.mrf.mxu0 }
 0x130   :  { %v5732_v18 = vadd.f32 %v3203_v11, %v2804_v10  ;;  %v3205_v19 = vpop.f32.mrf.mxu1  ;;  %v287_v10 = vld [vmem:[%s7046_s0 + $0x880] sm:$0xff]  ;;  %v288_v16 = vld [vmem:[%s7046_s0 + $0x888] sm:$0xff] }
 0x131   :  { %v2808_v20 = vpop.f32.mrf.mxu0  ;;  %2999 = vmatmul.mubr.bf16.gmra.mxu0 %v4753_v9  ;;  %v291_v11 = vld [vmem:[%s7046_s0 + $0x8a0] sm:$0xff] }
 0x132   :  { %v2809_v21 = vadd.f32 %v5610_v14, %v2808_v20  ;;  %v3208_v24 = vpop.f32.mrf.mxu1  ;;  %3399 = vmatmul.mubr.bf16.gmra.mxu1 %v4755_v13  ;;  %3006 = vmatprep.mubr.bf16.mxu0 %v4762_v15  ;;  %v4777_v20 = vcombine.low %v279_v50, %v283_v51  ;;  %v4786_v26 = vcombine.high %v287_v10, %v291_v11 }
 0x133   :  { %v2810_v25 = vpop.f32.mrf.mxu0  ;;  %3406 = vmatprep.mubr.bf16.mxu1 %v4764_v17  ;;  %v292_v17 = vld [vmem:[%s7046_s0 + $0x8a8] sm:$0xff] }
 0x134   :  { %v5741_v28 = vadd.f32 %v3208_v24, %v2809_v21  ;;  %v3210_v29 = vpop.f32.mrf.mxu1  ;;  %v4779_v25 = vcombine.low %v280_v54, %v284_v55  ;;  %v4787_v51 = vcombine.low %v288_v16, %v292_v17 }
 0x135   :  { %v2811_v32 = vpop.f32.mrf.mxu0  ;;  %v4788_v29 = vcombine.high %v288_v16, %v292_v17 }
 0x136   :  { %v2812_v34 = vadd.f32 %v5610_v14, %v2811_v32  ;;  %v3211_v36 = vpop.f32.mrf.mxu1 }
 0x137   :  { %v2813_v40 = vpop.f32.mrf.mxu0 }
 0x138   :  { %v5750_v42 = vadd.f32 %v3211_v36, %v2812_v34  ;;  %v3213_v43 = vpop.f32.mrf.mxu1 }
 0x139   :  { %v2816_v45 = vpop.f32.mrf.mxu0  ;;  %3007 = vmatmul.mubr.bf16.gmra.mxu0 %v4761_v33  ;;  %v296_v43 = vld [vmem:[%s7046_s0 + $0x8c8] sm:$0xff] }
 0x13a   :  { %v2817_v47 = vadd.f32 %v5610_v14, %v2816_v45  ;;  %v3216_v48 = vpop.f32.mrf.mxu1  ;;  %3407 = vmatmul.mubr.bf16.gmra.mxu1 %v4763_v38  ;;  %3014 = vmatprep.mubr.bf16.mxu0 %v4770_v39  ;;  %v295_v38 = vld [vmem:[%s7046_s0 + $0x8c0] sm:$0xff]  ;;  %v300_v45 = vld [vmem:[%s7046_s0 + $0x8e8] sm:$0xff] }
 0x13b   :  { %v2818_v49 = vpop.f32.mrf.mxu0  ;;  %3414 = vmatprep.mubr.bf16.mxu1 %v4772_v41  ;;  %v299_v39 = vld [vmem:[%s7046_s0 + $0x8e0] sm:$0xff]  ;;  %v4796_v55 = vcombine.high %v296_v43, %v300_v45  ;;  %v4795_v16 = vcombine.low %v296_v43, %v300_v45 }
 0x13c   :  { %v5759_v52 = vadd.f32 %v3216_v48, %v2817_v47  ;;  %v3218_v53 = vpop.f32.mrf.mxu1  ;;  %v4785_v48 = vcombine.low %v287_v10, %v291_v11  ;;  %v4793_v10 = vcombine.low %v295_v38, %v299_v39 }
 0x13d   :  { %v2819_v57 = vpop.f32.mrf.mxu0  ;;  %v4794_v53 = vcombine.high %v295_v38, %v299_v39  ;;  %v316_v38 = vld [vmem:[%s7046_s0 + $0x968] sm:$0xff] }
 0x13e   :  { %v2820_v60 = vadd.f32 %v5610_v14, %v2819_v57  ;;  %v3219_v0 = vpop.f32.mrf.mxu1 }
 0x13f   :  { %v2821_v1 = vpop.f32.mrf.mxu0 }
 0x140   :  { %v5768_v3 = vadd.f32 %v3219_v0, %v2820_v60  ;;  %v3221_v5 = vpop.f32.mrf.mxu1  ;;  %v303_v1 = vld [vmem:[%s7046_s0 + $0x900] sm:$0xff] }
 0x141   :  { %v2824_v6 = vpop.f32.mrf.mxu0  ;;  %3015 = vmatmul.mubr.bf16.gmra.mxu0 %v4769_v58 }
 0x142   :  { %v2825_v7 = vadd.f32 %v5610_v14, %v2824_v6  ;;  %v3224_v8 = vpop.f32.mrf.mxu1  ;;  %3415 = vmatmul.mubr.bf16.gmra.mxu1 %v4771_v61  ;;  %3022 = vmatprep.mubr.bf16.mxu0 %v4778_v62 }
 0x143   :  { %v2826_v9 = vpop.f32.mrf.mxu0  ;;  %3422 = vmatprep.mubr.bf16.mxu1 %v4780_v2  ;;  %v307_v2 = vld [vmem:[%s7046_s0 + $0x920] sm:$0xff] }
 0x144   :  { %v5777_v13 = vadd.f32 %v3224_v8, %v2825_v7  ;;  %v3226_v15 = vpop.f32.mrf.mxu1  ;;  %v304_v7 = vld [vmem:[%s7046_s0 + $0x908] sm:$0xff]  ;;  %v4802_v17 = vcombine.high %v303_v1, %v307_v2 }
 0x145   :  { %v2827_v19 = vpop.f32.mrf.mxu0  ;;  %v308_v8 = vld [vmem:[%s7046_s0 + $0x928] sm:$0xff] }
 0x146   :  { %v2828_v21 = vadd.f32 %v5610_v14, %v2827_v19  ;;  %v3227_v24 = vpop.f32.mrf.mxu1 }
 0x147   :  { %v2829_v27 = vpop.f32.mrf.mxu0 }
 0x148   :  { %v5786_v30 = vadd.f32 %v3227_v24, %v2828_v21  ;;  %v3229_v31 = vpop.f32.mrf.mxu1 }
 0x149   :  { %v2832_v32 = vpop.f32.mrf.mxu0  ;;  %3023 = vmatmul.mubr.bf16.gmra.mxu0 %v4777_v20  ;;  %v4804_v20 = vcombine.high %v304_v7, %v308_v8  ;;  %v311_v31 = vld [vmem:[%s7046_s0 + $0x940] sm:$0xff] }
 0x14a   :  { %v2833_v33 = vadd.f32 %v5610_v14, %v2832_v32  ;;  %v3232_v34 = vpop.f32.mrf.mxu1  ;;  %3423 = vmatmul.mubr.bf16.gmra.mxu1 %v4779_v25  ;;  %3030 = vmatprep.mubr.bf16.mxu0 %v4786_v26  ;;  %v315_v32 = vld [vmem:[%s7046_s0 + $0x960] sm:$0xff] }
 0x14b   :  { %v2834_v36 = vpop.f32.mrf.mxu0  ;;  %3430 = vmatprep.mubr.bf16.mxu1 %v4788_v29 }
 0x14c   :  { %v5795_v40 = vadd.f32 %v3232_v34, %v2833_v33  ;;  %v3234_v41 = vpop.f32.mrf.mxu1  ;;  %v312_v36 = vld [vmem:[%s7046_s0 + $0x948] sm:$0xff] }
 0x14d   :  { %v2835_v47 = vpop.f32.mrf.mxu0  ;;  %v4801_v41 = vcombine.low %v303_v1, %v307_v2  ;;  %v320_v2 = vld [vmem:[%s7046_s0 + $0x988] sm:$0xff] }
 0x14e   :  { %v2836_v49 = vadd.f32 %v5610_v14, %v2835_v47  ;;  %v3235_v50 = vpop.f32.mrf.mxu1  ;;  %v4803_v47 = vcombine.low %v304_v7, %v308_v8  ;;  %v4809_v8 = vcombine.low %v311_v31, %v315_v32 }
 0x14f   :  { %v2837_v54 = vpop.f32.mrf.mxu0 }
 0x150   :  { %v5804_v57 = vadd.f32 %v3235_v50, %v2836_v49  ;;  %v3237_v58 = vpop.f32.mrf.mxu1  ;;  %v4812_v50 = vcombine.high %v312_v36, %v316_v38 }
 0x151   :  { %v2840_v60 = vpop.f32.mrf.mxu0  ;;  %3031 = vmatmul.mubr.bf16.gmra.mxu0 %v4785_v48  ;;  %v4810_v48 = vcombine.high %v311_v31, %v315_v32  ;;  %v331_v31 = vld [vmem:[%s7046_s0 + $0x9e0] sm:$0xff] }
 0x152   :  { %v2841_v0 = vadd.f32 %v5610_v14, %v2840_v60  ;;  %v3240_v61 = vpop.f32.mrf.mxu1  ;;  %3431 = vmatmul.mubr.bf16.gmra.mxu1 %v4787_v51  ;;  %3038 = vmatprep.mubr.bf16.mxu0 %v4794_v53 }
 0x153   :  { %v2842_v62 = vpop.f32.mrf.mxu0  ;;  %3438 = vmatprep.mubr.bf16.mxu1 %v4796_v55 }
 0x154   :  { %v5813_v5 = vadd.f32 %v3240_v61, %v2841_v0  ;;  %v3242_v6 = vpop.f32.mrf.mxu1  ;;  %v319_v0 = vld [vmem:[%s7046_s0 + $0x980] sm:$0xff] }
 0x155   :  { %v2843_v9 = vpop.f32.mrf.mxu0  ;;  %v323_v61 = vld [vmem:[%s7046_s0 + $0x9a0] sm:$0xff]  ;;  %v324_v6 = vld [vmem:[%s7046_s0 + $0x9a8] sm:$0xff] }
 0x156   :  { %v2844_v11 = vadd.f32 %v5610_v14, %v2843_v9  ;;  %v3243_v15 = vpop.f32.mrf.mxu1 }
 0x157   :  { %v2845_v19 = vpop.f32.mrf.mxu0 }
 0x158   :  { %v5822_v21 = vadd.f32 %v3243_v15, %v2844_v11  ;;  %v3245_v24 = vpop.f32.mrf.mxu1  ;;  %v4811_v11 = vcombine.low %v312_v36, %v316_v38  ;;  %v4818_v15 = vcombine.high %v319_v0, %v323_v61  ;;  %v328_v36 = vld [vmem:[%s7046_s0 + $0x9c8] sm:$0xff] }
 0x159   :  { %v2848_v25 = vpop.f32.mrf.mxu0  ;;  %3039 = vmatmul.mubr.bf16.gmra.mxu0 %v4793_v10  ;;  %v332_v38 = vld [vmem:[%s7046_s0 + $0x9e8] sm:$0xff] }
 0x15a   :  { %v2849_v26 = vadd.f32 %v5610_v14, %v2848_v25  ;;  %v3248_v27 = vpop.f32.mrf.mxu1  ;;  %3439 = vmatmul.mubr.bf16.gmra.mxu1 %v4795_v16  ;;  %3046 = vmatprep.mubr.bf16.mxu0 %v4802_v17  ;;  %v4820_v17 = vcombine.high %v320_v2, %v324_v6 }
 0x15b   :  { %v2850_v29 = vpop.f32.mrf.mxu0  ;;  %3446 = vmatprep.mubr.bf16.mxu1 %v4804_v20 }
 0x15c   :  { %v5831_v33 = vadd.f32 %v3248_v27, %v2849_v26  ;;  %v3250_v34 = vpop.f32.mrf.mxu1  ;;  %v327_v29 = vld [vmem:[%s7046_s0 + $0x9c0] sm:$0xff] }
 0x15d   :  { %v2851_v39 = vpop.f32.mrf.mxu0 }
 0x15e   :  { %v2852_v43 = vadd.f32 %v5610_v14, %v2851_v39  ;;  %v3251_v45 = vpop.f32.mrf.mxu1 }
 0x15f   :  { %v2853_v49 = vpop.f32.mrf.mxu0 }
 0x160   :  { %v5840_v51 = vadd.f32 %v3251_v45, %v2852_v43  ;;  %v3253_v53 = vpop.f32.mrf.mxu1 }
 0x161   :  { %v2856_v54 = vpop.f32.mrf.mxu0  ;;  %3047 = vmatmul.mubr.bf16.gmra.mxu0 %v4801_v41  ;;  %v4817_v41 = vcombine.low %v319_v0, %v323_v61  ;;  %v335_v0 = vld [vmem:[%s7046_s0 + $0xa00] sm:$0xff] }
 0x162   :  { %v2857_v55 = vadd.f32 %v5610_v14, %v2856_v54  ;;  %v3256_v58 = vpop.f32.mrf.mxu1  ;;  %3447 = vmatmul.mubr.bf16.gmra.mxu1 %v4803_v47  ;;  %3054 = vmatprep.mubr.bf16.mxu0 %v4810_v48  ;;  %v4819_v47 = vcombine.low %v320_v2, %v324_v6  ;;  %v4826_v48 = vcombine.high %v327_v29, %v331_v31  ;;  %v339_v61 = vld [vmem:[%s7046_s0 + $0xa20] sm:$0xff] }
 0x163   :  { %v2858_v60 = vpop.f32.mrf.mxu0  ;;  %3454 = vmatprep.mubr.bf16.mxu1 %v4812_v50  ;;  %v4828_v50 = vcombine.high %v328_v36, %v332_v38 }
 0x164   :  { %v5849_v62 = vadd.f32 %v3256_v58, %v2857_v55  ;;  %v3258_v1 = vpop.f32.mrf.mxu1 }
 0x165   :  { %v2859_v7 = vpop.f32.mrf.mxu0 }
 0x166   :  { %v2860_v9 = vadd.f32 %v5610_v14, %v2859_v7  ;;  %v3259_v10 = vpop.f32.mrf.mxu1  ;;  %v336_v7 = vld [vmem:[%s7046_s0 + $0xa08] sm:$0xff] }
 0x167   :  { %v2861_v16 = vpop.f32.mrf.mxu0 }
 0x168   :  { %v5858_v19 = vadd.f32 %v3259_v10, %v2860_v9  ;;  %v3261_v20 = vpop.f32.mrf.mxu1  ;;  %v4825_v10 = vcombine.low %v327_v29, %v331_v31  ;;  %v4827_v16 = vcombine.low %v328_v36, %v332_v38  ;;  %v343_v29 = vld [vmem:[%s7046_s0 + $0xa40] sm:$0xff] }
 0x169   :  { %v2864_v24 = vpop.f32.mrf.mxu0  ;;  %3055 = vmatmul.mubr.bf16.gmra.mxu0 %v4809_v8  ;;  %v340_v8 = vld [vmem:[%s7046_s0 + $0xa28] sm:$0xff]  ;;  %v347_v31 = vld [vmem:[%s7046_s0 + $0xa60] sm:$0xff] }
 0x16a   :  { %v2865_v25 = vadd.f32 %v5610_v14, %v2864_v24  ;;  %v3264_v26 = vpop.f32.mrf.mxu1  ;;  %3455 = vmatmul.mubr.bf16.gmra.mxu1 %v4811_v11  ;;  %3062 = vmatprep.mubr.bf16.mxu0 %v4818_v15  ;;  %v4836_v24 = vcombine.high %v336_v7, %v340_v8 }
 0x16b   :  { %v2866_v27 = vpop.f32.mrf.mxu0  ;;  %3462 = vmatprep.mubr.bf16.mxu1 %v4820_v17  ;;  %v4834_v17 = vcombine.high %v335_v0, %v339_v61 }
 0x16c   :  { %v5867_v32 = vadd.f32 %v3264_v26, %v2865_v25  ;;  %v3266_v34 = vpop.f32.mrf.mxu1 }
 0x16d   :  { %v2867_v39 = vpop.f32.mrf.mxu0 }
 0x16e   :  { %v2868_v43 = vadd.f32 %v5610_v14, %v2867_v39  ;;  %v3267_v45 = vpop.f32.mrf.mxu1 }
 0x16f   :  { %v2869_v49 = vpop.f32.mrf.mxu0 }
 0x170   :  { %v5876_v53 = vadd.f32 %v3267_v45, %v2868_v43  ;;  %v3269_v54 = vpop.f32.mrf.mxu1  ;;  %v344_v43 = vld [vmem:[%s7046_s0 + $0xa48] sm:$0xff] }
 0x171   :  { %v2872_v55 = vpop.f32.mrf.mxu0  ;;  %3063 = vmatmul.mubr.bf16.gmra.mxu0 %v4817_v41  ;;  %v348_v45 = vld [vmem:[%s7046_s0 + $0xa68] sm:$0xff]  ;;  %v4835_v54 = vcombine.low %v336_v7, %v340_v8 }
 0x172   :  { %v2873_v58 = vadd.f32 %v5610_v14, %v2872_v55  ;;  %v3272_v60 = vpop.f32.mrf.mxu1  ;;  %3463 = vmatmul.mubr.bf16.gmra.mxu1 %v4819_v47  ;;  %3070 = vmatprep.mubr.bf16.mxu0 %v4826_v48  ;;  %v4833_v48 = vcombine.low %v335_v0, %v339_v61  ;;  %v4842_v55 = vcombine.high %v343_v29, %v347_v31  ;;  %v351_v0 = vld [vmem:[%s7046_s0 + $0xa80] sm:$0xff] }
 0x173   :  { %v2874_v1 = vpop.f32.mrf.mxu0  ;;  %3470 = vmatprep.mubr.bf16.mxu1 %v4828_v50  ;;  %v355_v61 = vld [vmem:[%s7046_s0 + $0xaa0] sm:$0xff] }
 0x174   :  { %v5885_v2 = vadd.f32 %v3272_v60, %v2873_v58  ;;  %v3274_v6 = vpop.f32.mrf.mxu1  ;;  %v4844_v60 = vcombine.high %v344_v43, %v348_v45 }
 0x175   :  { %v2875_v9 = vpop.f32.mrf.mxu0 }
 0x176   :  { %v2876_v11 = vadd.f32 %v5610_v14, %v2875_v9  ;;  %v3275_v15 = vpop.f32.mrf.mxu1 }
 0x177   :  { %v2877_v20 = vpop.f32.mrf.mxu0 }
 0x178   :  { %v5894_v25 = vadd.f32 %v3275_v15, %v2876_v11  ;;  %v3277_v26 = vpop.f32.mrf.mxu1 }
 0x179   :  { %v2880_v27 = vpop.f32.mrf.mxu0  ;;  %3071 = vmatmul.mubr.bf16.gmra.mxu0 %v4825_v10 }
 0x17a   :  { %v2881_v34 = vadd.f32 %v5610_v14, %v2880_v27  ;;  %v3280_v39 = vpop.f32.mrf.mxu1  ;;  %3471 = vmatmul.mubr.bf16.gmra.mxu1 %v4827_v16  ;;  %3078 = vmatprep.mubr.bf16.mxu0 %v4834_v17  ;;  %v352_v16 = vld [vmem:[%s7046_s0 + $0xa88] sm:$0xff] }
 0x17b   :  { %v2882_v41 = vpop.f32.mrf.mxu0  ;;  %3478 = vmatprep.mubr.bf16.mxu1 %v4836_v24  ;;  %v356_v17 = vld [vmem:[%s7046_s0 + $0xaa8] sm:$0xff]  ;;  %v4841_v24 = vcombine.low %v343_v29, %v347_v31  ;;  %v359_v29 = vld [vmem:[%s7046_s0 + $0xac0] sm:$0xff] }
 0x17c   :  { %v5903_v36 = vadd.f32 %v3280_v39, %v2881_v34  ;;  %v3282_v38 = vpop.f32.mrf.mxu1  ;;  %v4843_v34 = vcombine.low %v344_v43, %v348_v45  ;;  %v4850_v39 = vcombine.high %v351_v0, %v355_v61  ;;  %v363_v31 = vld [vmem:[%s7046_s0 + $0xae0] sm:$0xff] }
 0x17d   :  { %v2883_v47 = vpop.f32.mrf.mxu0  ;;  %v4852_v38 = vcombine.high %v352_v16, %v356_v17 }
 0x17e   :  { %v2884_v49 = vadd.f32 %v5610_v14, %v2883_v47  ;;  %v3283_v50 = vpop.f32.mrf.mxu1 }
 0x17f   :  { %v2885_v58 = vpop.f32.mrf.mxu0 }
 0x180   :  { %v5912_v1 = vadd.f32 %v3283_v50, %v2884_v49  ;;  %v3285_v6 = vpop.f32.mrf.mxu1  ;;  %v360_v58 = vld [vmem:[%s7046_s0 + $0xac8] sm:$0xff] }
 0x181   :  { %v2888_v9 = vpop.f32.mrf.mxu0  ;;  %3079 = vmatmul.mubr.bf16.gmra.mxu0 %v4833_v48 }
 0x182   :  { %v2889_v10 = vadd.f32 %v5610_v14, %v2888_v9  ;;  %v3288_v11 = vpop.f32.mrf.mxu1  ;;  %3479 = vmatmul.mubr.bf16.gmra.mxu1 %v4835_v54  ;;  %3086 = vmatprep.mubr.bf16.mxu0 %v4842_v55  ;;  %v4849_v9 = vcombine.low %v351_v0, %v355_v61  ;;  %v367_v0 = vld [vmem:[%s7046_s0 + $0xb00] sm:$0xff] }
 0x183   :  { %v2890_v15 = vpop.f32.mrf.mxu0  ;;  %3486 = vmatprep.mubr.bf16.mxu1 %v4844_v60  ;;  %v364_v60 = vld [vmem:[%s7046_s0 + $0xae8] sm:$0xff]  ;;  %v371_v61 = vld [vmem:[%s7046_s0 + $0xb20] sm:$0xff] }
 0x184   :  { %v5921_v7 = vadd.f32 %v3288_v11, %v2889_v10  ;;  %v3290_v8 = vpop.f32.mrf.mxu1  ;;  %v4851_v15 = vcombine.low %v352_v16, %v356_v17 }
 0x185   :  { %v2891_v20 = vpop.f32.mrf.mxu0  ;;  %v4858_v8 = vcombine.high %v359_v29, %v363_v31 }
 0x186   :  { %v2892_v26 = vadd.f32 %v5610_v14, %v2891_v20  ;;  %v3291_v27 = vpop.f32.mrf.mxu1 }
 0x187   :  { %v2893_v41 = vpop.f32.mrf.mxu0 }
 0x188   :  { %v5930_v47 = vadd.f32 %v3291_v27, %v2892_v26  ;;  %v3293_v48 = vpop.f32.mrf.mxu1 }
 0x189   :  { %v2896_v49 = vpop.f32.mrf.mxu0  ;;  %3087 = vmatmul.mubr.bf16.gmra.mxu0 %v4841_v24  ;;  %v4860_v24 = vcombine.high %v360_v58, %v364_v60  ;;  %v368_v48 = vld [vmem:[%s7046_s0 + $0xb08] sm:$0xff] }
 0x18a   :  { %v2897_v50 = vadd.f32 %v5610_v14, %v2896_v49  ;;  %v3296_v54 = vpop.f32.mrf.mxu1  ;;  %3487 = vmatmul.mubr.bf16.gmra.mxu1 %v4843_v34  ;;  %3094 = vmatprep.mubr.bf16.mxu0 %v4850_v39  ;;  %v372_v49 = vld [vmem:[%s7046_s0 + $0xb28] sm:$0xff] }
 0x18b   :  { %v2898_v55 = vpop.f32.mrf.mxu0  ;;  %3494 = vmatprep.mubr.bf16.mxu1 %v4852_v38 }
 0x18c   :  { %v5939_v43 = vadd.f32 %v3296_v54, %v2897_v50  ;;  %v3298_v45 = vpop.f32.mrf.mxu1  ;;  %v4857_v54 = vcombine.low %v359_v29, %v363_v31  ;;  %v375_v29 = vld [vmem:[%s7046_s0 + $0xb40] sm:$0xff] }
 0x18d   :  { %v2899_v6 = vpop.f32.mrf.mxu0 }
 0x18e   :  { %v2900_v10 = vadd.f32 %v5610_v14, %v2899_v6  ;;  %v3299_v11 = vpop.f32.mrf.mxu1  ;;  %v4859_v6 = vcombine.low %v360_v58, %v364_v60  ;;  %v376_v60 = vld [vmem:[%s7046_s0 + $0xb48] sm:$0xff] }
 0x18f   :  { %v2901_v20 = vpop.f32.mrf.mxu0 }
 0x190   :  { %v5948_v26 = vadd.f32 %v3299_v11, %v2900_v10  ;;  %v3301_v27 = vpop.f32.mrf.mxu1  ;;  %v4868_v11 = vcombine.high %v368_v48, %v372_v49 }
 0x191   :  { %v2904_v34 = vpop.f32.mrf.mxu0  ;;  %3095 = vmatmul.mubr.bf16.gmra.mxu0 %v4849_v9  ;;  %v4866_v9 = vcombine.high %v367_v0, %v371_v61 }
 0x192   :  { %v2905_v39 = vadd.f32 %v5610_v14, %v2904_v34  ;;  %v3304_v41 = vpop.f32.mrf.mxu1  ;;  %3495 = vmatmul.mubr.bf16.gmra.mxu1 %v4851_v15  ;;  %3102 = vmatprep.mubr.bf16.mxu0 %v4858_v8 }
 0x193   :  { %v2906_v38 = vpop.f32.mrf.mxu0  ;;  %3502 = vmatprep.mubr.bf16.mxu1 %v4860_v24 }
 0x194   :  { %v5957_v16 = vadd.f32 %v3304_v41, %v2905_v39  ;;  %v3306_v17 = vpop.f32.mrf.mxu1  ;;  %v4865_v41 = vcombine.low %v367_v0, %v371_v61  ;;  %v17_v0 = vld [vmem:[%s7046_s0 + $0x10] sm:$0xff] }
 0x195   :  { %v2907_v50 = vpop.f32.mrf.mxu0  ;;  %v21_v61 = vld [vmem:[%s7046_s0 + $0x30] sm:$0xff] }
 0x196   :  { %v2908_v55 = vadd.f32 %v5610_v14, %v2907_v50  ;;  %v3307_v45 = vpop.f32.mrf.mxu1  ;;  %v4867_v50 = vcombine.low %v368_v48, %v372_v49 }
 0x197   :  { %v2909_v10 = vpop.f32.mrf.mxu0 }
 0x198   :  { %v5966_v15 = vadd.f32 %v3307_v45, %v2908_v55  ;;  %v3309_v8 = vpop.f32.mrf.mxu1  ;;  %v4876_v45 = vcombine.high %v376_v60, %v376_v60 }
 0x199   :  { %v2912_v20 = vpop.f32.mrf.mxu0  ;;  %3103 = vmatmul.mubr.bf16.gmra.mxu0 %v4857_v54  ;;  %v4874_v54 = vcombine.high %v375_v29, %v375_v29 }
 0x19a   :  { %v2913_v24 = vadd.f32 %v5610_v14, %v2912_v20  ;;  %v3312_v27 = vpop.f32.mrf.mxu1  ;;  %3503 = vmatmul.mubr.bf16.gmra.mxu1 %v4859_v6  ;;  %3110 = vmatprep.mubr.bf16.mxu0 %v4866_v9 }
 0x19b   :  { %v2914_v34 = vpop.f32.mrf.mxu0  ;;  %3510 = vmatprep.mubr.bf16.mxu1 %v4868_v11 }
 0x19c   :  { %v5972_v31 = vadd.f32 %v3312_v27, %v2913_v24  ;;  %v3314_v58 = vpop.f32.mrf.mxu1  ;;  %v18_v24 = vld [vmem:[%s7046_s0 + $0x18] sm:$0xff] }
 0x19d   :  { %v2915_v39 = vpop.f32.mrf.mxu0  ;;  %v22_v27 = vld [vmem:[%s7046_s0 + $0x38] sm:$0xff]  ;;  %v4873_v58 = vcombine.low %v375_v29, %v375_v29 }
 0x19e   :  { %v2916_v38 = vadd.f32 %v5610_v14, %v2915_v39  ;;  %v3315_v17 = vpop.f32.mrf.mxu1 }
 0x19f   :  { %v2917_v55 = vpop.f32.mrf.mxu0 }
 0x1a0   :  { %v5978_v6 = vadd.f32 %v3315_v17, %v2916_v38  ;;  %v3317_v9 = vpop.f32.mrf.mxu1  ;;  %v4875_v38 = vcombine.low %v376_v60, %v376_v60  ;;  %v4518_v17 = vcombine.high %v17_v0, %v21_v61  ;;  %v25_v60 = vld [vmem:[%s7046_s0 + $0x50] sm:$0xff] }
 0x1a1   :  { %v2920_v10 = vpop.f32.mrf.mxu0  ;;  %3111 = vmatmul.mubr.bf16.gmra.mxu0 %v4865_v41 }
 0x1a2   :  { %v2921_v11 = vadd.f32 %v5610_v14, %v2920_v10  ;;  %v3320_v8 = vpop.f32.mrf.mxu1  ;;  %3511 = vmatmul.mubr.bf16.gmra.mxu1 %v4867_v50  ;;  %3118 = vmatprep.mubr.bf16.mxu0 %v4874_v54  ;;  %v4520_v54 = vcombine.high %v18_v24, %v22_v27  ;;  %v6001_v10 = vld [vmem:[%s7047_s2] ss:$0 sm:$0xff] }
 0x1a3   :  { %v2922_v20 = vpop.f32.mrf.mxu0  ;;  %3518 = vmatprep.mubr.bf16.mxu1 %v4876_v45 }
 0x1a4   :  { %v5987_v48 = vadd.f32 %v3320_v8, %v2921_v11  ;;  %v3322_v49 = vpop.f32.mrf.mxu1  ;;  %v29_v8 = vld [vmem:[%s7046_s0 + $0x70] sm:$0xff] }
 0x1a5   :  { %v2923_v34 = vpop.f32.mrf.mxu0 }
 0x1a6   :  { %v2924_v39 = vadd.f32 %v5610_v14, %v2923_v34  ;;  %v3323_v41 = vpop.f32.mrf.mxu1  ;;  %v26_v34 = vld [vmem:[%s7046_s0 + $0x58] sm:$0xff] }
 0x1a7   :  { %v2925_v50 = vpop.f32.mrf.mxu0 }
 0x1a8   :  { %v5996_v55 = vadd.f32 %v3323_v41, %v2924_v39  ;;  %v3325_v45 = vpop.f32.mrf.mxu1  ;;  %v4517_v41 = vcombine.low %v17_v0, %v21_v61  ;;  %v4519_v50 = vcombine.low %v18_v24, %v22_v27  ;;  %v33_v0 = vld [vmem:[%s7046_s0 + $0x90] sm:$0xff] }
 0x1a9   :  { %v2928_v9 = vpop.f32.mrf.mxu0  ;;  %3119 = vmatmul.mubr.bf16.gmra.mxu0 %v4873_v58  ;;  %v30_v58 = vld [vmem:[%s7046_s0 + $0x78] sm:$0xff]  ;;  %v37_v61 = vld [vmem:[%s7046_s0 + $0xb0] sm:$0xff] }
 0x1aa   :  { %7049 = vst [vmem:[#allocation2_spill] sm:$0xff] %v5996_v55  ;;  %v2929_v11 = vadd.f32 %v6001_v10, %v2928_v9  ;;  %v3328_v29 = vpop.f32.mrf.mxu1  ;;  %3519 = vmatmul.mubr.bf16.gmra.mxu1 %v4875_v38  ;;  %3558 = vmatprep.mubr.bf16.mxu0 %v4518_v17  ;;  %v4528_v9 = vcombine.high %v26_v34, %v30_v58 }
 0x1ab   :  { %v2930_v14 = vpop.f32.mrf.mxu0  ;;  %3958 = vmatprep.mubr.bf16.mxu1 %v4520_v54  ;;  %v4526_v54 = vcombine.high %v25_v60, %v29_v8 }
 0x1ac   :  { %v6010_v20 = vadd.f32 %v3328_v29, %v2929_v11  ;;  %v3330_v49 = vpop.f32.mrf.mxu1 }
 0x1ad   :  { %v2931_v39 = vpop.f32.mrf.mxu0 }
 0x1ae   :  { %7050 = vst [vmem:[#allocation3_spill] sm:$0xff] %v6010_v20  ;;  %v2932_v38 = vadd.f32 %v6001_v10, %v2931_v39  ;;  %v3331_v17 = vpop.f32.mrf.mxu1  ;;  %v34_v39 = vld [vmem:[%s7046_s0 + $0x98] sm:$0xff] }
 0x1af   :  { %v2933_v45 = vpop.f32.mrf.mxu0 }
 0x1b0   :  { %v6019_v11 = vadd.f32 %v3331_v17, %v2932_v38  ;;  %v3333_v29 = vpop.f32.mrf.mxu1  ;;  %v4525_v38 = vcombine.low %v25_v60, %v29_v8  ;;  %v4534_v45 = vcombine.high %v33_v0, %v37_v61  ;;  %v41_v60 = vld [vmem:[%s7046_s0 + $0xd0] sm:$0xff] }
 0x1b1   :  { %v2936_v14 = vpop.f32.mrf.mxu0  ;;  %3559 = vmatmul.mubr.bf16.vlgmr.msra.gmra.mxu0 %v4517_v41  ;;  %v45_v8 = vld [vmem:[%s7046_s0 + $0xf0] sm:$0xff] }
 0x1b2   :  { %7051 = vst [vmem:[#allocation4_spill] sm:$0xff] %v6019_v11  ;;  %v2937_v49 = vadd.f32 %v6001_v10, %v2936_v14  ;;  %v3336_v20 = vpop.f32.mrf.mxu1  ;;  %3959 = vmatmul.mubr.bf16.vlgmr.msra.gmra.mxu1 %v4519_v50  ;;  %3566 = vmatprep.mubr.bf16.mxu0 %v4526_v54  ;;  %v4527_v54 = vcombine.low %v26_v34, %v30_v58 }
 0x1b3   :  { %v2938_v55 = vpop.f32.mrf.mxu0  ;;  %3966 = vmatprep.mubr.bf16.mxu1 %v4528_v9 }
 0x1b4   :  { %v6028_v24 = vadd.f32 %v3336_v20, %v2937_v49  ;;  %v3338_v27 = vpop.f32.mrf.mxu1  ;;  %v38_v55 = vld [vmem:[%s7046_s0 + $0xb8] sm:$0xff] }
 0x1b5   :  { %v2939_v41 = vpop.f32.mrf.mxu0  ;;  %v4536_v29 = vcombine.high %v34_v39, %v38_v55 }
 0x1b6   :  { %7052 = vst [vmem:[#allocation5_spill] sm:$0xff] %v6028_v24  ;;  %v2940_v17 = vadd.f32 %v6001_v10, %v2939_v41  ;;  %v3339_v50 = vpop.f32.mrf.mxu1  ;;  %v42_v41 = vld [vmem:[%s7046_s0 + $0xd8] sm:$0xff] }
 0x1b7   :  { %v2941_v9 = vpop.f32.mrf.mxu0 }
 0x1b8   :  { %v6037_v20 = vadd.f32 %v3339_v50, %v2940_v17  ;;  %v3341_v14 = vpop.f32.mrf.mxu1  ;;  %v4533_v17 = vcombine.low %v33_v0, %v37_v61  ;;  %v4542_v9 = vcombine.high %v41_v60, %v45_v8  ;;  %v49_v0 = vld [vmem:[%s7046_s0 + $0x110] sm:$0xff] }
 0x1b9   :  { %v2944_v49 = vpop.f32.mrf.mxu0  ;;  %3567 = vmatmul.mubr.bf16.gmra.mxu0 %v4525_v38  ;;  %v53_v61 = vld [vmem:[%s7046_s0 + $0x130] sm:$0xff] }
 0x1ba   :  { %7053 = vst [vmem:[#allocation6_spill] sm:$0xff] %v6037_v20  ;;  %v2945_v27 = vadd.f32 %v6001_v10, %v2944_v49  ;;  %v3344_v24 = vpop.f32.mrf.mxu1  ;;  %3967 = vmatmul.mubr.bf16.gmra.mxu1 %v4527_v54  ;;  %3574 = vmatprep.mubr.bf16.mxu0 %v4534_v45  ;;  %v4535_v45 = vcombine.low %v34_v39, %v38_v55 }
 0x1bb   :  { %v2946_v11 = vpop.f32.mrf.mxu0  ;;  %3974 = vmatprep.mubr.bf16.mxu1 %v4536_v29 }
 0x1bc   :  { %v6046_v34 = vadd.f32 %v3344_v24, %v2945_v27  ;;  %v3346_v58 = vpop.f32.mrf.mxu1  ;;  %v46_v11 = vld [vmem:[%s7046_s0 + $0xf8] sm:$0xff] }
 0x1bd   :  { %v2947_v38 = vpop.f32.mrf.mxu0  ;;  %v4544_v14 = vcombine.high %v42_v41, %v46_v11 }
 0x1be   :  { %7054 = vst [vmem:[#allocation7_spill] sm:$0xff] %v6046_v34  ;;  %v2948_v50 = vadd.f32 %v6001_v10, %v2947_v38  ;;  %v3347_v54 = vpop.f32.mrf.mxu1  ;;  %v50_v38 = vld [vmem:[%s7046_s0 + $0x118] sm:$0xff] }
 0x1bf   :  { %v2949_v29 = vpop.f32.mrf.mxu0 }
 0x1c0   :  { %v6055_v24 = vadd.f32 %v3347_v54, %v2948_v50  ;;  %v3349_v49 = vpop.f32.mrf.mxu1  ;;  %v4541_v50 = vcombine.low %v41_v60, %v45_v8  ;;  %v4550_v29 = vcombine.high %v49_v0, %v53_v61  ;;  %v57_v60 = vld [vmem:[%s7046_s0 + $0x150] sm:$0xff] }
 0x1c1   :  { %v2952_v27 = vpop.f32.mrf.mxu0  ;;  %3575 = vmatmul.mubr.bf16.gmra.mxu0 %v4533_v17  ;;  %v61_v8 = vld [vmem:[%s7046_s0 + $0x170] sm:$0xff] }
 0x1c2   :  { %7055 = vst [vmem:[#allocation8_spill] sm:$0xff] %v6055_v24  ;;  %v2953_v58 = vadd.f32 %v6001_v10, %v2952_v27  ;;  %v3352_v34 = vpop.f32.mrf.mxu1  ;;  %3975 = vmatmul.mubr.bf16.gmra.mxu1 %v4535_v45  ;;  %3582 = vmatprep.mubr.bf16.mxu0 %v4542_v9  ;;  %v4543_v9 = vcombine.low %v42_v41, %v46_v11 }
 0x1c3   :  { %v2954_v20 = vpop.f32.mrf.mxu0  ;;  %3982 = vmatprep.mubr.bf16.mxu1 %v4544_v14 }
 0x1c4   :  { %v6064_v39 = vadd.f32 %v3352_v34, %v2953_v58  ;;  %v3354_v55 = vpop.f32.mrf.mxu1  ;;  %v54_v20 = vld [vmem:[%s7046_s0 + $0x138] sm:$0xff] }
 0x1c5   :  { %v2955_v17 = vpop.f32.mrf.mxu0  ;;  %v4552_v49 = vcombine.high %v50_v38, %v54_v20 }
 0x1c6   :  { %7056 = vst [vmem:[#allocation9_spill] sm:$0xff] %v6064_v39  ;;  %v2956_v54 = vadd.f32 %v6001_v10, %v2955_v17  ;;  %v3355_v45 = vpop.f32.mrf.mxu1  ;;  %v58_v17 = vld [vmem:[%s7046_s0 + $0x158] sm:$0xff] }
 0x1c7   :  { %v2957_v14 = vpop.f32.mrf.mxu0 }
 0x1c8   :  { %v6073_v34 = vadd.f32 %v3355_v45, %v2956_v54  ;;  %v3357_v27 = vpop.f32.mrf.mxu1  ;;  %v4549_v54 = vcombine.low %v49_v0, %v53_v61  ;;  %v4558_v14 = vcombine.high %v57_v60, %v61_v8  ;;  %v65_v0 = vld [vmem:[%s7046_s0 + $0x190] sm:$0xff] }
 0x1c9   :  { %v2960_v58 = vpop.f32.mrf.mxu0  ;;  %3583 = vmatmul.mubr.bf16.gmra.mxu0 %v4541_v50  ;;  %v69_v61 = vld [vmem:[%s7046_s0 + $0x1b0] sm:$0xff] }
 0x1ca   :  { %7057 = vst [vmem:[#allocation10_spill] sm:$0xff] %v6073_v34  ;;  %v2961_v55 = vadd.f32 %v6001_v10, %v2960_v58  ;;  %v3360_v39 = vpop.f32.mrf.mxu1  ;;  %3983 = vmatmul.mubr.bf16.gmra.mxu1 %v4543_v9  ;;  %3590 = vmatprep.mubr.bf16.mxu0 %v4550_v29  ;;  %v4551_v29 = vcombine.low %v50_v38, %v54_v20 }
 0x1cb   :  { %v2962_v24 = vpop.f32.mrf.mxu0  ;;  %3990 = vmatprep.mubr.bf16.mxu1 %v4552_v49 }
 0x1cc   :  { %v6082_v41 = vadd.f32 %v3360_v39, %v2961_v55  ;;  %v3362_v11 = vpop.f32.mrf.mxu1  ;;  %v62_v24 = vld [vmem:[%s7046_s0 + $0x178] sm:$0xff] }
 0x1cd   :  { %v2963_v50 = vpop.f32.mrf.mxu0  ;;  %v4560_v27 = vcombine.high %v58_v17, %v62_v24 }
 0x1ce   :  { %7058 = vst [vmem:[#allocation11_spill] sm:$0xff] %v6082_v41  ;;  %v2964_v45 = vadd.f32 %v6001_v10, %v2963_v50  ;;  %v3363_v9 = vpop.f32.mrf.mxu1  ;;  %v66_v50 = vld [vmem:[%s7046_s0 + $0x198] sm:$0xff] }
 0x1cf   :  { %v2965_v49 = vpop.f32.mrf.mxu0 }
 0x1d0   :  { %v6091_v39 = vadd.f32 %v3363_v9, %v2964_v45  ;;  %v3365_v58 = vpop.f32.mrf.mxu1  ;;  %v4557_v45 = vcombine.low %v57_v60, %v61_v8  ;;  %v4566_v49 = vcombine.high %v65_v0, %v69_v61  ;;  %v73_v60 = vld [vmem:[%s7046_s0 + $0x1d0] sm:$0xff] }
 0x1d1   :  { %v2968_v55 = vpop.f32.mrf.mxu0  ;;  %3591 = vmatmul.mubr.bf16.gmra.mxu0 %v4549_v54  ;;  %v77_v8 = vld [vmem:[%s7046_s0 + $0x1f0] sm:$0xff] }
 0x1d2   :  { %7059 = vst [vmem:[#allocation12_spill] sm:$0xff] %v6091_v39  ;;  %v2969_v11 = vadd.f32 %v6001_v10, %v2968_v55  ;;  %v3368_v41 = vpop.f32.mrf.mxu1  ;;  %3991 = vmatmul.mubr.bf16.gmra.mxu1 %v4551_v29  ;;  %3598 = vmatprep.mubr.bf16.mxu0 %v4558_v14  ;;  %v4559_v14 = vcombine.low %v58_v17, %v62_v24 }
 0x1d3   :  { %v2970_v34 = vpop.f32.mrf.mxu0  ;;  %3998 = vmatprep.mubr.bf16.mxu1 %v4560_v27 }
 0x1d4   :  { %v6100_v38 = vadd.f32 %v3368_v41, %v2969_v11  ;;  %v3370_v20 = vpop.f32.mrf.mxu1  ;;  %v70_v34 = vld [vmem:[%s7046_s0 + $0x1b8] sm:$0xff] }
 0x1d5   :  { %v2971_v54 = vpop.f32.mrf.mxu0  ;;  %v4568_v58 = vcombine.high %v66_v50, %v70_v34 }
 0x1d6   :  { %7060 = vst [vmem:[#allocation13_spill] sm:$0xff] %v6100_v38  ;;  %v2972_v9 = vadd.f32 %v6001_v10, %v2971_v54  ;;  %v3371_v29 = vpop.f32.mrf.mxu1  ;;  %v74_v54 = vld [vmem:[%s7046_s0 + $0x1d8] sm:$0xff] }
 0x1d7   :  { %v2973_v27 = vpop.f32.mrf.mxu0 }
 0x1d8   :  { %v6109_v41 = vadd.f32 %v3371_v29, %v2972_v9  ;;  %v3373_v55 = vpop.f32.mrf.mxu1  ;;  %v4565_v9 = vcombine.low %v65_v0, %v69_v61  ;;  %v4574_v27 = vcombine.high %v73_v60, %v77_v8  ;;  %v81_v0 = vld [vmem:[%s7046_s0 + $0x210] sm:$0xff] }
 0x1d9   :  { %v2976_v11 = vpop.f32.mrf.mxu0  ;;  %3599 = vmatmul.mubr.bf16.gmra.mxu0 %v4557_v45  ;;  %v85_v61 = vld [vmem:[%s7046_s0 + $0x230] sm:$0xff] }
 0x1da   :  { %7061 = vst [vmem:[#allocation14_spill] sm:$0xff] %v6109_v41  ;;  %v2977_v20 = vadd.f32 %v6001_v10, %v2976_v11  ;;  %v3376_v38 = vpop.f32.mrf.mxu1  ;;  %3999 = vmatmul.mubr.bf16.gmra.mxu1 %v4559_v14  ;;  %3606 = vmatprep.mubr.bf16.mxu0 %v4566_v49  ;;  %v4567_v49 = vcombine.low %v66_v50, %v70_v34 }
 0x1db   :  { %v2978_v39 = vpop.f32.mrf.mxu0  ;;  %4006 = vmatprep.mubr.bf16.mxu1 %v4568_v58 }
 0x1dc   :  { %v6118_v17 = vadd.f32 %v3376_v38, %v2977_v20  ;;  %v3378_v24 = vpop.f32.mrf.mxu1  ;;  %v78_v39 = vld [vmem:[%s7046_s0 + $0x1f8] sm:$0xff] }
 0x1dd   :  { %v2979_v45 = vpop.f32.mrf.mxu0  ;;  %v4576_v55 = vcombine.high %v74_v54, %v78_v39 }
 0x1de   :  { %7062 = vst [vmem:[#allocation15_spill] sm:$0xff] %v6118_v17  ;;  %v2980_v29 = vadd.f32 %v6001_v10, %v2979_v45  ;;  %v3379_v14 = vpop.f32.mrf.mxu1  ;;  %v82_v45 = vld [vmem:[%s7046_s0 + $0x218] sm:$0xff] }
 0x1df   :  { %v2981_v58 = vpop.f32.mrf.mxu0 }
 0x1e0   :  { %v6127_v38 = vadd.f32 %v3379_v14, %v2980_v29  ;;  %v3381_v11 = vpop.f32.mrf.mxu1  ;;  %v4573_v29 = vcombine.low %v73_v60, %v77_v8  ;;  %v4582_v58 = vcombine.high %v81_v0, %v85_v61  ;;  %v89_v60 = vld [vmem:[%s7046_s0 + $0x250] sm:$0xff] }
 0x1e1   :  { %v2984_v20 = vpop.f32.mrf.mxu0  ;;  %3607 = vmatmul.mubr.bf16.gmra.mxu0 %v4565_v9  ;;  %v93_v8 = vld [vmem:[%s7046_s0 + $0x270] sm:$0xff] }
 0x1e2   :  { %7063 = vst [vmem:[#allocation16_spill] sm:$0xff] %v6127_v38  ;;  %v2985_v24 = vadd.f32 %v6001_v10, %v2984_v20  ;;  %v3384_v17 = vpop.f32.mrf.mxu1  ;;  %4007 = vmatmul.mubr.bf16.gmra.mxu1 %v4567_v49  ;;  %3614 = vmatprep.mubr.bf16.mxu0 %v4574_v27  ;;  %v4575_v27 = vcombine.low %v74_v54, %v78_v39 }
 0x1e3   :  { %v2986_v41 = vpop.f32.mrf.mxu0  ;;  %4014 = vmatprep.mubr.bf16.mxu1 %v4576_v55 }
 0x1e4   :  { %v6136_v50 = vadd.f32 %v3384_v17, %v2985_v24  ;;  %v3386_v34 = vpop.f32.mrf.mxu1  ;;  %v86_v41 = vld [vmem:[%s7046_s0 + $0x238] sm:$0xff] }
 0x1e5   :  { %v2987_v9 = vpop.f32.mrf.mxu0  ;;  %v4584_v11 = vcombine.high %v82_v45, %v86_v41 }
 0x1e6   :  { %7064 = vst [vmem:[#allocation17_spill] sm:$0xff] %v6136_v50  ;;  %v2988_v14 = vadd.f32 %v6001_v10, %v2987_v9  ;;  %v3387_v49 = vpop.f32.mrf.mxu1  ;;  %v90_v9 = vld [vmem:[%s7046_s0 + $0x258] sm:$0xff] }
 0x1e7   :  { %v2989_v55 = vpop.f32.mrf.mxu0 }
 0x1e8   :  { %v6145_v17 = vadd.f32 %v3387_v49, %v2988_v14  ;;  %v3389_v20 = vpop.f32.mrf.mxu1  ;;  %v4581_v14 = vcombine.low %v81_v0, %v85_v61  ;;  %v4590_v55 = vcombine.high %v89_v60, %v93_v8  ;;  %v97_v0 = vld [vmem:[%s7046_s0 + $0x290] sm:$0xff] }
 0x1e9   :  { %v2992_v24 = vpop.f32.mrf.mxu0  ;;  %3615 = vmatmul.mubr.bf16.gmra.mxu0 %v4573_v29  ;;  %v101_v61 = vld [vmem:[%s7046_s0 + $0x2b0] sm:$0xff] }
 0x1ea   :  { %7065 = vst [vmem:[#allocation18_spill] sm:$0xff] %v6145_v17  ;;  %v2993_v34 = vadd.f32 %v6001_v10, %v2992_v24  ;;  %v3392_v50 = vpop.f32.mrf.mxu1  ;;  %4015 = vmatmul.mubr.bf16.gmra.mxu1 %v4575_v27  ;;  %3622 = vmatprep.mubr.bf16.mxu0 %v4582_v58  ;;  %v4583_v58 = vcombine.low %v82_v45, %v86_v41 }
 0x1eb   :  { %v2994_v38 = vpop.f32.mrf.mxu0  ;;  %4022 = vmatprep.mubr.bf16.mxu1 %v4584_v11 }
 0x1ec   :  { %v6154_v54 = vadd.f32 %v3392_v50, %v2993_v34  ;;  %v3394_v39 = vpop.f32.mrf.mxu1  ;;  %v94_v38 = vld [vmem:[%s7046_s0 + $0x278] sm:$0xff] }
 0x1ed   :  { %v2995_v29 = vpop.f32.mrf.mxu0  ;;  %v4592_v20 = vcombine.high %v90_v9, %v94_v38 }
 0x1ee   :  { %7066 = vst [vmem:[#allocation19_spill] sm:$0xff] %v6154_v54  ;;  %v2996_v49 = vadd.f32 %v6001_v10, %v2995_v29  ;;  %v3395_v27 = vpop.f32.mrf.mxu1  ;;  %v98_v29 = vld [vmem:[%s7046_s0 + $0x298] sm:$0xff] }
 0x1ef   :  { %v2997_v11 = vpop.f32.mrf.mxu0 }
 0x1f0   :  { %v6163_v50 = vadd.f32 %v3395_v27, %v2996_v49  ;;  %v3397_v24 = vpop.f32.mrf.mxu1  ;;  %v4589_v49 = vcombine.low %v89_v60, %v93_v8  ;;  %v4598_v11 = vcombine.high %v97_v0, %v101_v61  ;;  %v105_v60 = vld [vmem:[%s7046_s0 + $0x2d0] sm:$0xff] }
 0x1f1   :  { %v3000_v34 = vpop.f32.mrf.mxu0  ;;  %3623 = vmatmul.mubr.bf16.gmra.mxu0 %v4581_v14  ;;  %v109_v8 = vld [vmem:[%s7046_s0 + $0x2f0] sm:$0xff] }
 0x1f2   :  { %7067 = vst [vmem:[#allocation20_spill] sm:$0xff] %v6163_v50  ;;  %v3001_v39 = vadd.f32 %v6001_v10, %v3000_v34  ;;  %v3400_v54 = vpop.f32.mrf.mxu1  ;;  %4023 = vmatmul.mubr.bf16.gmra.mxu1 %v4583_v58  ;;  %3630 = vmatprep.mubr.bf16.mxu0 %v4590_v55  ;;  %v4591_v55 = vcombine.low %v90_v9, %v94_v38 }
 0x1f3   :  { %v3002_v17 = vpop.f32.mrf.mxu0  ;;  %4030 = vmatprep.mubr.bf16.mxu1 %v4592_v20 }
 0x1f4   :  { %v6172_v45 = vadd.f32 %v3400_v54, %v3001_v39  ;;  %v3402_v41 = vpop.f32.mrf.mxu1  ;;  %v102_v17 = vld [vmem:[%s7046_s0 + $0x2b8] sm:$0xff] }
 0x1f5   :  { %v3003_v14 = vpop.f32.mrf.mxu0  ;;  %v4600_v24 = vcombine.high %v98_v29, %v102_v17 }
 0x1f6   :  { %7068 = vst [vmem:[#allocation21_spill] sm:$0xff] %v6172_v45  ;;  %v3004_v27 = vadd.f32 %v6001_v10, %v3003_v14  ;;  %v3403_v58 = vpop.f32.mrf.mxu1  ;;  %v106_v14 = vld [vmem:[%s7046_s0 + $0x2d8] sm:$0xff] }
 0x1f7   :  { %v3005_v20 = vpop.f32.mrf.mxu0 }
 0x1f8   :  { %v6181_v54 = vadd.f32 %v3403_v58, %v3004_v27  ;;  %v3405_v34 = vpop.f32.mrf.mxu1  ;;  %v4597_v27 = vcombine.low %v97_v0, %v101_v61  ;;  %v4606_v20 = vcombine.high %v105_v60, %v109_v8  ;;  %v113_v0 = vld [vmem:[%s7046_s0 + $0x310] sm:$0xff] }
 0x1f9   :  { %v3008_v39 = vpop.f32.mrf.mxu0  ;;  %3631 = vmatmul.mubr.bf16.gmra.mxu0 %v4589_v49  ;;  %v117_v61 = vld [vmem:[%s7046_s0 + $0x330] sm:$0xff] }
 0x1fa   :  { %7069 = vst [vmem:[#allocation22_spill] sm:$0xff] %v6181_v54  ;;  %v3009_v41 = vadd.f32 %v6001_v10, %v3008_v39  ;;  %v3408_v45 = vpop.f32.mrf.mxu1  ;;  %4031 = vmatmul.mubr.bf16.gmra.mxu1 %v4591_v55  ;;  %3638 = vmatprep.mubr.bf16.mxu0 %v4598_v11  ;;  %v4599_v11 = vcombine.low %v98_v29, %v102_v17 }
 0x1fb   :  { %v3010_v50 = vpop.f32.mrf.mxu0  ;;  %4038 = vmatprep.mubr.bf16.mxu1 %v4600_v24 }
 0x1fc   :  { %v6190_v9 = vadd.f32 %v3408_v45, %v3009_v41  ;;  %v3410_v38 = vpop.f32.mrf.mxu1  ;;  %v110_v50 = vld [vmem:[%s7046_s0 + $0x2f8] sm:$0xff] }
 0x1fd   :  { %v3011_v49 = vpop.f32.mrf.mxu0  ;;  %v4608_v34 = vcombine.high %v106_v14, %v110_v50 }
 0x1fe   :  { %7070 = vst [vmem:[#allocation23_spill] sm:$0xff] %v6190_v9  ;;  %v3012_v58 = vadd.f32 %v6001_v10, %v3011_v49  ;;  %v3411_v55 = vpop.f32.mrf.mxu1  ;;  %v114_v49 = vld [vmem:[%s7046_s0 + $0x318] sm:$0xff] }
 0x1ff   :  { %v3013_v24 = vpop.f32.mrf.mxu0 }
 0x200   :  { %v6199_v45 = vadd.f32 %v3411_v55, %v3012_v58  ;;  %v3413_v39 = vpop.f32.mrf.mxu1  ;;  %v4605_v58 = vcombine.low %v105_v60, %v109_v8  ;;  %v4614_v24 = vcombine.high %v113_v0, %v117_v61  ;;  %v121_v60 = vld [vmem:[%s7046_s0 + $0x350] sm:$0xff] }
 0x201   :  { %v3016_v41 = vpop.f32.mrf.mxu0  ;;  %3639 = vmatmul.mubr.bf16.gmra.mxu0 %v4597_v27  ;;  %v125_v8 = vld [vmem:[%s7046_s0 + $0x370] sm:$0xff] }
 0x202   :  { %7071 = vst [vmem:[#allocation24_spill] sm:$0xff] %v6199_v45  ;;  %v3017_v38 = vadd.f32 %v6001_v10, %v3016_v41  ;;  %v3416_v9 = vpop.f32.mrf.mxu1  ;;  %4039 = vmatmul.mubr.bf16.gmra.mxu1 %v4599_v11  ;;  %3646 = vmatprep.mubr.bf16.mxu0 %v4606_v20  ;;  %v4607_v20 = vcombine.low %v106_v14, %v110_v50 }
 0x203   :  { %v3018_v54 = vpop.f32.mrf.mxu0  ;;  %4046 = vmatprep.mubr.bf16.mxu1 %v4608_v34 }
 0x204   :  { %v6208_v29 = vadd.f32 %v3416_v9, %v3017_v38  ;;  %v3418_v17 = vpop.f32.mrf.mxu1  ;;  %v118_v54 = vld [vmem:[%s7046_s0 + $0x338] sm:$0xff] }
 0x205   :  { %v3019_v27 = vpop.f32.mrf.mxu0  ;;  %v4616_v39 = vcombine.high %v114_v49, %v118_v54 }
 0x206   :  { %7072 = vst [vmem:[#allocation25_spill] sm:$0xff] %v6208_v29  ;;  %v3020_v55 = vadd.f32 %v6001_v10, %v3019_v27  ;;  %v3419_v11 = vpop.f32.mrf.mxu1  ;;  %v122_v27 = vld [vmem:[%s7046_s0 + $0x358] sm:$0xff] }
 0x207   :  { %v3021_v34 = vpop.f32.mrf.mxu0 }
 0x208   :  { %v6217_v9 = vadd.f32 %v3419_v11, %v3020_v55  ;;  %v3421_v41 = vpop.f32.mrf.mxu1  ;;  %v4613_v55 = vcombine.low %v113_v0, %v117_v61  ;;  %v4622_v34 = vcombine.high %v121_v60, %v125_v8  ;;  %v129_v0 = vld [vmem:[%s7046_s0 + $0x390] sm:$0xff] }
 0x209   :  { %v3024_v38 = vpop.f32.mrf.mxu0  ;;  %3647 = vmatmul.mubr.bf16.gmra.mxu0 %v4605_v58  ;;  %v133_v61 = vld [vmem:[%s7046_s0 + $0x3b0] sm:$0xff] }
 0x20a   :  { %7073 = vst [vmem:[#allocation26_spill] sm:$0xff] %v6217_v9  ;;  %v3025_v17 = vadd.f32 %v6001_v10, %v3024_v38  ;;  %v3424_v29 = vpop.f32.mrf.mxu1  ;;  %4047 = vmatmul.mubr.bf16.gmra.mxu1 %v4607_v20  ;;  %3654 = vmatprep.mubr.bf16.mxu0 %v4614_v24  ;;  %v4615_v24 = vcombine.low %v114_v49, %v118_v54 }
 0x20b   :  { %v3026_v45 = vpop.f32.mrf.mxu0  ;;  %4054 = vmatprep.mubr.bf16.mxu1 %v4616_v39 }
 0x20c   :  { %v6226_v14 = vadd.f32 %v3424_v29, %v3025_v17  ;;  %v3426_v50 = vpop.f32.mrf.mxu1  ;;  %v126_v45 = vld [vmem:[%s7046_s0 + $0x378] sm:$0xff] }
 0x20d   :  { %v3027_v58 = vpop.f32.mrf.mxu0  ;;  %v4624_v41 = vcombine.high %v122_v27, %v126_v45 }
 0x20e   :  { %7074 = vst [vmem:[#allocation27_spill] sm:$0xff] %v6226_v14  ;;  %v3028_v11 = vadd.f32 %v6001_v10, %v3027_v58  ;;  %v3427_v20 = vpop.f32.mrf.mxu1  ;;  %v130_v58 = vld [vmem:[%s7046_s0 + $0x398] sm:$0xff] }
 0x20f   :  { %v3029_v39 = vpop.f32.mrf.mxu0 }
 0x210   :  { %v6235_v29 = vadd.f32 %v3427_v20, %v3028_v11  ;;  %v3429_v38 = vpop.f32.mrf.mxu1  ;;  %v4621_v11 = vcombine.low %v121_v60, %v125_v8  ;;  %v4630_v39 = vcombine.high %v129_v0, %v133_v61  ;;  %v137_v60 = vld [vmem:[%s7046_s0 + $0x3d0] sm:$0xff] }
 0x211   :  { %v3032_v17 = vpop.f32.mrf.mxu0  ;;  %3655 = vmatmul.mubr.bf16.gmra.mxu0 %v4613_v55  ;;  %v141_v8 = vld [vmem:[%s7046_s0 + $0x3f0] sm:$0xff] }
 0x212   :  { %7075 = vst [vmem:[#allocation28_spill] sm:$0xff] %v6235_v29  ;;  %v3033_v50 = vadd.f32 %v6001_v10, %v3032_v17  ;;  %v3432_v14 = vpop.f32.mrf.mxu1  ;;  %4055 = vmatmul.mubr.bf16.gmra.mxu1 %v4615_v24  ;;  %3662 = vmatprep.mubr.bf16.mxu0 %v4622_v34  ;;  %v4623_v34 = vcombine.low %v122_v27, %v126_v45 }
 0x213   :  { %v3034_v9 = vpop.f32.mrf.mxu0  ;;  %4062 = vmatprep.mubr.bf16.mxu1 %v4624_v41 }
 0x214   :  { %v6244_v49 = vadd.f32 %v3432_v14, %v3033_v50  ;;  %v3434_v54 = vpop.f32.mrf.mxu1  ;;  %v134_v9 = vld [vmem:[%s7046_s0 + $0x3b8] sm:$0xff] }
 0x215   :  { %v3035_v55 = vpop.f32.mrf.mxu0  ;;  %v4632_v38 = vcombine.high %v130_v58, %v134_v9 }
 0x216   :  { %7076 = vst [vmem:[#allocation29_spill] sm:$0xff] %v6244_v49  ;;  %v3036_v20 = vadd.f32 %v6001_v10, %v3035_v55  ;;  %v3435_v24 = vpop.f32.mrf.mxu1  ;;  %v138_v55 = vld [vmem:[%s7046_s0 + $0x3d8] sm:$0xff] }
 0x217   :  { %v3037_v41 = vpop.f32.mrf.mxu0 }
 0x218   :  { %v6253_v14 = vadd.f32 %v3435_v24, %v3036_v20  ;;  %v3437_v17 = vpop.f32.mrf.mxu1  ;;  %v4629_v20 = vcombine.low %v129_v0, %v133_v61  ;;  %v4638_v41 = vcombine.high %v137_v60, %v141_v8  ;;  %v145_v0 = vld [vmem:[%s7046_s0 + $0x410] sm:$0xff] }
 0x219   :  { %v3040_v50 = vpop.f32.mrf.mxu0  ;;  %3663 = vmatmul.mubr.bf16.gmra.mxu0 %v4621_v11  ;;  %v149_v61 = vld [vmem:[%s7046_s0 + $0x430] sm:$0xff] }
 0x21a   :  { %7077 = vst [vmem:[#allocation30_spill] sm:$0xff] %v6253_v14  ;;  %v3041_v54 = vadd.f32 %v6001_v10, %v3040_v50  ;;  %v3440_v49 = vpop.f32.mrf.mxu1  ;;  %4063 = vmatmul.mubr.bf16.gmra.mxu1 %v4623_v34  ;;  %3670 = vmatprep.mubr.bf16.mxu0 %v4630_v39  ;;  %v4631_v39 = vcombine.low %v130_v58, %v134_v9 }
 0x21b   :  { %v3042_v29 = vpop.f32.mrf.mxu0  ;;  %4070 = vmatprep.mubr.bf16.mxu1 %v4632_v38 }
 0x21c   :  { %v6262_v27 = vadd.f32 %v3440_v49, %v3041_v54  ;;  %v3442_v45 = vpop.f32.mrf.mxu1  ;;  %v142_v29 = vld [vmem:[%s7046_s0 + $0x3f8] sm:$0xff] }
 0x21d   :  { %v3043_v11 = vpop.f32.mrf.mxu0  ;;  %v4640_v17 = vcombine.high %v138_v55, %v142_v29 }
 0x21e   :  { %7078 = vst [vmem:[#allocation31_spill] sm:$0xff] %v6262_v27  ;;  %v3044_v24 = vadd.f32 %v6001_v10, %v3043_v11  ;;  %v3443_v34 = vpop.f32.mrf.mxu1  ;;  %v146_v11 = vld [vmem:[%s7046_s0 + $0x418] sm:$0xff] }
 0x21f   :  { %v3045_v38 = vpop.f32.mrf.mxu0 }
 0x220   :  { %v6271_v49 = vadd.f32 %v3443_v34, %v3044_v24  ;;  %v3445_v50 = vpop.f32.mrf.mxu1  ;;  %v4637_v24 = vcombine.low %v137_v60, %v141_v8  ;;  %v4646_v38 = vcombine.high %v145_v0, %v149_v61  ;;  %v153_v60 = vld [vmem:[%s7046_s0 + $0x450] sm:$0xff] }
 0x221   :  { %v3048_v54 = vpop.f32.mrf.mxu0  ;;  %3671 = vmatmul.mubr.bf16.gmra.mxu0 %v4629_v20  ;;  %v157_v8 = vld [vmem:[%s7046_s0 + $0x470] sm:$0xff] }
 0x222   :  { %7079 = vst [vmem:[#allocation32_spill] sm:$0xff] %v6271_v49  ;;  %v3049_v45 = vadd.f32 %v6001_v10, %v3048_v54  ;;  %v3448_v27 = vpop.f32.mrf.mxu1  ;;  %4071 = vmatmul.mubr.bf16.gmra.mxu1 %v4631_v39  ;;  %3678 = vmatprep.mubr.bf16.mxu0 %v4638_v41  ;;  %v4639_v41 = vcombine.low %v138_v55, %v142_v29 }
 0x223   :  { %v3050_v14 = vpop.f32.mrf.mxu0  ;;  %4078 = vmatprep.mubr.bf16.mxu1 %v4640_v17 }
 0x224   :  { %v6280_v58 = vadd.f32 %v3448_v27, %v3049_v45  ;;  %v3450_v9 = vpop.f32.mrf.mxu1  ;;  %v150_v14 = vld [vmem:[%s7046_s0 + $0x438] sm:$0xff] }
 0x225   :  { %v3051_v20 = vpop.f32.mrf.mxu0  ;;  %v4648_v50 = vcombine.high %v146_v11, %v150_v14 }
 0x226   :  { %7080 = vst [vmem:[#allocation33_spill] sm:$0xff] %v6280_v58  ;;  %v3052_v34 = vadd.f32 %v6001_v10, %v3051_v20  ;;  %v3451_v39 = vpop.f32.mrf.mxu1  ;;  %v154_v20 = vld [vmem:[%s7046_s0 + $0x458] sm:$0xff] }
 0x227   :  { %v3053_v17 = vpop.f32.mrf.mxu0 }
 0x228   :  { %v6289_v27 = vadd.f32 %v3451_v39, %v3052_v34  ;;  %v3453_v54 = vpop.f32.mrf.mxu1  ;;  %v4645_v34 = vcombine.low %v145_v0, %v149_v61  ;;  %v4654_v17 = vcombine.high %v153_v60, %v157_v8  ;;  %v161_v0 = vld [vmem:[%s7046_s0 + $0x490] sm:$0xff] }
 0x229   :  { %v3056_v45 = vpop.f32.mrf.mxu0  ;;  %3679 = vmatmul.mubr.bf16.gmra.mxu0 %v4637_v24  ;;  %v165_v61 = vld [vmem:[%s7046_s0 + $0x4b0] sm:$0xff] }
 0x22a   :  { %7081 = vst [vmem:[#allocation34_spill] sm:$0xff] %v6289_v27  ;;  %v3057_v9 = vadd.f32 %v6001_v10, %v3056_v45  ;;  %v3456_v58 = vpop.f32.mrf.mxu1  ;;  %4079 = vmatmul.mubr.bf16.gmra.mxu1 %v4639_v41  ;;  %3686 = vmatprep.mubr.bf16.mxu0 %v4646_v38  ;;  %v4647_v38 = vcombine.low %v146_v11, %v150_v14 }
 0x22b   :  { %v3058_v49 = vpop.f32.mrf.mxu0  ;;  %4086 = vmatprep.mubr.bf16.mxu1 %v4648_v50 }
 0x22c   :  { %v6298_v55 = vadd.f32 %v3456_v58, %v3057_v9  ;;  %v3458_v29 = vpop.f32.mrf.mxu1  ;;  %v158_v49 = vld [vmem:[%s7046_s0 + $0x478] sm:$0xff] }
 0x22d   :  { %v3059_v24 = vpop.f32.mrf.mxu0  ;;  %v4656_v54 = vcombine.high %v154_v20, %v158_v49 }
 0x22e   :  { %7082 = vst [vmem:[#allocation35_spill] sm:$0xff] %v6298_v55  ;;  %v3060_v39 = vadd.f32 %v6001_v10, %v3059_v24  ;;  %v3459_v41 = vpop.f32.mrf.mxu1  ;;  %v162_v24 = vld [vmem:[%s7046_s0 + $0x498] sm:$0xff] }
 0x22f   :  { %v3061_v50 = vpop.f32.mrf.mxu0 }
 0x230   :  { %v6307_v58 = vadd.f32 %v3459_v41, %v3060_v39  ;;  %v3461_v45 = vpop.f32.mrf.mxu1  ;;  %v4653_v39 = vcombine.low %v153_v60, %v157_v8  ;;  %v4662_v50 = vcombine.high %v161_v0, %v165_v61  ;;  %v169_v60 = vld [vmem:[%s7046_s0 + $0x4d0] sm:$0xff] }
 0x231   :  { %v3064_v9 = vpop.f32.mrf.mxu0  ;;  %3687 = vmatmul.mubr.bf16.gmra.mxu0 %v4645_v34  ;;  %v173_v8 = vld [vmem:[%s7046_s0 + $0x4f0] sm:$0xff] }
 0x232   :  { %7083 = vst [vmem:[#allocation36_spill] sm:$0xff] %v6307_v58  ;;  %v3065_v29 = vadd.f32 %v6001_v10, %v3064_v9  ;;  %v3464_v55 = vpop.f32.mrf.mxu1  ;;  %4087 = vmatmul.mubr.bf16.gmra.mxu1 %v4647_v38  ;;  %3694 = vmatprep.mubr.bf16.mxu0 %v4654_v17  ;;  %v4655_v17 = vcombine.low %v154_v20, %v158_v49 }
 0x233   :  { %v3066_v27 = vpop.f32.mrf.mxu0  ;;  %4094 = vmatprep.mubr.bf16.mxu1 %v4656_v54 }
 0x234   :  { %v6316_v11 = vadd.f32 %v3464_v55, %v3065_v29  ;;  %v3466_v14 = vpop.f32.mrf.mxu1  ;;  %v166_v27 = vld [vmem:[%s7046_s0 + $0x4b8] sm:$0xff] }
 0x235   :  { %v3067_v34 = vpop.f32.mrf.mxu0  ;;  %v4664_v45 = vcombine.high %v162_v24, %v166_v27 }
 0x236   :  { %7084 = vst [vmem:[#allocation37_spill] sm:$0xff] %v6316_v11  ;;  %v3068_v41 = vadd.f32 %v6001_v10, %v3067_v34  ;;  %v3467_v38 = vpop.f32.mrf.mxu1  ;;  %v170_v34 = vld [vmem:[%s7046_s0 + $0x4d8] sm:$0xff] }
 0x237   :  { %v3069_v54 = vpop.f32.mrf.mxu0 }
 0x238   :  { %v6325_v55 = vadd.f32 %v3467_v38, %v3068_v41  ;;  %v3469_v9 = vpop.f32.mrf.mxu1  ;;  %v4661_v41 = vcombine.low %v161_v0, %v165_v61  ;;  %v4670_v54 = vcombine.high %v169_v60, %v173_v8  ;;  %v177_v0 = vld [vmem:[%s7046_s0 + $0x510] sm:$0xff] }
 0x239   :  { %v3072_v29 = vpop.f32.mrf.mxu0  ;;  %3695 = vmatmul.mubr.bf16.gmra.mxu0 %v4653_v39  ;;  %v181_v61 = vld [vmem:[%s7046_s0 + $0x530] sm:$0xff] }
 0x23a   :  { %7085 = vst [vmem:[#allocation38_spill] sm:$0xff] %v6325_v55  ;;  %v3073_v14 = vadd.f32 %v6001_v10, %v3072_v29  ;;  %v3472_v11 = vpop.f32.mrf.mxu1  ;;  %4095 = vmatmul.mubr.bf16.gmra.mxu1 %v4655_v17  ;;  %3702 = vmatprep.mubr.bf16.mxu0 %v4662_v50  ;;  %v4663_v50 = vcombine.low %v162_v24, %v166_v27 }
 0x23b   :  { %v3074_v58 = vpop.f32.mrf.mxu0  ;;  %4102 = vmatprep.mubr.bf16.mxu1 %v4664_v45 }
 0x23c   :  { %v6334_v20 = vadd.f32 %v3472_v11, %v3073_v14  ;;  %v3474_v49 = vpop.f32.mrf.mxu1  ;;  %v174_v58 = vld [vmem:[%s7046_s0 + $0x4f8] sm:$0xff] }
 0x23d   :  { %v3075_v39 = vpop.f32.mrf.mxu0  ;;  %v4672_v9 = vcombine.high %v170_v34, %v174_v58 }
 0x23e   :  { %7086 = vst [vmem:[#allocation39_spill] sm:$0xff] %v6334_v20  ;;  %v3076_v38 = vadd.f32 %v6001_v10, %v3075_v39  ;;  %v3475_v17 = vpop.f32.mrf.mxu1  ;;  %v178_v39 = vld [vmem:[%s7046_s0 + $0x518] sm:$0xff] }
 0x23f   :  { %v3077_v45 = vpop.f32.mrf.mxu0 }
 0x240   :  { %v6343_v11 = vadd.f32 %v3475_v17, %v3076_v38  ;;  %v3477_v29 = vpop.f32.mrf.mxu1  ;;  %v4669_v38 = vcombine.low %v169_v60, %v173_v8  ;;  %v4678_v45 = vcombine.high %v177_v0, %v181_v61  ;;  %v185_v60 = vld [vmem:[%s7046_s0 + $0x550] sm:$0xff] }
 0x241   :  { %v3080_v14 = vpop.f32.mrf.mxu0  ;;  %3703 = vmatmul.mubr.bf16.gmra.mxu0 %v4661_v41  ;;  %v189_v8 = vld [vmem:[%s7046_s0 + $0x570] sm:$0xff] }
 0x242   :  { %7087 = vst [vmem:[#allocation40_spill] sm:$0xff] %v6343_v11  ;;  %v3081_v49 = vadd.f32 %v6001_v10, %v3080_v14  ;;  %v3480_v20 = vpop.f32.mrf.mxu1  ;;  %4103 = vmatmul.mubr.bf16.gmra.mxu1 %v4663_v50  ;;  %3710 = vmatprep.mubr.bf16.mxu0 %v4670_v54  ;;  %v4671_v54 = vcombine.low %v170_v34, %v174_v58 }
 0x243   :  { %v3082_v55 = vpop.f32.mrf.mxu0  ;;  %4110 = vmatprep.mubr.bf16.mxu1 %v4672_v9 }
 0x244   :  { %v6352_v24 = vadd.f32 %v3480_v20, %v3081_v49  ;;  %v3482_v27 = vpop.f32.mrf.mxu1  ;;  %v182_v55 = vld [vmem:[%s7046_s0 + $0x538] sm:$0xff] }
 0x245   :  { %v3083_v41 = vpop.f32.mrf.mxu0  ;;  %v4680_v29 = vcombine.high %v178_v39, %v182_v55 }
 0x246   :  { %7088 = vst [vmem:[#allocation41_spill] sm:$0xff] %v6352_v24  ;;  %v3084_v17 = vadd.f32 %v6001_v10, %v3083_v41  ;;  %v3483_v50 = vpop.f32.mrf.mxu1  ;;  %v186_v41 = vld [vmem:[%s7046_s0 + $0x558] sm:$0xff] }
 0x247   :  { %v3085_v9 = vpop.f32.mrf.mxu0 }
 0x248   :  { %v6361_v20 = vadd.f32 %v3483_v50, %v3084_v17  ;;  %v3485_v14 = vpop.f32.mrf.mxu1  ;;  %v4677_v17 = vcombine.low %v177_v0, %v181_v61  ;;  %v4686_v9 = vcombine.high %v185_v60, %v189_v8  ;;  %v193_v0 = vld [vmem:[%s7046_s0 + $0x590] sm:$0xff] }
 0x249   :  { %v3088_v49 = vpop.f32.mrf.mxu0  ;;  %3711 = vmatmul.mubr.bf16.gmra.mxu0 %v4669_v38  ;;  %v197_v61 = vld [vmem:[%s7046_s0 + $0x5b0] sm:$0xff] }
 0x24a   :  { %7089 = vst [vmem:[#allocation42_spill] sm:$0xff] %v6361_v20  ;;  %v3089_v27 = vadd.f32 %v6001_v10, %v3088_v49  ;;  %v3488_v24 = vpop.f32.mrf.mxu1  ;;  %4111 = vmatmul.mubr.bf16.gmra.mxu1 %v4671_v54  ;;  %3718 = vmatprep.mubr.bf16.mxu0 %v4678_v45  ;;  %v4679_v45 = vcombine.low %v178_v39, %v182_v55 }
 0x24b   :  { %v3090_v11 = vpop.f32.mrf.mxu0  ;;  %4118 = vmatprep.mubr.bf16.mxu1 %v4680_v29 }
 0x24c   :  { %v6370_v34 = vadd.f32 %v3488_v24, %v3089_v27  ;;  %v3490_v58 = vpop.f32.mrf.mxu1  ;;  %v190_v11 = vld [vmem:[%s7046_s0 + $0x578] sm:$0xff] }
 0x24d   :  { %v3091_v38 = vpop.f32.mrf.mxu0  ;;  %v4688_v14 = vcombine.high %v186_v41, %v190_v11 }
 0x24e   :  { %7090 = vst [vmem:[#allocation43_spill] sm:$0xff] %v6370_v34  ;;  %v3092_v50 = vadd.f32 %v6001_v10, %v3091_v38  ;;  %v3491_v54 = vpop.f32.mrf.mxu1 }
 0x24f   :  { %v3093_v29 = vpop.f32.mrf.mxu0 }
 0x250   :  { %v6379_v24 = vadd.f32 %v3491_v54, %v3092_v50  ;;  %v3493_v49 = vpop.f32.mrf.mxu1  ;;  %v5019_v50 = vld [vmem:[%s7047_s2] ss:$0 sm:$0xff] }
 0x251   :  { %v3096_v27 = vpop.f32.mrf.mxu0  ;;  %3719 = vmatmul.mubr.bf16.gmra.mxu0 %v4677_v17  ;;  %v4685_v17 = vcombine.low %v185_v60, %v189_v8  ;;  %v201_v8 = vld [vmem:[%s7046_s0 + $0x5d0] sm:$0xff] }
 0x252   :  { %7091 = vst [vmem:[#allocation44_spill] sm:$0xff] %v6379_v24  ;;  %v3097_v58 = vadd.f32 %v6001_v10, %v3096_v27  ;;  %v3496_v34 = vpop.f32.mrf.mxu1  ;;  %4119 = vmatmul.mubr.bf16.gmra.mxu1 %v4679_v45  ;;  %3726 = vmatprep.mubr.bf16.mxu0 %v4686_v9  ;;  %v194_v10 = vld [vmem:[%s7046_s0 + $0x598] sm:$0xff]  ;;  %v4687_v9 = vcombine.low %v186_v41, %v190_v11  ;;  %v205_v41 = vld [vmem:[%s7046_s0 + $0x5f0] sm:$0xff] }
 0x253   :  { %v3098_v20 = vpop.f32.mrf.mxu0  ;;  %4126 = vmatprep.mubr.bf16.mxu1 %v4688_v14 }
 0x254   :  { %v6388_v39 = vadd.f32 %v3496_v34, %v3097_v58  ;;  %v3498_v55 = vpop.f32.mrf.mxu1  ;;  %v198_v20 = vld [vmem:[%s7046_s0 + $0x5b8] sm:$0xff]  ;;  %v4694_v34 = vcombine.high %v193_v0, %v197_v61 }
 0x255   :  { %v3099_v38 = vpop.f32.mrf.mxu0  ;;  %v4696_v14 = vcombine.high %v194_v10, %v198_v20 }
 0x256   :  { %7092 = vst [vmem:[#allocation45_spill] sm:$0xff] %v6388_v39  ;;  %v3100_v54 = vadd.f32 %v5019_v50, %v3099_v38  ;;  %v3499_v45 = vpop.f32.mrf.mxu1 }
 0x257   :  { %v3101_v29 = vpop.f32.mrf.mxu0 }
 0x258   :  { %v6399_v49 = vadd.f32 %v3499_v45, %v3100_v54  ;;  %v3501_v27 = vpop.f32.mrf.mxu1  ;;  %v206_v54 = vld [vmem:[%s7046_s0 + $0x5f8] sm:$0xff] }
 0x259   :  { %v3104_v58 = vpop.f32.mrf.mxu0  ;;  %3727 = vmatmul.mubr.bf16.gmra.mxu0 %v4685_v17  ;;  %v202_v17 = vld [vmem:[%s7046_s0 + $0x5d8] sm:$0xff]  ;;  %v4702_v27 = vcombine.high %v201_v8, %v205_v41 }
 0x25a   :  { %7093 = vst [vmem:[#allocation46_spill] sm:$0xff] %v6399_v49  ;;  %v3105_v55 = vadd.f32 %v5019_v50, %v3104_v58  ;;  %v3504_v39 = vpop.f32.mrf.mxu1  ;;  %4127 = vmatmul.mubr.bf16.gmra.mxu1 %v4687_v9  ;;  %3734 = vmatprep.mubr.bf16.mxu0 %v4694_v34  ;;  %v4693_v9 = vcombine.low %v193_v0, %v197_v61  ;;  %v209_v0 = vld [vmem:[%s7046_s0 + $0x610] sm:$0xff] }
 0x25b   :  { %v3106_v60 = vpop.f32.mrf.mxu0  ;;  %4134 = vmatprep.mubr.bf16.mxu1 %v4696_v14  ;;  %v4695_v14 = vcombine.low %v194_v10, %v198_v20  ;;  %v213_v61 = vld [vmem:[%s7046_s0 + $0x630] sm:$0xff] }
 0x25c   :  { %v6407_v11 = vadd.f32 %v3504_v39, %v3105_v55  ;;  %v3506_v38 = vpop.f32.mrf.mxu1  ;;  %v4704_v60 = vcombine.high %v202_v17, %v206_v54 }
 0x25d   :  { %v3107_v45 = vpop.f32.mrf.mxu0 }
 0x25e   :  { %7094 = vst [vmem:[#allocation47_spill] sm:$0xff] %v6407_v11  ;;  %v3108_v34 = vadd.f32 %v5019_v50, %v3107_v45  ;;  %v3507_v29 = vpop.f32.mrf.mxu1  ;;  %v210_v45 = vld [vmem:[%s7046_s0 + $0x618] sm:$0xff] }
 0x25f   :  { %v3109_v58 = vpop.f32.mrf.mxu0 }
 0x260   :  { %v6415_v49 = vadd.f32 %v3507_v29, %v3108_v34  ;;  %v3509_v39 = vpop.f32.mrf.mxu1  ;;  %v4701_v34 = vcombine.low %v201_v8, %v205_v41  ;;  %v4710_v58 = vcombine.high %v209_v0, %v213_v61  ;;  %v217_v8 = vld [vmem:[%s7046_s0 + $0x650] sm:$0xff] }
 0x261   :  { %v3112_v55 = vpop.f32.mrf.mxu0  ;;  %3735 = vmatmul.mubr.bf16.gmra.mxu0 %v4693_v9  ;;  %v221_v41 = vld [vmem:[%s7046_s0 + $0x670] sm:$0xff] }
 0x262   :  { %7095 = vst [vmem:[#allocation48_spill] sm:$0xff] %v6415_v49  ;;  %v3113_v38 = vadd.f32 %v5019_v50, %v3112_v55  ;;  %v3512_v11 = vpop.f32.mrf.mxu1  ;;  %4135 = vmatmul.mubr.bf16.gmra.mxu1 %v4695_v14  ;;  %3742 = vmatprep.mubr.bf16.mxu0 %v4702_v27  ;;  %v4703_v27 = vcombine.low %v202_v17, %v206_v54 }
 0x263   :  { %v3114_v24 = vpop.f32.mrf.mxu0  ;;  %4142 = vmatprep.mubr.bf16.mxu1 %v4704_v60 }
 0x264   :  { %v6423_v10 = vadd.f32 %v3512_v11, %v3113_v38  ;;  %v3514_v20 = vpop.f32.mrf.mxu1  ;;  %v214_v24 = vld [vmem:[%s7046_s0 + $0x638] sm:$0xff] }
 0x265   :  { %v3115_v9 = vpop.f32.mrf.mxu0  ;;  %v4712_v39 = vcombine.high %v210_v45, %v214_v24 }
 0x266   :  { %7096 = vst [vmem:[#allocation49_spill] sm:$0xff] %v6423_v10  ;;  %v3116_v29 = vadd.f32 %v5019_v50, %v3115_v9  ;;  %v3515_v14 = vpop.f32.mrf.mxu1 }
 0x267   :  { %v3117_v60 = vpop.f32.mrf.mxu0 }
 0x268   :  { %v6431_v55 = vadd.f32 %v3515_v14, %v3116_v29  ;;  %v3517_v11 = vpop.f32.mrf.mxu1  ;;  %v4711_v14 = vcombine.low %v210_v45, %v214_v24  ;;  %v226_v24 = vld [vmem:[%s7046_s0 + $0x698] sm:$0xff] }
 0x269   :  { %v3120_v38 = vpop.f32.mrf.mxu0  ;;  %3743 = vmatmul.mubr.bf16.gmra.mxu0 %v4701_v34  ;;  %v4709_v34 = vcombine.low %v209_v0, %v213_v61  ;;  %v229_v0 = vld [vmem:[%s7046_s0 + $0x6b0] sm:$0xff] }
 0x26a   :  { %v3121_v20 = vadd.f32 %v5019_v50, %v3120_v38  ;;  %v3520_v10 = vpop.f32.mrf.mxu1  ;;  %4143 = vmatmul.mubr.bf16.gmra.mxu1 %v4703_v27  ;;  %3750 = vmatprep.mubr.bf16.mxu0 %v4710_v58  ;;  %v218_v50 = vld [vmem:[%s7046_s0 + $0x658] sm:$0xff]  ;;  %v4718_v27 = vcombine.high %v217_v8, %v221_v41 }
 0x26b   :  { %v3122_v49 = vpop.f32.mrf.mxu0  ;;  %4150 = vmatprep.mubr.bf16.mxu1 %v4712_v39 }
 0x26c   :  { %v6439_v17 = vadd.f32 %v3520_v10, %v3121_v20  ;;  %v3522_v54 = vpop.f32.mrf.mxu1  ;;  %v222_v49 = vld [vmem:[%s7046_s0 + $0x678] sm:$0xff] }
 0x26d   :  { %v3123_v9 = vpop.f32.mrf.mxu0  ;;  %v4720_v60 = vcombine.high %v218_v50, %v222_v49  ;;  %v225_v54 = vld [vmem:[%s7046_s0 + $0x690] sm:$0xff] }
 0x26e   :  { %7097 = vst [vmem:[#allocation50_spill] sm:$0xff] %v6439_v17  ;;  %v3523_v29 = vpop.f32.mrf.mxu1 }
 0x26f   :  { %v3124_v58 = vpop.f32.mrf.mxu0 }
 0x270   :  { %v3524_v39 = vpop.f32.mrf.mxu1  ;;  %v4719_v58 = vcombine.low %v218_v50, %v222_v49  ;;  %v237_v50 = vld [vmem:[%s7046_s0 + $0x6f0] sm:$0xff] }
 0x271   :  { %v3560_v11 = vpop.f32.mrf.mxu0  ;;  %3751 = vmatmul.mubr.bf16.gmra.mxu0 %v4709_v34  ;;  %v4717_v34 = vcombine.low %v217_v8, %v221_v41  ;;  %v233_v41 = vld [vmem:[%s7046_s0 + $0x6d0] sm:$0xff] }
 0x272   :  { %v3561_v10 = vadd.f32 %v3560_v11, %v5619_v22  ;;  %v3960_v38 = vpop.f32.mrf.mxu1  ;;  %4151 = vmatmul.mubr.bf16.gmra.mxu1 %v4711_v14  ;;  %3758 = vmatprep.mubr.bf16.mxu0 %v4718_v27  ;;  %v230_v22 = vld [vmem:[%s7046_s0 + $0x6b8] sm:$0xff] }
 0x273   :  { %v3562_v20 = vpop.f32.mrf.mxu0  ;;  %4158 = vmatprep.mubr.bf16.mxu1 %v4720_v60  ;;  %v4726_v60 = vcombine.high %v225_v54, %v229_v0  ;;  %v4728_v11 = vcombine.high %v226_v24, %v230_v22 }
 0x274   :  { %v3961_v61 = vadd.f32 %v3960_v38, %v3561_v10  ;;  %v3962_v45 = vpop.f32.mrf.mxu1 }
 0x275   :  { %v3563_v9 = vpop.f32.mrf.mxu0 }
 0x276   :  { %v4326_v29 = vmax.f32 %v3961_v61, 0.0  ;;  %v3564_v14 = vadd.f32 %v3563_v9, %v5632_v35  ;;  %v3963_v27 = vpop.f32.mrf.mxu1  ;;  %v238_v9 = vld [vmem:[%s7046_s0 + $0x6f8] sm:$0xff] }
 0x277   :  { %v3565_v39 = vpop.f32.mrf.mxu0 }
 0x278   :  { %4417 = vst [vmem:[%s7048_s3] sm:$0xff] %v4326_v29  ;;  %v3964_v10 = vadd.f32 %v3963_v27, %v3564_v14  ;;  %v3965_v38 = vpop.f32.mrf.mxu1  ;;  %v4725_v29 = vcombine.low %v225_v54, %v229_v0  ;;  %v4734_v39 = vcombine.high %v233_v41, %v237_v50  ;;  %v241_v0 = vld [vmem:[%s7046_s0 + $0x710] sm:$0xff] }
 0x279   :  { %v3568_v20 = vpop.f32.mrf.mxu0  ;;  %3759 = vmatmul.mubr.bf16.gmra.mxu0 %v4717_v34 }
 0x27a   :  { %v4327_v45 = vmax.f32 %v3964_v10, 0.0  ;;  %v3569_v17 = vadd.f32 %v3568_v20, %v5644_v44  ;;  %v3968_v8 = vpop.f32.mrf.mxu1  ;;  %4159 = vmatmul.mubr.bf16.gmra.mxu1 %v4719_v58  ;;  %3766 = vmatprep.mubr.bf16.mxu0 %v4726_v60  ;;  %v234_v44 = vld [vmem:[%s7046_s0 + $0x6d8] sm:$0xff]  ;;  %v4727_v60 = vcombine.low %v226_v24, %v230_v22  ;;  %v245_v24 = vld [vmem:[%s7046_s0 + $0x730] sm:$0xff] }
 0x27b   :  { %v3570_v35 = vpop.f32.mrf.mxu0  ;;  %4166 = vmatprep.mubr.bf16.mxu1 %v4728_v11  ;;  %v4736_v10 = vcombine.high %v234_v44, %v238_v9 }
 0x27c   :  { %4418 = vst [vmem:[%s7048_s3 + $0x8] sm:$0xff] %v4327_v45  ;;  %v3969_v49 = vadd.f32 %v3968_v8, %v3569_v17  ;;  %v3970_v61 = vpop.f32.mrf.mxu1 }
 0x27d   :  { %v3571_v34 = vpop.f32.mrf.mxu0 }
 0x27e   :  { %v4328_v14 = vmax.f32 %v3969_v49, 0.0  ;;  %v3572_v27 = vadd.f32 %v3571_v34, %v5654_v56  ;;  %v3971_v58 = vpop.f32.mrf.mxu1  ;;  %v246_v49 = vld [vmem:[%s7046_s0 + $0x738] sm:$0xff]  ;;  %v4733_v34 = vcombine.low %v233_v41, %v237_v50  ;;  %v249_v50 = vld [vmem:[%s7046_s0 + $0x750] sm:$0xff] }
 0x27f   :  { %v3573_v11 = vpop.f32.mrf.mxu0 }
 0x280   :  { %4419 = vst [vmem:[%s7048_s3 + $0x10] sm:$0xff] %v4328_v14  ;;  %v3972_v17 = vadd.f32 %v3971_v58, %v3572_v27  ;;  %v3973_v38 = vpop.f32.mrf.mxu1  ;;  %v4735_v58 = vcombine.low %v234_v44, %v238_v9  ;;  %v253_v44 = vld [vmem:[%s7046_s0 + $0x770] sm:$0xff] }
 0x281   :  { %v3576_v20 = vpop.f32.mrf.mxu0  ;;  %3767 = vmatmul.mubr.bf16.gmra.mxu0 %v4725_v29 }
 0x282   :  { %v4329_v45 = vmax.f32 %v3972_v17, 0.0  ;;  %v3577_v8 = vadd.f32 %v3576_v20, %v5663_v63  ;;  %v3976_v54 = vpop.f32.mrf.mxu1  ;;  %4167 = vmatmul.mubr.bf16.gmra.mxu1 %v4727_v60  ;;  %3774 = vmatprep.mubr.bf16.mxu0 %v4734_v39  ;;  %v242_v63 = vld [vmem:[%s7046_s0 + $0x718] sm:$0xff]  ;;  %v4742_v60 = vcombine.high %v241_v0, %v245_v24 }
 0x283   :  { %v3578_v56 = vpop.f32.mrf.mxu0  ;;  %4174 = vmatprep.mubr.bf16.mxu1 %v4736_v10  ;;  %v4744_v11 = vcombine.high %v242_v63, %v246_v49 }
 0x284   :  { %4420 = vst [vmem:[%s7048_s3 + $0x18] sm:$0xff] %v4329_v45  ;;  %v3977_v22 = vadd.f32 %v3976_v54, %v3577_v8  ;;  %v3978_v35 = vpop.f32.mrf.mxu1  ;;  %v254_v54 = vld [vmem:[%s7046_s0 + $0x778] sm:$0xff] }
 0x285   :  { %v3579_v61 = vpop.f32.mrf.mxu0 }
 0x286   :  { %v4330_v29 = vmax.f32 %v3977_v22, 0.0  ;;  %v3580_v14 = vadd.f32 %v3579_v61, %v5672_v12  ;;  %v3979_v27 = vpop.f32.mrf.mxu1  ;;  %v4741_v22 = vcombine.low %v241_v0, %v245_v24  ;;  %v257_v24 = vld [vmem:[%s7046_s0 + $0x790] sm:$0xff] }
 0x287   :  { %v3581_v39 = vpop.f32.mrf.mxu0 }
 0x288   :  { %4421 = vst [vmem:[%s7048_s3 + $0x20] sm:$0xff] %v4330_v29  ;;  %v3980_v10 = vadd.f32 %v3979_v27, %v3580_v14  ;;  %v3981_v17 = vpop.f32.mrf.mxu1  ;;  %v4743_v29 = vcombine.low %v242_v63, %v246_v49  ;;  %v4750_v14 = vcombine.high %v249_v50, %v253_v44  ;;  %v261_v63 = vld [vmem:[%s7046_s0 + $0x7b0] sm:$0xff] }
 0x289   :  { %v3584_v38 = vpop.f32.mrf.mxu0  ;;  %3775 = vmatmul.mubr.bf16.gmra.mxu0 %v4733_v34 }
 0x28a   :  { %v4331_v20 = vmax.f32 %v3980_v10, 0.0  ;;  %v3585_v45 = vadd.f32 %v3584_v38, %v5684_v23  ;;  %v3984_v41 = vpop.f32.mrf.mxu1  ;;  %4175 = vmatmul.mubr.bf16.gmra.mxu1 %v4735_v58  ;;  %3782 = vmatprep.mubr.bf16.mxu0 %v4742_v60  ;;  %v250_v23 = vld [vmem:[%s7046_s0 + $0x758] sm:$0xff] }
 0x28b   :  { %v3586_v12 = vpop.f32.mrf.mxu0  ;;  %4182 = vmatprep.mubr.bf16.mxu1 %v4744_v11  ;;  %v4752_v58 = vcombine.high %v250_v23, %v254_v54 }
 0x28c   :  { %4422 = vst [vmem:[%s7048_s3 + $0x28] sm:$0xff] %v4331_v20  ;;  %v3985_v9 = vadd.f32 %v3984_v41, %v3585_v45  ;;  %v3986_v8 = vpop.f32.mrf.mxu1  ;;  %v262_v20 = vld [vmem:[%s7046_s0 + $0x7b8] sm:$0xff]  ;;  %v4749_v41 = vcombine.low %v249_v50, %v253_v44  ;;  %v265_v44 = vld [vmem:[%s7046_s0 + $0x7d0] sm:$0xff] }
 0x28d   :  { %v3587_v56 = vpop.f32.mrf.mxu0 }
 0x28e   :  { %v4332_v35 = vmax.f32 %v3985_v9, 0.0  ;;  %v3588_v61 = vadd.f32 %v3587_v56, %v5696_v37  ;;  %v3987_v34 = vpop.f32.mrf.mxu1  ;;  %v4751_v56 = vcombine.low %v250_v23, %v254_v54  ;;  %v269_v23 = vld [vmem:[%s7046_s0 + $0x7f0] sm:$0xff] }
 0x28f   :  { %v3589_v27 = vpop.f32.mrf.mxu0 }
 0x290   :  { %4423 = vst [vmem:[%s7048_s3 + $0x30] sm:$0xff] %v4332_v35  ;;  %v3988_v60 = vadd.f32 %v3987_v34, %v3588_v61  ;;  %v3989_v39 = vpop.f32.mrf.mxu1 }
 0x291   :  { %v3592_v11 = vpop.f32.mrf.mxu0  ;;  %3783 = vmatmul.mubr.bf16.gmra.mxu0 %v4741_v22  ;;  %v4758_v22 = vcombine.high %v257_v24, %v261_v63  ;;  %v270_v39 = vld [vmem:[%s7046_s0 + $0x7f8] sm:$0xff] }
 0x292   :  { %v4333_v10 = vmax.f32 %v3988_v60, 0.0  ;;  %v3593_v17 = vadd.f32 %v3592_v11, %v5705_v46  ;;  %v3992_v0 = vpop.f32.mrf.mxu1  ;;  %4183 = vmatmul.mubr.bf16.gmra.mxu1 %v4743_v29  ;;  %3790 = vmatprep.mubr.bf16.mxu0 %v4750_v14  ;;  %v258_v46 = vld [vmem:[%s7046_s0 + $0x798] sm:$0xff] }
 0x293   :  { %v3594_v37 = vpop.f32.mrf.mxu0  ;;  %4190 = vmatprep.mubr.bf16.mxu1 %v4752_v58  ;;  %v4760_v61 = vcombine.high %v258_v46, %v262_v20 }
 0x294   :  { %4424 = vst [vmem:[%s7048_s3 + $0x38] sm:$0xff] %v4333_v10  ;;  %v3993_v49 = vadd.f32 %v3992_v0, %v3593_v17  ;;  %v3994_v38 = vpop.f32.mrf.mxu1  ;;  %v4757_v10 = vcombine.low %v257_v24, %v261_v63  ;;  %v273_v63 = vld [vmem:[%s7046_s0 + $0x810] sm:$0xff] }
 0x295   :  { %v3595_v45 = vpop.f32.mrf.mxu0  ;;  %v4766_v38 = vcombine.high %v265_v44, %v269_v23 }
 0x296   :  { %v4334_v12 = vmax.f32 %v3993_v49, 0.0  ;;  %v3596_v9 = vadd.f32 %v3595_v45, %v5714_v59  ;;  %v3995_v8 = vpop.f32.mrf.mxu1  ;;  %v4759_v49 = vcombine.low %v258_v46, %v262_v20  ;;  %v277_v46 = vld [vmem:[%s7046_s0 + $0x830] sm:$0xff] }
 0x297   :  { %v3597_v35 = vpop.f32.mrf.mxu0 }
 0x298   :  { %4425 = vst [vmem:[%s7048_s3 + $0x40] sm:$0xff] %v4334_v12  ;;  %v3996_v34 = vadd.f32 %v3995_v8, %v3596_v9  ;;  %v3997_v29 = vpop.f32.mrf.mxu1 }
 0x299   :  { %v3600_v14 = vpop.f32.mrf.mxu0  ;;  %3791 = vmatmul.mubr.bf16.gmra.mxu0 %v4749_v41  ;;  %v4765_v29 = vcombine.low %v265_v44, %v269_v23  ;;  %v281_v23 = vld [vmem:[%s7046_s0 + $0x850] sm:$0xff] }
 0x29a   :  { %v4335_v27 = vmax.f32 %v3996_v34, 0.0  ;;  %v3601_v58 = vadd.f32 %v3600_v14, %v5723_v4  ;;  %v4000_v50 = vpop.f32.mrf.mxu1  ;;  %4191 = vmatmul.mubr.bf16.gmra.mxu1 %v4751_v56  ;;  %3798 = vmatprep.mubr.bf16.mxu0 %v4758_v22  ;;  %v266_v4 = vld [vmem:[%s7046_s0 + $0x7d8] sm:$0xff] }
 0x29b   :  { %v3602_v59 = vpop.f32.mrf.mxu0  ;;  %4198 = vmatprep.mubr.bf16.mxu1 %v4760_v61  ;;  %v4768_v41 = vcombine.high %v266_v4, %v270_v39  ;;  %v278_v61 = vld [vmem:[%s7046_s0 + $0x838] sm:$0xff] }
 0x29c   :  { %4426 = vst [vmem:[%s7048_s3 + $0x48] sm:$0xff] %v4335_v27  ;;  %v4001_v54 = vadd.f32 %v4000_v50, %v3601_v58  ;;  %v4002_v60 = vpop.f32.mrf.mxu1  ;;  %v4767_v50 = vcombine.low %v266_v4, %v270_v39  ;;  %v4774_v59 = vcombine.high %v273_v63, %v277_v46  ;;  %v285_v4 = vld [vmem:[%s7046_s0 + $0x870] sm:$0xff] }
 0x29d   :  { %v3603_v11 = vpop.f32.mrf.mxu0 }
 0x29e   :  { %v4336_v17 = vmax.f32 %v4001_v54, 0.0  ;;  %v3604_v0 = vadd.f32 %v3603_v11, %v5732_v18  ;;  %v4003_v37 = vpop.f32.mrf.mxu1 }
 0x29f   :  { %v3605_v45 = vpop.f32.mrf.mxu0 }
 0x2a0   :  { %4427 = vst [vmem:[%s7048_s3 + $0x50] sm:$0xff] %v4336_v17  ;;  %v4004_v12 = vadd.f32 %v4003_v37, %v3604_v0  ;;  %v4005_v9 = vpop.f32.mrf.mxu1 }
 0x2a1   :  { %v3608_v8 = vpop.f32.mrf.mxu0  ;;  %3799 = vmatmul.mubr.bf16.gmra.mxu0 %v4757_v10 }
 0x2a2   :  { %v4337_v56 = vmax.f32 %v4004_v12, 0.0  ;;  %v3609_v22 = vadd.f32 %v3608_v8, %v5741_v28  ;;  %v4008_v24 = vpop.f32.mrf.mxu1  ;;  %4199 = vmatmul.mubr.bf16.gmra.mxu1 %v4759_v49  ;;  %3806 = vmatprep.mubr.bf16.mxu0 %v4766_v38  ;;  %v274_v28 = vld [vmem:[%s7046_s0 + $0x818] sm:$0xff] }
 0x2a3   :  { %v3610_v18 = vpop.f32.mrf.mxu0  ;;  %4206 = vmatprep.mubr.bf16.mxu1 %v4768_v41  ;;  %v4776_v60 = vcombine.high %v274_v28, %v278_v61  ;;  %v286_v38 = vld [vmem:[%s7046_s0 + $0x878] sm:$0xff]  ;;  %v4773_v41 = vcombine.low %v273_v63, %v277_v46  ;;  %v289_v46 = vld [vmem:[%s7046_s0 + $0x890] sm:$0xff] }
 0x2a4   :  { %4428 = vst [vmem:[%s7048_s3 + $0x58] sm:$0xff] %v4337_v56  ;;  %v4009_v20 = vadd.f32 %v4008_v24, %v3609_v22  ;;  %v4010_v35 = vpop.f32.mrf.mxu1  ;;  %v4775_v56 = vcombine.low %v274_v28, %v278_v61  ;;  %v4782_v22 = vcombine.high %v281_v23, %v285_v4  ;;  %v293_v28 = vld [vmem:[%s7046_s0 + $0x8b0] sm:$0xff] }
 0x2a5   :  { %v3611_v34 = vpop.f32.mrf.mxu0 }
 0x2a6   :  { %v4338_v14 = vmax.f32 %v4009_v20, 0.0  ;;  %v3612_v27 = vadd.f32 %v3611_v34, %v5750_v42  ;;  %v4011_v58 = vpop.f32.mrf.mxu1 }
 0x2a7   :  { %v3613_v54 = vpop.f32.mrf.mxu0 }
 0x2a8   :  { %4429 = vst [vmem:[%s7048_s3 + $0x60] sm:$0xff] %v4338_v14  ;;  %v4012_v11 = vadd.f32 %v4011_v58, %v3612_v27  ;;  %v4013_v10 = vpop.f32.mrf.mxu1  ;;  %v294_v58 = vld [vmem:[%s7046_s0 + $0x8b8] sm:$0xff] }
 0x2a9   :  { %v3616_v17 = vpop.f32.mrf.mxu0  ;;  %3807 = vmatmul.mubr.bf16.gmra.mxu0 %v4765_v29 }
 0x2aa   :  { %v4339_v0 = vmax.f32 %v4012_v11, 0.0  ;;  %v3617_v37 = vadd.f32 %v3616_v17, %v5759_v52  ;;  %v4016_v44 = vpop.f32.mrf.mxu1  ;;  %4207 = vmatmul.mubr.bf16.gmra.mxu1 %v4767_v50  ;;  %3814 = vmatprep.mubr.bf16.mxu0 %v4774_v59  ;;  %v282_v52 = vld [vmem:[%s7046_s0 + $0x858] sm:$0xff]  ;;  %v4781_v59 = vcombine.low %v281_v23, %v285_v4  ;;  %v4790_v17 = vcombine.high %v289_v46, %v293_v28  ;;  %v297_v4 = vld [vmem:[%s7046_s0 + $0x8d0] sm:$0xff] }
 0x2ab   :  { %v3618_v42 = vpop.f32.mrf.mxu0  ;;  %4214 = vmatprep.mubr.bf16.mxu1 %v4776_v60  ;;  %v4784_v18 = vcombine.high %v282_v52, %v286_v38  ;;  %v4783_v10 = vcombine.low %v282_v52, %v286_v38  ;;  %v301_v52 = vld [vmem:[%s7046_s0 + $0x8f0] sm:$0xff] }
 0x2ac   :  { %4430 = vst [vmem:[%s7048_s3 + $0x68] sm:$0xff] %v4339_v0  ;;  %v4017_v39 = vadd.f32 %v4016_v44, %v3617_v37  ;;  %v4018_v49 = vpop.f32.mrf.mxu1 }
 0x2ad   :  { %v3619_v45 = vpop.f32.mrf.mxu0 }
 0x2ae   :  { %v4340_v12 = vmax.f32 %v4017_v39, 0.0  ;;  %v3620_v9 = vadd.f32 %v3619_v45, %v5768_v3  ;;  %v4019_v8 = vpop.f32.mrf.mxu1 }
 0x2af   :  { %v3621_v24 = vpop.f32.mrf.mxu0 }
 0x2b0   :  { %4431 = vst [vmem:[%s7048_s3 + $0x70] sm:$0xff] %v4340_v12  ;;  %v4020_v20 = vadd.f32 %v4019_v8, %v3620_v9  ;;  %v4021_v35 = vpop.f32.mrf.mxu1  ;;  %v302_v12 = vld [vmem:[%s7046_s0 + $0x8f8] sm:$0xff]  ;;  %v4789_v8 = vcombine.low %v289_v46, %v293_v28  ;;  %v305_v28 = vld [vmem:[%s7046_s0 + $0x910] sm:$0xff] }
 0x2b1   :  { %v3624_v34 = vpop.f32.mrf.mxu0  ;;  %3815 = vmatmul.mubr.bf16.gmra.mxu0 %v4773_v41 }
 0x2b2   :  { %v4341_v29 = vmax.f32 %v4020_v20, 0.0  ;;  %v3625_v14 = vadd.f32 %v3624_v34, %v5777_v13  ;;  %v4024_v63 = vpop.f32.mrf.mxu1  ;;  %4215 = vmatmul.mubr.bf16.gmra.mxu1 %v4775_v56  ;;  %3822 = vmatprep.mubr.bf16.mxu0 %v4782_v22  ;;  %v290_v13 = vld [vmem:[%s7046_s0 + $0x898] sm:$0xff]  ;;  %v4798_v20 = vcombine.high %v297_v4, %v301_v52 }
 0x2b3   :  { %v3626_v3 = vpop.f32.mrf.mxu0  ;;  %4222 = vmatprep.mubr.bf16.mxu1 %v4784_v18  ;;  %v4792_v37 = vcombine.high %v290_v13, %v294_v58  ;;  %v4791_v18 = vcombine.low %v290_v13, %v294_v58 }
 0x2b4   :  { %4432 = vst [vmem:[%s7048_s3 + $0x78] sm:$0xff] %v4341_v29  ;;  %v4025_v61 = vadd.f32 %v4024_v63, %v3625_v14  ;;  %v4026_v27 = vpop.f32.mrf.mxu1 }
 0x2b5   :  { %v3627_v50 = vpop.f32.mrf.mxu0  ;;  %v309_v27 = vld [vmem:[%s7046_s0 + $0x930] sm:$0xff] }
 0x2b6   :  { %v4342_v54 = vmax.f32 %v4025_v61, 0.0  ;;  %v3628_v60 = vadd.f32 %v3627_v50, %v5786_v30  ;;  %v4027_v11 = vpop.f32.mrf.mxu1  ;;  %v310_v50 = vld [vmem:[%s7046_s0 + $0x938] sm:$0xff] }
 0x2b7   :  { %v3629_v0 = vpop.f32.mrf.mxu0 }
 0x2b8   :  { %4433 = vst [vmem:[%s7048_s3 + $0x80] sm:$0xff] %v4342_v54  ;;  %v4028_v44 = vadd.f32 %v4027_v11, %v3628_v60  ;;  %v4029_v42 = vpop.f32.mrf.mxu1  ;;  %v4797_v54 = vcombine.low %v297_v4, %v301_v52  ;;  %v4806_v0 = vcombine.high %v305_v28, %v309_v27  ;;  %v313_v4 = vld [vmem:[%s7046_s0 + $0x950] sm:$0xff] }
 0x2b9   :  { %v3632_v39 = vpop.f32.mrf.mxu0  ;;  %3823 = vmatmul.mubr.bf16.gmra.mxu0 %v4781_v59  ;;  %v317_v52 = vld [vmem:[%s7046_s0 + $0x970] sm:$0xff] }
 0x2ba   :  { %v4343_v49 = vmax.f32 %v4028_v44, 0.0  ;;  %v3633_v45 = vadd.f32 %v3632_v39, %v5795_v40  ;;  %v4032_v23 = vpop.f32.mrf.mxu1  ;;  %4223 = vmatmul.mubr.bf16.gmra.mxu1 %v4783_v10  ;;  %3830 = vmatprep.mubr.bf16.mxu0 %v4790_v17  ;;  %v298_v40 = vld [vmem:[%s7046_s0 + $0x8d8] sm:$0xff] }
 0x2bb   :  { %v3634_v30 = vpop.f32.mrf.mxu0  ;;  %4230 = vmatprep.mubr.bf16.mxu1 %v4792_v37  ;;  %v4800_v34 = vcombine.high %v298_v40, %v302_v12  ;;  %v4799_v17 = vcombine.low %v298_v40, %v302_v12  ;;  %v318_v40 = vld [vmem:[%s7046_s0 + $0x978] sm:$0xff] }
 0x2bc   :  { %4434 = vst [vmem:[%s7048_s3 + $0x88] sm:$0xff] %v4343_v49  ;;  %v4033_v38 = vadd.f32 %v4032_v23, %v3633_v45  ;;  %v4034_v41 = vpop.f32.mrf.mxu1 }
 0x2bd   :  { %v3635_v9 = vpop.f32.mrf.mxu0 }
 0x2be   :  { %v4344_v56 = vmax.f32 %v4033_v38, 0.0  ;;  %v3636_v22 = vadd.f32 %v3635_v9, %v5804_v57  ;;  %v4035_v24 = vpop.f32.mrf.mxu1  ;;  %v4805_v9 = vcombine.low %v305_v28, %v309_v27 }
 0x2bf   :  { %v3637_v35 = vpop.f32.mrf.mxu0 }
 0x2c0   :  { %4435 = vst [vmem:[%s7048_s3 + $0x90] sm:$0xff] %v4344_v56  ;;  %v4036_v29 = vadd.f32 %v4035_v24, %v3636_v22  ;;  %v4037_v14 = vpop.f32.mrf.mxu1 }
 0x2c1   :  { %v3640_v63 = vpop.f32.mrf.mxu0  ;;  %3831 = vmatmul.mubr.bf16.gmra.mxu0 %v4789_v8 }
 0x2c2   :  { %v4345_v3 = vmax.f32 %v4036_v29, 0.0  ;;  %v3641_v61 = vadd.f32 %v3640_v63, %v5813_v5  ;;  %v4040_v46 = vpop.f32.mrf.mxu1  ;;  %4231 = vmatmul.mubr.bf16.gmra.mxu1 %v4791_v18  ;;  %3838 = vmatprep.mubr.bf16.mxu0 %v4798_v20  ;;  %v306_v5 = vld [vmem:[%s7046_s0 + $0x918] sm:$0xff]  ;;  %v4814_v18 = vcombine.high %v313_v4, %v317_v52 }
 0x2c3   :  { %v3642_v57 = vpop.f32.mrf.mxu0  ;;  %4238 = vmatprep.mubr.bf16.mxu1 %v4800_v34  ;;  %v4808_v44 = vcombine.high %v306_v5, %v310_v50  ;;  %v4807_v24 = vcombine.low %v306_v5, %v310_v50  ;;  %v4813_v5 = vcombine.low %v313_v4, %v317_v52  ;;  %v334_v4 = vld [vmem:[%s7046_s0 + $0x9f8] sm:$0xff] }
 0x2c4   :  { %4436 = vst [vmem:[%s7048_s3 + $0x98] sm:$0xff] %v4345_v3  ;;  %v4041_v13 = vadd.f32 %v4040_v46, %v3641_v61  ;;  %v4042_v58 = vpop.f32.mrf.mxu1  ;;  %v321_v46 = vld [vmem:[%s7046_s0 + $0x990] sm:$0xff] }
 0x2c5   :  { %v3643_v59 = vpop.f32.mrf.mxu0  ;;  %v325_v57 = vld [vmem:[%s7046_s0 + $0x9b0] sm:$0xff] }
 0x2c6   :  { %v4346_v60 = vmax.f32 %v4041_v13, 0.0  ;;  %v3644_v11 = vadd.f32 %v3643_v59, %v5822_v21  ;;  %v4043_v10 = vpop.f32.mrf.mxu1  ;;  %v326_v13 = vld [vmem:[%s7046_s0 + $0x9b8] sm:$0xff] }
 0x2c7   :  { %v3645_v37 = vpop.f32.mrf.mxu0 }
 0x2c8   :  { %4437 = vst [vmem:[%s7048_s3 + $0xa0] sm:$0xff] %v4346_v60  ;;  %v4044_v42 = vadd.f32 %v4043_v10, %v3644_v11  ;;  %v4045_v39 = vpop.f32.mrf.mxu1  ;;  %v4822_v11 = vcombine.high %v321_v46, %v325_v57 }
 0x2c9   :  { %v3648_v49 = vpop.f32.mrf.mxu0  ;;  %3839 = vmatmul.mubr.bf16.gmra.mxu0 %v4797_v54 }
 0x2ca   :  { %v4347_v45 = vmax.f32 %v4044_v42, 0.0  ;;  %v3649_v23 = vadd.f32 %v3648_v49, %v5831_v33  ;;  %v4048_v30 = vpop.f32.mrf.mxu1  ;;  %4239 = vmatmul.mubr.bf16.gmra.mxu1 %v4799_v17  ;;  %3846 = vmatprep.mubr.bf16.mxu0 %v4806_v0  ;;  %v314_v33 = vld [vmem:[%s7046_s0 + $0x958] sm:$0xff] }
 0x2cb   :  { %v3650_v21 = vpop.f32.mrf.mxu0  ;;  %4246 = vmatprep.mubr.bf16.mxu1 %v4808_v44  ;;  %v4816_v35 = vcombine.high %v314_v33, %v318_v40  ;;  %v4815_v60 = vcombine.low %v314_v33, %v318_v40 }
 0x2cc   :  { %4438 = vst [vmem:[%s7048_s3 + $0xa8] sm:$0xff] %v4347_v45  ;;  %v4049_v38 = vadd.f32 %v4048_v30, %v3649_v23  ;;  %v4050_v41 = vpop.f32.mrf.mxu1  ;;  %v329_v45 = vld [vmem:[%s7046_s0 + $0x9d0] sm:$0xff] }
 0x2cd   :  { %v3651_v12 = vpop.f32.mrf.mxu0  ;;  %v333_v23 = vld [vmem:[%s7046_s0 + $0x9f0] sm:$0xff] }
 0x2ce   :  { %v4348_v8 = vmax.f32 %v4049_v38, 0.0  ;;  %v3652_v56 = vadd.f32 %v3651_v12, %v5840_v51  ;;  %v4051_v22 = vpop.f32.mrf.mxu1  ;;  %v4821_v38 = vcombine.low %v321_v46, %v325_v57  ;;  %v4829_v46 = vcombine.low %v329_v45, %v333_v23 }
 0x2cf   :  { %v3653_v20 = vpop.f32.mrf.mxu0 }
 0x2d0   :  { %4439 = vst [vmem:[%s7048_s3 + $0xb0] sm:$0xff] %v4348_v8  ;;  %v4052_v34 = vadd.f32 %v4051_v22, %v3652_v56  ;;  %v4053_v29 = vpop.f32.mrf.mxu1 }
 0x2d1   :  { %v3656_v14 = vpop.f32.mrf.mxu0  ;;  %3847 = vmatmul.mubr.bf16.gmra.mxu0 %v4805_v9  ;;  %v4830_v9 = vcombine.high %v329_v45, %v333_v23  ;;  %v337_v29 = vld [vmem:[%s7046_s0 + $0xa10] sm:$0xff] }
 0x2d2   :  { %v4349_v63 = vmax.f32 %v4052_v34, 0.0  ;;  %v3657_v3 = vadd.f32 %v3656_v14, %v5849_v62  ;;  %v4056_v61 = vpop.f32.mrf.mxu1  ;;  %4247 = vmatmul.mubr.bf16.gmra.mxu1 %v4807_v24  ;;  %3854 = vmatprep.mubr.bf16.mxu0 %v4814_v18  ;;  %v322_v62 = vld [vmem:[%s7046_s0 + $0x998] sm:$0xff]  ;;  %v341_v14 = vld [vmem:[%s7046_s0 + $0xa30] sm:$0xff] }
 0x2d3   :  { %v3658_v51 = vpop.f32.mrf.mxu0  ;;  %4254 = vmatprep.mubr.bf16.mxu1 %v4816_v35  ;;  %v4824_v17 = vcombine.high %v322_v62, %v326_v13  ;;  %v4823_v12 = vcombine.low %v322_v62, %v326_v13  ;;  %v4838_v13 = vcombine.high %v337_v29, %v341_v14 }
 0x2d4   :  { %4440 = vst [vmem:[%s7048_s3 + $0xb8] sm:$0xff] %v4349_v63  ;;  %v4057_v28 = vadd.f32 %v4056_v61, %v3657_v3  ;;  %v4058_v27 = vpop.f32.mrf.mxu1  ;;  %v342_v61 = vld [vmem:[%s7046_s0 + $0xa38] sm:$0xff] }
 0x2d5   :  { %v3659_v58 = vpop.f32.mrf.mxu0 }
 0x2d6   :  { %v4350_v50 = vmax.f32 %v4057_v28, 0.0  ;;  %v3660_v59 = vadd.f32 %v3659_v58, %v5858_v19  ;;  %v4059_v54 = vpop.f32.mrf.mxu1 }
 0x2d7   :  { %v3661_v10 = vpop.f32.mrf.mxu0 }
 0x2d8   :  { %4441 = vst [vmem:[%s7048_s3 + $0xc0] sm:$0xff] %v4350_v50  ;;  %v4060_v0 = vadd.f32 %v4059_v54, %v3660_v59  ;;  %v4061_v37 = vpop.f32.mrf.mxu1 }
 0x2d9   :  { %v3664_v44 = vpop.f32.mrf.mxu0  ;;  %3855 = vmatmul.mubr.bf16.gmra.mxu0 %v4813_v5 }
 0x2da   :  { %v4351_v42 = vmax.f32 %v4060_v0, 0.0  ;;  %v3665_v39 = vadd.f32 %v3664_v44, %v5867_v32  ;;  %v4064_v49 = vpop.f32.mrf.mxu1  ;;  %4255 = vmatmul.mubr.bf16.gmra.mxu1 %v4815_v60  ;;  %3862 = vmatprep.mubr.bf16.mxu0 %v4822_v11  ;;  %v330_v32 = vld [vmem:[%s7046_s0 + $0x9d8] sm:$0xff]  ;;  %v349_v0 = vld [vmem:[%s7046_s0 + $0xa70] sm:$0xff] }
 0x2db   :  { %v3666_v19 = vpop.f32.mrf.mxu0  ;;  %4262 = vmatprep.mubr.bf16.mxu1 %v4824_v17  ;;  %v4832_v56 = vcombine.high %v330_v32, %v334_v4  ;;  %v4831_v62 = vcombine.low %v330_v32, %v334_v4  ;;  %v345_v17 = vld [vmem:[%s7046_s0 + $0xa50] sm:$0xff] }
 0x2dc   :  { %4442 = vst [vmem:[%s7048_s3 + $0xc8] sm:$0xff] %v4351_v42  ;;  %v4065_v30 = vadd.f32 %v4064_v49, %v3665_v39  ;;  %v4066_v21 = vpop.f32.mrf.mxu1  ;;  %v350_v42 = vld [vmem:[%s7046_s0 + $0xa78] sm:$0xff]  ;;  %v4837_v49 = vcombine.low %v337_v29, %v341_v14 }
 0x2dd   :  { %v3667_v52 = vpop.f32.mrf.mxu0  ;;  %v4846_v21 = vcombine.high %v345_v17, %v349_v0 }
 0x2de   :  { %v4352_v41 = vmax.f32 %v4065_v30, 0.0  ;;  %v3668_v33 = vadd.f32 %v3667_v52, %v5876_v53  ;;  %v4067_v40 = vpop.f32.mrf.mxu1 }
 0x2df   :  { %v3669_v8 = vpop.f32.mrf.mxu0 }
 0x2e0   :  { %4443 = vst [vmem:[%s7048_s3 + $0xd0] sm:$0xff] %v4352_v41  ;;  %v4068_v22 = vadd.f32 %v4067_v40, %v3668_v33  ;;  %v4069_v24 = vpop.f32.mrf.mxu1  ;;  %v357_v8 = vld [vmem:[%s7046_s0 + $0xab0] sm:$0xff] }
 0x2e1   :  { %v3672_v18 = vpop.f32.mrf.mxu0  ;;  %3863 = vmatmul.mubr.bf16.gmra.mxu0 %v4821_v38  ;;  %v358_v24 = vld [vmem:[%s7046_s0 + $0xab8] sm:$0xff] }
 0x2e2   :  { %v4353_v20 = vmax.f32 %v4068_v22, 0.0  ;;  %v3673_v35 = vadd.f32 %v3672_v18, %v5885_v2  ;;  %v4072_v34 = vpop.f32.mrf.mxu1  ;;  %4263 = vmatmul.mubr.bf16.gmra.mxu1 %v4823_v12  ;;  %3870 = vmatprep.mubr.bf16.mxu0 %v4830_v9  ;;  %v338_v2 = vld [vmem:[%s7046_s0 + $0xa18] sm:$0xff]  ;;  %v353_v9 = vld [vmem:[%s7046_s0 + $0xa90] sm:$0xff] }
 0x2e3   :  { %v3674_v53 = vpop.f32.mrf.mxu0  ;;  %4270 = vmatprep.mubr.bf16.mxu1 %v4832_v56  ;;  %v4840_v5 = vcombine.high %v338_v2, %v342_v61  ;;  %v4839_v30 = vcombine.low %v338_v2, %v342_v61  ;;  %v4854_v14 = vcombine.high %v353_v9, %v357_v8 }
 0x2e4   :  { %4444 = vst [vmem:[%s7048_s3 + $0xd8] sm:$0xff] %v4353_v20  ;;  %v4073_v63 = vadd.f32 %v4072_v34, %v3673_v35  ;;  %v4074_v3 = vpop.f32.mrf.mxu1  ;;  %v4845_v20 = vcombine.low %v345_v17, %v349_v0 }
 0x2e5   :  { %v3675_v51 = vpop.f32.mrf.mxu0 }
 0x2e6   :  { %v4354_v57 = vmax.f32 %v4073_v63, 0.0  ;;  %v3676_v28 = vadd.f32 %v3675_v51, %v5894_v25  ;;  %v4075_v27 = vpop.f32.mrf.mxu1 }
 0x2e7   :  { %v3677_v58 = vpop.f32.mrf.mxu0 }
 0x2e8   :  { %4445 = vst [vmem:[%s7048_s3 + $0xe0] sm:$0xff] %v4354_v57  ;;  %v4076_v50 = vadd.f32 %v4075_v27, %v3676_v28  ;;  %v4077_v59 = vpop.f32.mrf.mxu1  ;;  %v361_v27 = vld [vmem:[%s7046_s0 + $0xad0] sm:$0xff] }
 0x2e9   :  { %v3680_v54 = vpop.f32.mrf.mxu0  ;;  %3871 = vmatmul.mubr.bf16.gmra.mxu0 %v4829_v46  ;;  %v4853_v59 = vcombine.low %v353_v9, %v357_v8 }
 0x2ea   :  { %v4355_v60 = vmax.f32 %v4076_v50, 0.0  ;;  %v3681_v11 = vadd.f32 %v3680_v54, %v5903_v36  ;;  %v4080_v10 = vpop.f32.mrf.mxu1  ;;  %4271 = vmatmul.mubr.bf16.gmra.mxu1 %v4831_v62  ;;  %3878 = vmatprep.mubr.bf16.mxu0 %v4838_v13  ;;  %v346_v36 = vld [vmem:[%s7046_s0 + $0xa58] sm:$0xff]  ;;  %v365_v62 = vld [vmem:[%s7046_s0 + $0xaf0] sm:$0xff] }
 0x2eb   :  { %v3682_v25 = vpop.f32.mrf.mxu0  ;;  %4278 = vmatprep.mubr.bf16.mxu1 %v4840_v5  ;;  %v4848_v4 = vcombine.high %v346_v36, %v350_v42  ;;  %v4847_v29 = vcombine.low %v346_v36, %v350_v42  ;;  %v366_v5 = vld [vmem:[%s7046_s0 + $0xaf8] sm:$0xff] }
 0x2ec   :  { %4446 = vst [vmem:[%s7048_s3 + $0xe8] sm:$0xff] %v4355_v60  ;;  %v4081_v37 = vadd.f32 %v4080_v10, %v3681_v11  ;;  %v4082_v44 = vpop.f32.mrf.mxu1  ;;  %v4862_v25 = vcombine.high %v361_v27, %v365_v62 }
 0x2ed   :  { %v3683_v39 = vpop.f32.mrf.mxu0 }
 0x2ee   :  { %v4356_v19 = vmax.f32 %v4081_v37, 0.0  ;;  %v3684_v45 = vadd.f32 %v3683_v39, %v5912_v1  ;;  %v4083_v23 = vpop.f32.mrf.mxu1 }
 0x2ef   :  { %v3685_v32 = vpop.f32.mrf.mxu0 }
 0x2f0   :  { %4447 = vst [vmem:[%s7048_s3 + $0xf0] sm:$0xff] %v4356_v19  ;;  %v4084_v52 = vadd.f32 %v4083_v23, %v3684_v45  ;;  %v4085_v38 = vpop.f32.mrf.mxu1  ;;  %v369_v19 = vld [vmem:[%s7046_s0 + $0xb10] sm:$0xff] }
 0x2f1   :  { %v3688_v41 = vpop.f32.mrf.mxu0  ;;  %3879 = vmatmul.mubr.bf16.gmra.mxu0 %v4837_v49  ;;  %v373_v45 = vld [vmem:[%s7046_s0 + $0xb30] sm:$0xff] }
 0x2f2   :  { %v4357_v33 = vmax.f32 %v4084_v52, 0.0  ;;  %v3689_v40 = vadd.f32 %v3688_v41, %v5921_v7  ;;  %v4088_v12 = vpop.f32.mrf.mxu1  ;;  %4279 = vmatmul.mubr.bf16.gmra.mxu1 %v4839_v30  ;;  %3886 = vmatprep.mubr.bf16.mxu0 %v4846_v21  ;;  %v354_v7 = vld [vmem:[%s7046_s0 + $0xa98] sm:$0xff] }
 0x2f3   :  { %v3690_v1 = vpop.f32.mrf.mxu0  ;;  %4286 = vmatprep.mubr.bf16.mxu1 %v4848_v4  ;;  %v4856_v3 = vcombine.high %v354_v7, %v358_v24  ;;  %v4855_v10 = vcombine.low %v354_v7, %v358_v24  ;;  %v374_v21 = vld [vmem:[%s7046_s0 + $0xb38] sm:$0xff]  ;;  %v4861_v4 = vcombine.low %v361_v27, %v365_v62 }
 0x2f4   :  { %4448 = vst [vmem:[%s7048_s3 + $0xf8] sm:$0xff] %v4357_v33  ;;  %v4089_v56 = vadd.f32 %v4088_v12, %v3689_v40  ;;  %v4090_v22 = vpop.f32.mrf.mxu1  ;;  %v4870_v40 = vcombine.high %v369_v19, %v373_v45 }
 0x2f5   :  { %v3691_v18 = vpop.f32.mrf.mxu0 }
 0x2f6   :  { %v4358_v35 = vmax.f32 %v4089_v56, 0.0  ;;  %v3692_v34 = vadd.f32 %v3691_v18, %v5930_v47  ;;  %v4091_v53 = vpop.f32.mrf.mxu1  ;;  %v377_v18 = vld [vmem:[%s7046_s0 + $0xb50] sm:$0xff] }
 0x2f7   :  { %v3693_v63 = vpop.f32.mrf.mxu0 }
 0x2f8   :  { %4449 = vst [vmem:[%s7048_s3 + $0x100] sm:$0xff] %v4358_v35  ;;  %v4092_v2 = vadd.f32 %v4091_v53, %v3692_v34  ;;  %v4093_v61 = vpop.f32.mrf.mxu1  ;;  %v378_v34 = vld [vmem:[%s7046_s0 + $0xb58] sm:$0xff]  ;;  %v4869_v53 = vcombine.low %v369_v19, %v373_v45  ;;  %v7100_v45 = vld [vmem:[#allocation4_spill] sm:$0xff] }
 0x2f9   :  { %v3696_v51 = vpop.f32.mrf.mxu0  ;;  %3887 = vmatmul.mubr.bf16.gmra.mxu0 %v4845_v20 }
 0x2fa   :  { %v4359_v46 = vmax.f32 %v4092_v2, 0.0  ;;  %v3697_v57 = vadd.f32 %v3696_v51, %v5939_v43  ;;  %v4096_v28 = vpop.f32.mrf.mxu1  ;;  %4287 = vmatmul.mubr.bf16.gmra.mxu1 %v4847_v29  ;;  %3894 = vmatprep.mubr.bf16.mxu0 %v4854_v14  ;;  %v362_v43 = vld [vmem:[%s7046_s0 + $0xad8] sm:$0xff]  ;;  %v4878_v2 = vcombine.high %v377_v18, %v377_v18  ;;  %v4880_v51 = vcombine.high %v378_v34, %v378_v34 }
 0x2fb   :  { %v3698_v47 = vpop.f32.mrf.mxu0  ;;  %4294 = vmatprep.mubr.bf16.mxu1 %v4856_v3  ;;  %v4864_v0 = vcombine.high %v362_v43, %v366_v5  ;;  %v4863_v33 = vcombine.low %v362_v43, %v366_v5  ;;  %v4877_v5 = vcombine.low %v377_v18, %v377_v18 }
 0x2fc   :  { %4450 = vst [vmem:[%s7048_s3 + $0x108] sm:$0xff] %v4359_v46  ;;  %v4097_v13 = vadd.f32 %v4096_v28, %v3697_v57  ;;  %v4098_v58 = vpop.f32.mrf.mxu1 }
 0x2fd   :  { %v3699_v50 = vpop.f32.mrf.mxu0 }
 0x2fe   :  { %v4360_v54 = vmax.f32 %v4097_v13, 0.0  ;;  %v3700_v60 = vadd.f32 %v3699_v50, %v5948_v26  ;;  %v4099_v11 = vpop.f32.mrf.mxu1 }
 0x2ff   :  { %v3701_v17 = vpop.f32.mrf.mxu0 }
 0x300   :  { %4451 = vst [vmem:[%s7048_s3 + $0x110] sm:$0xff] %v4360_v54  ;;  %v4100_v37 = vadd.f32 %v4099_v11, %v3700_v60  ;;  %v4101_v44 = vpop.f32.mrf.mxu1  ;;  %v4879_v11 = vcombine.low %v378_v34, %v378_v34  ;;  %v7103_v34 = vld [vmem:[#allocation7_spill] sm:$0xff] }
 0x301   :  { %v3704_v36 = vpop.f32.mrf.mxu0  ;;  %3895 = vmatmul.mubr.bf16.gmra.mxu0 %v4853_v59  ;;  %v7098_v59 = vld [vmem:[#allocation2_spill] sm:$0xff] }
 0x302   :  { %v4361_v42 = vmax.f32 %v4100_v37, 0.0  ;;  %v3705_v39 = vadd.f32 %v3704_v36, %v5957_v16  ;;  %v4104_v49 = vpop.f32.mrf.mxu1  ;;  %4295 = vmatmul.mubr.bf16.gmra.mxu1 %v4855_v10  ;;  %3902 = vmatprep.mubr.bf16.mxu0 %v4862_v25  ;;  %v370_v16 = vld [vmem:[%s7046_s0 + $0xb18] sm:$0xff]  ;;  %v7099_v37 = vld [vmem:[#allocation3_spill] sm:$0xff] }
 0x303   :  { %v3706_v26 = vpop.f32.mrf.mxu0  ;;  %4302 = vmatprep.mubr.bf16.mxu1 %v4864_v0  ;;  %v4872_v1 = vcombine.high %v370_v16, %v374_v21  ;;  %v4871_v3 = vcombine.low %v370_v16, %v374_v21 }
 0x304   :  { %4452 = vst [vmem:[%s7048_s3 + $0x118] sm:$0xff] %v4361_v42  ;;  %v4105_v23 = vadd.f32 %v4104_v49, %v3705_v39  ;;  %v4106_v30 = vpop.f32.mrf.mxu1 }
 0x305   :  { %v3707_v32 = vpop.f32.mrf.mxu0 }
 0x306   :  { %v4362_v52 = vmax.f32 %v4105_v23, 0.0  ;;  %v3708_v38 = vadd.f32 %v3707_v32, %v5966_v15  ;;  %v4107_v41 = vpop.f32.mrf.mxu1 }
 0x307   :  { %v3709_v12 = vpop.f32.mrf.mxu0 }
 0x308   :  { %4453 = vst [vmem:[%s7048_s3 + $0x120] sm:$0xff] %v4362_v52  ;;  %v4108_v9 = vadd.f32 %v4107_v41, %v3708_v38  ;;  %v4109_v8 = vpop.f32.mrf.mxu1  ;;  %v7101_v38 = vld [vmem:[#allocation5_spill] sm:$0xff] }
 0x309   :  { %v3712_v56 = vpop.f32.mrf.mxu0  ;;  %3903 = vmatmul.mubr.bf16.gmra.mxu0 %v4861_v4 }
 0x30a   :  { %v4363_v22 = vmax.f32 %v4108_v9, 0.0  ;;  %v3713_v7 = vadd.f32 %v3712_v56, %v5972_v31  ;;  %v4112_v24 = vpop.f32.mrf.mxu1  ;;  %4303 = vmatmul.mubr.bf16.gmra.mxu1 %v4863_v33  ;;  %3910 = vmatprep.mubr.bf16.mxu0 %v4870_v40  ;;  %v7102_v56 = vld [vmem:[#allocation6_spill] sm:$0xff] }
 0x30b   :  { %v3714_v15 = vpop.f32.mrf.mxu0  ;;  %4310 = vmatprep.mubr.bf16.mxu1 %v4872_v1 }
 0x30c   :  { %4454 = vst [vmem:[%s7048_s3 + $0x128] sm:$0xff] %v4363_v22  ;;  %v4113_v20 = vadd.f32 %v4112_v24, %v3713_v7  ;;  %v4114_v35 = vpop.f32.mrf.mxu1 }
 0x30d   :  { %v3715_v31 = vpop.f32.mrf.mxu0 }
 0x30e   :  { %v4364_v29 = vmax.f32 %v4113_v20, 0.0  ;;  %v3716_v14 = vadd.f32 %v3715_v31, %v5978_v6  ;;  %v4115_v63 = vpop.f32.mrf.mxu1 }
 0x30f   :  { %v3717_v61 = vpop.f32.mrf.mxu0 }
 0x310   :  { %4455 = vst [vmem:[%s7048_s3 + $0x130] sm:$0xff] %v4364_v29  ;;  %v4116_v46 = vadd.f32 %v4115_v63, %v3716_v14  ;;  %v4117_v57 = vpop.f32.mrf.mxu1  ;;  %v7104_v61 = vld [vmem:[#allocation8_spill] sm:$0xff] }
 0x311   :  { %v3720_v28 = vpop.f32.mrf.mxu0  ;;  %3911 = vmatmul.mubr.bf16.gmra.mxu0 %v4869_v53 }
 0x312   :  { %v4365_v47 = vmax.f32 %v4116_v46, 0.0  ;;  %v3721_v27 = vadd.f32 %v3720_v28, %v5987_v48  ;;  %v4120_v62 = vpop.f32.mrf.mxu1  ;;  %4311 = vmatmul.mubr.bf16.gmra.mxu1 %v4871_v3  ;;  %3918 = vmatprep.mubr.bf16.mxu0 %v4878_v2 }
 0x313   :  { %v3722_v6 = vpop.f32.mrf.mxu0  ;;  %4318 = vmatprep.mubr.bf16.mxu1 %v4880_v51 }
 0x314   :  { %4456 = vst [vmem:[%s7048_s3 + $0x138] sm:$0xff] %v4365_v47  ;;  %v4121_v13 = vadd.f32 %v4120_v62, %v3721_v27  ;;  %v4122_v58 = vpop.f32.mrf.mxu1  ;;  %v7105_v6 = vld [vmem:[#allocation9_spill] sm:$0xff] }
 0x315   :  { %v3723_v43 = vpop.f32.mrf.mxu0 }
 0x316   :  { %v4366_v50 = vmax.f32 %v4121_v13, 0.0  ;;  %v3724_v54 = vadd.f32 %v3723_v43, %v7098_v59  ;;  %v4123_v60 = vpop.f32.mrf.mxu1 }
 0x317   :  { %v3725_v10 = vpop.f32.mrf.mxu0 }
 0x318   :  { %4457 = vst [vmem:[%s7048_s3 + $0x140] sm:$0xff] %v4366_v50  ;;  %v4124_v48 = vadd.f32 %v4123_v60, %v3724_v54  ;;  %v4125_v25 = vpop.f32.mrf.mxu1  ;;  %v7106_v60 = vld [vmem:[#allocation10_spill] sm:$0xff] }
 0x319   :  { %v3728_v17 = vpop.f32.mrf.mxu0  ;;  %3919 = vmatmul.mubr.bf16.gmra.mxu0 %v4877_v5 }
 0x31a   :  { %v4367_v0 = vmax.f32 %v4124_v48, 0.0  ;;  %v3729_v44 = vadd.f32 %v3728_v17, %v7099_v37  ;;  %v4128_v36 = vpop.f32.mrf.mxu1  ;;  %4319 = vmatmul.mubr.bf16.gmra.mxu1 %v4879_v11 }
 0x31b   :  { %v3730_v42 = vpop.f32.mrf.mxu0 }
 0x31c   :  { %4458 = vst [vmem:[%s7048_s3 + $0x148] sm:$0xff] %v4367_v0  ;;  %v4129_v39 = vadd.f32 %v4128_v36, %v3729_v44  ;;  %v4130_v49 = vpop.f32.mrf.mxu1  ;;  %v7107_v44 = vld [vmem:[#allocation11_spill] sm:$0xff] }
 0x31d   :  { %v3731_v26 = vpop.f32.mrf.mxu0 }
 0x31e   :  { %v4368_v19 = vmax.f32 %v4129_v39, 0.0  ;;  %v3732_v23 = vadd.f32 %v3731_v26, %v7100_v45  ;;  %v4131_v30 = vpop.f32.mrf.mxu1 }
 0x31f   :  { %v3733_v16 = vpop.f32.mrf.mxu0 }
 0x320   :  { %4459 = vst [vmem:[%s7048_s3 + $0x150] sm:$0xff] %v4368_v19  ;;  %v4132_v21 = vadd.f32 %v4131_v30, %v3732_v23  ;;  %v4133_v32 = vpop.f32.mrf.mxu1  ;;  %v7108_v23 = vld [vmem:[#allocation12_spill] sm:$0xff] }
 0x321   :  { %v3736_v4 = vpop.f32.mrf.mxu0 }
 0x322   :  { %v4369_v52 = vmax.f32 %v4132_v21, 0.0  ;;  %v3737_v41 = vadd.f32 %v3736_v4, %v7101_v38  ;;  %v4136_v33 = vpop.f32.mrf.mxu1 }
 0x323   :  { %v3738_v40 = vpop.f32.mrf.mxu0 }
 0x324   :  { %4460 = vst [vmem:[%s7048_s3 + $0x158] sm:$0xff] %v4369_v52  ;;  %v4137_v12 = vadd.f32 %v4136_v33, %v3737_v41  ;;  %v4138_v1 = vpop.f32.mrf.mxu1  ;;  %v7109_v41 = vld [vmem:[#allocation13_spill] sm:$0xff] }
 0x325   :  { %v3739_v9 = vpop.f32.mrf.mxu0 }
 0x326   :  { %v4370_v8 = vmax.f32 %v4137_v12, 0.0  ;;  %v3740_v22 = vadd.f32 %v3739_v9, %v7102_v56  ;;  %v4139_v7 = vpop.f32.mrf.mxu1 }
 0x327   :  { %v3741_v24 = vpop.f32.mrf.mxu0 }
 0x328   :  { %4461 = vst [vmem:[%s7048_s3 + $0x160] sm:$0xff] %v4370_v8  ;;  %v4140_v15 = vadd.f32 %v4139_v7, %v3740_v22  ;;  %v4141_v18 = vpop.f32.mrf.mxu1  ;;  %v7110_v22 = vld [vmem:[#allocation14_spill] sm:$0xff] }
 0x329   :  { %v3744_v20 = vpop.f32.mrf.mxu0 }
 0x32a   :  { %v4371_v35 = vmax.f32 %v4140_v15, 0.0  ;;  %v3745_v31 = vadd.f32 %v3744_v20, %v7103_v34  ;;  %v4144_v53 = vpop.f32.mrf.mxu1 }
 0x32b   :  { %v3746_v29 = vpop.f32.mrf.mxu0 }
 0x32c   :  { %4462 = vst [vmem:[%s7048_s3 + $0x168] sm:$0xff] %v4371_v35  ;;  %v4145_v14 = vadd.f32 %v4144_v53, %v3745_v31  ;;  %v4146_v63 = vpop.f32.mrf.mxu1  ;;  %v7111_v31 = vld [vmem:[#allocation15_spill] sm:$0xff] }
 0x32d   :  { %v3747_v3 = vpop.f32.mrf.mxu0 }
 0x32e   :  { %v4372_v2 = vmax.f32 %v4145_v14, 0.0  ;;  %v3748_v51 = vadd.f32 %v3747_v3, %v7104_v61  ;;  %v4147_v46 = vpop.f32.mrf.mxu1 }
 0x32f   :  { %v3749_v57 = vpop.f32.mrf.mxu0 }
 0x330   :  { %4463 = vst [vmem:[%s7048_s3 + $0x170] sm:$0xff] %v4372_v2  ;;  %v4148_v28 = vadd.f32 %v4147_v46, %v3748_v51  ;;  %v4149_v47 = vpop.f32.mrf.mxu1  ;;  %v7112_v51 = vld [vmem:[#allocation16_spill] sm:$0xff] }
 0x331   :  { %v3752_v27 = vpop.f32.mrf.mxu0 }
 0x332   :  { %v4373_v62 = vmax.f32 %v4148_v28, 0.0  ;;  %v3753_v13 = vadd.f32 %v3752_v27, %v7105_v6  ;;  %v4152_v58 = vpop.f32.mrf.mxu1 }
 0x333   :  { %v3754_v43 = vpop.f32.mrf.mxu0 }
 0x334   :  { %4464 = vst [vmem:[%s7048_s3 + $0x178] sm:$0xff] %v4373_v62  ;;  %v4153_v5 = vadd.f32 %v4152_v58, %v3753_v13  ;;  %v4154_v50 = vpop.f32.mrf.mxu1  ;;  %v7113_v13 = vld [vmem:[#allocation17_spill] sm:$0xff] }
 0x335   :  { %v3755_v59 = vpop.f32.mrf.mxu0 }
 0x336   :  { %v4374_v54 = vmax.f32 %v4153_v5, 0.0  ;;  %v3756_v11 = vadd.f32 %v3755_v59, %v7106_v60  ;;  %v4155_v10 = vpop.f32.mrf.mxu1 }
 0x337   :  { %v3757_v48 = vpop.f32.mrf.mxu0 }
 0x338   :  { %4465 = vst [vmem:[%s7048_s3 + $0x180] sm:$0xff] %v4374_v54  ;;  %v4156_v25 = vadd.f32 %v4155_v10, %v3756_v11  ;;  %v4157_v17 = vpop.f32.mrf.mxu1  ;;  %v7114_v11 = vld [vmem:[#allocation18_spill] sm:$0xff] }
 0x339   :  { %v3760_v0 = vpop.f32.mrf.mxu0 }
 0x33a   :  { %v4375_v37 = vmax.f32 %v4156_v25, 0.0  ;;  %v3761_v36 = vadd.f32 %v3760_v0, %v7107_v44  ;;  %v4160_v42 = vpop.f32.mrf.mxu1 }
 0x33b   :  { %v3762_v39 = vpop.f32.mrf.mxu0 }
 0x33c   :  { %4466 = vst [vmem:[%s7048_s3 + $0x188] sm:$0xff] %v4375_v37  ;;  %v4161_v49 = vadd.f32 %v4160_v42, %v3761_v36  ;;  %v4162_v26 = vpop.f32.mrf.mxu1  ;;  %v7115_v36 = vld [vmem:[#allocation19_spill] sm:$0xff] }
 0x33d   :  { %v3763_v19 = vpop.f32.mrf.mxu0 }
 0x33e   :  { %v4376_v45 = vmax.f32 %v4161_v49, 0.0  ;;  %v3764_v30 = vadd.f32 %v3763_v19, %v7108_v23  ;;  %v4163_v16 = vpop.f32.mrf.mxu1 }
 0x33f   :  { %v3765_v21 = vpop.f32.mrf.mxu0 }
 0x340   :  { %4467 = vst [vmem:[%s7048_s3 + $0x190] sm:$0xff] %v4376_v45  ;;  %v4164_v32 = vadd.f32 %v4163_v16, %v3764_v30  ;;  %v4165_v4 = vpop.f32.mrf.mxu1  ;;  %v7116_v30 = vld [vmem:[#allocation20_spill] sm:$0xff] }
 0x341   :  { %v3768_v52 = vpop.f32.mrf.mxu0 }
 0x342   :  { %v4377_v38 = vmax.f32 %v4164_v32, 0.0  ;;  %v3769_v33 = vadd.f32 %v3768_v52, %v7109_v41  ;;  %v4168_v40 = vpop.f32.mrf.mxu1 }
 0x343   :  { %v3770_v12 = vpop.f32.mrf.mxu0 }
 0x344   :  { %4468 = vst [vmem:[%s7048_s3 + $0x198] sm:$0xff] %v4377_v38  ;;  %v4169_v1 = vadd.f32 %v4168_v40, %v3769_v33  ;;  %v4170_v9 = vpop.f32.mrf.mxu1  ;;  %v7117_v33 = vld [vmem:[#allocation21_spill] sm:$0xff] }
 0x345   :  { %v3771_v8 = vpop.f32.mrf.mxu0 }
 0x346   :  { %v4378_v56 = vmax.f32 %v4169_v1, 0.0  ;;  %v3772_v7 = vadd.f32 %v3771_v8, %v7110_v22  ;;  %v4171_v24 = vpop.f32.mrf.mxu1 }
 0x347   :  { %v3773_v15 = vpop.f32.mrf.mxu0 }
 0x348   :  { %4469 = vst [vmem:[%s7048_s3 + $0x1a0] sm:$0xff] %v4378_v56  ;;  %v4172_v18 = vadd.f32 %v4171_v24, %v3772_v7  ;;  %v4173_v20 = vpop.f32.mrf.mxu1  ;;  %v7118_v7 = vld [vmem:[#allocation22_spill] sm:$0xff] }
 0x349   :  { %v3776_v35 = vpop.f32.mrf.mxu0 }
 0x34a   :  { %v4379_v34 = vmax.f32 %v4172_v18, 0.0  ;;  %v3777_v53 = vadd.f32 %v3776_v35, %v7111_v31  ;;  %v4176_v29 = vpop.f32.mrf.mxu1 }
 0x34b   :  { %v3778_v14 = vpop.f32.mrf.mxu0 }
 0x34c   :  { %4470 = vst [vmem:[%s7048_s3 + $0x1a8] sm:$0xff] %v4379_v34  ;;  %v4177_v63 = vadd.f32 %v4176_v29, %v3777_v53  ;;  %v4178_v3 = vpop.f32.mrf.mxu1  ;;  %v7119_v53 = vld [vmem:[#allocation23_spill] sm:$0xff] }
 0x34d   :  { %v3779_v2 = vpop.f32.mrf.mxu0 }
 0x34e   :  { %v4380_v61 = vmax.f32 %v4177_v63, 0.0  ;;  %v3780_v46 = vadd.f32 %v3779_v2, %v7112_v51  ;;  %v4179_v57 = vpop.f32.mrf.mxu1 }
 0x34f   :  { %v3781_v28 = vpop.f32.mrf.mxu0 }
 0x350   :  { %4471 = vst [vmem:[%s7048_s3 + $0x1b0] sm:$0xff] %v4380_v61  ;;  %v4180_v47 = vadd.f32 %v4179_v57, %v3780_v46  ;;  %v4181_v27 = vpop.f32.mrf.mxu1  ;;  %v7120_v46 = vld [vmem:[#allocation24_spill] sm:$0xff] }
 0x351   :  { %v3784_v62 = vpop.f32.mrf.mxu0 }
 0x352   :  { %v4381_v6 = vmax.f32 %v4180_v47, 0.0  ;;  %v3785_v58 = vadd.f32 %v3784_v62, %v7113_v13  ;;  %v4184_v43 = vpop.f32.mrf.mxu1 }
 0x353   :  { %v3786_v5 = vpop.f32.mrf.mxu0 }
 0x354   :  { %4472 = vst [vmem:[%s7048_s3 + $0x1b8] sm:$0xff] %v4381_v6  ;;  %v4185_v50 = vadd.f32 %v4184_v43, %v3785_v58  ;;  %v4186_v59 = vpop.f32.mrf.mxu1  ;;  %v7121_v58 = vld [vmem:[#allocation25_spill] sm:$0xff] }
 0x355   :  { %v3787_v54 = vpop.f32.mrf.mxu0 }
 0x356   :  { %v4382_v60 = vmax.f32 %v4185_v50, 0.0  ;;  %v3788_v10 = vadd.f32 %v3787_v54, %v7114_v11  ;;  %v4187_v48 = vpop.f32.mrf.mxu1 }
 0x357   :  { %v3789_v25 = vpop.f32.mrf.mxu0 }
 0x358   :  { %4473 = vst [vmem:[%s7048_s3 + $0x1c0] sm:$0xff] %v4382_v60  ;;  %v4188_v17 = vadd.f32 %v4187_v48, %v3788_v10  ;;  %v4189_v0 = vpop.f32.mrf.mxu1  ;;  %v7122_v10 = vld [vmem:[#allocation26_spill] sm:$0xff] }
 0x359   :  { %v3792_v37 = vpop.f32.mrf.mxu0 }
 0x35a   :  { %v4383_v44 = vmax.f32 %v4188_v17, 0.0  ;;  %v3793_v42 = vadd.f32 %v3792_v37, %v7115_v36  ;;  %v4192_v39 = vpop.f32.mrf.mxu1 }
 0x35b   :  { %v3794_v49 = vpop.f32.mrf.mxu0 }
 0x35c   :  { %4474 = vst [vmem:[%s7048_s3 + $0x1c8] sm:$0xff] %v4383_v44  ;;  %v4193_v26 = vadd.f32 %v4192_v39, %v3793_v42  ;;  %v4194_v19 = vpop.f32.mrf.mxu1  ;;  %v7123_v42 = vld [vmem:[#allocation27_spill] sm:$0xff] }
 0x35d   :  { %v3795_v45 = vpop.f32.mrf.mxu0 }
 0x35e   :  { %v4384_v23 = vmax.f32 %v4193_v26, 0.0  ;;  %v3796_v16 = vadd.f32 %v3795_v45, %v7116_v30  ;;  %v4195_v21 = vpop.f32.mrf.mxu1 }
 0x35f   :  { %v3797_v32 = vpop.f32.mrf.mxu0 }
 0x360   :  { %4475 = vst [vmem:[%s7048_s3 + $0x1d0] sm:$0xff] %v4384_v23  ;;  %v4196_v4 = vadd.f32 %v4195_v21, %v3796_v16  ;;  %v4197_v52 = vpop.f32.mrf.mxu1  ;;  %v7124_v16 = vld [vmem:[#allocation28_spill] sm:$0xff] }
 0x361   :  { %v3800_v38 = vpop.f32.mrf.mxu0 }
 0x362   :  { %v4385_v41 = vmax.f32 %v4196_v4, 0.0  ;;  %v3801_v40 = vadd.f32 %v3800_v38, %v7117_v33  ;;  %v4200_v12 = vpop.f32.mrf.mxu1 }
 0x363   :  { %v3802_v1 = vpop.f32.mrf.mxu0 }
 0x364   :  { %4476 = vst [vmem:[%s7048_s3 + $0x1d8] sm:$0xff] %v4385_v41  ;;  %v4201_v9 = vadd.f32 %v4200_v12, %v3801_v40  ;;  %v4202_v8 = vpop.f32.mrf.mxu1  ;;  %v7125_v40 = vld [vmem:[#allocation29_spill] sm:$0xff] }
 0x365   :  { %v3803_v56 = vpop.f32.mrf.mxu0 }
 0x366   :  { %v4386_v22 = vmax.f32 %v4201_v9, 0.0  ;;  %v3804_v24 = vadd.f32 %v3803_v56, %v7118_v7  ;;  %v4203_v15 = vpop.f32.mrf.mxu1 }
 0x367   :  { %v3805_v18 = vpop.f32.mrf.mxu0 }
 0x368   :  { %4477 = vst [vmem:[%s7048_s3 + $0x1e0] sm:$0xff] %v4386_v22  ;;  %v4204_v20 = vadd.f32 %v4203_v15, %v3804_v24  ;;  %v4205_v35 = vpop.f32.mrf.mxu1  ;;  %v7126_v24 = vld [vmem:[#allocation30_spill] sm:$0xff] }
 0x369   :  { %v3808_v34 = vpop.f32.mrf.mxu0 }
 0x36a   :  { %v4387_v31 = vmax.f32 %v4204_v20, 0.0  ;;  %v3809_v29 = vadd.f32 %v3808_v34, %v7119_v53  ;;  %v4208_v14 = vpop.f32.mrf.mxu1 }
 0x36b   :  { %v3810_v63 = vpop.f32.mrf.mxu0 }
 0x36c   :  { %4478 = vst [vmem:[%s7048_s3 + $0x1e8] sm:$0xff] %v4387_v31  ;;  %v4209_v3 = vadd.f32 %v4208_v14, %v3809_v29  ;;  %v4210_v2 = vpop.f32.mrf.mxu1  ;;  %v7127_v29 = vld [vmem:[#allocation31_spill] sm:$0xff] }
 0x36d   :  { %v3811_v61 = vpop.f32.mrf.mxu0 }
 0x36e   :  { %v4388_v51 = vmax.f32 %v4209_v3, 0.0  ;;  %v3812_v57 = vadd.f32 %v3811_v61, %v7120_v46  ;;  %v4211_v28 = vpop.f32.mrf.mxu1 }
 0x36f   :  { %v3813_v47 = vpop.f32.mrf.mxu0 }
 0x370   :  { %4479 = vst [vmem:[%s7048_s3 + $0x1f0] sm:$0xff] %v4388_v51  ;;  %v4212_v27 = vadd.f32 %v4211_v28, %v3812_v57  ;;  %v4213_v62 = vpop.f32.mrf.mxu1  ;;  %v7128_v57 = vld [vmem:[#allocation32_spill] sm:$0xff] }
 0x371   :  { %v3816_v6 = vpop.f32.mrf.mxu0 }
 0x372   :  { %v4389_v13 = vmax.f32 %v4212_v27, 0.0  ;;  %v3817_v43 = vadd.f32 %v3816_v6, %v7121_v58  ;;  %v4216_v5 = vpop.f32.mrf.mxu1 }
 0x373   :  { %v3818_v50 = vpop.f32.mrf.mxu0 }
 0x374   :  { %4480 = vst [vmem:[%s7048_s3 + $0x1f8] sm:$0xff] %v4389_v13  ;;  %v4217_v59 = vadd.f32 %v4216_v5, %v3817_v43  ;;  %v4218_v54 = vpop.f32.mrf.mxu1  ;;  %v7129_v43 = vld [vmem:[#allocation33_spill] sm:$0xff] }
 0x375   :  { %v3819_v60 = vpop.f32.mrf.mxu0 }
 0x376   :  { %v4390_v11 = vmax.f32 %v4217_v59, 0.0  ;;  %v3820_v48 = vadd.f32 %v3819_v60, %v7122_v10  ;;  %v4219_v25 = vpop.f32.mrf.mxu1 }
 0x377   :  { %v3821_v17 = vpop.f32.mrf.mxu0 }
 0x378   :  { %4481 = vst [vmem:[%s7048_s3 + $0x200] sm:$0xff] %v4390_v11  ;;  %v4220_v0 = vadd.f32 %v4219_v25, %v3820_v48  ;;  %v4221_v37 = vpop.f32.mrf.mxu1  ;;  %v7130_v48 = vld [vmem:[#allocation34_spill] sm:$0xff] }
 0x379   :  { %v3824_v44 = vpop.f32.mrf.mxu0 }
 0x37a   :  { %v4391_v36 = vmax.f32 %v4220_v0, 0.0  ;;  %v3825_v39 = vadd.f32 %v3824_v44, %v7123_v42  ;;  %v4224_v49 = vpop.f32.mrf.mxu1 }
 0x37b   :  { %v3826_v26 = vpop.f32.mrf.mxu0 }
 0x37c   :  { %4482 = vst [vmem:[%s7048_s3 + $0x208] sm:$0xff] %v4391_v36  ;;  %v4225_v19 = vadd.f32 %v4224_v49, %v3825_v39  ;;  %v4226_v45 = vpop.f32.mrf.mxu1  ;;  %v7131_v39 = vld [vmem:[#allocation35_spill] sm:$0xff] }
 0x37d   :  { %v3827_v23 = vpop.f32.mrf.mxu0 }
 0x37e   :  { %v4392_v30 = vmax.f32 %v4225_v19, 0.0  ;;  %v3828_v21 = vadd.f32 %v3827_v23, %v7124_v16  ;;  %v4227_v32 = vpop.f32.mrf.mxu1 }
 0x37f   :  { %v3829_v4 = vpop.f32.mrf.mxu0 }
 0x380   :  { %4483 = vst [vmem:[%s7048_s3 + $0x210] sm:$0xff] %v4392_v30  ;;  %v4228_v52 = vadd.f32 %v4227_v32, %v3828_v21  ;;  %v4229_v38 = vpop.f32.mrf.mxu1  ;;  %v7132_v21 = vld [vmem:[#allocation36_spill] sm:$0xff] }
 0x381   :  { %v3832_v41 = vpop.f32.mrf.mxu0 }
 0x382   :  { %v4393_v33 = vmax.f32 %v4228_v52, 0.0  ;;  %v3833_v12 = vadd.f32 %v3832_v41, %v7125_v40  ;;  %v4232_v1 = vpop.f32.mrf.mxu1 }
 0x383   :  { %v3834_v9 = vpop.f32.mrf.mxu0 }
 0x384   :  { %4484 = vst [vmem:[%s7048_s3 + $0x218] sm:$0xff] %v4393_v33  ;;  %v4233_v8 = vadd.f32 %v4232_v1, %v3833_v12  ;;  %v4234_v56 = vpop.f32.mrf.mxu1  ;;  %v7133_v12 = vld [vmem:[#allocation37_spill] sm:$0xff] }
 0x385   :  { %v3835_v22 = vpop.f32.mrf.mxu0 }
 0x386   :  { %v4394_v7 = vmax.f32 %v4233_v8, 0.0  ;;  %v3836_v15 = vadd.f32 %v3835_v22, %v7126_v24  ;;  %v4235_v18 = vpop.f32.mrf.mxu1 }
 0x387   :  { %v3837_v20 = vpop.f32.mrf.mxu0 }
 0x388   :  { %4485 = vst [vmem:[%s7048_s3 + $0x220] sm:$0xff] %v4394_v7  ;;  %v4236_v35 = vadd.f32 %v4235_v18, %v3836_v15  ;;  %v4237_v34 = vpop.f32.mrf.mxu1  ;;  %v7134_v15 = vld [vmem:[#allocation38_spill] sm:$0xff] }
 0x389   :  { %v3840_v31 = vpop.f32.mrf.mxu0 }
 0x38a   :  { %v4395_v53 = vmax.f32 %v4236_v35, 0.0  ;;  %v3841_v14 = vadd.f32 %v3840_v31, %v7127_v29  ;;  %v4240_v63 = vpop.f32.mrf.mxu1 }
 0x38b   :  { %v3842_v3 = vpop.f32.mrf.mxu0 }
 0x38c   :  { %4486 = vst [vmem:[%s7048_s3 + $0x228] sm:$0xff] %v4395_v53  ;;  %v4241_v2 = vadd.f32 %v4240_v63, %v3841_v14  ;;  %v4242_v61 = vpop.f32.mrf.mxu1  ;;  %v7135_v14 = vld [vmem:[#allocation39_spill] sm:$0xff] }
 0x38d   :  { %v3843_v51 = vpop.f32.mrf.mxu0 }
 0x38e   :  { %v4396_v46 = vmax.f32 %v4241_v2, 0.0  ;;  %v3844_v28 = vadd.f32 %v3843_v51, %v7128_v57  ;;  %v4243_v47 = vpop.f32.mrf.mxu1 }
 0x38f   :  { %v3845_v27 = vpop.f32.mrf.mxu0 }
 0x390   :  { %4487 = vst [vmem:[%s7048_s3 + $0x230] sm:$0xff] %v4396_v46  ;;  %v4244_v62 = vadd.f32 %v4243_v47, %v3844_v28  ;;  %v4245_v6 = vpop.f32.mrf.mxu1  ;;  %v7136_v28 = vld [vmem:[#allocation40_spill] sm:$0xff] }
 0x391   :  { %v3848_v13 = vpop.f32.mrf.mxu0 }
 0x392   :  { %v4397_v58 = vmax.f32 %v4244_v62, 0.0  ;;  %v3849_v5 = vadd.f32 %v3848_v13, %v7129_v43  ;;  %v4248_v50 = vpop.f32.mrf.mxu1 }
 0x393   :  { %v3850_v59 = vpop.f32.mrf.mxu0 }
 0x394   :  { %4488 = vst [vmem:[%s7048_s3 + $0x238] sm:$0xff] %v4397_v58  ;;  %v4249_v54 = vadd.f32 %v4248_v50, %v3849_v5  ;;  %v4250_v60 = vpop.f32.mrf.mxu1  ;;  %v7137_v5 = vld [vmem:[#allocation41_spill] sm:$0xff] }
 0x395   :  { %v3851_v11 = vpop.f32.mrf.mxu0 }
 0x396   :  { %v4398_v10 = vmax.f32 %v4249_v54, 0.0  ;;  %v3852_v25 = vadd.f32 %v3851_v11, %v7130_v48  ;;  %v4251_v17 = vpop.f32.mrf.mxu1 }
 0x397   :  { %v3853_v0 = vpop.f32.mrf.mxu0 }
 0x398   :  { %4489 = vst [vmem:[%s7048_s3 + $0x240] sm:$0xff] %v4398_v10  ;;  %v4252_v37 = vadd.f32 %v4251_v17, %v3852_v25  ;;  %v4253_v44 = vpop.f32.mrf.mxu1  ;;  %v7138_v25 = vld [vmem:[#allocation42_spill] sm:$0xff] }
 0x399   :  { %v3856_v36 = vpop.f32.mrf.mxu0 }
 0x39a   :  { %v4399_v42 = vmax.f32 %v4252_v37, 0.0  ;;  %v3857_v49 = vadd.f32 %v3856_v36, %v7131_v39  ;;  %v4256_v26 = vpop.f32.mrf.mxu1 }
 0x39b   :  { %v3858_v19 = vpop.f32.mrf.mxu0 }
 0x39c   :  { %4490 = vst [vmem:[%s7048_s3 + $0x248] sm:$0xff] %v4399_v42  ;;  %v4257_v45 = vadd.f32 %v4256_v26, %v3857_v49  ;;  %v4258_v23 = vpop.f32.mrf.mxu1  ;;  %v7139_v49 = vld [vmem:[#allocation43_spill] sm:$0xff] }
 0x39d   :  { %v3859_v30 = vpop.f32.mrf.mxu0 }
 0x39e   :  { %v4400_v16 = vmax.f32 %v4257_v45, 0.0  ;;  %v3860_v32 = vadd.f32 %v3859_v30, %v7132_v21  ;;  %v4259_v4 = vpop.f32.mrf.mxu1 }
 0x39f   :  { %v3861_v52 = vpop.f32.mrf.mxu0 }
 0x3a0   :  { %4491 = vst [vmem:[%s7048_s3 + $0x250] sm:$0xff] %v4400_v16  ;;  %v4260_v38 = vadd.f32 %v4259_v4, %v3860_v32  ;;  %v4261_v41 = vpop.f32.mrf.mxu1  ;;  %v7140_v32 = vld [vmem:[#allocation44_spill] sm:$0xff] }
 0x3a1   :  { %v3864_v33 = vpop.f32.mrf.mxu0 }
 0x3a2   :  { %v4401_v40 = vmax.f32 %v4260_v38, 0.0  ;;  %v3865_v1 = vadd.f32 %v3864_v33, %v7133_v12  ;;  %v4264_v9 = vpop.f32.mrf.mxu1 }
 0x3a3   :  { %v3866_v8 = vpop.f32.mrf.mxu0 }
 0x3a4   :  { %4492 = vst [vmem:[%s7048_s3 + $0x258] sm:$0xff] %v4401_v40  ;;  %v4265_v56 = vadd.f32 %v4264_v9, %v3865_v1  ;;  %v4266_v22 = vpop.f32.mrf.mxu1  ;;  %v7141_v1 = vld [vmem:[#allocation45_spill] sm:$0xff] }
 0x3a5   :  { %v3867_v7 = vpop.f32.mrf.mxu0 }
 0x3a6   :  { %v4402_v24 = vmax.f32 %v4265_v56, 0.0  ;;  %v3868_v18 = vadd.f32 %v3867_v7, %v7134_v15  ;;  %v4267_v20 = vpop.f32.mrf.mxu1 }
 0x3a7   :  { %v3869_v35 = vpop.f32.mrf.mxu0 }
 0x3a8   :  { %4493 = vst [vmem:[%s7048_s3 + $0x260] sm:$0xff] %v4402_v24  ;;  %v4268_v34 = vadd.f32 %v4267_v20, %v3868_v18  ;;  %v4269_v31 = vpop.f32.mrf.mxu1  ;;  %v7142_v18 = vld [vmem:[#allocation46_spill] sm:$0xff] }
 0x3a9   :  { %v3872_v53 = vpop.f32.mrf.mxu0 }
 0x3aa   :  { %v4403_v29 = vmax.f32 %v4268_v34, 0.0  ;;  %v3873_v63 = vadd.f32 %v3872_v53, %v7135_v14  ;;  %v4272_v3 = vpop.f32.mrf.mxu1 }
 0x3ab   :  { %v3874_v2 = vpop.f32.mrf.mxu0 }
 0x3ac   :  { %4494 = vst [vmem:[%s7048_s3 + $0x268] sm:$0xff] %v4403_v29  ;;  %v4273_v61 = vadd.f32 %v4272_v3, %v3873_v63  ;;  %v4274_v51 = vpop.f32.mrf.mxu1  ;;  %v7143_v63 = vld [vmem:[#allocation47_spill] sm:$0xff] }
 0x3ad   :  { %v3875_v46 = vpop.f32.mrf.mxu0 }
 0x3ae   :  { %v4404_v57 = vmax.f32 %v4273_v61, 0.0  ;;  %v3876_v47 = vadd.f32 %v3875_v46, %v7136_v28  ;;  %v4275_v27 = vpop.f32.mrf.mxu1 }
 0x3af   :  { %v3877_v62 = vpop.f32.mrf.mxu0 }
 0x3b0   :  { %4495 = vst [vmem:[%s7048_s3 + $0x270] sm:$0xff] %v4404_v57  ;;  %v4276_v6 = vadd.f32 %v4275_v27, %v3876_v47  ;;  %v4277_v13 = vpop.f32.mrf.mxu1  ;;  %v7144_v47 = vld [vmem:[#allocation48_spill] sm:$0xff] }
 0x3b1   :  { %v3880_v58 = vpop.f32.mrf.mxu0 }
 0x3b2   :  { %v4405_v43 = vmax.f32 %v4276_v6, 0.0  ;;  %v3881_v50 = vadd.f32 %v3880_v58, %v7137_v5  ;;  %v4280_v59 = vpop.f32.mrf.mxu1 }
 0x3b3   :  { %v3882_v54 = vpop.f32.mrf.mxu0 }
 0x3b4   :  { %4496 = vst [vmem:[%s7048_s3 + $0x278] sm:$0xff] %v4405_v43  ;;  %v4281_v60 = vadd.f32 %v4280_v59, %v3881_v50  ;;  %v4282_v11 = vpop.f32.mrf.mxu1  ;;  %v7145_v50 = vld [vmem:[#allocation49_spill] sm:$0xff] }
 0x3b5   :  { %v3883_v10 = vpop.f32.mrf.mxu0 }
 0x3b6   :  { %v4406_v48 = vmax.f32 %v4281_v60, 0.0  ;;  %v3884_v17 = vadd.f32 %v3883_v10, %v7138_v25  ;;  %v4283_v0 = vpop.f32.mrf.mxu1 }
 0x3b7   :  { %v3885_v37 = vpop.f32.mrf.mxu0 }
 0x3b8   :  { %4497 = vst [vmem:[%s7048_s3 + $0x280] sm:$0xff] %v4406_v48  ;;  %v4284_v44 = vadd.f32 %v4283_v0, %v3884_v17  ;;  %v4285_v36 = vpop.f32.mrf.mxu1 }
 0x3b9   :  { %v3888_v42 = vpop.f32.mrf.mxu0 }
 0x3ba   :  { %v4407_v39 = vmax.f32 %v4284_v44, 0.0  ;;  %v3889_v26 = vadd.f32 %v3888_v42, %v7139_v49  ;;  %v4288_v19 = vpop.f32.mrf.mxu1  ;;  %v7146_v49 = vld [vmem:[#allocation50_spill] sm:$0xff] }
 0x3bb   :  { %v3890_v45 = vpop.f32.mrf.mxu0 }
 0x3bc   :  { %4498 = vst [vmem:[%s7048_s3 + $0x288] sm:$0xff] %v4407_v39  ;;  %v4289_v23 = vadd.f32 %v4288_v19, %v3889_v26  ;;  %v4290_v30 = vpop.f32.mrf.mxu1 }
 0x3bd   :  { %v3891_v16 = vpop.f32.mrf.mxu0 }
 0x3be   :  { %v4408_v21 = vmax.f32 %v4289_v23, 0.0  ;;  %v3892_v4 = vadd.f32 %v3891_v16, %v7140_v32  ;;  %v4291_v52 = vpop.f32.mrf.mxu1 }
 0x3bf   :  { %v3893_v38 = vpop.f32.mrf.mxu0 }
 0x3c0   :  { %4499 = vst [vmem:[%s7048_s3 + $0x290] sm:$0xff] %v4408_v21  ;;  %v4292_v41 = vadd.f32 %v4291_v52, %v3892_v4  ;;  %v4293_v33 = vpop.f32.mrf.mxu1 }
 0x3c1   :  { %v3896_v40 = vpop.f32.mrf.mxu0 }
 0x3c2   :  { %v4409_v12 = vmax.f32 %v4292_v41, 0.0  ;;  %v3897_v9 = vadd.f32 %v3896_v40, %v7141_v1  ;;  %v4296_v8 = vpop.f32.mrf.mxu1 }
 0x3c3   :  { %v3898_v56 = vpop.f32.mrf.mxu0 }
 0x3c4   :  { %4500 = vst [vmem:[%s7048_s3 + $0x298] sm:$0xff] %v4409_v12  ;;  %v4297_v22 = vadd.f32 %v4296_v8, %v3897_v9  ;;  %v4298_v7 = vpop.f32.mrf.mxu1 }
 0x3c5   :  { %v3899_v24 = vpop.f32.mrf.mxu0 }
 0x3c6   :  { %v4410_v15 = vmax.f32 %v4297_v22, 0.0  ;;  %v3900_v20 = vadd.f32 %v3899_v24, %v7142_v18  ;;  %v4299_v35 = vpop.f32.mrf.mxu1 }
 0x3c7   :  { %v3901_v34 = vpop.f32.mrf.mxu0 }
 0x3c8   :  { %4501 = vst [vmem:[%s7048_s3 + $0x2a0] sm:$0xff] %v4410_v15  ;;  %v4300_v31 = vadd.f32 %v4299_v35, %v3900_v20  ;;  %v4301_v53 = vpop.f32.mrf.mxu1 }
 0x3c9   :  { %v3904_v29 = vpop.f32.mrf.mxu0 }
 0x3ca   :  { %v4411_v14 = vmax.f32 %v4300_v31, 0.0  ;;  %v3905_v3 = vadd.f32 %v3904_v29, %v7143_v63  ;;  %v4304_v2 = vpop.f32.mrf.mxu1 }
 0x3cb   :  { %v3906_v61 = vpop.f32.mrf.mxu0 }
 0x3cc   :  { %4502 = vst [vmem:[%s7048_s3 + $0x2a8] sm:$0xff] %v4411_v14  ;;  %v4305_v51 = vadd.f32 %v4304_v2, %v3905_v3  ;;  %v4306_v46 = vpop.f32.mrf.mxu1 }
 0x3cd   :  { %v3907_v57 = vpop.f32.mrf.mxu0 }
 0x3ce   :  { %v4412_v28 = vmax.f32 %v4305_v51, 0.0  ;;  %v3908_v27 = vadd.f32 %v3907_v57, %v7144_v47  ;;  %v4307_v62 = vpop.f32.mrf.mxu1 }
 0x3cf   :  { %v3909_v6 = vpop.f32.mrf.mxu0 }
 0x3d0   :  { %4503 = vst [vmem:[%s7048_s3 + $0x2b0] sm:$0xff] %v4412_v28  ;;  %v4308_v13 = vadd.f32 %v4307_v62, %v3908_v27  ;;  %v4309_v58 = vpop.f32.mrf.mxu1 }
 0x3d1   :  { %v3912_v43 = vpop.f32.mrf.mxu0 }
 0x3d2   :  { %v4413_v5 = vmax.f32 %v4308_v13, 0.0  ;;  %v3913_v59 = vadd.f32 %v3912_v43, %v7145_v50  ;;  %v4312_v54 = vpop.f32.mrf.mxu1 }
 0x3d3   :  { %v3914_v60 = vpop.f32.mrf.mxu0 }
 0x3d4   :  { %4504 = vst [vmem:[%s7048_s3 + $0x2b8] sm:$0xff] %v4413_v5  ;;  %v4313_v11 = vadd.f32 %v4312_v54, %v3913_v59  ;;  %v4314_v10 = vpop.f32.mrf.mxu1 }
 0x3d5   :  { %v3915_v48 = vpop.f32.mrf.mxu0 }
 0x3d6   :  { %v4414_v25 = vmax.f32 %v4313_v11, 0.0  ;;  %v3916_v17 = vadd.f32 %v3915_v48, %v6431_v55  ;;  %v4315_v0 = vpop.f32.mrf.mxu1 }
 0x3d7   :  { %v3917_v37 = vpop.f32.mrf.mxu0 }
 0x3d8   :  { %4505 = vst [vmem:[%s7048_s3 + $0x2c0] sm:$0xff] %v4414_v25  ;;  %v4316_v44 = vadd.f32 %v4315_v0, %v3916_v17  ;;  %v4317_v36 = vpop.f32.mrf.mxu1 }
 0x3d9   :  { %v3920_v42 = vpop.f32.mrf.mxu0 }
 0x3da   :  { %v4415_v39 = vmax.f32 %v4316_v44, 0.0  ;;  %v3921_v26 = vadd.f32 %v3920_v42, %v7146_v49  ;;  %v4320_v19 = vpop.f32.mrf.mxu1 }
 0x3db   :  { %v3922_v45 = vpop.f32.mrf.mxu0 }
 0x3dc   :  { %4506 = vst [vmem:[%s7048_s3 + $0x2c8] sm:$0xff] %v4415_v39  ;;  %v4321_v23 = vadd.f32 %v4320_v19, %v3921_v26  ;;  %v4322_v55 = vpop.f32.mrf.mxu1 }
 0x3dd   :  { %v3923_v30 = vpop.f32.mrf.mxu0 }
 0x3de   :  { %v4416_v16 = vmax.f32 %v4321_v23, 0.0  ;;  %v4323_v21 = vpop.f32.mrf.mxu1 }
 0x3df   :  { %v3924_v32 = vpop.f32.mrf.mxu0 }
 0x3e0   :  { %4507 = vst [vmem:[%s7048_s3 + $0x2d0] sm:$0xff] %v4416_v16  ;;  %v4324_v4 = vpop.f32.mrf.mxu1 }

// kernel: dis_tan_forward.11
= control target key start
LH: loop header
LB: loop body
LE: loop exit
PB: predicated region body
PF: predicated region fallthrough
CT: control target
= control target key end

     0   :  { %vm1305_vm2 = vcmask 162816   ;;  %s3770_s0 = inlined_call_operand.vmem [shape: f32[722,20], index: 0, kind: input, shape index: {}]   ;;  %s3771_s1 = inlined_call_operand.vmem [shape: f32[722,20], index: 1, kind: input, shape index: {}]   ;;  %s3772_s2 = inlined_call_operand.vmem [shape: f32[1,20], index: 2, kind: input, shape index: {}]   ;;  %s3773_s3 = inlined_call_operand.vmem [shape: f32[1,20], index: 3, kind: input, shape index: {}]   ;;  %s3774_s4 = inlined_call_operand.vmem [shape: f32[722,20], index: 4, kind: output, shape index: {}]  }
   0x1   :  { %v17_v0 = vld [vmem:[%s3770_s0] sm:$0xff]  ;;  %v18_v5 = vld [vmem:[%s3770_s0 + $0x8] sm:$0xff]  ;;  %v19_v10 = vld [vmem:[%s3770_s0 + $0x10] sm:$0xff] }
   0x2   :  { %v1621_v1 = vld [vmem:[%s3772_s2] ss:$0 sm:$0xff]  ;;  %v207_v6 = vld [vmem:[%s3771_s1 + $0x8] sm:$0xff]  ;;  %v208_v11 = vld [vmem:[%s3771_s1 + $0x10] sm:$0xff] }
   0x3   :  { %v206_v2 = vld [vmem:[%s3771_s1] sm:$0xff]  ;;  %v115_v3 = vsub.f32 %v17_v0, %v1621_v1  ;;  %v116_v8 = vsub.f32 %v18_v5, %v1621_v1  ;;  %v20_v12 = vld [vmem:[%s3770_s0 + $0x18] sm:$0xff]  ;;  %v117_v14 = vsub.f32 %v19_v10, %v1621_v1  ;;  %v22_v24 = vld [vmem:[%s3770_s0 + $0x28] sm:$0xff] }
   0x4   :  { %v1630_v4 = vld [vmem:[%s3773_s3] ss:$0 sm:$0xff]  ;;  %v118_v16 = vsub.f32 %v20_v12, %v1621_v1  ;;  %v209_v17 = vld [vmem:[%s3771_s1 + $0x18] sm:$0xff]  ;;  %v211_v25 = vld [vmem:[%s3771_s1 + $0x28] sm:$0xff]  ;;  %v120_v35 = vsub.f32 %v22_v24, %v1621_v1 }
   0x5   :  { %v304_v7 = vsub.f32 %v206_v2, %v1630_v4  ;;  %v305_v9 = vsub.f32 %v207_v6, %v1630_v4  ;;  %v395_v13 = vmul.f32 %v115_v3, %v115_v3  ;;  %v306_v15 = vsub.f32 %v208_v11, %v1630_v4  ;;  %v21_v18 = vld [vmem:[%s3770_s0 + $0x20] sm:$0xff]  ;;  %v23_v37 = vld [vmem:[%s3770_s0 + $0x30] sm:$0xff]  ;;  %v24_v39 = vld [vmem:[%s3770_s0 + $0x38] sm:$0xff] }
   0x6   :  { %v396_v20 = vmul.f32 %v116_v8, %v116_v8  ;;  %v307_v22 = vsub.f32 %v209_v17, %v1630_v4  ;;  %v210_v23 = vld [vmem:[%s3771_s1 + $0x20] sm:$0xff]  ;;  %v397_v26 = vmul.f32 %v117_v14, %v117_v14  ;;  %v398_v28 = vmul.f32 %v118_v16, %v118_v16  ;;  %v212_v38 = vld [vmem:[%s3771_s1 + $0x30] sm:$0xff]  ;;  %v213_v40 = vld [vmem:[%s3771_s1 + $0x38] sm:$0xff] }
   0x7   :  { %v486_v19 = vmul.f32 %v304_v7, %v304_v7  ;;  %v487_v21 = vmul.f32 %v305_v9, %v305_v9  ;;  %v488_v27 = vmul.f32 %v306_v15, %v306_v15  ;;  %v119_v32 = vsub.f32 %v21_v18, %v1621_v1  ;;  %v25_v50 = vld [vmem:[%s3770_s0 + $0x40] sm:$0xff]  ;;  %v26_v60 = vld [vmem:[%s3770_s0 + $0x48] sm:$0xff]  ;;  %v27_v63 = vld [vmem:[%s3770_s0 + $0x50] sm:$0xff] }
   0x8   :  { %v489_v31 = vmul.f32 %v307_v22, %v307_v22  ;;  %v308_v34 = vsub.f32 %v210_v23, %v1630_v4  ;;  %v309_v36 = vsub.f32 %v211_v25, %v1630_v4  ;;  %v400_v44 = vmul.f32 %v120_v35, %v120_v35  ;;  %v214_v51 = vld [vmem:[%s3771_s1 + $0x40] sm:$0xff]  ;;  %v215_v62 = vld [vmem:[%s3771_s1 + $0x48] sm:$0xff]  ;;  %v216_v0 = vld [vmem:[%s3771_s1 + $0x50] sm:$0xff] }
   0x9   :  { %v1669_v29 = vadd.f32 %v486_v19, %v395_v13  ;;  %v1671_v30 = vadd.f32 %v487_v21, %v396_v20  ;;  %v1674_v33 = vadd.f32 %v488_v27, %v397_v26  ;;  %v399_v41 = vmul.f32 %v119_v32, %v119_v32  ;;  %v28_v16 = vld [vmem:[%s3770_s0 + $0x58] sm:$0xff] }
   0xa   :  { %v1694_v42 = vadd.f32 %v489_v31, %v398_v28  ;;  %v490_v43 = vmul.f32 %v308_v34, %v308_v34  ;;  %v491_v45 = vmul.f32 %v309_v36, %v309_v36  ;;  %v121_v46 = vsub.f32 %v23_v37, %v1621_v1  ;;  %v217_v31 = vld [vmem:[%s3771_s1 + $0x58] sm:$0xff] }
   0xb   :  { %1404 = vrsqrt.f32 %v1669_v29  ;;  %v310_v47 = vsub.f32 %v212_v38, %v1630_v4  ;;  %v122_v48 = vsub.f32 %v24_v39, %v1621_v1  ;;  %v311_v49 = vsub.f32 %v213_v40, %v1630_v4 }
   0xc   :  { %1406 = vrsqrt.f32 %v1671_v30  ;;  %vm670_vm0 = vcmp.eq.f32.partialorder %v1669_v29, inf  ;;  %vm672_vm1 = vcmp.eq.f32.partialorder %v1669_v29, 0.0  ;;  %v1709_v52 = vadd.f32 %v490_v43, %v399_v41 }
   0xd   :  { %1408 = vrsqrt.f32 %v1674_v33  ;;  %v1711_v53 = vadd.f32 %v491_v45, %v400_v44  ;;  %v401_v54 = vmul.f32 %v121_v46, %v121_v46  ;;  %v492_v55 = vmul.f32 %v310_v47, %v310_v47  ;;  %v218_v45 = vld [vmem:[%s3771_s1 + $0x60] sm:$0xff] }
   0xe   :  { %1410 = vrsqrt.f32 %v1694_v42  ;;  %v402_v56 = vmul.f32 %v122_v48, %v122_v48  ;;  %v493_v57 = vmul.f32 %v311_v49, %v311_v49  ;;  %v123_v58 = vsub.f32 %v25_v50, %v1621_v1  ;;  %v30_v48 = vld [vmem:[%s3770_s0 + $0x68] sm:$0xff] }
   0xf   :  { %v312_v59 = vsub.f32 %v214_v51, %v1630_v4  ;;  %v673_v61 = vand.u32 2147483648, %v1669_v29  ;;  %vm677_vm3 = vcmp.eq.f32.partialorder %v1671_v30, inf  ;;  %vm679_vm4 = vcmp.eq.f32.partialorder %v1671_v30, 0.0  ;;  %v219_v49 = vld [vmem:[%s3771_s1 + $0x68] sm:$0xff] }
  0x10   :  { %1412 = vrsqrt.f32 %v1709_v52  ;;  %v680_v2 = vand.u32 2147483648, %v1671_v30  ;;  %vm684_vm5 = vcmp.eq.f32.partialorder %v1674_v33, inf  ;;  %vm686_vm6 = vcmp.eq.f32.partialorder %v1674_v33, 0.0 }
  0x11   :  { %1414 = vrsqrt.f32 %v1711_v53  ;;  %v1735_v3 = vadd.f32 %v492_v55, %v401_v54  ;;  %v1737_v5 = vadd.f32 %v493_v57, %v402_v56  ;;  %v403_v6 = vmul.f32 %v123_v58, %v123_v58 }
  0x12   :  { %v494_v7 = vmul.f32 %v312_v59, %v312_v59  ;;  %v124_v8 = vsub.f32 %v26_v60, %v1621_v1  ;;  %v313_v9 = vsub.f32 %v215_v62, %v1630_v4  ;;  %v125_v10 = vsub.f32 %v27_v63, %v1621_v1  ;;  %v31_v63 = vld [vmem:[%s3770_s0 + $0x70] sm:$0xff] }
  0x13   :  { %v314_v11 = vsub.f32 %v216_v0, %v1630_v4  ;;  %v687_v12 = vand.u32 2147483648, %v1674_v33  ;;  %vm691_vm7 = vcmp.eq.f32.partialorder %v1694_v42, inf  ;;  %vm693_vm8 = vcmp.eq.f32.partialorder %v1694_v42, 0.0 }
  0x14   :  { %1416 = vrsqrt.f32 %v1735_v3  ;;  %v694_v14 = vand.u32 2147483648, %v1694_v42  ;;  %vm698_vm9 = vcmp.eq.f32.partialorder %v1709_v52, inf  ;;  %v701_v15 = vand.u32 2147483648, %v1709_v52 }
  0x15   :  { %1418 = vrsqrt.f32 %v1737_v5  ;;  %vm700_vm10 = vcmp.eq.f32.partialorder %v1709_v52, 0.0  ;;  %v1756_v19 = vadd.f32 %v494_v7, %v403_v6  ;;  %v404_v20 = vmul.f32 %v124_v8, %v124_v8 }
  0x16   :  { %v495_v21 = vmul.f32 %v313_v9, %v313_v9  ;;  %vm705_vm11 = vcmp.eq.f32.partialorder %v1711_v53, inf  ;;  %v405_v24 = vmul.f32 %v125_v10, %v125_v10  ;;  %v496_v25 = vmul.f32 %v314_v11, %v314_v11  ;;  %v220_v9 = vld [vmem:[%s3771_s1 + $0x70] sm:$0xff] }
  0x17   :  { %1420 = vrsqrt.f32 %v1756_v19  ;;  %v126_v28 = vsub.f32 %v28_v16, %v1621_v1  ;;  %vm707_vm12 = vcmp.eq.f32.partialorder %v1711_v53, 0.0  ;;  %v708_v35 = vand.u32 2147483648, %v1711_v53 }
  0x18   :  { %v1405_v13 = vpop.eup %1404  ;;  %v1785_v38 = vadd.f32 %v495_v21, %v404_v20  ;;  %v1787_v39 = vadd.f32 %v496_v25, %v405_v24  ;;  %vm712_vm13 = vcmp.eq.f32.partialorder %v1735_v3, inf  ;;  %vm714_vm14 = vcmp.eq.f32.partialorder %v1735_v3, 0.0  ;;  %v32_v20 = vld [vmem:[%s3770_s0 + $0x78] sm:$0xff]  ;;  %v33_v25 = vld [vmem:[%s3770_s0 + $0x80] sm:$0xff] }
  0x19   :  { %v1407_v17 = vpop.eup %1406  ;;  %v669_v18 = vmul.f32 %v1405_v13, %v1669_v29  ;;  %v715_v43 = vand.u32 2147483648, %v1735_v3  ;;  %v406_v44 = vmul.f32 %v126_v28, %v126_v28  ;;  %vm719_vm15 = vcmp.eq.f32.partialorder %v1737_v5, inf  ;;  %v221_v24 = vld [vmem:[%s3771_s1 + $0x78] sm:$0xff] }
  0x1a   :  { %v1409_v22 = vpop.eup %1408  ;;  %v676_v23 = vmul.f32 %v1407_v17, %v1671_v30  ;;  %1422 = vrsqrt.f32 %v1785_v38  ;;  %v722_v55 = vand.u32 2147483648, %v1737_v5  ;;  %v316_v59 = vsub.f32 %v218_v45, %v1630_v4 }
  0x1b   :  { %v671_v26 = vsel %vm670_vm0, %v1669_v29, %v669_v18  ;;  %v683_v27 = vmul.f32 %v1409_v22, %v1674_v33  ;;  %v1411_v36 = vpop.eup %1410  ;;  %vm721_vm0 = vcmp.eq.f32.partialorder %v1737_v5, 0.0  ;;  %1424 = vrsqrt.f32 %v1787_v39 }
  0x1c   :  { %v674_v32 = vsel %vm672_vm1, %v673_v61, %v671_v26  ;;  %v678_v34 = vsel %vm677_vm3, %v1671_v30, %v676_v23  ;;  %v690_v41 = vmul.f32 %v1411_v36, %v1694_v42  ;;  %v315_v30 = vsub.f32 %v217_v31, %v1630_v4 }
  0x1d   :  { %1306 = vst.msk [vmem:[%s3774_s4] sm:$0xff] %vm1305_vm2, %v674_v32  ;;  %v681_v37 = vsel %vm679_vm4, %v680_v2, %v678_v34  ;;  %v685_v29 = vsel %vm684_vm5, %v1674_v33, %v683_v27  ;;  %v29_v33 = vld [vmem:[%s3770_s0 + $0x60] sm:$0xff]  ;;  %v1413_v46 = vpop.eup %1412  ;;  %vm726_vm1 = vcmp.eq.f32.partialorder %v1756_v19, inf  ;;  %v128_v61 = vsub.f32 %v30_v48, %v1621_v1 }
  0x1e   :  { %1307 = vst.msk [vmem:[%s3774_s4 + $0x8] sm:$0xff] %vm1305_vm2, %v681_v37  ;;  %v688_v40 = vsel %vm686_vm6, %v687_v12, %v685_v29  ;;  %v692_v47 = vsel %vm691_vm7, %v1694_v42, %v690_v41  ;;  %v1415_v50 = vpop.eup %1414  ;;  %v697_v54 = vmul.f32 %v1413_v46, %v1709_v52  ;;  %v497_v56 = vmul.f32 %v315_v30, %v315_v30 }
  0x1f   :  { %1308 = vst.msk [vmem:[%s3774_s4 + $0x10] sm:$0xff] %vm1305_vm2, %v688_v40  ;;  %v695_v51 = vsel %vm693_vm8, %v694_v14, %v692_v47  ;;  %v704_v57 = vmul.f32 %v1415_v50, %v1711_v53  ;;  %v127_v58 = vsub.f32 %v29_v33, %v1621_v1  ;;  %v317_v62 = vsub.f32 %v219_v49, %v1630_v4  ;;  %v34_v49 = vld [vmem:[%s3770_s0 + $0x88] sm:$0xff] }
  0x20   :  { %1309 = vst.msk [vmem:[%s3774_s4 + $0x18] sm:$0xff] %vm1305_vm2, %v695_v51  ;;  %v699_v42 = vsel %vm698_vm9, %v1709_v52, %v697_v54  ;;  %v1838_v60 = vadd.f32 %v497_v56, %v406_v44  ;;  %v498_v8 = vmul.f32 %v316_v59, %v316_v59  ;;  %vm728_vm3 = vcmp.eq.f32.partialorder %v1756_v19, 0.0  ;;  %v223_v50 = vld [vmem:[%s3771_s1 + $0x88] sm:$0xff] }
  0x21   :  { %v1417_v0 = vpop.eup %1416  ;;  %v702_v2 = vsel %vm700_vm10, %v701_v15, %v699_v42  ;;  %v706_v6 = vsel %vm705_vm11, %v1711_v53, %v704_v57  ;;  %v407_v7 = vmul.f32 %v127_v58, %v127_v58  ;;  %v729_v13 = vand.u32 2147483648, %v1756_v19  ;;  %v35_v42 = vld [vmem:[%s3770_s0 + $0x90] sm:$0xff] }
  0x22   :  { %v1419_v10 = vpop.eup %1418  ;;  %1310 = vst.msk [vmem:[%s3774_s4 + $0x20] sm:$0xff] %vm1305_vm2, %v702_v2  ;;  %v709_v52 = vsel %vm707_vm12, %v708_v35, %v706_v6  ;;  %v711_v11 = vmul.f32 %v1417_v0, %v1735_v3  ;;  %1426 = vrsqrt.f32 %v1838_v60  ;;  %v129_v53 = vsub.f32 %v31_v63, %v1621_v1  ;;  %v36_v63 = vld [vmem:[%s3770_s0 + $0x98] sm:$0xff] }
  0x23   :  { %1311 = vst.msk [vmem:[%s3774_s4 + $0x28] sm:$0xff] %vm1305_vm2, %v709_v52  ;;  %v718_v12 = vmul.f32 %v1419_v10, %v1737_v5  ;;  %v1870_v14 = vadd.f32 %v498_v8, %v407_v7  ;;  %v408_v16 = vmul.f32 %v128_v61, %v128_v61  ;;  %v499_v17 = vmul.f32 %v317_v62, %v317_v62  ;;  %v224_v62 = vld [vmem:[%s3771_s1 + $0x90] sm:$0xff]  ;;  %v225_v0 = vld [vmem:[%s3771_s1 + $0x98] sm:$0xff]  ;;  %v37_v10 = vld [vmem:[%s3770_s0 + $0xa0] sm:$0xff] }
  0x24   :  { %v713_v15 = vsel %vm712_vm13, %v1735_v3, %v711_v11  ;;  %v318_v18 = vsub.f32 %v220_v9, %v1630_v4  ;;  %v1421_v21 = vpop.eup %1420  ;;  %vm733_vm4 = vcmp.eq.f32.partialorder %v1785_v38, inf  ;;  %v222_v3 = vld [vmem:[%s3771_s1 + $0x80] sm:$0xff]  ;;  %vm735_vm5 = vcmp.eq.f32.partialorder %v1785_v38, 0.0 }
  0x25   :  { %v716_v22 = vsel %vm714_vm14, %v715_v43, %v713_v15  ;;  %v720_v23 = vsel %vm719_vm15, %v1737_v5, %v718_v12  ;;  %1428 = vrsqrt.f32 %v1870_v14  ;;  %v725_v27 = vmul.f32 %v1421_v21, %v1756_v19 }
  0x26   :  { %1312 = vst.msk [vmem:[%s3774_s4 + $0x30] sm:$0xff] %vm1305_vm2, %v716_v22  ;;  %v723_v26 = vsel %vm721_vm0, %v722_v55, %v720_v23  ;;  %v736_v28 = vand.u32 2147483648, %v1785_v38  ;;  %v1909_v31 = vadd.f32 %v499_v17, %v408_v16  ;;  %v409_v32 = vmul.f32 %v129_v53, %v129_v53 }
  0x27   :  { %1313 = vst.msk [vmem:[%s3774_s4 + $0x38] sm:$0xff] %vm1305_vm2, %v723_v26  ;;  %v500_v34 = vmul.f32 %v318_v18, %v318_v18  ;;  %v130_v35 = vsub.f32 %v32_v20, %v1621_v1  ;;  %v727_v5 = vsel %vm726_vm1, %v1756_v19, %v725_v27  ;;  %v319_v36 = vsub.f32 %v221_v24, %v1630_v4  ;;  %v1423_v40 = vpop.eup %1422  ;;  %v38_v24 = vld [vmem:[%s3770_s0 + $0xa8] sm:$0xff] }
  0x28   :  { %v131_v37 = vsub.f32 %v33_v25, %v1621_v1  ;;  %v320_v29 = vsub.f32 %v222_v3, %v1630_v4  ;;  %v730_v41 = vsel %vm728_vm3, %v729_v13, %v727_v5  ;;  %vm740_vm6 = vcmp.eq.f32.partialorder %v1787_v39, inf  ;;  %v1425_v30 = vpop.eup %1424 }
  0x29   :  { %vm742_vm7 = vcmp.eq.f32.partialorder %v1787_v39, 0.0  ;;  %1430 = vrsqrt.f32 %v1909_v31  ;;  %1314 = vst.msk [vmem:[%s3774_s4 + $0x40] sm:$0xff] %vm1305_vm2, %v730_v41  ;;  %v732_v43 = vmul.f32 %v1423_v40, %v1785_v38  ;;  %v743_v44 = vand.u32 2147483648, %v1787_v39  ;;  %v228_v40 = vld [vmem:[%s3771_s1 + $0xb0] sm:$0xff] }
  0x2a   :  { %v1929_v33 = vadd.f32 %v500_v34, %v409_v32  ;;  %v410_v19 = vmul.f32 %v130_v35, %v130_v35  ;;  %v739_v45 = vmul.f32 %v1425_v30, %v1787_v39  ;;  %v501_v46 = vmul.f32 %v319_v36, %v319_v36 }
  0x2b   :  { %v411_v47 = vmul.f32 %v131_v37, %v131_v37  ;;  %v502_v48 = vmul.f32 %v320_v29, %v320_v29  ;;  %v734_v51 = vsel %vm733_vm4, %v1785_v38, %v732_v43  ;;  %vm747_vm8 = vcmp.eq.f32.partialorder %v1838_v60, inf  ;;  %v227_v37 = vld [vmem:[%s3771_s1 + $0xa8] sm:$0xff]  ;;  %v39_v29 = vld [vmem:[%s3770_s0 + $0xb0] sm:$0xff] }
  0x2c   :  { %1432 = vrsqrt.f32 %v1929_v33  ;;  %v737_v54 = vsel %vm735_vm5, %v736_v28, %v734_v51  ;;  %v741_v55 = vsel %vm740_vm6, %v1787_v39, %v739_v45  ;;  %v1948_v56 = vadd.f32 %v501_v46, %v410_v19  ;;  %v229_v19 = vld [vmem:[%s3771_s1 + $0xb8] sm:$0xff] }
  0x2d   :  { %1315 = vst.msk [vmem:[%s3774_s4 + $0x48] sm:$0xff] %vm1305_vm2, %v737_v54  ;;  %v744_v57 = vsel %vm742_vm7, %v743_v44, %v741_v55  ;;  %v1956_v58 = vadd.f32 %v502_v48, %v411_v47  ;;  %v132_v38 = vsub.f32 %v34_v49, %v1621_v1  ;;  %v321_v59 = vsub.f32 %v223_v50, %v1630_v4  ;;  %v40_v44 = vld [vmem:[%s3770_s0 + $0xb8] sm:$0xff] }
  0x2e   :  { %1316 = vst.msk [vmem:[%s3774_s4 + $0x50] sm:$0xff] %vm1305_vm2, %v744_v57  ;;  %vm749_vm9 = vcmp.eq.f32.partialorder %v1838_v60, 0.0  ;;  %v750_v39 = vand.u32 2147483648, %v1838_v60  ;;  %vm754_vm10 = vcmp.eq.f32.partialorder %v1870_v14, inf  ;;  %1434 = vrsqrt.f32 %v1948_v56 }
  0x2f   :  { %v1427_v61 = vpop.eup %1426  ;;  %vm756_vm11 = vcmp.eq.f32.partialorder %v1870_v14, 0.0  ;;  %v757_v6 = vand.u32 2147483648, %v1870_v14  ;;  %1436 = vrsqrt.f32 %v1956_v58  ;;  %vm761_vm12 = vcmp.eq.f32.partialorder %v1909_v31, inf }
  0x30   :  { %v746_v2 = vmul.f32 %v1427_v61, %v1838_v60  ;;  %v412_v7 = vmul.f32 %v132_v38, %v132_v38  ;;  %v503_v8 = vmul.f32 %v321_v59, %v321_v59  ;;  %v133_v9 = vsub.f32 %v35_v42, %v1621_v1 }
  0x31   :  { %v322_v12 = vsub.f32 %v224_v62, %v1630_v4  ;;  %v134_v13 = vsub.f32 %v36_v63, %v1621_v1  ;;  %v323_v53 = vsub.f32 %v225_v0, %v1630_v4  ;;  %v135_v23 = vsub.f32 %v37_v10, %v1621_v1 }
  0x32   :  { %v1429_v52 = vpop.eup %1428  ;;  %v748_v11 = vsel %vm747_vm8, %v1838_v60, %v746_v2  ;;  %v1998_v17 = vadd.f32 %v503_v8, %v412_v7  ;;  %v413_v18 = vmul.f32 %v133_v9, %v133_v9  ;;  %v226_v60 = vld [vmem:[%s3771_s1 + $0xa0] sm:$0xff]  ;;  %vm763_vm13 = vcmp.eq.f32.partialorder %v1909_v31, 0.0 }
  0x33   :  { %v751_v15 = vsel %vm749_vm9, %v750_v39, %v748_v11  ;;  %v753_v16 = vmul.f32 %v1429_v52, %v1870_v14  ;;  %v504_v20 = vmul.f32 %v322_v12, %v322_v12  ;;  %v414_v21 = vmul.f32 %v134_v13, %v134_v13  ;;  %v41_v7 = vld [vmem:[%s3770_s0 + $0xc0] sm:$0xff]  ;;  %v42_v12 = vld [vmem:[%s3770_s0 + $0xc8] sm:$0xff] }
  0x34   :  { %1317 = vst.msk [vmem:[%s3774_s4 + $0x58] sm:$0xff] %vm1305_vm2, %v751_v15  ;;  %v505_v22 = vmul.f32 %v323_v53, %v323_v53  ;;  %v764_v3 = vand.u32 2147483648, %v1909_v31  ;;  %1438 = vrsqrt.f32 %v1998_v17  ;;  %vm768_vm14 = vcmp.eq.f32.partialorder %v1929_v33, inf  ;;  %v230_v11 = vld [vmem:[%s3771_s1 + $0xc0] sm:$0xff]  ;;  %v231_v13 = vld [vmem:[%s3771_s1 + $0xc8] sm:$0xff] }
  0x35   :  { %v755_v25 = vsel %vm754_vm10, %v1870_v14, %v753_v16  ;;  %v2020_v28 = vadd.f32 %v504_v20, %v413_v18  ;;  %vm770_vm15 = vcmp.eq.f32.partialorder %v1929_v33, 0.0  ;;  %v324_v35 = vsub.f32 %v226_v60, %v1630_v4 }
  0x36   :  { %v1431_v26 = vpop.eup %1430  ;;  %v758_v27 = vsel %vm756_vm11, %v757_v6, %v755_v25  ;;  %v2022_v32 = vadd.f32 %v505_v22, %v414_v21  ;;  %v136_v14 = vsub.f32 %v38_v24, %v1621_v1  ;;  %v771_v5 = vand.u32 2147483648, %v1929_v33 }
  0x37   :  { %1318 = vst.msk [vmem:[%s3774_s4 + $0x60] sm:$0xff] %vm1305_vm2, %v758_v27  ;;  %v760_v34 = vmul.f32 %v1431_v26, %v1909_v31  ;;  %vm775_vm0 = vcmp.eq.f32.partialorder %v1948_v56, inf  ;;  %1440 = vrsqrt.f32 %v2020_v28  ;;  %v415_v36 = vmul.f32 %v135_v23, %v135_v23  ;;  %v43_v26 = vld [vmem:[%s3770_s0 + $0xd0] sm:$0xff] }
  0x38   :  { %vm777_vm1 = vcmp.eq.f32.partialorder %v1948_v56, 0.0  ;;  %v778_v43 = vand.u32 2147483648, %v1948_v56  ;;  %1442 = vrsqrt.f32 %v2022_v32  ;;  %vm782_vm3 = vcmp.eq.f32.partialorder %v1956_v58, inf  ;;  %v232_v27 = vld [vmem:[%s3771_s1 + $0xd0] sm:$0xff] }
  0x39   :  { %v1433_v41 = vpop.eup %1432  ;;  %v762_v30 = vsel %vm761_vm12, %v1909_v31, %v760_v34  ;;  %v506_v47 = vmul.f32 %v324_v35, %v324_v35  ;;  %v325_v48 = vsub.f32 %v227_v37, %v1630_v4  ;;  %v416_v49 = vmul.f32 %v136_v14, %v136_v14  ;;  %v44_v34 = vld [vmem:[%s3770_s0 + $0xd8] sm:$0xff] }
  0x3a   :  { %v765_v45 = vsel %vm763_vm13, %v764_v3, %v762_v30  ;;  %v767_v46 = vmul.f32 %v1433_v41, %v1929_v33  ;;  %v137_v50 = vsub.f32 %v39_v29, %v1621_v1  ;;  %v326_v51 = vsub.f32 %v228_v40, %v1630_v4 }
  0x3b   :  { %1319 = vst.msk [vmem:[%s3774_s4 + $0x68] sm:$0xff] %vm1305_vm2, %v765_v45  ;;  %v1435_v54 = vpop.eup %1434  ;;  %v2070_v55 = vadd.f32 %v506_v47, %v415_v36  ;;  %v138_v57 = vsub.f32 %v40_v44, %v1621_v1  ;;  %v327_v38 = vsub.f32 %v229_v19, %v1630_v4  ;;  %v785_v39 = vand.u32 2147483648, %v1956_v58 }
  0x3c   :  { %v769_v31 = vsel %vm768_vm14, %v1929_v33, %v767_v46  ;;  %v1437_v59 = vpop.eup %1436  ;;  %v774_v61 = vmul.f32 %v1435_v54, %v1948_v56  ;;  %v507_v62 = vmul.f32 %v325_v48, %v325_v48  ;;  %vm784_vm4 = vcmp.eq.f32.partialorder %v1956_v58, 0.0 }
  0x3d   :  { %v772_v42 = vsel %vm770_vm15, %v771_v5, %v769_v31  ;;  %v781_v63 = vmul.f32 %v1437_v59, %v1956_v58  ;;  %1444 = vrsqrt.f32 %v2070_v55  ;;  %v417_v0 = vmul.f32 %v137_v50, %v137_v50 }
  0x3e   :  { %1320 = vst.msk [vmem:[%s3774_s4 + $0x70] sm:$0xff] %vm1305_vm2, %v772_v42  ;;  %v776_v33 = vsel %vm775_vm0, %v1948_v56, %v774_v61  ;;  %vm789_vm5 = vcmp.eq.f32.partialorder %v1998_v17, inf  ;;  %v2089_v2 = vadd.f32 %v507_v62, %v416_v49  ;;  %v508_v6 = vmul.f32 %v326_v51, %v326_v51 }
  0x3f   :  { %v779_v8 = vsel %vm777_vm1, %v778_v43, %v776_v33  ;;  %v783_v9 = vsel %vm782_vm3, %v1956_v58, %v781_v63  ;;  %v418_v10 = vmul.f32 %v138_v57, %v138_v57  ;;  %v509_v52 = vmul.f32 %v327_v38, %v327_v38  ;;  %v234_v57 = vld [vmem:[%s3771_s1 + $0xe0] sm:$0xff]  ;;  %v46_v38 = vld [vmem:[%s3770_s0 + $0xe8] sm:$0xff] }
  0x40   :  { %1321 = vst.msk [vmem:[%s3774_s4 + $0x78] sm:$0xff] %vm1305_vm2, %v779_v8  ;;  %v786_v56 = vsel %vm784_vm4, %v785_v39, %v783_v9  ;;  %vm791_vm6 = vcmp.eq.f32.partialorder %v1998_v17, 0.0  ;;  %v792_v53 = vand.u32 2147483648, %v1998_v17  ;;  %1446 = vrsqrt.f32 %v2089_v2  ;;  %v235_v8 = vld [vmem:[%s3771_s1 + $0xe8] sm:$0xff] }
  0x41   :  { %v1439_v15 = vpop.eup %1438  ;;  %1322 = vst.msk [vmem:[%s3774_s4 + $0x80] sm:$0xff] %vm1305_vm2, %v786_v56  ;;  %vm796_vm7 = vcmp.eq.f32.partialorder %v2020_v28, inf  ;;  %v2122_v16 = vadd.f32 %v508_v6, %v417_v0  ;;  %v2124_v18 = vadd.f32 %v509_v52, %v418_v10  ;;  %v139_v58 = vsub.f32 %v41_v7, %v1621_v1 }
  0x42   :  { %v788_v20 = vmul.f32 %v1439_v15, %v1998_v17  ;;  %v328_v21 = vsub.f32 %v230_v11, %v1630_v4  ;;  %v140_v22 = vsub.f32 %v42_v12, %v1621_v1  ;;  %v329_v23 = vsub.f32 %v231_v13, %v1630_v4 }
  0x43   :  { %vm798_vm8 = vcmp.eq.f32.partialorder %v2020_v28, 0.0  ;;  %v799_v60 = vand.u32 2147483648, %v2020_v28  ;;  %vm803_vm9 = vcmp.eq.f32.partialorder %v2022_v32, inf  ;;  %1448 = vrsqrt.f32 %v2122_v16 }
  0x44   :  { %v1441_v24 = vpop.eup %1440  ;;  %v790_v25 = vsel %vm789_vm5, %v1998_v17, %v788_v20  ;;  %vm805_vm10 = vcmp.eq.f32.partialorder %v2022_v32, 0.0  ;;  %v806_v3 = vand.u32 2147483648, %v2022_v32  ;;  %1450 = vrsqrt.f32 %v2124_v18  ;;  %v233_v17 = vld [vmem:[%s3771_s1 + $0xd8] sm:$0xff]  ;;  %v236_v20 = vld [vmem:[%s3771_s1 + $0xf0] sm:$0xff] }
  0x45   :  { %v1443_v35 = vpop.eup %1442  ;;  %v793_v14 = vsel %vm791_vm6, %v792_v53, %v790_v25  ;;  %v795_v5 = vmul.f32 %v1441_v24, %v2020_v28  ;;  %vm810_vm11 = vcmp.eq.f32.partialorder %v2070_v55, inf  ;;  %v419_v36 = vmul.f32 %v139_v58, %v139_v58  ;;  %v47_v58 = vld [vmem:[%s3770_s0 + $0xf0] sm:$0xff] }
  0x46   :  { %1323 = vst.msk [vmem:[%s3774_s4 + $0x88] sm:$0xff] %vm1305_vm2, %v793_v14  ;;  %v802_v37 = vmul.f32 %v1443_v35, %v2022_v32  ;;  %v510_v29 = vmul.f32 %v328_v21, %v328_v21  ;;  %v420_v40 = vmul.f32 %v140_v22, %v140_v22  ;;  %v511_v41 = vmul.f32 %v329_v23, %v329_v23  ;;  %v237_v35 = vld [vmem:[%s3771_s1 + $0xf8] sm:$0xff] }
  0x47   :  { %v797_v30 = vsel %vm796_vm7, %v2020_v28, %v795_v5  ;;  %v141_v43 = vsub.f32 %v43_v26, %v1621_v1  ;;  %v330_v44 = vsub.f32 %v232_v27, %v1630_v4  ;;  %v142_v19 = vsub.f32 %v44_v34, %v1621_v1  ;;  %v48_v34 = vld [vmem:[%s3770_s0 + $0xf8] sm:$0xff] }
  0x48   :  { %v800_v45 = vsel %vm798_vm8, %v799_v60, %v797_v30  ;;  %v804_v46 = vsel %vm803_vm9, %v2022_v32, %v802_v37  ;;  %v2173_v47 = vadd.f32 %v510_v29, %v419_v36  ;;  %v2175_v48 = vadd.f32 %v511_v41, %v420_v40  ;;  %v45_v32 = vld [vmem:[%s3770_s0 + $0xe0] sm:$0xff] }
  0x49   :  { %1324 = vst.msk [vmem:[%s3774_s4 + $0x90] sm:$0xff] %vm1305_vm2, %v800_v45  ;;  %v807_v49 = vsel %vm805_vm10, %v806_v3, %v804_v46  ;;  %v421_v50 = vmul.f32 %v141_v43, %v141_v43  ;;  %v512_v51 = vmul.f32 %v330_v44, %v330_v44  ;;  %v331_v28 = vsub.f32 %v233_v17, %v1630_v4  ;;  %v49_v17 = vld [vmem:[%s3770_s0 + $0x100] sm:$0xff] }
  0x4a   :  { %v1445_v54 = vpop.eup %1444  ;;  %1325 = vst.msk [vmem:[%s3774_s4 + $0x98] sm:$0xff] %vm1305_vm2, %v807_v49  ;;  %vm812_vm12 = vcmp.eq.f32.partialorder %v2070_v55, 0.0  ;;  %v813_v31 = vand.u32 2147483648, %v2070_v55  ;;  %vm817_vm13 = vcmp.eq.f32.partialorder %v2089_v2, inf  ;;  %1452 = vrsqrt.f32 %v2173_v47  ;;  %v238_v30 = vld [vmem:[%s3771_s1 + $0x100] sm:$0xff] }
  0x4b   :  { %v809_v59 = vmul.f32 %v1445_v54, %v2070_v55  ;;  %vm819_vm14 = vcmp.eq.f32.partialorder %v2089_v2, 0.0  ;;  %v820_v42 = vand.u32 2147483648, %v2089_v2  ;;  %1454 = vrsqrt.f32 %v2175_v48 }
  0x4c   :  { %vm824_vm15 = vcmp.eq.f32.partialorder %v2122_v16, inf  ;;  %v2206_v61 = vadd.f32 %v512_v51, %v421_v50  ;;  %v422_v39 = vmul.f32 %v142_v19, %v142_v19  ;;  %v513_v62 = vmul.f32 %v331_v28, %v331_v28  ;;  %v50_v19 = vld [vmem:[%s3770_s0 + $0x108] sm:$0xff] }
  0x4d   :  { %v1447_v63 = vpop.eup %1446  ;;  %v811_v0 = vsel %vm810_vm11, %v2070_v55, %v809_v59  ;;  %v143_v33 = vsub.f32 %v45_v32, %v1621_v1  ;;  %v332_v6 = vsub.f32 %v234_v57, %v1630_v4  ;;  %v144_v7 = vsub.f32 %v46_v38, %v1621_v1 }
  0x4e   :  { %v814_v9 = vsel %vm812_vm12, %v813_v31, %v811_v0  ;;  %v816_v10 = vmul.f32 %v1447_v63, %v2089_v2  ;;  %vm826_vm0 = vcmp.eq.f32.partialorder %v2122_v16, 0.0  ;;  %1456 = vrsqrt.f32 %v2206_v61  ;;  %v239_v63 = vld [vmem:[%s3771_s1 + $0x108] sm:$0xff] }
  0x4f   :  { %1326 = vst.msk [vmem:[%s3774_s4 + $0xa0] sm:$0xff] %vm1305_vm2, %v814_v9  ;;  %v827_v52 = vand.u32 2147483648, %v2122_v16  ;;  %vm831_vm1 = vcmp.eq.f32.partialorder %v2124_v18, inf  ;;  %v2228_v11 = vadd.f32 %v513_v62, %v422_v39  ;;  %v423_v12 = vmul.f32 %v143_v33, %v143_v33 }
  0x50   :  { %v1449_v55 = vpop.eup %1448  ;;  %v818_v13 = vsel %vm817_vm13, %v2089_v2, %v816_v10  ;;  %v834_v56 = vand.u32 2147483648, %v2124_v18  ;;  %v514_v53 = vmul.f32 %v332_v6, %v332_v6  ;;  %v333_v15 = vsub.f32 %v235_v8, %v1630_v4  ;;  %v240_v8 = vld [vmem:[%s3771_s1 + $0x110] sm:$0xff] }
  0x51   :  { %v1451_v21 = vpop.eup %1450  ;;  %v821_v22 = vsel %vm819_vm14, %v820_v42, %v818_v13  ;;  %v823_v23 = vmul.f32 %v1449_v55, %v2122_v16  ;;  %1458 = vrsqrt.f32 %v2228_v11  ;;  %v424_v60 = vmul.f32 %v144_v7, %v144_v7  ;;  %v51_v7 = vld [vmem:[%s3770_s0 + $0x110] sm:$0xff] }
  0x52   :  { %1327 = vst.msk [vmem:[%s3774_s4 + $0xa8] sm:$0xff] %vm1305_vm2, %v821_v22  ;;  %v830_v24 = vmul.f32 %v1451_v21, %v2124_v18  ;;  %vm833_vm3 = vcmp.eq.f32.partialorder %v2124_v18, 0.0  ;;  %vm838_vm4 = vcmp.eq.f32.partialorder %v2173_v47, inf  ;;  %v2252_v25 = vadd.f32 %v514_v53, %v423_v12 }
  0x53   :  { %v825_v2 = vsel %vm824_vm15, %v2122_v16, %v823_v23  ;;  %v515_v3 = vmul.f32 %v333_v15, %v333_v15  ;;  %v145_v26 = vsub.f32 %v47_v58, %v1621_v1  ;;  %v334_v27 = vsub.f32 %v236_v20, %v1630_v4  ;;  %v52_v58 = vld [vmem:[%s3770_s0 + $0x118] sm:$0xff] }
  0x54   :  { %v828_v14 = vsel %vm826_vm0, %v827_v52, %v825_v2  ;;  %v832_v5 = vsel %vm831_vm1, %v2124_v18, %v830_v24  ;;  %vm840_vm5 = vcmp.eq.f32.partialorder %v2173_v47, 0.0  ;;  %1460 = vrsqrt.f32 %v2252_v25  ;;  %v241_v20 = vld [vmem:[%s3771_s1 + $0x118] sm:$0xff]  ;;  %v242_v2 = vld [vmem:[%s3771_s1 + $0x120] sm:$0xff] }
  0x55   :  { %1328 = vst.msk [vmem:[%s3774_s4 + $0xb0] sm:$0xff] %vm1305_vm2, %v828_v14  ;;  %v835_v36 = vsel %vm833_vm3, %v834_v56, %v832_v5  ;;  %v841_v37 = vand.u32 2147483648, %v2173_v47  ;;  %vm845_vm6 = vcmp.eq.f32.partialorder %v2175_v48, inf  ;;  %v2278_v16 = vadd.f32 %v515_v3, %v424_v60 }
  0x56   :  { %1329 = vst.msk [vmem:[%s3774_s4 + $0xb8] sm:$0xff] %vm1305_vm2, %v835_v36  ;;  %v425_v18 = vmul.f32 %v145_v26, %v145_v26  ;;  %v516_v29 = vmul.f32 %v334_v27, %v334_v27  ;;  %v146_v40 = vsub.f32 %v48_v34, %v1621_v1  ;;  %v335_v41 = vsub.f32 %v237_v35, %v1630_v4  ;;  %v2384_v27 = vld [vmem:[%s3772_s2] ss:$0 sm:$0xff] }
  0x57   :  { %v1453_v43 = vpop.eup %1452  ;;  %vm847_vm7 = vcmp.eq.f32.partialorder %v2175_v48, 0.0  ;;  %v848_v44 = vand.u32 2147483648, %v2175_v48  ;;  %vm852_vm8 = vcmp.eq.f32.partialorder %v2206_v61, inf  ;;  %1462 = vrsqrt.f32 %v2278_v16 }
  0x58   :  { %v1455_v45 = vpop.eup %1454  ;;  %v837_v46 = vmul.f32 %v1453_v43, %v2173_v47  ;;  %v2300_v49 = vadd.f32 %v516_v29, %v425_v18  ;;  %v426_v50 = vmul.f32 %v146_v40, %v146_v40  ;;  %v517_v51 = vmul.f32 %v335_v41, %v335_v41  ;;  %v2407_v41 = vld [vmem:[%s3773_s3] ss:$0 sm:$0xff] }
  0x59   :  { %v844_v28 = vmul.f32 %v1455_v45, %v2175_v48  ;;  %vm854_vm9 = vcmp.eq.f32.partialorder %v2206_v61, 0.0  ;;  %v147_v54 = vsub.f32 %v49_v17, %v1621_v1  ;;  %v336_v31 = vsub.f32 %v238_v30, %v1630_v4 }
  0x5a   :  { %v839_v32 = vsel %vm838_vm4, %v2173_v47, %v837_v46  ;;  %v855_v57 = vand.u32 2147483648, %v2206_v61  ;;  %1464 = vrsqrt.f32 %v2300_v49  ;;  %v148_v38 = vsub.f32 %v50_v19, %v1621_v1 }
  0x5b   :  { %v1457_v59 = vpop.eup %1456  ;;  %v842_v42 = vsel %vm840_vm5, %v841_v37, %v839_v32  ;;  %v846_v39 = vsel %vm845_vm6, %v2175_v48, %v844_v28  ;;  %vm859_vm10 = vcmp.eq.f32.partialorder %v2228_v11, inf  ;;  %v2318_v62 = vadd.f32 %v517_v51, %v426_v50  ;;  %v54_v37 = vld [vmem:[%s3770_s0 + $0x128] sm:$0xff]  ;;  %v55_v32 = vld [vmem:[%s3770_s0 + $0x130] sm:$0xff] }
  0x5c   :  { %1330 = vst.msk [vmem:[%s3774_s4 + $0xc0] sm:$0xff] %vm1305_vm2, %v842_v42  ;;  %v849_v47 = vsel %vm847_vm7, %v848_v44, %v846_v39  ;;  %v851_v0 = vmul.f32 %v1457_v59, %v2206_v61  ;;  %v427_v33 = vmul.f32 %v147_v54, %v147_v54  ;;  %v518_v6 = vmul.f32 %v336_v31, %v336_v31  ;;  %v243_v50 = vld [vmem:[%s3771_s1 + $0x128] sm:$0xff] }
  0x5d   :  { %1331 = vst.msk [vmem:[%s3774_s4 + $0xc8] sm:$0xff] %vm1305_vm2, %v849_v47  ;;  %vm861_vm11 = vcmp.eq.f32.partialorder %v2228_v11, 0.0  ;;  %v862_v48 = vand.u32 2147483648, %v2228_v11  ;;  %vm866_vm12 = vcmp.eq.f32.partialorder %v2252_v25, inf  ;;  %1466 = vrsqrt.f32 %v2318_v62 }
  0x5e   :  { %v1459_v9 = vpop.eup %1458  ;;  %v853_v10 = vsel %vm852_vm8, %v2206_v61, %v851_v0  ;;  %v2347_v52 = vadd.f32 %v518_v6, %v427_v33  ;;  %v337_v12 = vsub.f32 %v239_v63, %v1630_v4  ;;  %v428_v55 = vmul.f32 %v148_v38, %v148_v38 }
  0x5f   :  { %v856_v13 = vsel %vm854_vm9, %v855_v57, %v853_v10  ;;  %v858_v56 = vmul.f32 %v1459_v9, %v2228_v11  ;;  %v149_v53 = vsub.f32 %v51_v7, %v1621_v1  ;;  %v338_v15 = vsub.f32 %v240_v8, %v1630_v4  ;;  %v53_v1 = vld [vmem:[%s3770_s0 + $0x120] sm:$0xff]  ;;  %v56_v7 = vld [vmem:[%s3770_s0 + $0x138] sm:$0xff] }
  0x60   :  { %1332 = vst.msk [vmem:[%s3774_s4 + $0xd0] sm:$0xff] %vm1305_vm2, %v856_v13  ;;  %vm868_vm13 = vcmp.eq.f32.partialorder %v2252_v25, 0.0  ;;  %v869_v61 = vand.u32 2147483648, %v2252_v25  ;;  %vm873_vm14 = vcmp.eq.f32.partialorder %v2278_v16, inf  ;;  %1468 = vrsqrt.f32 %v2347_v52  ;;  %v245_v8 = vld [vmem:[%s3771_s1 + $0x138] sm:$0xff] }
  0x61   :  { %v1461_v21 = vpop.eup %1460  ;;  %v860_v22 = vsel %vm859_vm10, %v2228_v11, %v858_v56  ;;  %v519_v23 = vmul.f32 %v337_v12, %v337_v12  ;;  %v429_v60 = vmul.f32 %v149_v53, %v149_v53  ;;  %v520_v24 = vmul.f32 %v338_v15, %v338_v15  ;;  %v246_v56 = vld [vmem:[%s3771_s1 + $0x140] sm:$0xff] }
  0x62   :  { %v863_v3 = vsel %vm861_vm11, %v862_v48, %v860_v22  ;;  %v865_v26 = vmul.f32 %v1461_v21, %v2252_v25  ;;  %v150_v34 = vsub.f32 %v52_v58, %v2384_v27  ;;  %v339_v35 = vsub.f32 %v241_v20, %v1630_v4  ;;  %v57_v48 = vld [vmem:[%s3770_s0 + $0x140] sm:$0xff] }
  0x63   :  { %1333 = vst.msk [vmem:[%s3774_s4 + $0xd8] sm:$0xff] %vm1305_vm2, %v863_v3  ;;  %v876_v14 = vand.u32 2147483648, %v2278_v16  ;;  %v2393_v11 = vadd.f32 %v519_v23, %v428_v55  ;;  %v2395_v5 = vadd.f32 %v520_v24, %v429_v60  ;;  %v151_v36 = vsub.f32 %v53_v1, %v2384_v27 }
  0x64   :  { %v1463_v18 = vpop.eup %1462  ;;  %v867_v4 = vsel %vm866_vm12, %v2252_v25, %v865_v26  ;;  %v430_v29 = vmul.f32 %v150_v34, %v150_v34  ;;  %v521_v40 = vmul.f32 %v339_v35, %v339_v35  ;;  %v340_v17 = vsub.f32 %v242_v2, %v2407_v41  ;;  %v247_v34 = vld [vmem:[%s3771_s1 + $0x148] sm:$0xff] }
  0x65   :  { %v870_v30 = vsel %vm868_vm13, %v869_v61, %v867_v4  ;;  %v872_v43 = vmul.f32 %v1463_v18, %v2278_v16  ;;  %vm875_vm15 = vcmp.eq.f32.partialorder %v2278_v16, 0.0  ;;  %1470 = vrsqrt.f32 %v2393_v11  ;;  %v58_v61 = vld [vmem:[%s3770_s0 + $0x148] sm:$0xff] }
  0x66   :  { %1334 = vst.msk [vmem:[%s3774_s4 + $0xe0] sm:$0xff] %vm1305_vm2, %v870_v30  ;;  %vm880_vm0 = vcmp.eq.f32.partialorder %v2300_v49, inf  ;;  %vm882_vm1 = vcmp.eq.f32.partialorder %v2300_v49, 0.0  ;;  %1472 = vrsqrt.f32 %v2395_v5  ;;  %v152_v25 = vsub.f32 %v54_v37, %v2384_v27 }
  0x67   :  { %v1465_v44 = vpop.eup %1464  ;;  %v874_v19 = vsel %vm873_vm14, %v2278_v16, %v872_v43  ;;  %v883_v45 = vand.u32 2147483648, %v2300_v49  ;;  %vm887_vm3 = vcmp.eq.f32.partialorder %v2318_v62, inf  ;;  %v2428_v46 = vadd.f32 %v521_v40, %v430_v29  ;;  %v244_v16 = vld [vmem:[%s3771_s1 + $0x130] sm:$0xff] }
  0x68   :  { %v877_v51 = vsel %vm875_vm15, %v876_v14, %v874_v19  ;;  %v879_v28 = vmul.f32 %v1465_v44, %v2300_v49  ;;  %v431_v54 = vmul.f32 %v151_v36, %v151_v36  ;;  %v522_v31 = vmul.f32 %v340_v17, %v340_v17  ;;  %v59_v17 = vld [vmem:[%s3770_s0 + $0x150] sm:$0xff] }
  0x69   :  { %1335 = vst.msk [vmem:[%s3774_s4 + $0xe8] sm:$0xff] %vm1305_vm2, %v877_v51  ;;  %vm889_vm4 = vcmp.eq.f32.partialorder %v2318_v62, 0.0  ;;  %v890_v57 = vand.u32 2147483648, %v2318_v62  ;;  %vm894_vm5 = vcmp.eq.f32.partialorder %v2347_v52, inf  ;;  %1474 = vrsqrt.f32 %v2428_v46  ;;  %v248_v51 = vld [vmem:[%s3771_s1 + $0x150] sm:$0xff] }
  0x6a   :  { %v1467_v38 = vpop.eup %1466  ;;  %v881_v59 = vsel %vm880_vm0, %v2300_v49, %v879_v28  ;;  %v2451_v42 = vadd.f32 %v522_v31, %v431_v54  ;;  %v341_v39 = vsub.f32 %v243_v50, %v2407_v41  ;;  %v432_v63 = vmul.f32 %v152_v25, %v152_v25 }
  0x6b   :  { %v884_v47 = vsel %vm882_vm1, %v883_v45, %v881_v59  ;;  %v886_v0 = vmul.f32 %v1467_v38, %v2318_v62  ;;  %v153_v33 = vsub.f32 %v55_v32, %v2384_v27  ;;  %v342_v6 = vsub.f32 %v244_v16, %v2407_v41  ;;  %v60_v32 = vld [vmem:[%s3770_s0 + $0x158] sm:$0xff] }
  0x6c   :  { %1336 = vst.msk [vmem:[%s3774_s4 + $0xf0] sm:$0xff] %vm1305_vm2, %v884_v47  ;;  %vm896_vm6 = vcmp.eq.f32.partialorder %v2347_v52, 0.0  ;;  %v897_v49 = vand.u32 2147483648, %v2347_v52  ;;  %vm901_vm7 = vcmp.eq.f32.partialorder %v2393_v11, inf  ;;  %1476 = vrsqrt.f32 %v2451_v42  ;;  %v249_v16 = vld [vmem:[%s3771_s1 + $0x158] sm:$0xff] }
  0x6d   :  { %v1469_v9 = vpop.eup %1468  ;;  %v888_v10 = vsel %vm887_vm3, %v2318_v62, %v886_v0  ;;  %v523_v12 = vmul.f32 %v341_v39, %v341_v39  ;;  %v433_v55 = vmul.f32 %v153_v33, %v153_v33  ;;  %v524_v13 = vmul.f32 %v342_v6, %v342_v6 }
  0x6e   :  { %v891_v53 = vsel %vm889_vm4, %v890_v57, %v888_v10  ;;  %v893_v15 = vmul.f32 %v1469_v9, %v2347_v52  ;;  %v154_v58 = vsub.f32 %v56_v7, %v2384_v27  ;;  %v343_v20 = vsub.f32 %v245_v8, %v2407_v41  ;;  %v61_v7 = vld [vmem:[%s3770_s0 + $0x160] sm:$0xff] }
  0x6f   :  { %1337 = vst.msk [vmem:[%s3774_s4 + $0xf8] sm:$0xff] %vm1305_vm2, %v891_v53  ;;  %vm903_vm8 = vcmp.eq.f32.partialorder %v2393_v11, 0.0  ;;  %v2495_v1 = vadd.f32 %v523_v12, %v432_v63  ;;  %v2497_v62 = vadd.f32 %v524_v13, %v433_v55  ;;  %v155_v21 = vsub.f32 %v57_v48, %v2384_v27  ;;  %v250_v8 = vld [vmem:[%s3771_s1 + $0x160] sm:$0xff]  ;;  %v251_v55 = vld [vmem:[%s3771_s1 + $0x168] sm:$0xff] }
  0x70   :  { %v895_v22 = vsel %vm894_vm5, %v2347_v52, %v893_v15  ;;  %v434_v23 = vmul.f32 %v154_v58, %v154_v58  ;;  %v525_v60 = vmul.f32 %v343_v20, %v343_v20  ;;  %v344_v24 = vsub.f32 %v246_v56, %v2407_v41 }
  0x71   :  { %v898_v2 = vsel %vm896_vm6, %v897_v49, %v895_v22  ;;  %v904_v3 = vand.u32 2147483648, %v2393_v11  ;;  %1478 = vrsqrt.f32 %v2495_v1  ;;  %v156_v26 = vsub.f32 %v58_v61, %v2384_v27  ;;  %v62_v49 = vld [vmem:[%s3770_s0 + $0x168] sm:$0xff] }
  0x72   :  { %v1471_v35 = vpop.eup %1470  ;;  %1338 = vst.msk [vmem:[%s3774_s4 + $0x100] sm:$0xff] %vm1305_vm2, %v898_v2  ;;  %vm908_vm9 = vcmp.eq.f32.partialorder %v2395_v5, inf  ;;  %vm910_vm10 = vcmp.eq.f32.partialorder %v2395_v5, 0.0  ;;  %v911_v52 = vand.u32 2147483648, %v2395_v5  ;;  %1480 = vrsqrt.f32 %v2497_v62 }
  0x73   :  { %v1473_v14 = vpop.eup %1472  ;;  %v900_v36 = vmul.f32 %v1471_v35, %v2393_v11  ;;  %vm915_vm11 = vcmp.eq.f32.partialorder %v2428_v46, inf  ;;  %v2522_v37 = vadd.f32 %v525_v60, %v434_v23  ;;  %v435_v18 = vmul.f32 %v155_v21, %v155_v21  ;;  %v63_v21 = vld [vmem:[%s3770_s0 + $0x170] sm:$0xff] }
  0x74   :  { %v907_v4 = vmul.f32 %v1473_v14, %v2395_v5  ;;  %vm917_vm12 = vcmp.eq.f32.partialorder %v2428_v46, 0.0  ;;  %v526_v29 = vmul.f32 %v344_v24, %v344_v24  ;;  %v345_v40 = vsub.f32 %v247_v34, %v2407_v41  ;;  %v64_v14 = vld [vmem:[%s3770_s0 + $0x178] sm:$0xff] }
  0x75   :  { %v902_v30 = vsel %vm901_vm7, %v2393_v11, %v900_v36  ;;  %v918_v43 = vand.u32 2147483648, %v2428_v46  ;;  %1482 = vrsqrt.f32 %v2522_v37  ;;  %v436_v25 = vmul.f32 %v156_v26, %v156_v26  ;;  %v253_v36 = vld [vmem:[%s3771_s1 + $0x178] sm:$0xff] }
  0x76   :  { %v1475_v44 = vpop.eup %1474  ;;  %v905_v19 = vsel %vm903_vm8, %v904_v3, %v902_v30  ;;  %v909_v45 = vsel %vm908_vm9, %v2395_v5, %v907_v4  ;;  %vm922_vm13 = vcmp.eq.f32.partialorder %v2451_v42, inf  ;;  %v2541_v50 = vadd.f32 %v526_v29, %v435_v18 }
  0x77   :  { %1339 = vst.msk [vmem:[%s3774_s4 + $0x108] sm:$0xff] %vm1305_vm2, %v905_v19  ;;  %v912_v11 = vsel %vm910_vm10, %v911_v52, %v909_v45  ;;  %v914_v28 = vmul.f32 %v1475_v44, %v2428_v46  ;;  %v527_v54 = vmul.f32 %v345_v40, %v345_v40  ;;  %v157_v31 = vsub.f32 %v59_v17, %v2384_v27  ;;  %v252_v52 = vld [vmem:[%s3771_s1 + $0x170] sm:$0xff] }
  0x78   :  { %1340 = vst.msk [vmem:[%s3774_s4 + $0x110] sm:$0xff] %vm1305_vm2, %v912_v11  ;;  %vm924_vm14 = vcmp.eq.f32.partialorder %v2451_v42, 0.0  ;;  %v925_v5 = vand.u32 2147483648, %v2451_v42  ;;  %vm929_vm15 = vcmp.eq.f32.partialorder %v2495_v1, inf  ;;  %1484 = vrsqrt.f32 %v2541_v50 }
  0x79   :  { %v1477_v57 = vpop.eup %1476  ;;  %v916_v38 = vsel %vm915_vm11, %v2428_v46, %v914_v28  ;;  %v2571_v59 = vadd.f32 %v527_v54, %v436_v25  ;;  %v346_v39 = vsub.f32 %v248_v51, %v2407_v41  ;;  %v437_v63 = vmul.f32 %v157_v31, %v157_v31 }
  0x7a   :  { %v919_v47 = vsel %vm917_vm12, %v918_v43, %v916_v38  ;;  %v921_v0 = vmul.f32 %v1477_v57, %v2451_v42  ;;  %v158_v33 = vsub.f32 %v60_v32, %v2384_v27  ;;  %v347_v6 = vsub.f32 %v249_v16, %v2407_v41 }
  0x7b   :  { %1341 = vst.msk [vmem:[%s3774_s4 + $0x118] sm:$0xff] %vm1305_vm2, %v919_v47  ;;  %vm931_vm0 = vcmp.eq.f32.partialorder %v2495_v1, 0.0  ;;  %v932_v46 = vand.u32 2147483648, %v2495_v1  ;;  %vm936_vm1 = vcmp.eq.f32.partialorder %v2497_v62, inf  ;;  %1486 = vrsqrt.f32 %v2571_v59 }
  0x7c   :  { %v923_v48 = vsel %vm922_vm13, %v2451_v42, %v921_v0  ;;  %v528_v9 = vmul.f32 %v346_v39, %v346_v39  ;;  %v438_v10 = vmul.f32 %v158_v33, %v158_v33  ;;  %v529_v12 = vmul.f32 %v347_v6, %v347_v6  ;;  %v66_v39 = vld [vmem:[%s3770_s0 + $0x188] sm:$0xff] }
  0x7d   :  { %v926_v13 = vsel %vm924_vm14, %v925_v5, %v923_v48  ;;  %vm938_vm3 = vcmp.eq.f32.partialorder %v2497_v62, 0.0  ;;  %v159_v56 = vsub.f32 %v61_v7, %v2384_v27  ;;  %v348_v53 = vsub.f32 %v250_v8, %v2407_v41 }
  0x7e   :  { %v1479_v15 = vpop.eup %1478  ;;  %1342 = vst.msk [vmem:[%s3774_s4 + $0x120] sm:$0xff] %vm1305_vm2, %v926_v13  ;;  %v939_v58 = vand.u32 2147483648, %v2497_v62  ;;  %v2612_v20 = vadd.f32 %v528_v9, %v437_v63  ;;  %v2614_v61 = vadd.f32 %v529_v12, %v438_v10  ;;  %v160_v42 = vsub.f32 %v62_v49, %v2384_v27  ;;  %v255_v49 = vld [vmem:[%s3771_s1 + $0x188] sm:$0xff]  ;;  %v67_v12 = vld [vmem:[%s3770_s0 + $0x190] sm:$0xff] }
  0x7f   :  { %v1481_v22 = vpop.eup %1480  ;;  %v928_v23 = vmul.f32 %v1479_v15, %v2495_v1  ;;  %v439_v60 = vmul.f32 %v159_v56, %v159_v56  ;;  %v530_v24 = vmul.f32 %v348_v53, %v348_v53  ;;  %v349_v2 = vsub.f32 %v251_v55, %v2407_v41  ;;  %v256_v55 = vld [vmem:[%s3771_s1 + $0x190] sm:$0xff]  ;;  %v68_v56 = vld [vmem:[%s3770_s0 + $0x198] sm:$0xff] }
  0x80   :  { %v935_v3 = vmul.f32 %v1481_v22, %v2497_v62  ;;  %vm943_vm4 = vcmp.eq.f32.partialorder %v2522_v37, inf  ;;  %vm945_vm5 = vcmp.eq.f32.partialorder %v2522_v37, 0.0  ;;  %1488 = vrsqrt.f32 %v2612_v20 }
  0x81   :  { %v930_v26 = vsel %vm929_vm15, %v2495_v1, %v928_v23  ;;  %v946_v34 = vand.u32 2147483648, %v2522_v37  ;;  %1490 = vrsqrt.f32 %v2614_v61  ;;  %v161_v35 = vsub.f32 %v63_v21, %v2384_v27 }
  0x82   :  { %v1483_v18 = vpop.eup %1482  ;;  %v933_v4 = vsel %vm931_vm0, %v932_v46, %v930_v26  ;;  %v937_v29 = vsel %vm936_vm1, %v2497_v62, %v935_v3  ;;  %vm950_vm6 = vcmp.eq.f32.partialorder %v2541_v50, inf  ;;  %v440_v40 = vmul.f32 %v160_v42, %v160_v42  ;;  %v65_v62 = vld [vmem:[%s3770_s0 + $0x180] sm:$0xff]  ;;  %v257_v42 = vld [vmem:[%s3771_s1 + $0x198] sm:$0xff] }
  0x83   :  { %1343 = vst.msk [vmem:[%s3774_s4 + $0x128] sm:$0xff] %vm1305_vm2, %v933_v4  ;;  %v940_v17 = vsel %vm938_vm3, %v939_v58, %v937_v29  ;;  %v942_v30 = vmul.f32 %v1483_v18, %v2522_v37  ;;  %v2654_v43 = vadd.f32 %v530_v24, %v439_v60  ;;  %v531_v1 = vmul.f32 %v349_v2, %v349_v2 }
  0x84   :  { %1344 = vst.msk [vmem:[%s3774_s4 + $0x130] sm:$0xff] %vm1305_vm2, %v940_v17  ;;  %vm952_vm7 = vcmp.eq.f32.partialorder %v2541_v50, 0.0  ;;  %v350_v25 = vsub.f32 %v252_v52, %v2407_v41  ;;  %v162_v44 = vsub.f32 %v64_v14, %v2384_v27  ;;  %v351_v19 = vsub.f32 %v253_v36, %v2407_v41 }
  0x85   :  { %v1485_v45 = vpop.eup %1484  ;;  %v944_v51 = vsel %vm943_vm4, %v2522_v37, %v942_v30  ;;  %v953_v11 = vand.u32 2147483648, %v2541_v50  ;;  %1492 = vrsqrt.f32 %v2654_v43  ;;  %v441_v28 = vmul.f32 %v161_v35, %v161_v35  ;;  %v254_v37 = vld [vmem:[%s3771_s1 + $0x180] sm:$0xff] }
  0x86   :  { %v947_v54 = vsel %vm945_vm5, %v946_v34, %v944_v51  ;;  %v949_v31 = vmul.f32 %v1485_v45, %v2541_v50  ;;  %vm957_vm8 = vcmp.eq.f32.partialorder %v2571_v59, inf  ;;  %v2676_v32 = vadd.f32 %v531_v1, %v440_v40  ;;  %v70_v45 = vld [vmem:[%s3770_s0 + $0x1a8] sm:$0xff] }
  0x87   :  { %1345 = vst.msk [vmem:[%s3774_s4 + $0x138] sm:$0xff] %vm1305_vm2, %v947_v54  ;;  %v532_v16 = vmul.f32 %v350_v25, %v350_v25  ;;  %v442_v5 = vmul.f32 %v162_v44, %v162_v44  ;;  %v533_v57 = vmul.f32 %v351_v19, %v351_v19  ;;  %v163_v38 = vsub.f32 %v65_v62, %v2384_v27  ;;  %v258_v62 = vld [vmem:[%s3771_s1 + $0x1a0] sm:$0xff]  ;;  %v259_v51 = vld [vmem:[%s3771_s1 + $0x1a8] sm:$0xff] }
  0x88   :  { %v1487_v63 = vpop.eup %1486  ;;  %v951_v47 = vsel %vm950_vm6, %v2541_v50, %v949_v31  ;;  %vm959_vm9 = vcmp.eq.f32.partialorder %v2571_v59, 0.0  ;;  %v960_v0 = vand.u32 2147483648, %v2571_v59  ;;  %1494 = vrsqrt.f32 %v2676_v32 }
  0x89   :  { %v954_v33 = vsel %vm952_vm7, %v953_v11, %v951_v47  ;;  %v956_v6 = vmul.f32 %v1487_v63, %v2571_v59  ;;  %vm964_vm10 = vcmp.eq.f32.partialorder %v2612_v20, inf  ;;  %v2699_v7 = vadd.f32 %v532_v16, %v441_v28 }
  0x8a   :  { %1346 = vst.msk [vmem:[%s3774_s4 + $0x140] sm:$0xff] %vm1305_vm2, %v954_v33  ;;  %vm966_vm11 = vcmp.eq.f32.partialorder %v2612_v20, 0.0  ;;  %v2706_v8 = vadd.f32 %v533_v57, %v442_v5  ;;  %v352_v46 = vsub.f32 %v254_v37, %v2407_v41  ;;  %v164_v50 = vsub.f32 %v66_v39, %v2384_v27  ;;  %v260_v33 = vld [vmem:[%s3771_s1 + $0x1b0] sm:$0xff] }
  0x8b   :  { %v958_v48 = vsel %vm957_vm8, %v2571_v59, %v956_v6  ;;  %v967_v9 = vand.u32 2147483648, %v2612_v20  ;;  %1496 = vrsqrt.f32 %v2699_v7  ;;  %v443_v10 = vmul.f32 %v163_v38, %v163_v38  ;;  %v72_v6 = vld [vmem:[%s3770_s0 + $0x1b8] sm:$0xff] }
  0x8c   :  { %v961_v13 = vsel %vm959_vm9, %v960_v0, %v958_v48  ;;  %vm971_vm12 = vcmp.eq.f32.partialorder %v2614_v61, inf  ;;  %vm973_vm13 = vcmp.eq.f32.partialorder %v2614_v61, 0.0  ;;  %1498 = vrsqrt.f32 %v2706_v8  ;;  %v71_v0 = vld [vmem:[%s3770_s0 + $0x1b0] sm:$0xff] }
  0x8d   :  { %v1489_v53 = vpop.eup %1488  ;;  %1347 = vst.msk [vmem:[%s3774_s4 + $0x148] sm:$0xff] %vm1305_vm2, %v961_v13  ;;  %v974_v15 = vand.u32 2147483648, %v2614_v61  ;;  %vm978_vm14 = vcmp.eq.f32.partialorder %v2654_v43, inf  ;;  %v534_v59 = vmul.f32 %v352_v46, %v352_v46  ;;  %v353_v58 = vsub.f32 %v255_v49, %v2407_v41 }
  0x8e   :  { %v1491_v21 = vpop.eup %1490  ;;  %v963_v22 = vmul.f32 %v1489_v53, %v2612_v20  ;;  %v444_v23 = vmul.f32 %v164_v50, %v164_v50  ;;  %v165_v60 = vsub.f32 %v67_v12, %v2384_v27  ;;  %v354_v24 = vsub.f32 %v256_v55, %v2407_v41 }
  0x8f   :  { %v970_v2 = vmul.f32 %v1491_v21, %v2614_v61  ;;  %v2746_v3 = vadd.f32 %v534_v59, %v443_v10  ;;  %v535_v26 = vmul.f32 %v353_v58, %v353_v58  ;;  %v166_v34 = vsub.f32 %v68_v56, %v2384_v27 }
  0x90   :  { %v965_v35 = vsel %vm964_vm10, %v2612_v20, %v963_v22  ;;  %v445_v52 = vmul.f32 %v165_v60, %v165_v60  ;;  %v536_v14 = vmul.f32 %v354_v24, %v354_v24  ;;  %v355_v36 = vsub.f32 %v257_v42, %v2407_v41 }
  0x91   :  { %v968_v18 = vsel %vm966_vm11, %v967_v9, %v965_v35  ;;  %v972_v4 = vsel %vm971_vm12, %v2614_v61, %v970_v2  ;;  %vm980_vm15 = vcmp.eq.f32.partialorder %v2654_v43, 0.0  ;;  %1500 = vrsqrt.f32 %v2746_v3  ;;  %v69_v61 = vld [vmem:[%s3770_s0 + $0x1a0] sm:$0xff] }
  0x92   :  { %v1493_v29 = vpop.eup %1492  ;;  %1348 = vst.msk [vmem:[%s3774_s4 + $0x150] sm:$0xff] %vm1305_vm2, %v968_v18  ;;  %v975_v40 = vsel %vm973_vm13, %v974_v15, %v972_v4  ;;  %v981_v20 = vand.u32 2147483648, %v2654_v43  ;;  %vm985_vm0 = vcmp.eq.f32.partialorder %v2676_v32, inf  ;;  %v2768_v17 = vadd.f32 %v535_v26, %v444_v23  ;;  %v262_v26 = vld [vmem:[%s3771_s1 + $0x1c0] sm:$0xff]  ;;  %v74_v18 = vld [vmem:[%s3770_s0 + $0x1c8] sm:$0xff] }
  0x93   :  { %1349 = vst.msk [vmem:[%s3774_s4 + $0x158] sm:$0xff] %vm1305_vm2, %v975_v40  ;;  %v977_v30 = vmul.f32 %v1493_v29, %v2654_v43  ;;  %v2775_v1 = vadd.f32 %v536_v14, %v445_v52  ;;  %v446_v25 = vmul.f32 %v166_v34, %v166_v34  ;;  %v537_v44 = vmul.f32 %v355_v36, %v355_v36 }
  0x94   :  { %vm987_vm1 = vcmp.eq.f32.partialorder %v2676_v32, 0.0  ;;  %v988_v19 = vand.u32 2147483648, %v2676_v32  ;;  %vm992_vm3 = vcmp.eq.f32.partialorder %v2699_v7, inf  ;;  %1502 = vrsqrt.f32 %v2768_v17 }
  0x95   :  { %v1495_v11 = vpop.eup %1494  ;;  %v979_v28 = vsel %vm978_vm14, %v2654_v43, %v977_v30  ;;  %vm994_vm4 = vcmp.eq.f32.partialorder %v2699_v7, 0.0  ;;  %v995_v54 = vand.u32 2147483648, %v2699_v7  ;;  %1504 = vrsqrt.f32 %v2775_v1  ;;  %v263_v30 = vld [vmem:[%s3771_s1 + $0x1c8] sm:$0xff] }
  0x96   :  { %v982_v31 = vsel %vm980_vm15, %v981_v20, %v979_v28  ;;  %v984_v16 = vmul.f32 %v1495_v11, %v2676_v32  ;;  %vm999_vm5 = vcmp.eq.f32.partialorder %v2706_v8, inf  ;;  %v2803_v5 = vadd.f32 %v537_v44, %v446_v25 }
  0x97   :  { %1350 = vst.msk [vmem:[%s3774_s4 + $0x160] sm:$0xff] %vm1305_vm2, %v982_v31  ;;  %v167_v57 = vsub.f32 %v69_v61, %v2384_v27  ;;  %v356_v38 = vsub.f32 %v258_v62, %v2407_v41  ;;  %v168_v37 = vsub.f32 %v70_v45, %v2384_v27  ;;  %v357_v43 = vsub.f32 %v259_v51, %v2407_v41  ;;  %v75_v31 = vld [vmem:[%s3770_s0 + $0x1d0] sm:$0xff] }
  0x98   :  { %v1497_v39 = vpop.eup %1496  ;;  %v986_v63 = vsel %vm985_vm0, %v2676_v32, %v984_v16  ;;  %vm1001_vm6 = vcmp.eq.f32.partialorder %v2706_v8, 0.0  ;;  %v1002_v47 = vand.u32 2147483648, %v2706_v8  ;;  %1506 = vrsqrt.f32 %v2803_v5  ;;  %v261_v32 = vld [vmem:[%s3771_s1 + $0x1b8] sm:$0xff] }
  0x99   :  { %v1499_v46 = vpop.eup %1498  ;;  %v989_v50 = vsel %vm987_vm1, %v988_v19, %v986_v63  ;;  %v991_v49 = vmul.f32 %v1497_v39, %v2699_v7  ;;  %vm1006_vm7 = vcmp.eq.f32.partialorder %v2746_v3, inf  ;;  %v447_v48 = vmul.f32 %v167_v57, %v167_v57  ;;  %v76_v39 = vld [vmem:[%s3770_s0 + $0x1d8] sm:$0xff] }
  0x9a   :  { %1351 = vst.msk [vmem:[%s3774_s4 + $0x168] sm:$0xff] %vm1305_vm2, %v989_v50  ;;  %v998_v9 = vmul.f32 %v1499_v46, %v2706_v8  ;;  %v538_v10 = vmul.f32 %v356_v38, %v356_v38  ;;  %v448_v12 = vmul.f32 %v168_v37, %v168_v37  ;;  %v539_v55 = vmul.f32 %v357_v43, %v357_v43  ;;  %v264_v43 = vld [vmem:[%s3771_s1 + $0x1d0] sm:$0xff] }
  0x9b   :  { %v993_v13 = vsel %vm992_vm3, %v2699_v7, %v991_v49  ;;  %v169_v56 = vsub.f32 %v71_v0, %v2384_v27  ;;  %v358_v53 = vsub.f32 %v260_v33, %v2407_v41  ;;  %v170_v15 = vsub.f32 %v72_v6, %v2384_v27 }
  0x9c   :  { %v996_v59 = vsel %vm994_vm4, %v995_v54, %v993_v13  ;;  %v1000_v58 = vsel %vm999_vm5, %v2706_v8, %v998_v9  ;;  %v2851_v42 = vadd.f32 %v538_v10, %v447_v48  ;;  %v2853_v21 = vadd.f32 %v539_v55, %v448_v12  ;;  %v73_v8 = vld [vmem:[%s3770_s0 + $0x1c0] sm:$0xff] }
  0x9d   :  { %1352 = vst.msk [vmem:[%s3774_s4 + $0x170] sm:$0xff] %vm1305_vm2, %v996_v59  ;;  %v1003_v22 = vsel %vm1001_vm6, %v1002_v47, %v1000_v58  ;;  %v449_v23 = vmul.f32 %v169_v56, %v169_v56  ;;  %v540_v60 = vmul.f32 %v358_v53, %v358_v53  ;;  %v359_v7 = vsub.f32 %v261_v32, %v2407_v41  ;;  %v77_v9 = vld [vmem:[%s3770_s0 + $0x1e0] sm:$0xff] }
  0x9e   :  { %v1501_v24 = vpop.eup %1500  ;;  %1353 = vst.msk [vmem:[%s3774_s4 + $0x178] sm:$0xff] %vm1305_vm2, %v1003_v22  ;;  %vm1008_vm8 = vcmp.eq.f32.partialorder %v2746_v3, 0.0  ;;  %v1009_v2 = vand.u32 2147483648, %v2746_v3  ;;  %vm1013_vm9 = vcmp.eq.f32.partialorder %v2768_v17, inf  ;;  %1508 = vrsqrt.f32 %v2851_v42  ;;  %v266_v10 = vld [vmem:[%s3771_s1 + $0x1e0] sm:$0xff]  ;;  %v78_v22 = vld [vmem:[%s3770_s0 + $0x1e8] sm:$0xff] }
  0x9f   :  { %v1005_v34 = vmul.f32 %v1501_v24, %v2746_v3  ;;  %vm1015_vm10 = vcmp.eq.f32.partialorder %v2768_v17, 0.0  ;;  %v1016_v35 = vand.u32 2147483648, %v2768_v17  ;;  %1510 = vrsqrt.f32 %v2853_v21 }
  0xa0   :  { %vm1020_vm11 = vcmp.eq.f32.partialorder %v2775_v1, inf  ;;  %v2881_v52 = vadd.f32 %v540_v60, %v449_v23  ;;  %v450_v14 = vmul.f32 %v170_v15, %v170_v15  ;;  %v541_v36 = vmul.f32 %v359_v7, %v359_v7 }
  0xa1   :  { %v1503_v4 = vpop.eup %1502  ;;  %v1007_v29 = vsel %vm1006_vm7, %v2746_v3, %v1005_v34  ;;  %vm1022_vm12 = vcmp.eq.f32.partialorder %v2775_v1, 0.0  ;;  %v171_v40 = vsub.f32 %v73_v8, %v2384_v27  ;;  %v360_v20 = vsub.f32 %v262_v26, %v2407_v41 }
  0xa2   :  { %v1505_v25 = vpop.eup %1504  ;;  %v1010_v44 = vsel %vm1008_vm8, %v1009_v2, %v1007_v29  ;;  %v1012_v61 = vmul.f32 %v1503_v4, %v2768_v17  ;;  %v1023_v19 = vand.u32 2147483648, %v2775_v1  ;;  %1512 = vrsqrt.f32 %v2881_v52 }
  0xa3   :  { %1354 = vst.msk [vmem:[%s3774_s4 + $0x180] sm:$0xff] %vm1305_vm2, %v1010_v44  ;;  %v1019_v62 = vmul.f32 %v1505_v25, %v2775_v1  ;;  %vm1027_vm13 = vcmp.eq.f32.partialorder %v2803_v5, inf  ;;  %v2906_v45 = vadd.f32 %v541_v36, %v450_v14  ;;  %v172_v3 = vsub.f32 %v74_v18, %v2384_v27  ;;  %v268_v25 = vld [vmem:[%s3771_s1 + $0x1f0] sm:$0xff] }
  0xa4   :  { %v1014_v51 = vsel %vm1013_vm9, %v2768_v17, %v1012_v61  ;;  %v451_v11 = vmul.f32 %v171_v40, %v171_v40  ;;  %v542_v28 = vmul.f32 %v360_v20, %v360_v20  ;;  %v361_v54 = vsub.f32 %v263_v30, %v2407_v41  ;;  %v265_v17 = vld [vmem:[%s3771_s1 + $0x1d8] sm:$0xff]  ;;  %v267_v40 = vld [vmem:[%s3771_s1 + $0x1e8] sm:$0xff]  ;;  %v79_v30 = vld [vmem:[%s3770_s0 + $0x1f0] sm:$0xff] }
  0xa5   :  { %v1507_v16 = vpop.eup %1506  ;;  %v1017_v57 = vsel %vm1015_vm10, %v1016_v35, %v1014_v51  ;;  %v1021_v38 = vsel %vm1020_vm11, %v2775_v1, %v1019_v62  ;;  %v1030_v37 = vand.u32 2147483648, %v2803_v5  ;;  %1514 = vrsqrt.f32 %v2906_v45 }
  0xa6   :  { %1355 = vst.msk [vmem:[%s3774_s4 + $0x188] sm:$0xff] %vm1305_vm2, %v1017_v57  ;;  %v1024_v63 = vsel %vm1022_vm12, %v1023_v19, %v1021_v38  ;;  %v1026_v47 = vmul.f32 %v1507_v16, %v2803_v5  ;;  %vm1029_vm14 = vcmp.eq.f32.partialorder %v2803_v5, 0.0  ;;  %vm1034_vm15 = vcmp.eq.f32.partialorder %v2851_v42, inf  ;;  %v81_v16 = vld [vmem:[%s3770_s0 + $0x200] sm:$0xff] }
  0xa7   :  { %1356 = vst.msk [vmem:[%s3774_s4 + $0x190] sm:$0xff] %vm1305_vm2, %v1024_v63  ;;  %v2945_v0 = vadd.f32 %v542_v28, %v451_v11  ;;  %v452_v33 = vmul.f32 %v172_v3, %v172_v3  ;;  %v543_v6 = vmul.f32 %v361_v54, %v361_v54  ;;  %v173_v46 = vsub.f32 %v75_v31, %v2384_v27  ;;  %v80_v31 = vld [vmem:[%s3770_s0 + $0x1f8] sm:$0xff] }
  0xa8   :  { %v1028_v1 = vsel %vm1027_vm13, %v2803_v5, %v1026_v47  ;;  %v362_v50 = vsub.f32 %v264_v43, %v2407_v41  ;;  %v174_v49 = vsub.f32 %v76_v39, %v2384_v27  ;;  %v363_v48 = vsub.f32 %v265_v17, %v2407_v41  ;;  %v270_v17 = vld [vmem:[%s3771_s1 + $0x200] sm:$0xff] }
  0xa9   :  { %v1031_v12 = vsel %vm1029_vm14, %v1030_v37, %v1028_v1  ;;  %vm1036_vm0 = vcmp.eq.f32.partialorder %v2851_v42, 0.0  ;;  %v1037_v55 = vand.u32 2147483648, %v2851_v42  ;;  %1516 = vrsqrt.f32 %v2945_v0  ;;  %v82_v1 = vld [vmem:[%s3770_s0 + $0x208] sm:$0xff] }
  0xaa   :  { %1357 = vst.msk [vmem:[%s3774_s4 + $0x198] sm:$0xff] %vm1305_vm2, %v1031_v12  ;;  %vm1041_vm1 = vcmp.eq.f32.partialorder %v2853_v21, inf  ;;  %v2968_v5 = vadd.f32 %v543_v6, %v452_v33  ;;  %v453_v32 = vmul.f32 %v173_v46, %v173_v46  ;;  %v544_v13 = vmul.f32 %v362_v50, %v362_v50 }
  0xab   :  { %v1509_v56 = vpop.eup %1508  ;;  %v454_v53 = vmul.f32 %v174_v49, %v174_v49  ;;  %v545_v15 = vmul.f32 %v363_v48, %v363_v48  ;;  %v175_v59 = vsub.f32 %v77_v9, %v2384_v27  ;;  %v364_v58 = vsub.f32 %v266_v10, %v2407_v41 }
  0xac   :  { %v1511_v23 = vpop.eup %1510  ;;  %v1033_v60 = vmul.f32 %v1509_v56, %v2851_v42  ;;  %vm1043_vm3 = vcmp.eq.f32.partialorder %v2853_v21, 0.0  ;;  %v1044_v7 = vand.u32 2147483648, %v2853_v21  ;;  %1518 = vrsqrt.f32 %v2968_v5  ;;  %v271_v56 = vld [vmem:[%s3771_s1 + $0x208] sm:$0xff] }
  0xad   :  { %v1040_v24 = vmul.f32 %v1511_v23, %v2853_v21  ;;  %vm1048_vm4 = vcmp.eq.f32.partialorder %v2881_v52, inf  ;;  %v2981_v2 = vadd.f32 %v544_v13, %v453_v32  ;;  %v2983_v8 = vadd.f32 %v545_v15, %v454_v53 }
  0xae   :  { %v1035_v26 = vsel %vm1034_vm15, %v2851_v42, %v1033_v60  ;;  %v455_v34 = vmul.f32 %v175_v59, %v175_v59  ;;  %v546_v35 = vmul.f32 %v364_v58, %v364_v58  ;;  %v176_v14 = vsub.f32 %v78_v22, %v2384_v27 }
  0xaf   :  { %v1513_v36 = vpop.eup %1512  ;;  %v1038_v18 = vsel %vm1036_vm0, %v1037_v55, %v1035_v26  ;;  %v1042_v4 = vsel %vm1041_vm1, %v2853_v21, %v1040_v24  ;;  %v1051_v29 = vand.u32 2147483648, %v2881_v52  ;;  %1520 = vrsqrt.f32 %v2981_v2  ;;  %v83_v24 = vld [vmem:[%s3770_s0 + $0x210] sm:$0xff] }
  0xb0   :  { %1358 = vst.msk [vmem:[%s3774_s4 + $0x1a0] sm:$0xff] %vm1305_vm2, %v1038_v18  ;;  %v1045_v42 = vsel %vm1043_vm3, %v1044_v7, %v1042_v4  ;;  %v1047_v20 = vmul.f32 %v1513_v36, %v2881_v52  ;;  %vm1050_vm5 = vcmp.eq.f32.partialorder %v2881_v52, 0.0  ;;  %vm1055_vm6 = vcmp.eq.f32.partialorder %v2906_v45, inf  ;;  %v272_v26 = vld [vmem:[%s3771_s1 + $0x210] sm:$0xff] }
  0xb1   :  { %1359 = vst.msk [vmem:[%s3774_s4 + $0x1a8] sm:$0xff] %vm1305_vm2, %v1045_v42  ;;  %vm1057_vm7 = vcmp.eq.f32.partialorder %v2906_v45, 0.0  ;;  %v1058_v21 = vand.u32 2147483648, %v2906_v45  ;;  %vm1062_vm8 = vcmp.eq.f32.partialorder %v2945_v0, inf  ;;  %1522 = vrsqrt.f32 %v2983_v8 }
  0xb2   :  { %v1515_v44 = vpop.eup %1514  ;;  %v1049_v61 = vsel %vm1048_vm4, %v2881_v52, %v1047_v20  ;;  %v3025_v19 = vadd.f32 %v546_v35, %v455_v34  ;;  %v365_v62 = vsub.f32 %v267_v40, %v2407_v41  ;;  %v456_v3 = vmul.f32 %v176_v14, %v176_v14  ;;  %v269_v52 = vld [vmem:[%s3771_s1 + $0x1f8] sm:$0xff] }
  0xb3   :  { %v1052_v51 = vsel %vm1050_vm5, %v1051_v29, %v1049_v61  ;;  %v1054_v11 = vmul.f32 %v1515_v44, %v2906_v45  ;;  %v177_v28 = vsub.f32 %v79_v30, %v2384_v27  ;;  %v366_v54 = vsub.f32 %v268_v25, %v2407_v41  ;;  %v84_v30 = vld [vmem:[%s3770_s0 + $0x218] sm:$0xff] }
  0xb4   :  { %1360 = vst.msk [vmem:[%s3774_s4 + $0x1b0] sm:$0xff] %vm1305_vm2, %v1052_v51  ;;  %vm1064_vm9 = vcmp.eq.f32.partialorder %v2945_v0, 0.0  ;;  %v1065_v57 = vand.u32 2147483648, %v2945_v0  ;;  %vm1069_vm10 = vcmp.eq.f32.partialorder %v2968_v5, inf  ;;  %1524 = vrsqrt.f32 %v3025_v19 }
  0xb5   :  { %v1056_v38 = vsel %vm1055_vm6, %v2906_v45, %v1054_v11  ;;  %v547_v37 = vmul.f32 %v365_v62, %v365_v62  ;;  %v457_v43 = vmul.f32 %v177_v28, %v177_v28  ;;  %v548_v39 = vmul.f32 %v366_v54, %v366_v54 }
  0xb6   :  { %v1517_v63 = vpop.eup %1516  ;;  %v1059_v47 = vsel %vm1057_vm7, %v1058_v21, %v1056_v38  ;;  %v178_v33 = vsub.f32 %v80_v31, %v2384_v27  ;;  %v367_v6 = vsub.f32 %v269_v52, %v2407_v41  ;;  %v179_v46 = vsub.f32 %v81_v16, %v2384_v27  ;;  %v85_v31 = vld [vmem:[%s3770_s0 + $0x220] sm:$0xff]  ;;  %v86_v16 = vld [vmem:[%s3770_s0 + $0x228] sm:$0xff] }
  0xb7   :  { %1361 = vst.msk [vmem:[%s3774_s4 + $0x1b8] sm:$0xff] %vm1305_vm2, %v1059_v47  ;;  %v1061_v50 = vmul.f32 %v1517_v63, %v2945_v0  ;;  %vm1071_vm11 = vcmp.eq.f32.partialorder %v2968_v5, 0.0  ;;  %v3068_v45 = vadd.f32 %v547_v37, %v456_v3  ;;  %v3070_v49 = vadd.f32 %v548_v39, %v457_v43  ;;  %v273_v3 = vld [vmem:[%s3771_s1 + $0x218] sm:$0xff]  ;;  %v274_v52 = vld [vmem:[%s3771_s1 + $0x220] sm:$0xff] }
  0xb8   :  { %v1072_v48 = vand.u32 2147483648, %v2968_v5  ;;  %v458_v9 = vmul.f32 %v178_v33, %v178_v33  ;;  %v549_v10 = vmul.f32 %v367_v6, %v367_v6  ;;  %v368_v12 = vsub.f32 %v270_v17, %v2407_v41  ;;  %v3178_v39 = vld [vmem:[%s3772_s2] ss:$0 sm:$0xff]  ;;  %v87_v33 = vld [vmem:[%s3770_s0 + $0x230] sm:$0xff] }
  0xb9   :  { %v1519_v55 = vpop.eup %1518  ;;  %v1063_v32 = vsel %vm1062_vm8, %v2945_v0, %v1061_v50  ;;  %vm1076_vm12 = vcmp.eq.f32.partialorder %v2981_v2, inf  ;;  %1526 = vrsqrt.f32 %v3068_v45  ;;  %v180_v13 = vsub.f32 %v82_v1, %v2384_v27  ;;  %v3184_v63 = vld [vmem:[%s3773_s3] ss:$0 sm:$0xff] }
  0xba   :  { %v1066_v53 = vsel %vm1064_vm9, %v1065_v57, %v1063_v32  ;;  %v1068_v15 = vmul.f32 %v1519_v55, %v2968_v5  ;;  %1528 = vrsqrt.f32 %v3070_v49  ;;  %v459_v59 = vmul.f32 %v179_v46, %v179_v46 }
  0xbb   :  { %1362 = vst.msk [vmem:[%s3774_s4 + $0x1c0] sm:$0xff] %vm1305_vm2, %v1066_v53  ;;  %vm1078_vm13 = vcmp.eq.f32.partialorder %v2981_v2, 0.0  ;;  %v1079_v58 = vand.u32 2147483648, %v2981_v2  ;;  %vm1083_vm14 = vcmp.eq.f32.partialorder %v2983_v8, inf  ;;  %v3094_v22 = vadd.f32 %v549_v10, %v458_v9 }
  0xbc   :  { %v1521_v0 = vpop.eup %1520  ;;  %v1070_v23 = vsel %vm1069_vm10, %v2968_v5, %v1068_v15  ;;  %vm1085_vm15 = vcmp.eq.f32.partialorder %v2983_v8, 0.0  ;;  %v550_v60 = vmul.f32 %v368_v12, %v368_v12  ;;  %v369_v7 = vsub.f32 %v271_v56, %v2407_v41  ;;  %v276_v12 = vld [vmem:[%s3771_s1 + $0x230] sm:$0xff] }
  0xbd   :  { %v1073_v34 = vsel %vm1071_vm11, %v1072_v48, %v1070_v23  ;;  %v1075_v35 = vmul.f32 %v1521_v0, %v2981_v2  ;;  %1530 = vrsqrt.f32 %v3094_v22  ;;  %v460_v14 = vmul.f32 %v180_v13, %v180_v13 }
  0xbe   :  { %v1523_v36 = vpop.eup %1522  ;;  %1363 = vst.msk [vmem:[%s3774_s4 + $0x1c8] sm:$0xff] %vm1305_vm2, %v1073_v34  ;;  %v1086_v18 = vand.u32 2147483648, %v2983_v8  ;;  %vm1090_vm0 = vcmp.eq.f32.partialorder %v3025_v19, inf  ;;  %v3117_v4 = vadd.f32 %v550_v60, %v459_v59  ;;  %v551_v29 = vmul.f32 %v369_v7, %v369_v7 }
  0xbf   :  { %v1077_v5 = vsel %vm1076_vm12, %v2981_v2, %v1075_v35  ;;  %v1082_v40 = vmul.f32 %v1523_v36, %v2983_v8  ;;  %v181_v42 = vsub.f32 %v83_v24, %v2384_v27  ;;  %v370_v20 = vsub.f32 %v272_v26, %v2407_v41 }
  0xc0   :  { %v1080_v25 = vsel %vm1078_vm13, %v1079_v58, %v1077_v5  ;;  %vm1092_vm1 = vcmp.eq.f32.partialorder %v3025_v19, 0.0  ;;  %v1093_v21 = vand.u32 2147483648, %v3025_v19  ;;  %1532 = vrsqrt.f32 %v3117_v4 }
  0xc1   :  { %v1525_v44 = vpop.eup %1524  ;;  %1364 = vst.msk [vmem:[%s3774_s4 + $0x1d0] sm:$0xff] %vm1305_vm2, %v1080_v25  ;;  %v1084_v61 = vsel %vm1083_vm14, %v2983_v8, %v1082_v40  ;;  %vm1097_vm3 = vcmp.eq.f32.partialorder %v3068_v45, inf  ;;  %v3141_v2 = vadd.f32 %v551_v29, %v460_v14  ;;  %v461_v62 = vmul.f32 %v181_v42, %v181_v42  ;;  %v277_v29 = vld [vmem:[%s3771_s1 + $0x238] sm:$0xff] }
  0xc2   :  { %v1087_v51 = vsel %vm1085_vm15, %v1086_v18, %v1084_v61  ;;  %v1089_v11 = vmul.f32 %v1525_v44, %v3025_v19  ;;  %v552_v28 = vmul.f32 %v370_v20, %v370_v20  ;;  %v182_v54 = vsub.f32 %v84_v30, %v2384_v27  ;;  %v278_v30 = vld [vmem:[%s3771_s1 + $0x240] sm:$0xff] }
  0xc3   :  { %1365 = vst.msk [vmem:[%s3774_s4 + $0x1d8] sm:$0xff] %vm1305_vm2, %v1087_v51  ;;  %vm1099_vm4 = vcmp.eq.f32.partialorder %v3068_v45, 0.0  ;;  %v1100_v27 = vand.u32 2147483648, %v3068_v45  ;;  %vm1104_vm5 = vcmp.eq.f32.partialorder %v3070_v49, inf  ;;  %1534 = vrsqrt.f32 %v3141_v2 }
  0xc4   :  { %v1091_v8 = vsel %vm1090_vm0, %v3025_v19, %v1089_v11  ;;  %v3170_v57 = vadd.f32 %v552_v28, %v461_v62  ;;  %v371_v38 = vsub.f32 %v273_v3, %v2407_v41  ;;  %v462_v37 = vmul.f32 %v182_v54, %v182_v54  ;;  %v275_v19 = vld [vmem:[%s3771_s1 + $0x228] sm:$0xff] }
  0xc5   :  { %v1094_v43 = vsel %vm1092_vm1, %v1093_v21, %v1091_v8  ;;  %v183_v17 = vsub.f32 %v85_v31, %v3178_v39  ;;  %v372_v47 = vsub.f32 %v274_v52, %v3184_v63  ;;  %v184_v41 = vsub.f32 %v86_v16, %v3178_v39  ;;  %v90_v31 = vld [vmem:[%s3770_s0 + $0x248] sm:$0xff]  ;;  %v91_v16 = vld [vmem:[%s3770_s0 + $0x250] sm:$0xff] }
  0xc6   :  { %v1527_v6 = vpop.eup %1526  ;;  %1366 = vst.msk [vmem:[%s3774_s4 + $0x1e0] sm:$0xff] %vm1305_vm2, %v1094_v43  ;;  %vm1106_vm6 = vcmp.eq.f32.partialorder %v3070_v49, 0.0  ;;  %v1107_v46 = vand.u32 2147483648, %v3070_v49  ;;  %vm1111_vm7 = vcmp.eq.f32.partialorder %v3094_v22, inf  ;;  %1536 = vrsqrt.f32 %v3170_v57  ;;  %v279_v52 = vld [vmem:[%s3771_s1 + $0x248] sm:$0xff] }
  0xc7   :  { %v1529_v1 = vpop.eup %1528  ;;  %v1096_v50 = vmul.f32 %v1527_v6, %v3068_v45  ;;  %v553_v48 = vmul.f32 %v371_v38, %v371_v38  ;;  %v463_v9 = vmul.f32 %v183_v17, %v183_v17  ;;  %v554_v10 = vmul.f32 %v372_v47, %v372_v47  ;;  %v280_v17 = vld [vmem:[%s3771_s1 + $0x250] sm:$0xff]  ;;  %v92_v6 = vld [vmem:[%s3770_s0 + $0x258] sm:$0xff] }
  0xc8   :  { %v1103_v55 = vmul.f32 %v1529_v1, %v3070_v49  ;;  %v1114_v32 = vand.u32 2147483648, %v3094_v22  ;;  %v373_v13 = vsub.f32 %v275_v19, %v3184_v63  ;;  %v185_v56 = vsub.f32 %v87_v33, %v3178_v39 }
  0xc9   :  { %v1098_v53 = vsel %vm1097_vm3, %v3068_v45, %v1096_v50  ;;  %v3213_v15 = vadd.f32 %v553_v48, %v462_v37  ;;  %v3215_v59 = vadd.f32 %v554_v10, %v463_v9  ;;  %v464_v58 = vmul.f32 %v184_v41, %v184_v41  ;;  %v88_v45 = vld [vmem:[%s3770_s0 + $0x238] sm:$0xff] }
  0xca   :  { %v1531_v0 = vpop.eup %1530  ;;  %v1101_v23 = vsel %vm1099_vm4, %v1100_v27, %v1098_v53  ;;  %v1105_v60 = vsel %vm1104_vm5, %v3070_v49, %v1103_v55  ;;  %v555_v7 = vmul.f32 %v373_v13, %v373_v13  ;;  %v374_v24 = vsub.f32 %v276_v12, %v3184_v63 }
  0xcb   :  { %1367 = vst.msk [vmem:[%s3774_s4 + $0x1e8] sm:$0xff] %vm1305_vm2, %v1101_v23  ;;  %v1108_v26 = vsel %vm1106_vm6, %v1107_v46, %v1105_v60  ;;  %v1110_v34 = vmul.f32 %v1531_v0, %v3094_v22  ;;  %vm1113_vm8 = vcmp.eq.f32.partialorder %v3094_v22, 0.0  ;;  %1538 = vrsqrt.f32 %v3213_v15 }
  0xcc   :  { %1368 = vst.msk [vmem:[%s3774_s4 + $0x1f0] sm:$0xff] %vm1305_vm2, %v1108_v26  ;;  %vm1118_vm9 = vcmp.eq.f32.partialorder %v3117_v4, inf  ;;  %1540 = vrsqrt.f32 %v3215_v59  ;;  %v465_v49 = vmul.f32 %v185_v56, %v185_v56  ;;  %vm1120_vm10 = vcmp.eq.f32.partialorder %v3117_v4, 0.0  ;;  %v93_v26 = vld [vmem:[%s3770_s0 + $0x260] sm:$0xff] }
  0xcd   :  { %v1533_v35 = vpop.eup %1532  ;;  %v1112_v14 = vsel %vm1111_vm7, %v3094_v22, %v1110_v34  ;;  %v1121_v36 = vand.u32 2147483648, %v3117_v4  ;;  %v3246_v18 = vadd.f32 %v555_v7, %v464_v58  ;;  %v556_v42 = vmul.f32 %v374_v24, %v374_v24  ;;  %v89_v22 = vld [vmem:[%s3770_s0 + $0x240] sm:$0xff] }
  0xce   :  { %v1115_v5 = vsel %vm1113_vm8, %v1114_v32, %v1112_v14  ;;  %v1117_v40 = vmul.f32 %v1533_v35, %v3117_v4  ;;  %v186_v20 = vsub.f32 %v88_v45, %v3178_v39  ;;  %vm1125_vm11 = vcmp.eq.f32.partialorder %v3141_v2, inf  ;;  %v281_v32 = vld [vmem:[%s3771_s1 + $0x258] sm:$0xff] }
  0xcf   :  { %1369 = vst.msk [vmem:[%s3774_s4 + $0x1f8] sm:$0xff] %vm1305_vm2, %v1115_v5  ;;  %vm1127_vm12 = vcmp.eq.f32.partialorder %v3141_v2, 0.0  ;;  %v1128_v25 = vand.u32 2147483648, %v3141_v2  ;;  %1542 = vrsqrt.f32 %v3246_v18  ;;  %v3270_v61 = vadd.f32 %v556_v42, %v465_v49  ;;  %v282_v5 = vld [vmem:[%s3771_s1 + $0x260] sm:$0xff] }
  0xd0   :  { %v1535_v21 = vpop.eup %1534  ;;  %v1119_v44 = vsel %vm1118_vm9, %v3117_v4, %v1117_v40  ;;  %v375_v62 = vsub.f32 %v277_v29, %v3184_v63  ;;  %v466_v3 = vmul.f32 %v186_v20, %v186_v20  ;;  %v187_v28 = vsub.f32 %v89_v22, %v3178_v39  ;;  %v94_v22 = vld [vmem:[%s3770_s0 + $0x268] sm:$0xff] }
  0xd1   :  { %v1122_v51 = vsel %vm1120_vm10, %v1121_v36, %v1119_v44  ;;  %v1124_v11 = vmul.f32 %v1535_v21, %v3141_v2  ;;  %v376_v54 = vsub.f32 %v278_v30, %v3184_v63  ;;  %vm1132_vm13 = vcmp.eq.f32.partialorder %v3170_v57, inf  ;;  %v283_v30 = vld [vmem:[%s3771_s1 + $0x268] sm:$0xff] }
  0xd2   :  { %1370 = vst.msk [vmem:[%s3774_s4 + $0x200] sm:$0xff] %vm1305_vm2, %v1122_v51  ;;  %vm1134_vm14 = vcmp.eq.f32.partialorder %v3170_v57, 0.0  ;;  %v1135_v4 = vand.u32 2147483648, %v3170_v57  ;;  %1544 = vrsqrt.f32 %v3270_v61  ;;  %v557_v38 = vmul.f32 %v375_v62, %v375_v62 }
  0xd3   :  { %v1537_v27 = vpop.eup %1536  ;;  %v1126_v8 = vsel %vm1125_vm11, %v3141_v2, %v1124_v11  ;;  %v467_v37 = vmul.f32 %v187_v28, %v187_v28  ;;  %v558_v43 = vmul.f32 %v376_v54, %v376_v54  ;;  %v188_v19 = vsub.f32 %v90_v31, %v3178_v39  ;;  %v95_v31 = vld [vmem:[%s3770_s0 + $0x270] sm:$0xff] }
  0xd4   :  { %v1129_v47 = vsel %vm1127_vm12, %v1128_v25, %v1126_v8  ;;  %v1131_v41 = vmul.f32 %v1537_v27, %v3170_v57  ;;  %v377_v33 = vsub.f32 %v279_v52, %v3184_v63  ;;  %vm1139_vm15 = vcmp.eq.f32.partialorder %v3213_v15, inf  ;;  %v284_v52 = vld [vmem:[%s3771_s1 + $0x270] sm:$0xff] }
  0xd5   :  { %1371 = vst.msk [vmem:[%s3774_s4 + $0x208] sm:$0xff] %vm1305_vm2, %v1129_v47  ;;  %v3314_v46 = vadd.f32 %v557_v38, %v466_v3  ;;  %v3316_v2 = vadd.f32 %v558_v43, %v467_v37  ;;  %v189_v1 = vsub.f32 %v91_v16, %v3178_v39  ;;  %v468_v48 = vmul.f32 %v188_v19, %v188_v19  ;;  %v285_v37 = vld [vmem:[%s3771_s1 + $0x278] sm:$0xff] }
  0xd6   :  { %v1133_v50 = vsel %vm1132_vm13, %v3170_v57, %v1131_v41  ;;  %v559_v9 = vmul.f32 %v377_v33, %v377_v33  ;;  %v378_v10 = vsub.f32 %v280_v17, %v3184_v63  ;;  %vm1141_vm0 = vcmp.eq.f32.partialorder %v3213_v15, 0.0 }
  0xd7   :  { %v1136_v12 = vsel %vm1134_vm14, %v1135_v4, %v1133_v50  ;;  %1546 = vrsqrt.f32 %v3314_v46  ;;  %v190_v55 = vsub.f32 %v92_v6, %v3178_v39  ;;  %v1142_v56 = vand.u32 2147483648, %v3213_v15  ;;  %v96_v4 = vld [vmem:[%s3770_s0 + $0x278] sm:$0xff] }
  0xd8   :  { %v1539_v13 = vpop.eup %1538  ;;  %1372 = vst.msk [vmem:[%s3774_s4 + $0x210] sm:$0xff] %vm1305_vm2, %v1136_v12  ;;  %vm1146_vm1 = vcmp.eq.f32.partialorder %v3215_v59, inf  ;;  %vm1148_vm3 = vcmp.eq.f32.partialorder %v3215_v59, 0.0  ;;  %1548 = vrsqrt.f32 %v3316_v2  ;;  %v1149_v58 = vand.u32 2147483648, %v3215_v59 }
  0xd9   :  { %v1541_v57 = vpop.eup %1540  ;;  %v1138_v53 = vmul.f32 %v1539_v13, %v3213_v15  ;;  %v3341_v0 = vadd.f32 %v559_v9, %v468_v48  ;;  %v469_v23 = vmul.f32 %v189_v1, %v189_v1  ;;  %vm1153_vm4 = vcmp.eq.f32.partialorder %v3246_v18, inf  ;;  %v97_v1 = vld [vmem:[%s3770_s0 + $0x280] sm:$0xff] }
  0xda   :  { %v1145_v60 = vmul.f32 %v1541_v57, %v3215_v59  ;;  %v560_v7 = vmul.f32 %v378_v10, %v378_v10  ;;  %v379_v24 = vsub.f32 %v281_v32, %v3184_v63  ;;  %vm1155_vm5 = vcmp.eq.f32.partialorder %v3246_v18, 0.0  ;;  %v98_v57 = vld [vmem:[%s3770_s0 + $0x288] sm:$0xff] }
  0xdb   :  { %v1140_v34 = vsel %vm1139_vm15, %v3213_v15, %v1138_v53  ;;  %1550 = vrsqrt.f32 %v3341_v0  ;;  %v470_v45 = vmul.f32 %v190_v55, %v190_v55  ;;  %v1156_v36 = vand.u32 2147483648, %v3246_v18  ;;  %v287_v53 = vld [vmem:[%s3771_s1 + $0x288] sm:$0xff] }
  0xdc   :  { %v1543_v49 = vpop.eup %1542  ;;  %v1143_v35 = vsel %vm1141_vm0, %v1142_v56, %v1140_v34  ;;  %v1147_v14 = vsel %vm1146_vm1, %v3215_v59, %v1145_v60  ;;  %v3360_v29 = vadd.f32 %v560_v7, %v469_v23  ;;  %v561_v42 = vmul.f32 %v379_v24, %v379_v24  ;;  %v286_v56 = vld [vmem:[%s3771_s1 + $0x280] sm:$0xff] }
  0xdd   :  { %1373 = vst.msk [vmem:[%s3774_s4 + $0x218] sm:$0xff] %vm1305_vm2, %v1143_v35  ;;  %v1150_v15 = vsel %vm1148_vm3, %v1149_v58, %v1147_v14  ;;  %v1152_v40 = vmul.f32 %v1543_v49, %v3246_v18  ;;  %v191_v20 = vsub.f32 %v93_v26, %v3178_v39  ;;  %vm1160_vm6 = vcmp.eq.f32.partialorder %v3270_v61, inf }
  0xde   :  { %1374 = vst.msk [vmem:[%s3774_s4 + $0x220] sm:$0xff] %vm1305_vm2, %v1150_v15  ;;  %vm1162_vm7 = vcmp.eq.f32.partialorder %v3270_v61, 0.0  ;;  %v1163_v59 = vand.u32 2147483648, %v3270_v61  ;;  %1552 = vrsqrt.f32 %v3360_v29  ;;  %v3390_v44 = vadd.f32 %v561_v42, %v470_v45 }
  0xdf   :  { %v1545_v25 = vpop.eup %1544  ;;  %v1154_v21 = vsel %vm1153_vm4, %v3246_v18, %v1152_v40  ;;  %v380_v62 = vsub.f32 %v282_v5, %v3184_v63  ;;  %v471_v3 = vmul.f32 %v191_v20, %v191_v20  ;;  %v192_v28 = vsub.f32 %v94_v22, %v3178_v39 }
  0xe0   :  { %v1157_v51 = vsel %vm1155_vm5, %v1156_v36, %v1154_v21  ;;  %v1159_v11 = vmul.f32 %v1545_v25, %v3270_v61  ;;  %v381_v54 = vsub.f32 %v283_v30, %v3184_v63  ;;  %vm1167_vm8 = vcmp.eq.f32.partialorder %v3314_v46, inf }
  0xe1   :  { %1375 = vst.msk [vmem:[%s3774_s4 + $0x228] sm:$0xff] %vm1305_vm2, %v1157_v51  ;;  %vm1169_vm9 = vcmp.eq.f32.partialorder %v3314_v46, 0.0  ;;  %v1170_v18 = vand.u32 2147483648, %v3314_v46  ;;  %1554 = vrsqrt.f32 %v3390_v44  ;;  %v562_v27 = vmul.f32 %v380_v62, %v380_v62  ;;  %v100_v62 = vld [vmem:[%s3770_s0 + $0x298] sm:$0xff] }
  0xe2   :  { %v1161_v16 = vsel %vm1160_vm6, %v3270_v61, %v1159_v11  ;;  %v472_v8 = vmul.f32 %v192_v28, %v192_v28  ;;  %v563_v38 = vmul.f32 %v381_v54, %v381_v54  ;;  %vm1174_vm10 = vcmp.eq.f32.partialorder %v3316_v2, inf }
  0xe3   :  { %v1164_v43 = vsel %vm1162_vm7, %v1163_v59, %v1161_v16  ;;  %v193_v17 = vsub.f32 %v95_v31, %v3178_v39  ;;  %v382_v47 = vsub.f32 %v284_v52, %v3184_v63  ;;  %v1177_v19 = vand.u32 2147483648, %v3316_v2 }
  0xe4   :  { %v1547_v41 = vpop.eup %1546  ;;  %1376 = vst.msk [vmem:[%s3774_s4 + $0x230] sm:$0xff] %vm1305_vm2, %v1164_v43  ;;  %v3431_v33 = vadd.f32 %v562_v27, %v471_v3  ;;  %v3433_v6 = vadd.f32 %v563_v38, %v472_v8  ;;  %v194_v61 = vsub.f32 %v96_v4, %v3178_v39  ;;  %v383_v12 = vsub.f32 %v285_v37, %v3184_v63  ;;  %v289_v4 = vld [vmem:[%s3771_s1 + $0x298] sm:$0xff]  ;;  %v101_v8 = vld [vmem:[%s3770_s0 + $0x2a0] sm:$0xff] }
  0xe5   :  { %v1549_v50 = vpop.eup %1548  ;;  %v1166_v48 = vmul.f32 %v1547_v41, %v3314_v46  ;;  %v473_v9 = vmul.f32 %v193_v17, %v193_v17  ;;  %v564_v10 = vmul.f32 %v382_v47, %v382_v47  ;;  %vm1176_vm11 = vcmp.eq.f32.partialorder %v3316_v2, 0.0  ;;  %v290_v38 = vld [vmem:[%s3771_s1 + $0x2a0] sm:$0xff] }
  0xe6   :  { %v1173_v55 = vmul.f32 %v1549_v50, %v3316_v2  ;;  %vm1181_vm12 = vcmp.eq.f32.partialorder %v3341_v0, inf  ;;  %1556 = vrsqrt.f32 %v3431_v33  ;;  %vm1183_vm13 = vcmp.eq.f32.partialorder %v3341_v0, 0.0 }
  0xe7   :  { %v1168_v32 = vsel %vm1167_vm8, %v3314_v46, %v1166_v48  ;;  %1558 = vrsqrt.f32 %v3433_v6  ;;  %v195_v13 = vsub.f32 %v97_v1, %v3178_v39  ;;  %v1184_v7 = vand.u32 2147483648, %v3341_v0 }
  0xe8   :  { %v1551_v58 = vpop.eup %1550  ;;  %v1171_v23 = vsel %vm1169_vm9, %v1170_v18, %v1168_v32  ;;  %v1175_v60 = vsel %vm1174_vm10, %v3316_v2, %v1173_v55  ;;  %v474_v24 = vmul.f32 %v194_v61, %v194_v61  ;;  %v3473_v45 = vadd.f32 %v564_v10, %v473_v9  ;;  %v99_v2 = vld [vmem:[%s3770_s0 + $0x290] sm:$0xff]  ;;  %v291_v61 = vld [vmem:[%s3771_s1 + $0x2a8] sm:$0xff] }
  0xe9   :  { %1377 = vst.msk [vmem:[%s3774_s4 + $0x238] sm:$0xff] %vm1305_vm2, %v1171_v23  ;;  %v1178_v26 = vsel %vm1176_vm11, %v1177_v19, %v1175_v60  ;;  %v1180_v34 = vmul.f32 %v1551_v58, %v3341_v0  ;;  %v565_v46 = vmul.f32 %v383_v12, %v383_v12  ;;  %vm1188_vm14 = vcmp.eq.f32.partialorder %v3360_v29, inf }
  0xea   :  { %1378 = vst.msk [vmem:[%s3774_s4 + $0x240] sm:$0xff] %vm1305_vm2, %v1178_v26  ;;  %v384_v49 = vsub.f32 %v286_v56, %v3184_v63  ;;  %v196_v35 = vsub.f32 %v98_v57, %v3178_v39  ;;  %v385_v14 = vsub.f32 %v287_v53, %v3184_v63  ;;  %v1191_v15 = vand.u32 2147483648, %v3360_v29 }
  0xeb   :  { %v1553_v36 = vpop.eup %1552  ;;  %v1182_v5 = vsel %vm1181_vm12, %v3341_v0, %v1180_v34  ;;  %1560 = vrsqrt.f32 %v3473_v45  ;;  %v475_v40 = vmul.f32 %v195_v13, %v195_v13  ;;  %vm1190_vm15 = vcmp.eq.f32.partialorder %v3360_v29, 0.0  ;;  %v288_v0 = vld [vmem:[%s3771_s1 + $0x290] sm:$0xff] }
  0xec   :  { %v1185_v42 = vsel %vm1183_vm13, %v1184_v7, %v1182_v5  ;;  %v1187_v20 = vmul.f32 %v1553_v36, %v3360_v29  ;;  %v3495_v22 = vadd.f32 %v565_v46, %v474_v24  ;;  %v566_v30 = vmul.f32 %v384_v49, %v384_v49  ;;  %v104_v36 = vld [vmem:[%s3770_s0 + $0x2b8] sm:$0xff] }
  0xed   :  { %1379 = vst.msk [vmem:[%s3774_s4 + $0x248] sm:$0xff] %vm1305_vm2, %v1185_v42  ;;  %v476_v59 = vmul.f32 %v196_v35, %v196_v35  ;;  %v567_v25 = vmul.f32 %v385_v14, %v385_v14  ;;  %v197_v21 = vsub.f32 %v99_v2, %v3178_v39  ;;  %vm1195_vm0 = vcmp.eq.f32.partialorder %v3390_v44, inf  ;;  %v292_v2 = vld [vmem:[%s3771_s1 + $0x2b0] sm:$0xff]  ;;  %v293_v5 = vld [vmem:[%s3771_s1 + $0x2b8] sm:$0xff] }
  0xee   :  { %v1555_v3 = vpop.eup %1554  ;;  %v1189_v51 = vsel %vm1188_vm14, %v3360_v29, %v1187_v20  ;;  %v1198_v11 = vand.u32 2147483648, %v3390_v44  ;;  %1562 = vrsqrt.f32 %v3495_v22  ;;  %vm1197_vm1 = vcmp.eq.f32.partialorder %v3390_v44, 0.0 }
  0xef   :  { %v1192_v28 = vsel %vm1190_vm15, %v1191_v15, %v1189_v51  ;;  %v1194_v54 = vmul.f32 %v1555_v3, %v3390_v44  ;;  %v3516_v31 = vadd.f32 %v566_v30, %v475_v40  ;;  %vm1202_vm3 = vcmp.eq.f32.partialorder %v3431_v33, inf  ;;  %v105_v51 = vld [vmem:[%s3770_s0 + $0x2c0] sm:$0xff] }
  0xf0   :  { %1380 = vst.msk [vmem:[%s3774_s4 + $0x250] sm:$0xff] %vm1305_vm2, %v1192_v28  ;;  %v3523_v29 = vadd.f32 %v567_v25, %v476_v59  ;;  %v386_v52 = vsub.f32 %v288_v0, %v3184_v63  ;;  %v198_v18 = vsub.f32 %v100_v62, %v3178_v39  ;;  %vm1204_vm4 = vcmp.eq.f32.partialorder %v3431_v33, 0.0  ;;  %v106_v28 = vld [vmem:[%s3770_s0 + $0x2c8] sm:$0xff] }
  0xf1   :  { %v1196_v16 = vsel %vm1195_vm0, %v3390_v44, %v1194_v54  ;;  %1564 = vrsqrt.f32 %v3516_v31  ;;  %v477_v27 = vmul.f32 %v197_v21, %v197_v21  ;;  %v1205_v43 = vand.u32 2147483648, %v3431_v33  ;;  %v102_v44 = vld [vmem:[%s3770_s0 + $0x2a8] sm:$0xff] }
  0xf2   :  { %v1199_v37 = vsel %vm1197_vm1, %v1198_v11, %v1196_v16  ;;  %vm1209_vm5 = vcmp.eq.f32.partialorder %v3433_v6, inf  ;;  %1566 = vrsqrt.f32 %v3523_v29  ;;  %vm1211_vm6 = vcmp.eq.f32.partialorder %v3433_v6, 0.0  ;;  %v294_v11 = vld [vmem:[%s3771_s1 + $0x2c0] sm:$0xff] }
  0xf3   :  { %v1557_v17 = vpop.eup %1556  ;;  %1381 = vst.msk [vmem:[%s3774_s4 + $0x258] sm:$0xff] %vm1305_vm2, %v1199_v37  ;;  %v1212_v47 = vand.u32 2147483648, %v3433_v6  ;;  %v568_v41 = vmul.f32 %v386_v52, %v386_v52  ;;  %v387_v19 = vsub.f32 %v289_v4, %v3184_v63  ;;  %v478_v48 = vmul.f32 %v198_v18, %v198_v18 }
  0xf4   :  { %v1559_v1 = vpop.eup %1558  ;;  %v1201_v50 = vmul.f32 %v1557_v17, %v3431_v33  ;;  %v199_v9 = vsub.f32 %v101_v8, %v3178_v39  ;;  %v388_v10 = vsub.f32 %v290_v38, %v3184_v63  ;;  %v200_v13 = vsub.f32 %v102_v44, %v3178_v39 }
  0xf5   :  { %v1208_v12 = vmul.f32 %v1559_v1, %v3433_v6  ;;  %v3559_v55 = vadd.f32 %v568_v41, %v477_v27  ;;  %v569_v32 = vmul.f32 %v387_v19, %v387_v19  ;;  %v389_v58 = vsub.f32 %v291_v61, %v3184_v63 }
  0xf6   :  { %v1203_v56 = vsel %vm1202_vm3, %v3431_v33, %v1201_v50  ;;  %v479_v57 = vmul.f32 %v199_v9, %v199_v9  ;;  %v570_v53 = vmul.f32 %v388_v10, %v388_v10  ;;  %vm1216_vm7 = vcmp.eq.f32.partialorder %v3473_v45, inf  ;;  %v107_v10 = vld [vmem:[%s3770_s0 + $0x2d0] sm:$0x3] }
  0xf7   :  { %v1206_v23 = vsel %vm1204_vm4, %v1205_v43, %v1203_v56  ;;  %v1210_v60 = vsel %vm1209_vm5, %v3433_v6, %v1208_v12  ;;  %1568 = vrsqrt.f32 %v3559_v55  ;;  %vm1218_vm8 = vcmp.eq.f32.partialorder %v3473_v45, 0.0  ;;  %v103_v6 = vld [vmem:[%s3770_s0 + $0x2b0] sm:$0xff] }
  0xf8   :  { %v1561_v7 = vpop.eup %1560  ;;  %1382 = vst.msk [vmem:[%s3774_s4 + $0x260] sm:$0xff] %vm1305_vm2, %v1206_v23  ;;  %v1213_v24 = vsel %vm1211_vm6, %v1212_v47, %v1210_v60  ;;  %v1219_v33 = vand.u32 2147483648, %v3473_v45  ;;  %v3581_v26 = vadd.f32 %v569_v32, %v478_v48  ;;  %v3588_v46 = vadd.f32 %v570_v53, %v479_v57  ;;  %v296_v32 = vld [vmem:[%s3771_s1 + $0x2d0] sm:$0x3] }
  0xf9   :  { %1383 = vst.msk [vmem:[%s3774_s4 + $0x268] sm:$0xff] %vm1305_vm2, %v1213_v24  ;;  %v1215_v34 = vmul.f32 %v1561_v7, %v3473_v45  ;;  %v480_v49 = vmul.f32 %v200_v13, %v200_v13  ;;  %v571_v35 = vmul.f32 %v389_v58, %v389_v58  ;;  %vm1223_vm9 = vcmp.eq.f32.partialorder %v3495_v22, inf }
  0xfa   :  { %vm1225_vm10 = vcmp.eq.f32.partialorder %v3495_v22, 0.0  ;;  %v1226_v14 = vand.u32 2147483648, %v3495_v22  ;;  %1570 = vrsqrt.f32 %v3581_v26  ;;  %vm1230_vm11 = vcmp.eq.f32.partialorder %v3516_v31, inf }
  0xfb   :  { %v1563_v15 = vpop.eup %1562  ;;  %v1217_v40 = vsel %vm1216_vm7, %v3473_v45, %v1215_v34  ;;  %vm1232_vm12 = vcmp.eq.f32.partialorder %v3516_v31, 0.0  ;;  %1572 = vrsqrt.f32 %v3588_v46  ;;  %v1233_v30 = vand.u32 2147483648, %v3516_v31 }
  0xfc   :  { %v1220_v42 = vsel %vm1218_vm8, %v1219_v33, %v1217_v40  ;;  %v1222_v20 = vmul.f32 %v1563_v15, %v3495_v22  ;;  %v3616_v59 = vadd.f32 %v571_v35, %v480_v49  ;;  %v201_v25 = vsub.f32 %v103_v6, %v3178_v39 }
  0xfd   :  { %1384 = vst.msk [vmem:[%s3774_s4 + $0x270] sm:$0xff] %vm1305_vm2, %v1220_v42  ;;  %v390_v21 = vsub.f32 %v292_v2, %v3184_v63  ;;  %v202_v0 = vsub.f32 %v104_v36, %v3178_v39  ;;  %v391_v45 = vsub.f32 %v293_v5, %v3184_v63  ;;  %vm1237_vm13 = vcmp.eq.f32.partialorder %v3523_v29, inf }
  0xfe   :  { %v1565_v62 = vpop.eup %1564  ;;  %v1224_v3 = vsel %vm1223_vm9, %v3495_v22, %v1222_v20  ;;  %vm1239_vm14 = vcmp.eq.f32.partialorder %v3523_v29, 0.0  ;;  %1574 = vrsqrt.f32 %v3616_v59  ;;  %v1240_v4 = vand.u32 2147483648, %v3523_v29  ;;  %v295_v22 = vld [vmem:[%s3771_s1 + $0x2c8] sm:$0xff] }
  0xff   :  { %v1567_v54 = vpop.eup %1566  ;;  %v1227_v52 = vsel %vm1225_vm10, %v1226_v14, %v1224_v3  ;;  %v1229_v18 = vmul.f32 %v1565_v62, %v3516_v31  ;;  %v481_v16 = vmul.f32 %v201_v25, %v201_v25  ;;  %v572_v8 = vmul.f32 %v390_v21, %v390_v21 }
 0x100   :  { %1385 = vst.msk [vmem:[%s3774_s4 + $0x278] sm:$0xff] %vm1305_vm2, %v1227_v52  ;;  %v1236_v27 = vmul.f32 %v1567_v54, %v3523_v29  ;;  %v482_v38 = vmul.f32 %v202_v0, %v202_v0  ;;  %v573_v37 = vmul.f32 %v391_v45, %v391_v45  ;;  %v203_v44 = vsub.f32 %v105_v51, %v3178_v39 }
 0x101   :  { %v1231_v43 = vsel %vm1230_vm11, %v3516_v31, %v1229_v18  ;;  %v392_v17 = vsub.f32 %v294_v11, %v3184_v63  ;;  %v204_v47 = vsub.f32 %v106_v28, %v3178_v39  ;;  %v3664_v61 = vadd.f32 %v572_v8, %v481_v16 }
 0x102   :  { %v1234_v41 = vsel %vm1232_vm12, %v1233_v30, %v1231_v43  ;;  %v1238_v19 = vsel %vm1237_vm13, %v3523_v29, %v1236_v27  ;;  %v3666_v1 = vadd.f32 %v573_v37, %v482_v38  ;;  %v483_v48 = vmul.f32 %v203_v44, %v203_v44 }
 0x103   :  { %1386 = vst.msk [vmem:[%s3774_s4 + $0x280] sm:$0xff] %vm1305_vm2, %v1234_v41  ;;  %v1241_v50 = vsel %vm1239_vm14, %v1240_v4, %v1238_v19  ;;  %v574_v9 = vmul.f32 %v392_v17, %v392_v17  ;;  %v393_v31 = vsub.f32 %v295_v22, %v3184_v63  ;;  %vm1244_vm15 = vcmp.eq.f32.partialorder %v3559_v55, inf }
 0x104   :  { %v1569_v12 = vpop.eup %1568  ;;  %1387 = vst.msk [vmem:[%s3774_s4 + $0x288] sm:$0xff] %vm1305_vm2, %v1241_v50  ;;  %vm1246_vm0 = vcmp.eq.f32.partialorder %v3559_v55, 0.0  ;;  %v1247_v29 = vand.u32 2147483648, %v3559_v55  ;;  %1576 = vrsqrt.f32 %v3664_v61  ;;  %vm1251_vm1 = vcmp.eq.f32.partialorder %v3581_v26, inf }
 0x105   :  { %v1243_v13 = vmul.f32 %v1569_v12, %v3559_v55  ;;  %vm1253_vm3 = vcmp.eq.f32.partialorder %v3581_v26, 0.0  ;;  %1578 = vrsqrt.f32 %v3666_v1  ;;  %v1254_v56 = vand.u32 2147483648, %v3581_v26 }
 0x106   :  { %v3694_v57 = vadd.f32 %v574_v9, %v483_v48  ;;  %v484_v53 = vmul.f32 %v204_v47, %v204_v47  ;;  %v575_v58 = vmul.f32 %v393_v31, %v393_v31  ;;  %vm1258_vm4 = vcmp.eq.f32.partialorder %v3588_v46, inf }
 0x107   :  { %v1571_v23 = vpop.eup %1570  ;;  %v1245_v60 = vsel %vm1244_vm15, %v3559_v55, %v1243_v13  ;;  %v205_v7 = vsub.f32 %v107_v10, %v3178_v39  ;;  %v394_v24 = vsub.f32 %v296_v32, %v3184_v63  ;;  %v1261_v35 = vand.u32 2147483648, %v3588_v46 }
 0x108   :  { %v1573_v33 = vpop.eup %1572  ;;  %v1248_v34 = vsel %vm1246_vm0, %v1247_v29, %v1245_v60  ;;  %v1250_v49 = vmul.f32 %v1571_v23, %v3581_v26  ;;  %1580 = vrsqrt.f32 %v3694_v57  ;;  %vm1260_vm5 = vcmp.eq.f32.partialorder %v3588_v46, 0.0 }
 0x109   :  { %1388 = vst.msk [vmem:[%s3774_s4 + $0x290] sm:$0xff] %vm1305_vm2, %v1248_v34  ;;  %v1257_v6 = vmul.f32 %v1573_v33, %v3588_v46  ;;  %v666_v39 = vadd.f32 %v575_v58, %v484_v53  ;;  %vm1265_vm6 = vcmp.eq.f32.partialorder %v3616_v59, inf  ;;  %v485_v55 = vmul.f32 %v205_v7, %v205_v7 }
 0x10a   :  { %v1252_v63 = vsel %vm1251_vm1, %v3581_v26, %v1250_v49  ;;  %v576_v14 = vmul.f32 %v394_v24, %v394_v24  ;;  %v1268_v15 = vand.u32 2147483648, %v3616_v59  ;;  %vm1267_vm7 = vcmp.eq.f32.partialorder %v3616_v59, 0.0 }
 0x10b   :  { %v1575_v2 = vpop.eup %1574  ;;  %v1255_v36 = vsel %vm1253_vm3, %v1254_v56, %v1252_v63  ;;  %v1259_v5 = vsel %vm1258_vm4, %v3588_v46, %v1257_v6  ;;  %1582 = vrsqrt.f32 %v666_v39  ;;  %vm1272_vm8 = vcmp.eq.f32.partialorder %v3664_v61, inf }
 0x10c   :  { %1389 = vst.msk [vmem:[%s3774_s4 + $0x298] sm:$0xff] %vm1305_vm2, %v1255_v36  ;;  %v1262_v40 = vsel %vm1260_vm5, %v1261_v35, %v1259_v5  ;;  %v1264_v42 = vmul.f32 %v1575_v2, %v3616_v59  ;;  %v667_v26 = vadd.f32 %v576_v14, %v485_v55  ;;  %v1275_v25 = vand.u32 2147483648, %v3664_v61 }
 0x10d   :  { %1390 = vst.msk [vmem:[%s3774_s4 + $0x2a0] sm:$0xff] %vm1305_vm2, %v1262_v40  ;;  %vm1274_vm9 = vcmp.eq.f32.partialorder %v3664_v61, 0.0  ;;  %vm1279_vm10 = vcmp.eq.f32.partialorder %v3666_v1, inf  ;;  %vm1281_vm11 = vcmp.eq.f32.partialorder %v3666_v1, 0.0  ;;  %vm1286_vm12 = vcmp.eq.f32.partialorder %v3694_v57, inf }
 0x10e   :  { %v1266_v46 = vsel %vm1265_vm6, %v3616_v59, %v1264_v42  ;;  %1584 = vrsqrt.f32 %v667_v26  ;;  %v1282_v59 = vand.u32 2147483648, %v3666_v1  ;;  %v1289_v28 = vand.u32 2147483648, %v3694_v57 }
 0x10f   :  { %v1269_v20 = vsel %vm1267_vm7, %v1268_v15, %v1266_v46  ;;  %vm1288_vm13 = vcmp.eq.f32.partialorder %v3694_v57, 0.0  ;;  %vm1293_vm14 = vcmp.eq.f32.partialorder %v666_v39, inf  ;;  %v1296_v16 = vand.u32 2147483648, %v666_v39 }
 0x110   :  { %1391 = vst.msk [vmem:[%s3774_s4 + $0x2a8] sm:$0xff] %vm1305_vm2, %v1269_v20  ;;  %vm1295_vm15 = vcmp.eq.f32.partialorder %v666_v39, 0.0  ;;  %vm1300_vm0 = vcmp.eq.f32.partialorder %v667_v26, inf  ;;  %v1303_v43 = vand.u32 2147483648, %v667_v26  ;;  %vm1302_vm1 = vcmp.eq.f32.partialorder %v667_v26, 0.0 }
 0x111   :  { %v1577_v30 = vpop.eup %1576  ;;  %vm1396_vm3 = vcmask 156672  }
 0x112   :  { %v1579_v21 = vpop.eup %1578  ;;  %v1271_v0 = vmul.f32 %v1577_v30, %v3664_v61 }
 0x113   :  { %v1278_v45 = vmul.f32 %v1579_v21, %v3666_v1 }
 0x114   :  { %v1273_v62 = vsel %vm1272_vm8, %v3664_v61, %v1271_v0 }
 0x115   :  { %v1581_v3 = vpop.eup %1580  ;;  %v1276_v51 = vsel %vm1274_vm9, %v1275_v25, %v1273_v62  ;;  %v1280_v11 = vsel %vm1279_vm10, %v3666_v1, %v1278_v45 }
 0x116   :  { %1392 = vst.msk [vmem:[%s3774_s4 + $0x2b0] sm:$0xff] %vm1305_vm2, %v1276_v51  ;;  %v1283_v54 = vsel %vm1281_vm11, %v1282_v59, %v1280_v11  ;;  %v1285_v52 = vmul.f32 %v1581_v3, %v3694_v57 }
 0x117   :  { %1393 = vst.msk [vmem:[%s3774_s4 + $0x2b8] sm:$0xff] %vm1305_vm2, %v1283_v54 }
 0x118   :  { %v1583_v18 = vpop.eup %1582  ;;  %v1287_v4 = vsel %vm1286_vm12, %v3694_v57, %v1285_v52 }
 0x119   :  { %v1290_v27 = vsel %vm1288_vm13, %v1289_v28, %v1287_v4  ;;  %v1292_v8 = vmul.f32 %v1583_v18, %v666_v39 }
 0x11a   :  { %1394 = vst.msk [vmem:[%s3774_s4 + $0x2c0] sm:$0xff] %vm1305_vm2, %v1290_v27 }
 0x11b   :  { %v1294_v38 = vsel %vm1293_vm14, %v666_v39, %v1292_v8  ;;  %v1585_v37 = vpop.eup %1584 }
 0x11c   :  { %v1297_v22 = vsel %vm1295_vm15, %v1296_v16, %v1294_v38  ;;  %v1299_v44 = vmul.f32 %v1585_v37, %v667_v26 }
 0x11d   :  { %1395 = vst.msk [vmem:[%s3774_s4 + $0x2c8] sm:$0xff] %vm1305_vm2, %v1297_v22 }
 0x11e   :  { %v1301_v17 = vsel %vm1300_vm0, %v667_v26, %v1299_v44 }
 0x11f   :  { %v1304_v47 = vsel %vm1302_vm1, %v1303_v43, %v1301_v17 }
 0x120   :  { %1397 = vst.msk [vmem:[%s3774_s4 + $0x2d0] sm:$0x3] %vm1396_vm3, %v1304_v47 }

// kernel: dis_tan_forward.12
= control target key start
LH: loop header
LB: loop body
LE: loop exit
PB: predicated region body
PF: predicated region fallthrough
CT: control target
= control target key end

     0   :  { %v1926_v0 = vmov 0   ;;  %s2711_s1 = inlined_call_operand.vmem [shape: bf16[384,128], index: 1, kind: input, shape index: {}]   ;;  %s2712_s0 = inlined_call_operand.vmem [shape: bf16[512,384], index: 0, kind: input, shape index: {}]   ;;  %s2713_s2 = inlined_call_operand.vmem [shape: f32[1,128], index: 2, kind: input, shape index: {}]   ;;  %s2714_s3 = inlined_call_operand.vmem [shape: f32[512,128], index: 3, kind: output, shape index: {}]  }
   0x1   :  { %854 = vmatprep.subr.bf16.mxu0 %v1926_v0  ;;  %1741 = vmatprep.subr.bf16.mxu1 %v1926_v0  ;;  %v1774_v1 = vld [vmem:[%s2711_s1 + $0x38] sm:$0xff]   ;;  %v1775_v2 = vld [vmem:[%s2711_s1 + $0x30] sm:$0xff]   ;;  %v1776_v3 = vld [vmem:[%s2711_s1 + $0x28] sm:$0xff]  }
   0x2   :  { %855 = vmatpush1.bf16.msra.mxu0 %v1774_v1  ;;  %1757 = vmatpush1.bf16.msra.mxu1 %v1774_v1  ;;  %v1777_v4 = vld [vmem:[%s2711_s1 + $0x20] sm:$0xff]   ;;  %v1778_v5 = vld [vmem:[%s2711_s1 + $0x18] sm:$0xff]   ;;  %v1779_v7 = vld [vmem:[%s2711_s1 + $0x10] sm:$0xff]  }
   0x3   :  { %856 = vmatprep.subr.bf16.mxu0 %v1926_v0  ;;  %1742 = vmatprep.subr.bf16.mxu1 %v1926_v0  ;;  %v1792_v6 = vld [vmem:[%s2712_s0 + $0x4] ss:$12 sps:$4 sm:$0xff]   ;;  %v1780_v9 = vld [vmem:[%s2711_s1 + $0x8] sm:$0xff]   ;;  %v1782_v11 = vld [vmem:[%s2711_s1 + $0x78] sm:$0xff]  }
   0x4   :  { %v1795_v8 = vld [vmem:[%s2712_s0 + $0x244] ss:$12 sps:$4 sm:$0xff]   ;;  %886 = vmatprep.mubr.bf16.mxu0 %v1792_v6  ;;  %v1784_v13 = vld [vmem:[%s2711_s1 + $0x68] sm:$0xff]   ;;  %v1786_v15 = vld [vmem:[%s2711_s1 + $0x58] sm:$0xff]  }
   0x5   :  { %1078 = vmatprep.mubr.bf16.mxu1 %v1795_v8  ;;  %v1781_v10 = vld [vmem:[%s2711_s1] sm:$0xff]   ;;  %v1783_v12 = vld [vmem:[%s2711_s1 + $0x70] sm:$0xff]   ;;  %v1788_v17 = vld [vmem:[%s2711_s1 + $0x48] sm:$0xff]  }
   0x6   :  { %857 = vmatpush1.bf16.msra.mxu0 %v1775_v2  ;;  %1758 = vmatpush1.bf16.msra.mxu1 %v1775_v2  ;;  %v1785_v14 = vld [vmem:[%s2711_s1 + $0x60] sm:$0xff]   ;;  %v1787_v16 = vld [vmem:[%s2711_s1 + $0x50] sm:$0xff]   ;;  %v1796_v19 = vld [vmem:[%s2711_s1 + $0xb8] sm:$0xff]  }
   0x7   :  { %858 = vmatprep.subr.bf16.mxu0 %v1926_v0  ;;  %1743 = vmatprep.subr.bf16.mxu1 %v1926_v0  ;;  %v1789_v18 = vld [vmem:[%s2711_s1 + $0x40] sm:$0xff]   ;;  %v1797_v22 = vld [vmem:[%s2712_s0 + $0x1c] ss:$12 sps:$4 sm:$0xff]   ;;  %v1803_v24 = vld [vmem:[%s2711_s1 + $0xb0] sm:$0xff]  }
   0x8   :  { %v1790_v20 = vld [vmem:[%s2712_s0] ss:$12 sps:$4 sm:$0xff]   ;;  %v1799_v23 = vld [vmem:[%s2712_s0 + $0x25c] ss:$12 sps:$4 sm:$0xff]   ;;  %v1801_v26 = vld [vmem:[%s2712_s0 + $0x18] ss:$12 sps:$4 sm:$0xff]  }
   0x9   :  { %v1793_v21 = vld [vmem:[%s2712_s0 + $0x240] ss:$12 sps:$4 sm:$0xff]   ;;  %v1802_v27 = vld [vmem:[%s2712_s0 + $0x258] ss:$12 sps:$4 sm:$0xff]   ;;  %v1808_v31 = vld [vmem:[%s2712_s0 + $0x30] ss:$12 sps:$4 sm:$0xff]  }
   0xa   :  { %859 = vmatpush1.bf16.msra.mxu0 %v1776_v3  ;;  %1759 = vmatpush1.bf16.msra.mxu1 %v1776_v3  ;;  %v1810_v25 = vld [vmem:[%s2711_s1 + $0xa8] sm:$0xff]   ;;  %v1804_v28 = vld [vmem:[%s2712_s0 + $0x34] ss:$12 sps:$4 sm:$0xff]   ;;  %v1824_v32 = vld [vmem:[%s2711_s1 + $0x98] sm:$0xff]  }
   0xb   :  { %860 = vmatprep.subr.bf16.mxu0 %v1926_v0  ;;  %1744 = vmatprep.subr.bf16.mxu1 %v1926_v0  ;;  %v1806_v29 = vld [vmem:[%s2712_s0 + $0x274] ss:$12 sps:$4 sm:$0xff]   ;;  %v1809_v33 = vld [vmem:[%s2712_s0 + $0x270] ss:$12 sps:$4 sm:$0xff]   ;;  %v1811_v34 = vld [vmem:[%s2712_s0 + $0x4c] ss:$12 sps:$4 sm:$0xff]  }
   0xc   :  { %v1817_v30 = vld [vmem:[%s2711_s1 + $0xa0] sm:$0xff]   ;;  %v1813_v35 = vld [vmem:[%s2712_s0 + $0x28c] ss:$12 sps:$4 sm:$0xff]   ;;  %v1831_v36 = vld [vmem:[%s2711_s1 + $0x90] sm:$0xff]  }
   0xd   :  { %v1815_v37 = vld [vmem:[%s2712_s0 + $0x48] ss:$12 sps:$4 sm:$0xff]   ;;  %v1818_v39 = vld [vmem:[%s2712_s0 + $0x64] ss:$12 sps:$4 sm:$0xff]   ;;  %v1822_v43 = vld [vmem:[%s2712_s0 + $0x60] ss:$12 sps:$4 sm:$0xff]  }
   0xe   :  { %861 = vmatpush1.bf16.msra.mxu0 %v1777_v4  ;;  %1760 = vmatpush1.bf16.msra.mxu1 %v1777_v4  ;;  %v1816_v38 = vld [vmem:[%s2712_s0 + $0x288] ss:$12 sps:$4 sm:$0xff]   ;;  %v1820_v40 = vld [vmem:[%s2712_s0 + $0x2a4] ss:$12 sps:$4 sm:$0xff]   ;;  %v1823_v44 = vld [vmem:[%s2712_s0 + $0x2a0] ss:$12 sps:$4 sm:$0xff]  }
   0xf   :  { %862 = vmatprep.subr.bf16.mxu0 %v1926_v0  ;;  %1745 = vmatprep.subr.bf16.mxu1 %v1926_v0  ;;  %v1838_v41 = vld [vmem:[%s2711_s1 + $0x88] sm:$0xff]   ;;  %v1845_v42 = vld [vmem:[%s2711_s1 + $0x80] sm:$0xff]   ;;  %v1836_v51 = vld [vmem:[%s2712_s0 + $0x90] ss:$12 sps:$4 sm:$0xff]  }
  0x10   :  { %v1825_v45 = vld [vmem:[%s2712_s0 + $0x7c] ss:$12 sps:$4 sm:$0xff]   ;;  %v1829_v47 = vld [vmem:[%s2712_s0 + $0x78] ss:$12 sps:$4 sm:$0xff]   ;;  %v1832_v49 = vld [vmem:[%s2712_s0 + $0x94] ss:$12 sps:$4 sm:$0xff]  }
  0x11   :  { %v1827_v46 = vld [vmem:[%s2712_s0 + $0x2bc] ss:$12 sps:$4 sm:$0xff]   ;;  %v1830_v48 = vld [vmem:[%s2712_s0 + $0x2b8] ss:$12 sps:$4 sm:$0xff]   ;;  %v1834_v50 = vld [vmem:[%s2712_s0 + $0x2d4] ss:$12 sps:$4 sm:$0xff]  }
  0x12   :  { %863 = vmatpush1.bf16.msra.mxu0 %v1778_v5  ;;  %1761 = vmatpush1.bf16.msra.mxu1 %v1778_v5  ;;  %v1837_v52 = vld [vmem:[%s2712_s0 + $0x2d0] ss:$12 sps:$4 sm:$0xff]   ;;  %v1839_v53 = vld [vmem:[%s2712_s0 + $0xac] ss:$12 sps:$4 sm:$0xff]   ;;  %v1843_v55 = vld [vmem:[%s2712_s0 + $0xa8] ss:$12 sps:$4 sm:$0xff]  }
  0x13   :  { %864 = vmatprep.subr.bf16.mxu0 %v1926_v0  ;;  %1746 = vmatprep.subr.bf16.mxu1 %v1926_v0  ;;  %v1841_v54 = vld [vmem:[%s2712_s0 + $0x2ec] ss:$12 sps:$4 sm:$0xff]   ;;  %v1844_v56 = vld [vmem:[%s2712_s0 + $0x2e8] ss:$12 sps:$4 sm:$0xff]   ;;  %v1846_v57 = vld [vmem:[%s2712_s0 + $0xc4] ss:$12 sps:$4 sm:$0xff]  }
  0x14   :  { %v1848_v58 = vld [vmem:[%s2712_s0 + $0x8] ss:$12 sps:$4 sm:$0xff]   ;;  %v1849_v59 = vld [vmem:[%s2712_s0 + $0xc0] ss:$12 sps:$4 sm:$0xff]   ;;  %v1853_v62 = vld [vmem:[%s2712_s0 + $0x38] ss:$12 sps:$4 sm:$0xff]  }
  0x15   :  { %v1850_v60 = vld [vmem:[%s2712_s0 + $0x20] ss:$12 sps:$4 sm:$0xff]   ;;  %v1851_v61 = vld [vmem:[%s2712_s0 + $0xdc] ss:$12 sps:$4 sm:$0xff]   ;;  %v1854_v63 = vld [vmem:[%s2712_s0 + $0xd8] ss:$12 sps:$4 sm:$0xff]  }
  0x16   :  { %865 = vmatpush1.bf16.msra.mxu0 %v1779_v7  ;;  %1762 = vmatpush1.bf16.msra.mxu1 %v1779_v7  ;;  %v1856_v1 = vld [vmem:[%s2712_s0 + $0xf4] ss:$12 sps:$4 sm:$0xff]   ;;  %v1859_v3 = vld [vmem:[%s2712_s0 + $0xf0] ss:$12 sps:$4 sm:$0xff]   ;;  %v1861_v5 = vld [vmem:[%s2712_s0 + $0x10c] ss:$12 sps:$4 sm:$0xff]  }
  0x17   :  { %866 = vmatprep.subr.bf16.mxu0 %v1926_v0  ;;  %1747 = vmatprep.subr.bf16.mxu1 %v1926_v0  ;;  %v1858_v2 = vld [vmem:[%s2712_s0 + $0x68] ss:$12 sps:$4 sm:$0xff]   ;;  %v1860_v4 = vld [vmem:[%s2712_s0 + $0x80] ss:$12 sps:$4 sm:$0xff]   ;;  %v1863_v6 = vld [vmem:[%s2712_s0 + $0x98] ss:$12 sps:$4 sm:$0xff]  }
  0x18   :  { %v1864_v7 = vld [vmem:[%s2712_s0 + $0x108] ss:$12 sps:$4 sm:$0xff]   ;;  %v1865_v8 = vld [vmem:[%s2712_s0 + $0xb0] ss:$12 sps:$4 sm:$0xff]  }
  0x1a   :  { %867 = vmatpush1.bf16.msra.mxu0 %v1780_v9  ;;  %1763 = vmatpush1.bf16.msra.mxu1 %v1780_v9  ;;  %v1866_v9 = vld [vmem:[%s2712_s0 + $0x124] ss:$12 sps:$4 sm:$0xff]  }
  0x1b   :  { %868 = vmatprep.subr.bf16.mxu0 %v1926_v0  ;;  %1748 = vmatprep.subr.bf16.mxu1 %v1926_v0 }
  0x1e   :  { %869 = vmatpush1.bf16.msra.mxu0 %v1781_v10  ;;  %1764 = vmatpush1.bf16.msra.mxu1 %v1781_v10  ;;  %v1868_v10 = vld [vmem:[%s2712_s0 + $0xc8] ss:$12 sps:$4 sm:$0xff]  }
  0x1f   :  { %870 = vmatprep.subr.bf16.mxu0 %v1926_v0  ;;  %1749 = vmatprep.subr.bf16.mxu1 %v1926_v0 }
  0x22   :  { %871 = vmatpush2.bf16.msra.mxu0 %v1782_v11  ;;  %1765 = vmatpush2.bf16.msra.mxu1 %v1782_v11  ;;  %v1869_v11 = vld [vmem:[%s2712_s0 + $0x120] ss:$12 sps:$4 sm:$0xff]  }
  0x23   :  { %872 = vmatprep.subr.bf16.mxu0 %v1926_v0  ;;  %1750 = vmatprep.subr.bf16.mxu1 %v1926_v0 }
  0x26   :  { %873 = vmatpush2.bf16.msra.mxu0 %v1783_v12  ;;  %1766 = vmatpush2.bf16.msra.mxu1 %v1783_v12  ;;  %v1870_v12 = vld [vmem:[%s2712_s0 + $0xe0] ss:$12 sps:$4 sm:$0xff]  }
  0x27   :  { %874 = vmatprep.subr.bf16.mxu0 %v1926_v0  ;;  %1751 = vmatprep.subr.bf16.mxu1 %v1926_v0 }
  0x2a   :  { %875 = vmatpush2.bf16.msra.mxu0 %v1784_v13  ;;  %1767 = vmatpush2.bf16.msra.mxu1 %v1784_v13  ;;  %v1871_v13 = vld [vmem:[%s2712_s0 + $0x13c] ss:$12 sps:$4 sm:$0xff]  }
  0x2b   :  { %876 = vmatprep.subr.bf16.mxu0 %v1926_v0  ;;  %1752 = vmatprep.subr.bf16.mxu1 %v1926_v0 }
  0x2e   :  { %877 = vmatpush2.bf16.msra.mxu0 %v1785_v14  ;;  %1768 = vmatpush2.bf16.msra.mxu1 %v1785_v14  ;;  %v1873_v14 = vld [vmem:[%s2712_s0 + $0xf8] ss:$12 sps:$4 sm:$0xff]  }
  0x2f   :  { %878 = vmatprep.subr.bf16.mxu0 %v1926_v0  ;;  %1753 = vmatprep.subr.bf16.mxu1 %v1926_v0 }
  0x32   :  { %879 = vmatpush2.bf16.msra.mxu0 %v1786_v15  ;;  %1769 = vmatpush2.bf16.msra.mxu1 %v1786_v15  ;;  %v1874_v15 = vld [vmem:[%s2712_s0 + $0x138] ss:$12 sps:$4 sm:$0xff]  }
  0x33   :  { %880 = vmatprep.subr.bf16.mxu0 %v1926_v0  ;;  %1754 = vmatprep.subr.bf16.mxu1 %v1926_v0 }
  0x36   :  { %881 = vmatpush2.bf16.msra.mxu0 %v1787_v16  ;;  %1770 = vmatpush2.bf16.msra.mxu1 %v1787_v16  ;;  %v1875_v16 = vld [vmem:[%s2712_s0 + $0x110] ss:$12 sps:$4 sm:$0xff]  }
  0x37   :  { %882 = vmatprep.subr.bf16.mxu0 %v1926_v0  ;;  %1755 = vmatprep.subr.bf16.mxu1 %v1926_v0 }
  0x3a   :  { %883 = vmatpush2.bf16.msra.mxu0 %v1788_v17  ;;  %1771 = vmatpush2.bf16.msra.mxu1 %v1788_v17  ;;  %v1876_v17 = vld [vmem:[%s2712_s0 + $0x154] ss:$12 sps:$4 sm:$0xff]  }
  0x3b   :  { %884 = vmatprep.subr.bf16.mxu0 %v1926_v0  ;;  %1756 = vmatprep.subr.bf16.mxu1 %v1926_v0  ;;  %v1855_v0 = vld [vmem:[%s2712_s0 + $0x50] ss:$12 sps:$4 sm:$0xff]  }
  0x3e   :  { %885 = vmatpush2.bf16.msra.mxu0 %v1789_v18  ;;  %1772 = vmatpush2.bf16.msra.mxu1 %v1789_v18  ;;  %v1878_v18 = vld [vmem:[%s2712_s0 + $0x128] ss:$12 sps:$4 sm:$0xff]  }
  0x3f   :  { %1661 = vmatprep.subr.bf16.mxu1 %v1796_v19 }
  0x41   :  { %887 = vmatmul.mubr.bf16.vlgmr.msra.gmra.mxu0 %v1790_v20  ;;  %1079 = vmatmul.mubr.bf16.vlgmr.msra.gmra.mxu1 %v1793_v21  ;;  %v1880_v20 = vld [vmem:[%s2712_s0 + $0x140] ss:$12 sps:$4 sm:$0xff]  }
  0x42   :  { %1662 = vmatpush3.bf16.msra.mxu1 %v1796_v19  ;;  %894 = vmatprep.mubr.bf16.mxu0 %v1797_v22  ;;  %v1879_v19 = vld [vmem:[%s2712_s0 + $0x150] ss:$12 sps:$4 sm:$0xff]   ;;  %v1881_v21 = vld [vmem:[%s2712_s0 + $0x16c] ss:$12 sps:$4 sm:$0xff]  }
  0x43   :  { %1086 = vmatprep.mubr.bf16.mxu1 %v1799_v23  ;;  %1663 = vmatprep.subr.bf16.mxu1 %v1803_v24  ;;  %v1883_v22 = vld [vmem:[%s2712_s0 + $0x158] ss:$12 sps:$4 sm:$0xff]   ;;  %v1884_v23 = vld [vmem:[%s2712_s0 + $0x168] ss:$12 sps:$4 sm:$0xff]  }
  0x46   :  { %1664 = vmatpush3.bf16.msra.mxu1 %v1803_v24  ;;  %v1885_v24 = vld [vmem:[%s2712_s0 + $0x170] ss:$12 sps:$4 sm:$0xff]  }
  0x47   :  { %1665 = vmatprep.subr.bf16.mxu1 %v1810_v25 }
  0x49   :  { %895 = vmatmul.mubr.bf16.gmra.mxu0 %v1801_v26  ;;  %1087 = vmatmul.mubr.bf16.gmra.mxu1 %v1802_v27  ;;  %v1888_v26 = vld [vmem:[%s2712_s0 + $0x188] ss:$12 sps:$4 sm:$0xff]   ;;  %v1889_v27 = vld [vmem:[%s2712_s0 + $0x180] ss:$12 sps:$4 sm:$0xff]  }
  0x4a   :  { %902 = vmatprep.mubr.bf16.mxu0 %v1804_v28  ;;  %1094 = vmatprep.mubr.bf16.mxu1 %v1806_v29  ;;  %v1890_v28 = vld [vmem:[%s2712_s0 + $0x1a0] ss:$12 sps:$4 sm:$0xff]   ;;  %v1891_v29 = vld [vmem:[%s2712_s0 + $0x19c] ss:$12 sps:$4 sm:$0xff]  }
  0x4b   :  { %1666 = vmatpush3.bf16.msra.mxu1 %v1810_v25  ;;  %v1886_v25 = vld [vmem:[%s2712_s0 + $0x184] ss:$12 sps:$4 sm:$0xff]  }
  0x4c   :  { %1667 = vmatprep.subr.bf16.mxu1 %v1817_v30 }
  0x4f   :  { %1668 = vmatpush3.bf16.msra.mxu1 %v1817_v30  ;;  %v1893_v30 = vld [vmem:[%s2712_s0 + $0x1b8] ss:$12 sps:$4 sm:$0xff]  }
  0x50   :  { %1669 = vmatprep.subr.bf16.mxu1 %v1824_v32 }
  0x51   :  { %903 = vmatmul.mubr.bf16.gmra.mxu0 %v1808_v31  ;;  %1095 = vmatmul.mubr.bf16.gmra.mxu1 %v1809_v33  ;;  %v1894_v31 = vld [vmem:[%s2712_s0 + $0x198] ss:$12 sps:$4 sm:$0xff]   ;;  %v1896_v33 = vld [vmem:[%s2712_s0 + $0x1b4] ss:$12 sps:$4 sm:$0xff]  }
  0x52   :  { %910 = vmatprep.mubr.bf16.mxu0 %v1811_v34  ;;  %1102 = vmatprep.mubr.bf16.mxu1 %v1813_v35  ;;  %v1898_v34 = vld [vmem:[%s2712_s0 + $0x1e8] ss:$12 sps:$4 sm:$0xff]   ;;  %v1899_v35 = vld [vmem:[%s2712_s0 + $0x1b0] ss:$12 sps:$4 sm:$0xff]  }
  0x53   :  { %1670 = vmatpush3.bf16.msra.mxu1 %v1824_v32  ;;  %v1895_v32 = vld [vmem:[%s2712_s0 + $0x1d0] ss:$12 sps:$4 sm:$0xff]  }
  0x54   :  { %1671 = vmatprep.subr.bf16.mxu1 %v1831_v36 }
  0x57   :  { %1672 = vmatpush3.bf16.msra.mxu1 %v1831_v36  ;;  %v1900_v36 = vld [vmem:[%s2712_s0 + $0x200] ss:$12 sps:$4 sm:$0xff]  }
  0x58   :  { %1673 = vmatprep.subr.bf16.mxu1 %v1838_v41 }
  0x59   :  { %911 = vmatmul.mubr.bf16.gmra.mxu0 %v1815_v37  ;;  %1103 = vmatmul.mubr.bf16.gmra.mxu1 %v1816_v38  ;;  %v1901_v37 = vld [vmem:[%s2712_s0 + $0x1cc] ss:$12 sps:$4 sm:$0xff]  }
  0x5a   :  { %918 = vmatprep.mubr.bf16.mxu0 %v1818_v39  ;;  %1110 = vmatprep.mubr.bf16.mxu1 %v1820_v40  ;;  %v1903_v38 = vld [vmem:[%s2712_s0 + $0x218] ss:$12 sps:$4 sm:$0xff]   ;;  %v1904_v39 = vld [vmem:[%s2712_s0 + $0x1c8] ss:$12 sps:$4 sm:$0xff]   ;;  %v1905_v40 = vld [vmem:[%s2712_s0 + $0x230] ss:$12 sps:$4 sm:$0xff]  }
  0x5b   :  { %1674 = vmatpush3.bf16.msra.mxu1 %v1838_v41  ;;  %v1906_v41 = vld [vmem:[%s2712_s0 + $0x1e4] ss:$12 sps:$4 sm:$0xff]  }
  0x5c   :  { %1675 = vmatprep.subr.bf16.mxu1 %v1845_v42 }
  0x5f   :  { %1676 = vmatpush3.bf16.msra.mxu1 %v1845_v42  ;;  %v1908_v42 = vld [vmem:[%s2712_s0 + $0x248] ss:$12 sps:$4 sm:$0xff]  }
  0x61   :  { %919 = vmatmul.mubr.bf16.gmra.mxu0 %v1822_v43  ;;  %1111 = vmatmul.mubr.bf16.gmra.mxu1 %v1823_v44  ;;  %v1909_v43 = vld [vmem:[%s2712_s0 + $0x1e0] ss:$12 sps:$4 sm:$0xff]  }
  0x62   :  { %926 = vmatprep.mubr.bf16.mxu0 %v1825_v45  ;;  %1118 = vmatprep.mubr.bf16.mxu1 %v1827_v46  ;;  %v1910_v44 = vld [vmem:[%s2712_s0 + $0x260] ss:$12 sps:$4 sm:$0xff]   ;;  %v1911_v45 = vld [vmem:[%s2712_s0 + $0x1fc] ss:$12 sps:$4 sm:$0xff]   ;;  %v1913_v46 = vld [vmem:[%s2712_s0 + $0x278] ss:$12 sps:$4 sm:$0xff]  }
  0x69   :  { %927 = vmatmul.mubr.bf16.gmra.mxu0 %v1829_v47  ;;  %1119 = vmatmul.mubr.bf16.gmra.mxu1 %v1830_v48  ;;  %v1914_v47 = vld [vmem:[%s2712_s0 + $0x1f8] ss:$12 sps:$4 sm:$0xff]   ;;  %v1915_v48 = vld [vmem:[%s2712_s0 + $0x290] ss:$12 sps:$4 sm:$0xff]  }
  0x6a   :  { %934 = vmatprep.mubr.bf16.mxu0 %v1832_v49  ;;  %1126 = vmatprep.mubr.bf16.mxu1 %v1834_v50  ;;  %v1916_v49 = vld [vmem:[%s2712_s0 + $0x214] ss:$12 sps:$4 sm:$0xff]  }
  0x6b   :  { %v1918_v50 = vld [vmem:[%s2712_s0 + $0x2a8] ss:$12 sps:$4 sm:$0xff]  }
  0x71   :  { %935 = vmatmul.mubr.bf16.gmra.mxu0 %v1836_v51  ;;  %1127 = vmatmul.mubr.bf16.gmra.mxu1 %v1837_v52  ;;  %v1919_v51 = vld [vmem:[%s2712_s0 + $0x210] ss:$12 sps:$4 sm:$0xff]   ;;  %v1920_v52 = vld [vmem:[%s2712_s0 + $0x2c0] ss:$12 sps:$4 sm:$0xff]  }
  0x72   :  { %942 = vmatprep.mubr.bf16.mxu0 %v1839_v53  ;;  %1134 = vmatprep.mubr.bf16.mxu1 %v1841_v54  ;;  %v1921_v53 = vld [vmem:[%s2712_s0 + $0x22c] ss:$12 sps:$4 sm:$0xff]  }
  0x73   :  { %v1923_v54 = vld [vmem:[%s2712_s0 + $0x2d8] ss:$12 sps:$4 sm:$0xff]  }
  0x79   :  { %943 = vmatmul.mubr.bf16.gmra.mxu0 %v1843_v55  ;;  %1135 = vmatmul.mubr.bf16.gmra.mxu1 %v1844_v56  ;;  %v1924_v55 = vld [vmem:[%s2712_s0 + $0x228] ss:$12 sps:$4 sm:$0xff]   ;;  %v1925_v56 = vld [vmem:[%s2712_s0 + $0x2f0] ss:$12 sps:$4 sm:$0xff]  }
  0x7a   :  { %950 = vmatprep.mubr.bf16.mxu0 %v1846_v57  ;;  %1677 = vmatprep.mubr.bf16.mxu1 %v1848_v58 }
  0x81   :  { %951 = vmatmul.mubr.bf16.gmra.mxu0 %v1849_v59  ;;  %1678 = vmatmul.mubr.bf16.vlgmr.msra.gmra.mxu1 %v1850_v60 }
  0x82   :  { %958 = vmatprep.mubr.bf16.mxu0 %v1851_v61  ;;  %1681 = vmatprep.mubr.bf16.mxu1 %v1853_v62 }
  0x89   :  { %959 = vmatmul.mubr.bf16.gmra.mxu0 %v1854_v63  ;;  %1682 = vmatmul.mubr.bf16.gmra.mxu1 %v1855_v0 }
  0x8a   :  { %966 = vmatprep.mubr.bf16.mxu0 %v1856_v1  ;;  %1685 = vmatprep.mubr.bf16.mxu1 %v1858_v2 }
  0x91   :  { %967 = vmatmul.mubr.bf16.gmra.mxu0 %v1859_v3  ;;  %1686 = vmatmul.mubr.bf16.gmra.mxu1 %v1860_v4 }
  0x92   :  { %974 = vmatprep.mubr.bf16.mxu0 %v1861_v5  ;;  %1689 = vmatprep.mubr.bf16.mxu1 %v1863_v6 }
  0x99   :  { %975 = vmatmul.mubr.bf16.gmra.mxu0 %v1864_v7  ;;  %1690 = vmatmul.mubr.bf16.gmra.mxu1 %v1865_v8 }
  0x9a   :  { %982 = vmatprep.mubr.bf16.mxu0 %v1866_v9  ;;  %1693 = vmatprep.mubr.bf16.mxu1 %v1868_v10 }
  0xa1   :  { %983 = vmatmul.mubr.bf16.gmra.mxu0 %v1869_v11  ;;  %1694 = vmatmul.mubr.bf16.gmra.mxu1 %v1870_v12 }
  0xa2   :  { %990 = vmatprep.mubr.bf16.mxu0 %v1871_v13  ;;  %1697 = vmatprep.mubr.bf16.mxu1 %v1873_v14 }
  0xa9   :  { %991 = vmatmul.mubr.bf16.gmra.mxu0 %v1874_v15  ;;  %1698 = vmatmul.mubr.bf16.gmra.mxu1 %v1875_v16 }
  0xaa   :  { %998 = vmatprep.mubr.bf16.mxu0 %v1876_v17  ;;  %1701 = vmatprep.mubr.bf16.mxu1 %v1878_v18 }
  0xb1   :  { %999 = vmatmul.mubr.bf16.gmra.mxu0 %v1879_v19  ;;  %1702 = vmatmul.mubr.bf16.gmra.mxu1 %v1880_v20 }
  0xb2   :  { %1006 = vmatprep.mubr.bf16.mxu0 %v1881_v21  ;;  %1705 = vmatprep.mubr.bf16.mxu1 %v1883_v22 }
  0xb9   :  { %1007 = vmatmul.mubr.bf16.gmra.mxu0 %v1884_v23  ;;  %1706 = vmatmul.mubr.bf16.gmra.mxu1 %v1885_v24 }
  0xba   :  { %1014 = vmatprep.mubr.bf16.mxu0 %v1886_v25  ;;  %1709 = vmatprep.mubr.bf16.mxu1 %v1888_v26 }
  0xc1   :  { %1015 = vmatmul.mubr.bf16.gmra.mxu0 %v1889_v27  ;;  %1710 = vmatmul.mubr.bf16.gmra.mxu1 %v1890_v28 }
  0xc2   :  { %1022 = vmatprep.mubr.bf16.mxu0 %v1891_v29  ;;  %1713 = vmatprep.mubr.bf16.mxu1 %v1893_v30 }
  0xc9   :  { %1023 = vmatmul.mubr.bf16.gmra.mxu0 %v1894_v31  ;;  %1714 = vmatmul.mubr.bf16.gmra.mxu1 %v1895_v32 }
  0xca   :  { %1030 = vmatprep.mubr.bf16.mxu0 %v1896_v33  ;;  %1717 = vmatprep.mubr.bf16.mxu1 %v1898_v34 }
  0xd1   :  { %1031 = vmatmul.mubr.bf16.gmra.mxu0 %v1899_v35  ;;  %1718 = vmatmul.mubr.bf16.gmra.mxu1 %v1900_v36 }
  0xd2   :  { %1038 = vmatprep.mubr.bf16.mxu0 %v1901_v37  ;;  %1721 = vmatprep.mubr.bf16.mxu1 %v1903_v38 }
  0xd9   :  { %1039 = vmatmul.mubr.bf16.gmra.mxu0 %v1904_v39  ;;  %1722 = vmatmul.mubr.bf16.gmra.mxu1 %v1905_v40 }
  0xda   :  { %1046 = vmatprep.mubr.bf16.mxu0 %v1906_v41  ;;  %1725 = vmatprep.mubr.bf16.mxu1 %v1908_v42 }
  0xe1   :  { %1047 = vmatmul.mubr.bf16.gmra.mxu0 %v1909_v43  ;;  %1726 = vmatmul.mubr.bf16.gmra.mxu1 %v1910_v44 }
  0xe2   :  { %1054 = vmatprep.mubr.bf16.mxu0 %v1911_v45  ;;  %1729 = vmatprep.mubr.bf16.mxu1 %v1913_v46 }
  0xe9   :  { %1055 = vmatmul.mubr.bf16.gmra.mxu0 %v1914_v47  ;;  %1730 = vmatmul.mubr.bf16.gmra.mxu1 %v1915_v48 }
  0xea   :  { %1062 = vmatprep.mubr.bf16.mxu0 %v1916_v49  ;;  %1733 = vmatprep.mubr.bf16.mxu1 %v1918_v50 }
  0xf1   :  { %1063 = vmatmul.mubr.bf16.gmra.mxu0 %v1919_v51  ;;  %1734 = vmatmul.mubr.bf16.gmra.mxu1 %v1920_v52 }
  0xf2   :  { %1070 = vmatprep.mubr.bf16.mxu0 %v1921_v53  ;;  %1737 = vmatprep.mubr.bf16.mxu1 %v1923_v54 }
  0xf9   :  { %1071 = vmatmul.mubr.bf16.gmra.mxu0 %v1924_v55  ;;  %1738 = vmatmul.mubr.bf16.gmra.mxu1 %v1925_v56  ;;  %v2400_v55 = vld [vmem:[%s2713_s2] ss:$0 sm:$0xff] }
 0x101   :  { %v2339_v57 = vpop.f32.mrf.mxu0  ;;  %v2341_v58 = vpop.f32.mrf.mxu1 }
 0x103   :  { %v890_v59 = vpop.f32.mrf.mxu0  ;;  %v1082_v60 = vpop.f32.mrf.mxu1 }
 0x105   :  { %v2343_v61 = vpop.f32.mrf.mxu0  ;;  %v2345_v62 = vpop.f32.mrf.mxu1 }
 0x107   :  { %v893_v63 = vpop.f32.mrf.mxu0  ;;  %v1085_v0 = vpop.f32.mrf.mxu1 }
 0x109   :  { %v896_v1 = vpop.f32.mrf.mxu0  ;;  %v2347_v2 = vpop.f32.mrf.mxu1 }
 0x10a   :  { %v897_v60 = vadd.f32 %v2400_v55, %v896_v1  ;;  %v892_v1 = vadd.f32 %v2400_v55, %v2343_v61 }
 0x10b   :  { %v898_v3 = vpop.f32.mrf.mxu0  ;;  %v1090_v4 = vpop.f32.mrf.mxu1 }
 0x10c   :  { %v889_v3 = vadd.f32 %v2400_v55, %v2339_v57 }
 0x10d   :  { %v899_v5 = vpop.f32.mrf.mxu0  ;;  %v2349_v6 = vpop.f32.mrf.mxu1 }
 0x10f   :  { %v901_v7 = vpop.f32.mrf.mxu0  ;;  %v1093_v8 = vpop.f32.mrf.mxu1 }
 0x111   :  { %v2351_v9 = vpop.f32.mrf.mxu0  ;;  %v2353_v10 = vpop.f32.mrf.mxu1 }
 0x113   :  { %v906_v11 = vpop.f32.mrf.mxu0  ;;  %v1098_v12 = vpop.f32.mrf.mxu1 }
 0x114   :  { %v900_v11 = vadd.f32 %v2400_v55, %v899_v5 }
 0x115   :  { %v2355_v13 = vpop.f32.mrf.mxu0  ;;  %v2357_v14 = vpop.f32.mrf.mxu1 }
 0x117   :  { %v909_v15 = vpop.f32.mrf.mxu0  ;;  %v1101_v16 = vpop.f32.mrf.mxu1 }
 0x119   :  { %v912_v17 = vpop.f32.mrf.mxu0  ;;  %v2359_v18 = vpop.f32.mrf.mxu1 }
 0x11a   :  { %v913_v5 = vadd.f32 %v2400_v55, %v912_v17 }
 0x11b   :  { %v914_v19 = vpop.f32.mrf.mxu0  ;;  %v1106_v20 = vpop.f32.mrf.mxu1 }
 0x11d   :  { %v2361_v21 = vpop.f32.mrf.mxu0  ;;  %v2363_v22 = vpop.f32.mrf.mxu1 }
 0x11e   :  { %v916_v17 = vadd.f32 %v2400_v55, %v2361_v21 }
 0x11f   :  { %v917_v23 = vpop.f32.mrf.mxu0  ;;  %v1109_v24 = vpop.f32.mrf.mxu1 }
 0x121   :  { %v2365_v25 = vpop.f32.mrf.mxu0  ;;  %v2367_v26 = vpop.f32.mrf.mxu1 }
 0x123   :  { %v922_v27 = vpop.f32.mrf.mxu0  ;;  %v1114_v28 = vpop.f32.mrf.mxu1 }
 0x124   :  { %v905_v28 = vadd.f32 %v2400_v55, %v2351_v9  ;;  %v908_v9 = vadd.f32 %v2400_v55, %v2355_v13  ;;  %v921_v13 = vadd.f32 %v2400_v55, %v2365_v25 }
 0x125   :  { %v2369_v29 = vpop.f32.mrf.mxu0  ;;  %v2371_v30 = vpop.f32.mrf.mxu1 }
 0x126   :  { %v924_v25 = vadd.f32 %v2400_v55, %v2369_v29 }
 0x127   :  { %v925_v31 = vpop.f32.mrf.mxu0  ;;  %v1117_v32 = vpop.f32.mrf.mxu1 }
 0x129   :  { %v2373_v33 = vpop.f32.mrf.mxu0  ;;  %v2375_v34 = vpop.f32.mrf.mxu1 }
 0x12a   :  { %v929_v21 = vadd.f32 %v2400_v55, %v2373_v33 }
 0x12b   :  { %v930_v35 = vpop.f32.mrf.mxu0  ;;  %v1122_v36 = vpop.f32.mrf.mxu1 }
 0x12d   :  { %v2377_v37 = vpop.f32.mrf.mxu0  ;;  %v2379_v38 = vpop.f32.mrf.mxu1 }
 0x12e   :  { %v932_v33 = vadd.f32 %v2400_v55, %v2377_v37 }
 0x12f   :  { %v933_v39 = vpop.f32.mrf.mxu0  ;;  %v1125_v40 = vpop.f32.mrf.mxu1 }
 0x131   :  { %v2381_v41 = vpop.f32.mrf.mxu0  ;;  %v2383_v42 = vpop.f32.mrf.mxu1 }
 0x132   :  { %v937_v29 = vadd.f32 %v2400_v55, %v2381_v41 }
 0x133   :  { %v938_v43 = vpop.f32.mrf.mxu0  ;;  %v1130_v44 = vpop.f32.mrf.mxu1 }
 0x135   :  { %v2385_v45 = vpop.f32.mrf.mxu0  ;;  %v2387_v46 = vpop.f32.mrf.mxu1 }
 0x136   :  { %v940_v41 = vadd.f32 %v2400_v55, %v2385_v45 }
 0x137   :  { %v941_v47 = vpop.f32.mrf.mxu0  ;;  %v1133_v48 = vpop.f32.mrf.mxu1 }
 0x139   :  { %v2389_v49 = vpop.f32.mrf.mxu0  ;;  %v2391_v50 = vpop.f32.mrf.mxu1 }
 0x13a   :  { %v945_v37 = vadd.f32 %v2400_v55, %v2389_v49 }
 0x13b   :  { %v946_v51 = vpop.f32.mrf.mxu0  ;;  %v1138_v52 = vpop.f32.mrf.mxu1 }
 0x13d   :  { %v2393_v53 = vpop.f32.mrf.mxu0  ;;  %v2395_v54 = vpop.f32.mrf.mxu1 }
 0x13e   :  { %v948_v49 = vadd.f32 %v2400_v55, %v2393_v53 }
 0x13f   :  { %v949_v56 = vpop.f32.mrf.mxu0  ;;  %v1141_v59 = vpop.f32.mrf.mxu1 }
 0x141   :  { %v2403_v63 = vpop.f32.mrf.mxu0  ;;  %v1679_v0 = vpop.f32.mrf.mxu1 }
 0x142   :  { %v1186_v4 = vadd.f32 %v1679_v0, %v897_v60 }
 0x143   :  { %v954_v7 = vpop.f32.mrf.mxu0  ;;  %v1177_v8 = vpop.f32.mrf.mxu1 }
 0x144   :  { %1434 = vst [vmem:[%s2714_s3 + $0x10] sm:$0xff] %v1186_v4  ;;  %v1178_v12 = vadd.f32 %v1177_v8, %v889_v3 }
 0x145   :  { %v2411_v15 = vpop.f32.mrf.mxu0  ;;  %v1680_v16 = vpop.f32.mrf.mxu1 }
 0x146   :  { %1432 = vst [vmem:[%s2714_s3] sm:$0xff] %v1178_v12  ;;  %v1189_v57 = vadd.f32 %v1680_v16, %v900_v11 }
 0x147   :  { %v957_v19 = vpop.f32.mrf.mxu0  ;;  %v1180_v20 = vpop.f32.mrf.mxu1 }
 0x148   :  { %1435 = vst [vmem:[%s2714_s3 + $0x18] sm:$0xff] %v1189_v57  ;;  %v1181_v23 = vadd.f32 %v1180_v20, %v892_v1 }
 0x149   :  { %v960_v24 = vpop.f32.mrf.mxu0  ;;  %v1683_v27 = vpop.f32.mrf.mxu1 }
 0x14a   :  { %1433 = vst [vmem:[%s2714_s3 + $0x8] sm:$0xff] %v1181_v23  ;;  %v1202_v61 = vadd.f32 %v1683_v27, %v913_v5 }
 0x14b   :  { %v962_v31 = vpop.f32.mrf.mxu0  ;;  %v1193_v32 = vpop.f32.mrf.mxu1 }
 0x14c   :  { %1438 = vst [vmem:[%s2714_s3 + $0x30] sm:$0xff] %v1202_v61  ;;  %v1194_v35 = vadd.f32 %v1193_v32, %v905_v28  ;;  %v961_v31 = vadd.f32 %v2400_v55, %v960_v24 }
 0x14d   :  { %v963_v36 = vpop.f32.mrf.mxu0  ;;  %v1684_v39 = vpop.f32.mrf.mxu1 }
 0x14e   :  { %1436 = vst [vmem:[%s2714_s3 + $0x20] sm:$0xff] %v1194_v35  ;;  %v1205_v40 = vadd.f32 %v1684_v39, %v916_v17  ;;  %v953_v35 = vadd.f32 %v2400_v55, %v2403_v63 }
 0x14f   :  { %v965_v43 = vpop.f32.mrf.mxu0  ;;  %v1196_v44 = vpop.f32.mrf.mxu1 }
 0x150   :  { %1439 = vst [vmem:[%s2714_s3 + $0x38] sm:$0xff] %v1205_v40  ;;  %v1197_v47 = vadd.f32 %v1196_v44, %v908_v9  ;;  %v964_v40 = vadd.f32 %v2400_v55, %v963_v36 }
 0x151   :  { %v968_v48 = vpop.f32.mrf.mxu0  ;;  %v1687_v51 = vpop.f32.mrf.mxu1 }
 0x152   :  { %1437 = vst [vmem:[%s2714_s3 + $0x28] sm:$0xff] %v1197_v47  ;;  %v1218_v52 = vadd.f32 %v1687_v51, %v929_v21  ;;  %v956_v21 = vadd.f32 %v2400_v55, %v2411_v15 }
 0x153   :  { %v970_v56 = vpop.f32.mrf.mxu0  ;;  %v1209_v59 = vpop.f32.mrf.mxu1 }
 0x154   :  { %1442 = vst [vmem:[%s2714_s3 + $0x50] sm:$0xff] %v1218_v52  ;;  %v1210_v60 = vadd.f32 %v1209_v59, %v921_v13  ;;  %v969_v59 = vadd.f32 %v2400_v55, %v968_v48 }
 0x155   :  { %v971_v0 = vpop.f32.mrf.mxu0  ;;  %v1688_v3 = vpop.f32.mrf.mxu1 }
 0x156   :  { %1440 = vst [vmem:[%s2714_s3 + $0x40] sm:$0xff] %v1210_v60  ;;  %v1221_v4 = vadd.f32 %v1688_v3, %v932_v33 }
 0x157   :  { %v973_v7 = vpop.f32.mrf.mxu0  ;;  %v1212_v8 = vpop.f32.mrf.mxu1 }
 0x158   :  { %1443 = vst [vmem:[%s2714_s3 + $0x58] sm:$0xff] %v1221_v4  ;;  %v1213_v11 = vadd.f32 %v1212_v8, %v924_v25  ;;  %v972_v8 = vadd.f32 %v2400_v55, %v971_v0 }
 0x159   :  { %v976_v12 = vpop.f32.mrf.mxu0  ;;  %v1691_v16 = vpop.f32.mrf.mxu1 }
 0x15a   :  { %1441 = vst [vmem:[%s2714_s3 + $0x48] sm:$0xff] %v1213_v11  ;;  %v1234_v1 = vadd.f32 %v1691_v16, %v945_v37  ;;  %v977_v13 = vadd.f32 %v2400_v55, %v976_v12 }
 0x15b   :  { %v978_v57 = vpop.f32.mrf.mxu0  ;;  %v1225_v19 = vpop.f32.mrf.mxu1 }
 0x15c   :  { %1446 = vst [vmem:[%s2714_s3 + $0x70] sm:$0xff] %v1234_v1  ;;  %v1226_v20 = vadd.f32 %v1225_v19, %v937_v29 }
 0x15d   :  { %v979_v5 = vpop.f32.mrf.mxu0  ;;  %v1692_v23 = vpop.f32.mrf.mxu1 }
 0x15e   :  { %1444 = vst [vmem:[%s2714_s3 + $0x60] sm:$0xff] %v1226_v20  ;;  %v1237_v27 = vadd.f32 %v1692_v23, %v948_v49  ;;  %v980_v3 = vadd.f32 %v2400_v55, %v979_v5 }
 0x15f   :  { %v981_v28 = vpop.f32.mrf.mxu0  ;;  %v1228_v61 = vpop.f32.mrf.mxu1 }
 0x160   :  { %1447 = vst [vmem:[%s2714_s3 + $0x78] sm:$0xff] %v1237_v27  ;;  %v1229_v53 = vadd.f32 %v1228_v61, %v940_v41 }
 0x161   :  { %v984_v32 = vpop.f32.mrf.mxu0  ;;  %v1695_v17 = vpop.f32.mrf.mxu1 }
 0x162   :  { %1445 = vst [vmem:[%s2714_s3 + $0x68] sm:$0xff] %v1229_v53  ;;  %v1250_v45 = vadd.f32 %v1695_v17, %v961_v31  ;;  %v985_v57 = vadd.f32 %v2400_v55, %v984_v32 }
 0x163   :  { %v986_v39 = vpop.f32.mrf.mxu0  ;;  %v1241_v9 = vpop.f32.mrf.mxu1 }
 0x164   :  { %1450 = vst [vmem:[%s2714_s3 + $0x90] sm:$0xff] %v1250_v45  ;;  %v1242_v24 = vadd.f32 %v1241_v9, %v953_v35 }
 0x165   :  { %v987_v43 = vpop.f32.mrf.mxu0  ;;  %v1696_v44 = vpop.f32.mrf.mxu1 }
 0x166   :  { %1448 = vst [vmem:[%s2714_s3 + $0x80] sm:$0xff] %v1242_v24  ;;  %v1253_v63 = vadd.f32 %v1696_v44, %v964_v40  ;;  %v988_v27 = vadd.f32 %v2400_v55, %v987_v43 }
 0x167   :  { %v989_v47 = vpop.f32.mrf.mxu0  ;;  %v1244_v51 = vpop.f32.mrf.mxu1 }
 0x168   :  { %1451 = vst [vmem:[%s2714_s3 + $0x98] sm:$0xff] %v1253_v63  ;;  %v1245_v36 = vadd.f32 %v1244_v51, %v956_v21 }
 0x169   :  { %v992_v52 = vpop.f32.mrf.mxu0  ;;  %v1699_v56 = vpop.f32.mrf.mxu1 }
 0x16a   :  { %1449 = vst [vmem:[%s2714_s3 + $0x88] sm:$0xff] %v1245_v36  ;;  %v1266_v15 = vadd.f32 %v1699_v56, %v977_v13  ;;  %v993_v12 = vadd.f32 %v2400_v55, %v992_v52 }
 0x16b   :  { %v994_v33 = vpop.f32.mrf.mxu0  ;;  %v1257_v60 = vpop.f32.mrf.mxu1 }
 0x16c   :  { %1454 = vst [vmem:[%s2714_s3 + $0xb0] sm:$0xff] %v1266_v15  ;;  %v1258_v25 = vadd.f32 %v1257_v60, %v969_v59 }
 0x16d   :  { %v995_v4 = vpop.f32.mrf.mxu0  ;;  %v1700_v7 = vpop.f32.mrf.mxu1 }
 0x16e   :  { %1452 = vst [vmem:[%s2714_s3 + $0xa0] sm:$0xff] %v1258_v25  ;;  %v1269_v48 = vadd.f32 %v1700_v7, %v980_v3  ;;  %v996_v20 = vadd.f32 %v2400_v55, %v995_v4 }
 0x16f   :  { %v997_v37 = vpop.f32.mrf.mxu0  ;;  %v1260_v11 = vpop.f32.mrf.mxu1 }
 0x170   :  { %1455 = vst [vmem:[%s2714_s3 + $0xb8] sm:$0xff] %v1269_v48  ;;  %v1261_v16 = vadd.f32 %v1260_v11, %v972_v8 }
 0x171   :  { %v1000_v29 = vpop.f32.mrf.mxu0  ;;  %v1703_v1 = vpop.f32.mrf.mxu1 }
 0x172   :  { %1453 = vst [vmem:[%s2714_s3 + $0xa8] sm:$0xff] %v1261_v16  ;;  %v1282_v0 = vadd.f32 %v1703_v1, %v993_v12  ;;  %v1001_v35 = vadd.f32 %v2400_v55, %v1000_v29 }
 0x173   :  { %v1002_v19 = vpop.f32.mrf.mxu0  ;;  %v1273_v49 = vpop.f32.mrf.mxu1 }
 0x174   :  { %1458 = vst [vmem:[%s2714_s3 + $0xd0] sm:$0xff] %v1282_v0  ;;  %v1274_v5 = vadd.f32 %v1273_v49, %v985_v57 }
 0x175   :  { %v1003_v23 = vpop.f32.mrf.mxu0  ;;  %v1704_v41 = vpop.f32.mrf.mxu1 }
 0x176   :  { %1456 = vst [vmem:[%s2714_s3 + $0xc0] sm:$0xff] %v1274_v5  ;;  %v1285_v28 = vadd.f32 %v1704_v41, %v996_v20  ;;  %v1004_v21 = vadd.f32 %v2400_v55, %v1003_v23 }
 0x177   :  { %v1005_v61 = vpop.f32.mrf.mxu0  ;;  %v1276_v31 = vpop.f32.mrf.mxu1 }
 0x178   :  { %1459 = vst [vmem:[%s2714_s3 + $0xd8] sm:$0xff] %v1285_v28  ;;  %v1277_v53 = vadd.f32 %v1276_v31, %v988_v27 }
 0x179   :  { %v1008_v32 = vpop.f32.mrf.mxu0  ;;  %v1707_v17 = vpop.f32.mrf.mxu1 }
 0x17a   :  { %1457 = vst [vmem:[%s2714_s3 + $0xc8] sm:$0xff] %v1277_v53  ;;  %v1009_v45 = vadd.f32 %v2400_v55, %v1008_v32 }
 0x17b   :  { %v1010_v39 = vpop.f32.mrf.mxu0  ;;  %v1289_v9 = vpop.f32.mrf.mxu1 }
 0x17c   :  { %v1298_v40 = vadd.f32 %v1707_v17, %v1009_v45  ;;  %v1290_v24 = vadd.f32 %v1289_v9, %v1001_v35 }
 0x17d   :  { %v1011_v43 = vpop.f32.mrf.mxu0  ;;  %v1708_v44 = vpop.f32.mrf.mxu1 }
 0x17e   :  { %1462 = vst [vmem:[%s2714_s3 + $0xf0] sm:$0xff] %v1298_v40  ;;  %1460 = vst [vmem:[%s2714_s3 + $0xe0] sm:$0xff] %v1290_v24  ;;  %v1012_v63 = vadd.f32 %v2400_v55, %v1011_v43 }
 0x17f   :  { %v1013_v47 = vpop.f32.mrf.mxu0  ;;  %v1292_v51 = vpop.f32.mrf.mxu1 }
 0x180   :  { %v1301_v13 = vadd.f32 %v1708_v44, %v1012_v63  ;;  %v1293_v36 = vadd.f32 %v1292_v51, %v1004_v21 }
 0x181   :  { %v1016_v52 = vpop.f32.mrf.mxu0  ;;  %v1711_v56 = vpop.f32.mrf.mxu1 }
 0x182   :  { %1463 = vst [vmem:[%s2714_s3 + $0xf8] sm:$0xff] %v1301_v13  ;;  %1461 = vst [vmem:[%s2714_s3 + $0xe8] sm:$0xff] %v1293_v36  ;;  %v1017_v59 = vadd.f32 %v2400_v55, %v1016_v52  ;;  %v1089_v52 = vadd.f32 %v2400_v55, %v2347_v2 }
 0x183   :  { %v1018_v15 = vpop.f32.mrf.mxu0  ;;  %v1305_v33 = vpop.f32.mrf.mxu1 }
 0x184   :  { %v1306_v60 = vadd.f32 %v1305_v33, %v1017_v59  ;;  %v1081_v33 = vadd.f32 %v2400_v55, %v2341_v58 }
 0x185   :  { %v1019_v3 = vpop.f32.mrf.mxu0  ;;  %v1712_v25 = vpop.f32.mrf.mxu1 }
 0x186   :  { %1464 = vst [vmem:[%s2714_s3 + $0x100] sm:$0xff] %v1306_v60  ;;  %v1020_v4 = vadd.f32 %v2400_v55, %v1019_v3 }
 0x187   :  { %v1021_v7 = vpop.f32.mrf.mxu0  ;;  %v1308_v8 = vpop.f32.mrf.mxu1 }
 0x188   :  { %v1309_v48 = vadd.f32 %v1308_v8, %v1020_v4  ;;  %v1092_v7 = vadd.f32 %v2400_v55, %v2349_v6 }
 0x189   :  { %v1024_v37 = vpop.f32.mrf.mxu0  ;;  %v1715_v11 = vpop.f32.mrf.mxu1 }
 0x18a   :  { %1465 = vst [vmem:[%s2714_s3 + $0x108] sm:$0xff] %v1309_v48  ;;  %v1025_v12 = vadd.f32 %v2400_v55, %v1024_v37  ;;  %v1084_v37 = vadd.f32 %v2400_v55, %v2345_v62 }
 0x18b   :  { %v1026_v16 = vpop.f32.mrf.mxu0  ;;  %v1321_v29 = vpop.f32.mrf.mxu1 }
 0x18c   :  { %v1314_v1 = vadd.f32 %v1711_v56, %v1025_v12 }
 0x18d   :  { %v1027_v57 = vpop.f32.mrf.mxu0  ;;  %v1716_v0 = vpop.f32.mrf.mxu1 }
 0x18e   :  { %1466 = vst [vmem:[%s2714_s3 + $0x110] sm:$0xff] %v1314_v1  ;;  %v1028_v19 = vadd.f32 %v2400_v55, %v1027_v57 }
 0x18f   :  { %v1029_v49 = vpop.f32.mrf.mxu0  ;;  %v1324_v20 = vpop.f32.mrf.mxu1 }
 0x190   :  { %v1317_v5 = vadd.f32 %v1712_v25, %v1028_v19  ;;  %v1097_v19 = vadd.f32 %v2400_v55, %v2353_v10 }
 0x191   :  { %v1032_v23 = vpop.f32.mrf.mxu0  ;;  %v2562_v41 = vpop.f32.mrf.mxu1 }
 0x192   :  { %1467 = vst [vmem:[%s2714_s3 + $0x118] sm:$0xff] %v1317_v5  ;;  %v1033_v27 = vadd.f32 %v2400_v55, %v1032_v23  ;;  %v1108_v23 = vadd.f32 %v2400_v55, %v2363_v22 }
 0x193   :  { %v1034_v28 = vpop.f32.mrf.mxu0  ;;  %v1337_v61 = vpop.f32.mrf.mxu1 }
 0x194   :  { %v1322_v31 = vadd.f32 %v1321_v29, %v1033_v27  ;;  %v1105_v29 = vadd.f32 %v2400_v55, %v2359_v18 }
 0x195   :  { %v1035_v53 = vpop.f32.mrf.mxu0  ;;  %v2568_v32 = vpop.f32.mrf.mxu1 }
 0x196   :  { %1468 = vst [vmem:[%s2714_s3 + $0x120] sm:$0xff] %v1322_v31  ;;  %v1036_v17 = vadd.f32 %v2400_v55, %v1035_v53  ;;  %v1100_v31 = vadd.f32 %v2400_v55, %v2357_v14 }
 0x197   :  { %v1037_v35 = vpop.f32.mrf.mxu0  ;;  %v1340_v45 = vpop.f32.mrf.mxu1 }
 0x198   :  { %v1325_v39 = vadd.f32 %v1324_v20, %v1036_v17  ;;  %v1121_v35 = vadd.f32 %v2400_v55, %v2375_v34 }
 0x199   :  { %v1040_v9 = vpop.f32.mrf.mxu0  ;;  %v2574_v40 = vpop.f32.mrf.mxu1 }
 0x19a   :  { %1469 = vst [vmem:[%s2714_s3 + $0x128] sm:$0xff] %v1325_v39  ;;  %v1041_v24 = vadd.f32 %v2400_v55, %v1040_v9 }
 0x19b   :  { %v1042_v43 = vpop.f32.mrf.mxu0  ;;  %v2580_v44 = vpop.f32.mrf.mxu1 }
 0x19c   :  { %v1330_v21 = vadd.f32 %v1715_v11, %v1041_v24  ;;  %v1113_v24 = vadd.f32 %v2400_v55, %v2367_v26 }
 0x19d   :  { %v1043_v63 = vpop.f32.mrf.mxu0  ;;  %v2582_v47 = vpop.f32.mrf.mxu1 }
 0x19e   :  { %1470 = vst [vmem:[%s2714_s3 + $0x130] sm:$0xff] %v1330_v21  ;;  %v1044_v51 = vadd.f32 %v2400_v55, %v1043_v63  ;;  %v1124_v63 = vadd.f32 %v2400_v55, %v2379_v38 }
 0x19f   :  { %v1045_v13 = vpop.f32.mrf.mxu0  ;;  %v2588_v36 = vpop.f32.mrf.mxu1 }
 0x1a0   :  { %v1333_v56 = vadd.f32 %v1716_v0, %v1044_v51 }
 0x1a1   :  { %v1048_v59 = vpop.f32.mrf.mxu0  ;;  %v1727_v15 = vpop.f32.mrf.mxu1 }
 0x1a2   :  { %1471 = vst [vmem:[%s2714_s3 + $0x138] sm:$0xff] %v1333_v56  ;;  %v1049_v60 = vadd.f32 %v2400_v55, %v1048_v59  ;;  %v1378_v3 = vadd.f32 %v1727_v15, %v1089_v52  ;;  %v1116_v56 = vadd.f32 %v2400_v55, %v2371_v30 }
 0x1a3   :  { %v1050_v25 = vpop.f32.mrf.mxu0  ;;  %v1369_v4 = vpop.f32.mrf.mxu1 }
 0x1a4   :  { %v1338_v8 = vadd.f32 %v1337_v61, %v1049_v60  ;;  %1482 = vst [vmem:[%s2714_s3 + $0x190] sm:$0xff] %v1378_v3  ;;  %v1370_v2 = vadd.f32 %v1369_v4, %v1081_v33  ;;  %v1137_v33 = vadd.f32 %v2400_v55, %v2391_v50  ;;  %v1129_v4 = vadd.f32 %v2400_v55, %v2383_v42 }
 0x1a5   :  { %v1051_v48 = vpop.f32.mrf.mxu0  ;;  %v1728_v58 = vpop.f32.mrf.mxu1 }
 0x1a6   :  { %1472 = vst [vmem:[%s2714_s3 + $0x140] sm:$0xff] %v1338_v8  ;;  %1480 = vst [vmem:[%s2714_s3 + $0x180] sm:$0xff] %v1370_v2  ;;  %v1052_v6 = vadd.f32 %v2400_v55, %v1051_v48  ;;  %v1381_v11 = vadd.f32 %v1728_v58, %v1092_v7  ;;  %v1140_v2 = vadd.f32 %v2400_v55, %v2395_v54 }
 0x1a7   :  { %v1053_v12 = vpop.f32.mrf.mxu0  ;;  %v1372_v16 = vpop.f32.mrf.mxu1 }
 0x1a8   :  { %v1341_v1 = vadd.f32 %v1340_v45, %v1052_v6  ;;  %1483 = vst [vmem:[%s2714_s3 + $0x198] sm:$0xff] %v1381_v11  ;;  %v1373_v62 = vadd.f32 %v1372_v16, %v1084_v37  ;;  %v1132_v6 = vadd.f32 %v2400_v55, %v2387_v46 }
 0x1a9   :  { %v1056_v57 = vpop.f32.mrf.mxu0  ;;  %v1731_v0 = vpop.f32.mrf.mxu1 }
 0x1aa   :  { %1473 = vst [vmem:[%s2714_s3 + $0x148] sm:$0xff] %v1341_v1  ;;  %1481 = vst [vmem:[%s2714_s3 + $0x188] sm:$0xff] %v1373_v62  ;;  %v1057_v18 = vadd.f32 %v2400_v55, %v1056_v57  ;;  %v1394_v49 = vadd.f32 %v1731_v0, %v1105_v29 }
 0x1ab   :  { %v1058_v20 = vpop.f32.mrf.mxu0  ;;  %v1385_v5 = vpop.f32.mrf.mxu1 }
 0x1ac   :  { %v1346_v27 = vadd.f32 %v2562_v41, %v1057_v18  ;;  %1486 = vst [vmem:[%s2714_s3 + $0x1b0] sm:$0xff] %v1394_v49  ;;  %v1386_v10 = vadd.f32 %v1385_v5, %v1097_v19 }
 0x1ad   :  { %v1059_v28 = vpop.f32.mrf.mxu0  ;;  %v1732_v61 = vpop.f32.mrf.mxu1 }
 0x1ae   :  { %1474 = vst [vmem:[%s2714_s3 + $0x150] sm:$0xff] %v1346_v27  ;;  %1484 = vst [vmem:[%s2714_s3 + $0x1a0] sm:$0xff] %v1386_v10  ;;  %v1060_v22 = vadd.f32 %v2400_v55, %v1059_v28  ;;  %v1397_v41 = vadd.f32 %v1732_v61, %v1108_v23 }
 0x1af   :  { %v1061_v53 = vpop.f32.mrf.mxu0  ;;  %v1388_v17 = vpop.f32.mrf.mxu1 }
 0x1b0   :  { %v1349_v45 = vadd.f32 %v2568_v32, %v1060_v22  ;;  %1487 = vst [vmem:[%s2714_s3 + $0x1b8] sm:$0xff] %v1397_v41  ;;  %v1389_v14 = vadd.f32 %v1388_v17, %v1100_v31 }
 0x1b1   :  { %v1064_v39 = vpop.f32.mrf.mxu0  ;;  %v1735_v9 = vpop.f32.mrf.mxu1 }
 0x1b2   :  { %1475 = vst [vmem:[%s2714_s3 + $0x158] sm:$0xff] %v1349_v45  ;;  %1485 = vst [vmem:[%s2714_s3 + $0x1a8] sm:$0xff] %v1389_v14  ;;  %v1065_v34 = vadd.f32 %v2400_v55, %v1064_v39  ;;  %v1410_v32 = vadd.f32 %v1735_v9, %v1121_v35 }
 0x1b3   :  { %v1066_v43 = vpop.f32.mrf.mxu0  ;;  %v1401_v21 = vpop.f32.mrf.mxu1 }
 0x1b4   :  { %v1354_v51 = vadd.f32 %v2580_v44, %v1065_v34  ;;  %1490 = vst [vmem:[%s2714_s3 + $0x1d0] sm:$0xff] %v1410_v32  ;;  %v1402_v26 = vadd.f32 %v1401_v21, %v1113_v24 }
 0x1b5   :  { %v1067_v13 = vpop.f32.mrf.mxu0  ;;  %v1736_v52 = vpop.f32.mrf.mxu1 }
 0x1b6   :  { %1476 = vst [vmem:[%s2714_s3 + $0x160] sm:$0xff] %v1354_v51  ;;  %1488 = vst [vmem:[%s2714_s3 + $0x1c0] sm:$0xff] %v1402_v26  ;;  %v1068_v38 = vadd.f32 %v2400_v55, %v1067_v13  ;;  %v1413_v44 = vadd.f32 %v1736_v52, %v1124_v63 }
 0x1b7   :  { %v1069_v59 = vpop.f32.mrf.mxu0  ;;  %v1404_v15 = vpop.f32.mrf.mxu1 }
 0x1b8   :  { %v1357_v60 = vadd.f32 %v2588_v36, %v1068_v38  ;;  %1491 = vst [vmem:[%s2714_s3 + $0x1d8] sm:$0xff] %v1413_v44  ;;  %v1405_v30 = vadd.f32 %v1404_v15, %v1116_v56 }
 0x1b9   :  { %v1072_v3 = vpop.f32.mrf.mxu0  ;;  %v1739_v25 = vpop.f32.mrf.mxu1 }
 0x1ba   :  { %1477 = vst [vmem:[%s2714_s3 + $0x168] sm:$0xff] %v1357_v60  ;;  %1489 = vst [vmem:[%s2714_s3 + $0x1c8] sm:$0xff] %v1405_v30  ;;  %v1073_v50 = vadd.f32 %v2400_v55, %v1072_v3  ;;  %v1426_v36 = vadd.f32 %v1739_v25, %v1137_v33 }
 0x1bb   :  { %v1074_v7 = vpop.f32.mrf.mxu0  ;;  %v1417_v8 = vpop.f32.mrf.mxu1 }
 0x1bc   :  { %v1362_v48 = vadd.f32 %v2574_v40, %v1073_v50  ;;  %1494 = vst [vmem:[%s2714_s3 + $0x1f0] sm:$0xff] %v1426_v36  ;;  %v1418_v42 = vadd.f32 %v1417_v8, %v1129_v4 }
 0x1bd   :  { %v1075_v58 = vpop.f32.mrf.mxu0  ;;  %v1740_v37 = vpop.f32.mrf.mxu1 }
 0x1be   :  { %1478 = vst [vmem:[%s2714_s3 + $0x170] sm:$0xff] %v1362_v48  ;;  %1492 = vst [vmem:[%s2714_s3 + $0x1e0] sm:$0xff] %v1418_v42  ;;  %v1076_v54 = vadd.f32 %v2400_v55, %v1075_v58  ;;  %v1429_v40 = vadd.f32 %v1740_v37, %v1140_v2 }
 0x1bf   :  { %v1077_v11 = vpop.f32.mrf.mxu0  ;;  %v1420_v12 = vpop.f32.mrf.mxu1 }
 0x1c0   :  { %v1365_v16 = vadd.f32 %v2582_v47, %v1076_v54  ;;  %1495 = vst [vmem:[%s2714_s3 + $0x1f8] sm:$0xff] %v1429_v40  ;;  %v1421_v46 = vadd.f32 %v1420_v12, %v1132_v6 }
 0x1c2   :  { %1479 = vst [vmem:[%s2714_s3 + $0x178] sm:$0xff] %v1365_v16  ;;  %1493 = vst [vmem:[%s2714_s3 + $0x1e8] sm:$0xff] %v1421_v46 }

// kernel: dis_tan_forward.13
= control target key start
LH: loop header
LB: loop body
LE: loop exit
PB: predicated region body
PF: predicated region fallthrough
CT: control target
= control target key end

     0   :  { %vm72_vm0 = vcmask 203776   ;;  %s535_s0 = inlined_call_operand.vmem [shape: f32[4,128,25], index: 0, kind: input, shape index: {}]   ;;  %s536_s1 = inlined_call_operand.vmem [shape: f32[128,25], index: 1, kind: output, shape index: {}]  }
   0x1   :  { %v8_v0 = vld [vmem:[%s535_s0] sm:$0xff]  ;;  %v9_v7 = vld [vmem:[%s535_s0 + $0x8] sm:$0xff]  ;;  %v10_v15 = vld [vmem:[%s535_s0 + $0x10] sm:$0xff] }
   0x2   :  { %v24_v1 = vld [vmem:[%s535_s0 + $0x80] sm:$0xff]  ;;  %v73_v4 = vsel %vm72_vm0, %v8_v0, -inf  ;;  %v25_v8 = vld [vmem:[%s535_s0 + $0x88] sm:$0xff]  ;;  %v80_v13 = vsel %vm72_vm0, %v9_v7, -inf  ;;  %v26_v19 = vld [vmem:[%s535_s0 + $0x90] sm:$0xff]  ;;  %v87_v22 = vsel %vm72_vm0, %v10_v15, -inf }
   0x3   :  { %v40_v2 = vld [vmem:[%s535_s0 + $0x100] sm:$0xff]  ;;  %v74_v5 = vsel %vm72_vm0, %v24_v1, -inf  ;;  %v41_v11 = vld [vmem:[%s535_s0 + $0x108] sm:$0xff]  ;;  %v81_v14 = vsel %vm72_vm0, %v25_v8, -inf  ;;  %v42_v20 = vld [vmem:[%s535_s0 + $0x110] sm:$0xff]  ;;  %v88_v24 = vsel %vm72_vm0, %v26_v19, -inf }
   0x4   :  { %v56_v3 = vld [vmem:[%s535_s0 + $0x180] sm:$0xff]  ;;  %v76_v6 = vsel %vm72_vm0, %v40_v2, -inf  ;;  %v75_v9 = vmax.f32 %v73_v4, %v74_v5  ;;  %v57_v12 = vld [vmem:[%s535_s0 + $0x188] sm:$0xff]  ;;  %v82_v16 = vmax.f32 %v80_v13, %v81_v14  ;;  %v83_v17 = vsel %vm72_vm0, %v41_v11, -inf  ;;  %v58_v21 = vld [vmem:[%s535_s0 + $0x190] sm:$0xff] }
   0x5   :  { %v78_v10 = vsel %vm72_vm0, %v56_v3, -inf  ;;  %v85_v18 = vsel %vm72_vm0, %v57_v12, -inf  ;;  %v90_v25 = vsel %vm72_vm0, %v42_v20, -inf  ;;  %v92_v26 = vsel %vm72_vm0, %v58_v21, -inf  ;;  %v11_v27 = vld [vmem:[%s535_s0 + $0x18] sm:$0xff]  ;;  %v12_v35 = vld [vmem:[%s535_s0 + $0x20] sm:$0xff] }
   0x6   :  { %v77_v23 = vmax.f32 %v75_v9, %v76_v6  ;;  %v27_v28 = vld [vmem:[%s535_s0 + $0x98] sm:$0xff]  ;;  %v84_v30 = vmax.f32 %v82_v16, %v83_v17  ;;  %v89_v31 = vmax.f32 %v87_v22, %v88_v24  ;;  %v94_v33 = vsel %vm72_vm0, %v11_v27, -inf  ;;  %v28_v36 = vld [vmem:[%s535_s0 + $0xa0] sm:$0xff]  ;;  %v13_v43 = vld [vmem:[%s535_s0 + $0x28] sm:$0xff] }
   0x7   :  { %v43_v29 = vld [vmem:[%s535_s0 + $0x118] sm:$0xff]  ;;  %v95_v34 = vsel %vm72_vm0, %v27_v28, -inf  ;;  %v44_v41 = vld [vmem:[%s535_s0 + $0x120] sm:$0xff]  ;;  %v101_v46 = vsel %vm72_vm0, %v12_v35, -inf  ;;  %v102_v47 = vsel %vm72_vm0, %v28_v36, -inf  ;;  %v29_v48 = vld [vmem:[%s535_s0 + $0xa8] sm:$0xff] }
   0x8   :  { %v59_v32 = vld [vmem:[%s535_s0 + $0x198] sm:$0xff]  ;;  %v79_v37 = vmax.f32 %v77_v23, %v78_v10  ;;  %v96_v38 = vmax.f32 %v94_v33, %v95_v34  ;;  %v97_v39 = vsel %vm72_vm0, %v43_v29, -inf  ;;  %v60_v42 = vld [vmem:[%s535_s0 + $0x1a0] sm:$0xff]  ;;  %v86_v44 = vmax.f32 %v84_v30, %v85_v18  ;;  %v45_v49 = vld [vmem:[%s535_s0 + $0x128] sm:$0xff] }
   0x9   :  { %v99_v40 = vsel %vm72_vm0, %v59_v32, -inf  ;;  %v91_v45 = vmax.f32 %v89_v31, %v90_v25  ;;  %v61_v50 = vld [vmem:[%s535_s0 + $0x1a8] sm:$0xff]  ;;  %v103_v52 = vmax.f32 %v101_v46, %v102_v47  ;;  %v104_v53 = vsel %vm72_vm0, %v44_v41, -inf  ;;  %v14_v55 = vld [vmem:[%s535_s0 + $0x30] sm:$0xff]  ;;  %v15_v63 = vld [vmem:[%s535_s0 + $0x38] sm:$0xff] }
   0xa   :  { %185 = vst.msk [vmem:[%s536_s1] sm:$0xff] %vm72_vm0, %v79_v37  ;;  %v98_v51 = vmax.f32 %v96_v38, %v97_v39  ;;  %v106_v54 = vsel %vm72_vm0, %v60_v42, -inf  ;;  %v30_v56 = vld [vmem:[%s535_s0 + $0xb0] sm:$0xff]  ;;  %186 = vst.msk [vmem:[%s536_s1 + $0x8] sm:$0xff] %vm72_vm0, %v86_v44  ;;  %v108_v59 = vsel %vm72_vm0, %v13_v43, -inf  ;;  %v109_v60 = vsel %vm72_vm0, %v29_v48, -inf }
   0xb   :  { %v46_v57 = vld [vmem:[%s535_s0 + $0x130] sm:$0xff]  ;;  %v93_v58 = vmax.f32 %v91_v45, %v92_v26  ;;  %v111_v61 = vsel %vm72_vm0, %v45_v49, -inf  ;;  %v31_v0 = vld [vmem:[%s535_s0 + $0xb8] sm:$0xff]  ;;  %v105_v2 = vmax.f32 %v103_v52, %v104_v53  ;;  %v110_v3 = vmax.f32 %v108_v59, %v109_v60  ;;  %v16_v7 = vld [vmem:[%s535_s0 + $0x40] sm:$0xff] }
   0xc   :  { %v62_v62 = vld [vmem:[%s535_s0 + $0x1b0] sm:$0xff]  ;;  %v100_v1 = vmax.f32 %v98_v51, %v99_v40  ;;  %v113_v4 = vsel %vm72_vm0, %v61_v50, -inf  ;;  %v47_v5 = vld [vmem:[%s535_s0 + $0x138] sm:$0xff]  ;;  %v115_v8 = vsel %vm72_vm0, %v14_v55, -inf  ;;  %v116_v9 = vsel %vm72_vm0, %v30_v56, -inf  ;;  %v32_v12 = vld [vmem:[%s535_s0 + $0xc0] sm:$0xff] }
   0xd   :  { %v63_v6 = vld [vmem:[%s535_s0 + $0x1b8] sm:$0xff]  ;;  %187 = vst.msk [vmem:[%s536_s1 + $0x10] sm:$0xff] %vm72_vm0, %v93_v58  ;;  %v118_v10 = vsel %vm72_vm0, %v46_v57, -inf  ;;  %v120_v11 = vsel %vm72_vm0, %v62_v62, -inf  ;;  %v107_v13 = vmax.f32 %v105_v2, %v106_v54  ;;  %v112_v14 = vmax.f32 %v110_v3, %v111_v61  ;;  %v48_v17 = vld [vmem:[%s535_s0 + $0x140] sm:$0xff]  ;;  %v17_v19 = vld [vmem:[%s535_s0 + $0x48] sm:$0xff] }
   0xe   :  { %188 = vst.msk [vmem:[%s536_s1 + $0x18] sm:$0xff] %vm72_vm0, %v100_v1  ;;  %v117_v15 = vmax.f32 %v115_v8, %v116_v9  ;;  %v122_v16 = vsel %vm72_vm0, %v15_v63, -inf  ;;  %v64_v18 = vld [vmem:[%s535_s0 + $0x1c0] sm:$0xff]  ;;  %v123_v20 = vsel %vm72_vm0, %v31_v0, -inf  ;;  %v125_v21 = vsel %vm72_vm0, %v47_v5, -inf  ;;  %v33_v24 = vld [vmem:[%s535_s0 + $0xc8] sm:$0xff] }
   0xf   :  { %v127_v22 = vsel %vm72_vm0, %v63_v6, -inf  ;;  %v129_v23 = vsel %vm72_vm0, %v16_v7, -inf  ;;  %v49_v25 = vld [vmem:[%s535_s0 + $0x148] sm:$0xff]  ;;  %189 = vst.msk [vmem:[%s536_s1 + $0x20] sm:$0xff] %vm72_vm0, %v107_v13  ;;  %v114_v26 = vmax.f32 %v112_v14, %v113_v4  ;;  %v124_v28 = vmax.f32 %v122_v16, %v123_v20  ;;  %v18_v31 = vld [vmem:[%s535_s0 + $0x50] sm:$0xff]  ;;  %v19_v43 = vld [vmem:[%s535_s0 + $0x58] sm:$0xff] }
  0x10   :  { %v119_v27 = vmax.f32 %v117_v15, %v118_v10  ;;  %v130_v29 = vsel %vm72_vm0, %v32_v12, -inf  ;;  %v65_v30 = vld [vmem:[%s535_s0 + $0x1c8] sm:$0xff]  ;;  %v132_v33 = vsel %vm72_vm0, %v48_v17, -inf  ;;  %v134_v34 = vsel %vm72_vm0, %v64_v18, -inf  ;;  %v34_v36 = vld [vmem:[%s535_s0 + $0xd0] sm:$0xff]  ;;  %v35_v44 = vld [vmem:[%s535_s0 + $0xd8] sm:$0xff] }
  0x11   :  { %v131_v32 = vmax.f32 %v129_v23, %v130_v29  ;;  %v136_v35 = vsel %vm72_vm0, %v17_v19, -inf  ;;  %v50_v37 = vld [vmem:[%s535_s0 + $0x150] sm:$0xff]  ;;  %190 = vst.msk [vmem:[%s536_s1 + $0x28] sm:$0xff] %vm72_vm0, %v114_v26  ;;  %v126_v40 = vmax.f32 %v124_v28, %v125_v21  ;;  %v137_v41 = vsel %vm72_vm0, %v33_v24, -inf  ;;  %v51_v49 = vld [vmem:[%s535_s0 + $0x158] sm:$0xff]  ;;  %v20_v51 = vld [vmem:[%s535_s0 + $0x60] sm:$0xff] }
  0x12   :  { %v66_v38 = vld [vmem:[%s535_s0 + $0x1d0] sm:$0xff]  ;;  %v121_v39 = vmax.f32 %v119_v27, %v120_v11  ;;  %v139_v42 = vsel %vm72_vm0, %v49_v25, -inf  ;;  %v138_v46 = vmax.f32 %v136_v35, %v137_v41  ;;  %v141_v47 = vsel %vm72_vm0, %v65_v30, -inf  ;;  %v67_v50 = vld [vmem:[%s535_s0 + $0x1d8] sm:$0xff]  ;;  %v36_v56 = vld [vmem:[%s535_s0 + $0xe0] sm:$0xff] }
  0x13   :  { %v133_v45 = vmax.f32 %v131_v32, %v132_v33  ;;  %v143_v48 = vsel %vm72_vm0, %v18_v31, -inf  ;;  %v128_v52 = vmax.f32 %v126_v40, %v127_v22  ;;  %v144_v53 = vsel %vm72_vm0, %v34_v36, -inf  ;;  %v52_v61 = vld [vmem:[%s535_s0 + $0x160] sm:$0xff]  ;;  %v21_v63 = vld [vmem:[%s535_s0 + $0x68] sm:$0xff]  ;;  %v22_v10 = vld [vmem:[%s535_s0 + $0x70] sm:$0xff] }
  0x14   :  { %191 = vst.msk [vmem:[%s536_s1 + $0x30] sm:$0xff] %vm72_vm0, %v121_v39  ;;  %v146_v54 = vsel %vm72_vm0, %v50_v37, -inf  ;;  %v148_v55 = vsel %vm72_vm0, %v66_v38, -inf  ;;  %v140_v58 = vmax.f32 %v138_v46, %v139_v42  ;;  %v145_v59 = vmax.f32 %v143_v48, %v144_v53  ;;  %v68_v62 = vld [vmem:[%s535_s0 + $0x1e0] sm:$0xff]  ;;  %v37_v4 = vld [vmem:[%s535_s0 + $0xe8] sm:$0xff]  ;;  %v38_v16 = vld [vmem:[%s535_s0 + $0xf0] sm:$0xff] }
  0x15   :  { %v135_v57 = vmax.f32 %v133_v45, %v134_v34  ;;  %v150_v60 = vsel %vm72_vm0, %v19_v43, -inf  ;;  %192 = vst.msk [vmem:[%s536_s1 + $0x38] sm:$0xff] %vm72_vm0, %v128_v52  ;;  %v151_v0 = vsel %vm72_vm0, %v35_v44, -inf  ;;  %v153_v1 = vsel %vm72_vm0, %v51_v49, -inf  ;;  %v53_v5 = vld [vmem:[%s535_s0 + $0x168] sm:$0xff]  ;;  %v54_v17 = vld [vmem:[%s535_s0 + $0x170] sm:$0xff] }
  0x16   :  { %v155_v2 = vsel %vm72_vm0, %v67_v50, -inf  ;;  %v157_v3 = vsel %vm72_vm0, %v20_v51, -inf  ;;  %v142_v6 = vmax.f32 %v140_v58, %v141_v47  ;;  %v147_v7 = vmax.f32 %v145_v59, %v146_v54  ;;  %v69_v14 = vld [vmem:[%s535_s0 + $0x1e8] sm:$0xff]  ;;  %v23_v22 = vld [vmem:[%s535_s0 + $0x78] sm:$0xff]  ;;  %v70_v25 = vld [vmem:[%s535_s0 + $0x1f0] sm:$0xff] }
  0x17   :  { %193 = vst.msk [vmem:[%s536_s1 + $0x40] sm:$0xff] %vm72_vm0, %v135_v57  ;;  %v152_v8 = vmax.f32 %v150_v60, %v151_v0  ;;  %v158_v9 = vsel %vm72_vm0, %v36_v56, -inf  ;;  %v160_v12 = vsel %vm72_vm0, %v52_v61, -inf  ;;  %v162_v13 = vsel %vm72_vm0, %v68_v62, -inf  ;;  %v39_v27 = vld [vmem:[%s535_s0 + $0xf8] sm:$0xff] }
  0x18   :  { %v159_v11 = vmax.f32 %v157_v3, %v158_v9  ;;  %v164_v15 = vsel %vm72_vm0, %v21_v63, -inf  ;;  %194 = vst.msk [vmem:[%s536_s1 + $0x48] sm:$0xff] %vm72_vm0, %v142_v6  ;;  %v149_v18 = vmax.f32 %v147_v7, %v148_v55  ;;  %v165_v20 = vsel %vm72_vm0, %v37_v4, -inf  ;;  %v55_v28 = vld [vmem:[%s535_s0 + $0x178] sm:$0xff] }
  0x19   :  { %v154_v19 = vmax.f32 %v152_v8, %v153_v1  ;;  %v167_v21 = vsel %vm72_vm0, %v53_v5, -inf  ;;  %v166_v24 = vmax.f32 %v164_v15, %v165_v20  ;;  %v171_v26 = vsel %vm72_vm0, %v22_v10, -inf  ;;  %v71_v36 = vld [vmem:[%s535_s0 + $0x1f8] sm:$0xff] }
  0x1a   :  { %v161_v23 = vmax.f32 %v159_v11, %v160_v12  ;;  %195 = vst.msk [vmem:[%s536_s1 + $0x50] sm:$0xff] %vm72_vm0, %v149_v18  ;;  %v169_v30 = vsel %vm72_vm0, %v69_v14, -inf  ;;  %v172_v31 = vsel %vm72_vm0, %v38_v16, -inf  ;;  %v174_v32 = vsel %vm72_vm0, %v54_v17, -inf }
  0x1b   :  { %v156_v29 = vmax.f32 %v154_v19, %v155_v2  ;;  %v168_v34 = vmax.f32 %v166_v24, %v167_v21  ;;  %v173_v35 = vmax.f32 %v171_v26, %v172_v31  ;;  %v178_v37 = vsel %vm72_vm0, %v23_v22, -inf }
  0x1c   :  { %v163_v33 = vmax.f32 %v161_v23, %v162_v13  ;;  %v176_v38 = vsel %vm72_vm0, %v70_v25, -inf  ;;  %v179_v39 = vsel %vm72_vm0, %v39_v27, -inf  ;;  %v181_v40 = vsel %vm72_vm0, %v55_v28, -inf }
  0x1d   :  { %196 = vst.msk [vmem:[%s536_s1 + $0x58] sm:$0xff] %vm72_vm0, %v156_v29  ;;  %v170_v41 = vmax.f32 %v168_v34, %v169_v30  ;;  %v175_v42 = vmax.f32 %v173_v35, %v174_v32  ;;  %v180_v43 = vmax.f32 %v178_v37, %v179_v39  ;;  %v183_v44 = vsel %vm72_vm0, %v71_v36, -inf }
  0x1e   :  { %197 = vst.msk [vmem:[%s536_s1 + $0x60] sm:$0xff] %vm72_vm0, %v163_v33 }
  0x1f   :  { %198 = vst.msk [vmem:[%s536_s1 + $0x68] sm:$0xff] %vm72_vm0, %v170_v41  ;;  %v177_v45 = vmax.f32 %v175_v42, %v176_v38  ;;  %v182_v46 = vmax.f32 %v180_v43, %v181_v40 }
  0x21   :  { %199 = vst.msk [vmem:[%s536_s1 + $0x70] sm:$0xff] %vm72_vm0, %v177_v45  ;;  %v184_v47 = vmax.f32 %v182_v46, %v183_v44 }
  0x23   :  { %200 = vst.msk [vmem:[%s536_s1 + $0x78] sm:$0xff] %vm72_vm0, %v184_v47 }

// kernel: dis_tan_forward.14
= control target key start
LH: loop header
LB: loop body
LE: loop exit
PB: predicated region body
PF: predicated region fallthrough
CT: control target
= control target key end

     0   :  { %v654_v35 = vmov 0.0   ;;  %vm655_vm0 = vmmov 0   ;;  %s811_s1 = inlined_call_operand.vmem [shape: bf16[640,128], index: 1, kind: input, shape index: {}]   ;;  %s812_s0 = inlined_call_operand.vmem [shape: bf16[8,640], index: 0, kind: input, shape index: {}]   ;;  %s813_s2 = inlined_call_operand.vmem [shape: f32[1,128], index: 2, kind: input, shape index: {}]   ;;  %s814_s3 = inlined_call_operand.vmem [shape: f32[8,128], index: 3, kind: output, shape index: {}]  }
   0x1   :  { %v609_v0 = vld [vmem:[%s811_s1 + $0x78] sm:$0xff]   ;;  %v613_v4 = vld [vmem:[%s811_s1 + $0x70] sm:$0xff]   ;;  %v617_v8 = vld [vmem:[%s811_s1 + $0x68] sm:$0xff]  }
   0x2   :  { %v610_v1 = vld [vmem:[%s811_s1 + $0x38] sm:$0xff]   ;;  %534 = vmatprep.subr.bf16.mxu0 %v609_v0  ;;  %v614_v5 = vld [vmem:[%s811_s1 + $0x30] sm:$0xff]   ;;  %v618_v9 = vld [vmem:[%s811_s1 + $0x28] sm:$0xff]  }
   0x3   :  { %v611_v2 = vld [vmem:[%s811_s1 + $0xf8] sm:$0xff]   ;;  %535 = vmatpush3.bf16.msra.mxu0 %v610_v1  ;;  %v615_v6 = vld [vmem:[%s811_s1 + $0xf0] sm:$0xff]   ;;  %v619_v10 = vld [vmem:[%s811_s1 + $0xe8] sm:$0xff]  }
   0x4   :  { %v612_v3 = vld [vmem:[%s811_s1 + $0xb8] sm:$0xff]   ;;  %556 = vmatprep.subr.bf16.mxu1 %v611_v2  ;;  %536 = vmatprep.subr.bf16.mxu0 %v613_v4  ;;  %v616_v7 = vld [vmem:[%s811_s1 + $0xb0] sm:$0xff]   ;;  %v620_v11 = vld [vmem:[%s811_s1 + $0xa8] sm:$0xff]  }
   0x5   :  { %557 = vmatpush3.bf16.msra.mxu1 %v612_v3  ;;  %v621_v12 = vld [vmem:[%s811_s1 + $0x60] sm:$0xff]   ;;  %v625_v16 = vld [vmem:[%s811_s1 + $0x58] sm:$0xff]   ;;  %v629_v20 = vld [vmem:[%s811_s1 + $0x50] sm:$0xff]  }
   0x6   :  { %558 = vmatprep.subr.bf16.mxu1 %v615_v6  ;;  %v622_v13 = vld [vmem:[%s811_s1 + $0x20] sm:$0xff]   ;;  %v626_v17 = vld [vmem:[%s811_s1 + $0x18] sm:$0xff]   ;;  %v630_v21 = vld [vmem:[%s811_s1 + $0x10] sm:$0xff]  }
   0x7   :  { %537 = vmatpush3.bf16.msra.mxu0 %v614_v5  ;;  %v623_v14 = vld [vmem:[%s811_s1 + $0xe0] sm:$0xff]   ;;  %v627_v18 = vld [vmem:[%s811_s1 + $0xd8] sm:$0xff]   ;;  %v631_v22 = vld [vmem:[%s811_s1 + $0xd0] sm:$0xff]  }
   0x8   :  { %538 = vmatprep.subr.bf16.mxu0 %v617_v8  ;;  %v624_v15 = vld [vmem:[%s811_s1 + $0xa0] sm:$0xff]   ;;  %v628_v19 = vld [vmem:[%s811_s1 + $0x98] sm:$0xff]   ;;  %v632_v23 = vld [vmem:[%s811_s1 + $0x90] sm:$0xff]  }
   0x9   :  { %559 = vmatpush3.bf16.msra.mxu1 %v616_v7  ;;  %v633_v24 = vld [vmem:[%s811_s1 + $0x48] sm:$0xff]   ;;  %v637_v28 = vld [vmem:[%s811_s1 + $0x40] sm:$0xff]   ;;  %v646_v39 = vld [vmem:[%s811_s1 + $0x138] sm:$0xff]  }
   0xa   :  { %560 = vmatprep.subr.bf16.mxu1 %v619_v10  ;;  %v634_v25 = vld [vmem:[%s811_s1 + $0x8] sm:$0xff]   ;;  %v638_v29 = vld [vmem:[%s811_s1] sm:$0xff]   ;;  %v647_v40 = vld [vmem:[%s811_s1 + $0x130] sm:$0xff]  }
   0xb   :  { %539 = vmatpush3.bf16.msra.mxu0 %v618_v9  ;;  %v635_v26 = vld [vmem:[%s811_s1 + $0xc8] sm:$0xff]   ;;  %v639_v30 = vld [vmem:[%s811_s1 + $0xc0] sm:$0xff]   ;;  %v650_v43 = vld [vmem:[%s811_s1 + $0x118] sm:$0xff]  }
   0xc   :  { %540 = vmatprep.subr.bf16.mxu0 %v621_v12  ;;  %v636_v27 = vld [vmem:[%s811_s1 + $0x88] sm:$0xff]   ;;  %v15_v31 = vld [vmem:[%s812_s0] sm:$0xff]  ;;  %v651_v44 = vld [vmem:[%s811_s1 + $0x110] sm:$0xff]  }
   0xd   :  { %561 = vmatpush3.bf16.msra.mxu1 %v620_v11  ;;  %v489_v32 = vcombine.low %v15_v31, %v15_v31  ;;  %v490_v33 = vcombine.high %v15_v31, %v15_v31  ;;  %v643_v34 = vld [vmem:[%s811_s1 + $0x80] sm:$0xff]   ;;  %v16_v36 = vld [vmem:[%s812_s0 + $0x8] sm:$0xff]  ;;  %v642_v47 = vld [vmem:[%s812_s0 + $0x10] ss:$0 sps:$4 sm:$0xff]  }
   0xe   :  { %562 = vmatprep.subr.bf16.mxu1 %v623_v14  ;;  %v491_v37 = vcombine.low %v16_v36, %v16_v36  ;;  %v492_v38 = vcombine.high %v16_v36, %v16_v36  ;;  %v648_v41 = vld [vmem:[%s811_s1 + $0x128] sm:$0xff]   ;;  %v649_v42 = vld [vmem:[%s811_s1 + $0x120] sm:$0xff]  }
   0xf   :  { %541 = vmatpush3.bf16.msra.mxu0 %v622_v13  ;;  %395 = vmatprep.mubr.bf16.mxu0 %v490_v33  ;;  %v652_v45 = vld [vmem:[%s811_s1 + $0x108] sm:$0xff]   ;;  %v653_v46 = vld [vmem:[%s811_s1 + $0x100] sm:$0xff]  }
  0x10   :  { %542 = vmatprep.subr.bf16.mxu0 %v625_v16  ;;  %435 = vmatprep.mubr.bf16.mxu1 %v492_v38  ;;  %v488_v57 = vld [vmem:[%s813_s2] ss:$0 sm:$0xff] }
  0x11   :  { %563 = vmatpush3.bf16.msra.mxu1 %v624_v15 }
  0x12   :  { %564 = vmatprep.subr.bf16.mxu1 %v627_v18 }
  0x13   :  { %543 = vmatpush3.bf16.msra.mxu0 %v626_v17 }
  0x14   :  { %544 = vmatprep.subr.bf16.mxu0 %v629_v20 }
  0x15   :  { %565 = vmatpush3.bf16.msra.mxu1 %v628_v19 }
  0x16   :  { %566 = vmatprep.subr.bf16.mxu1 %v631_v22 }
  0x17   :  { %545 = vmatpush3.bf16.msra.mxu0 %v630_v21 }
  0x18   :  { %546 = vmatprep.subr.bf16.mxu0 %v633_v24 }
  0x19   :  { %567 = vmatpush3.bf16.msra.mxu1 %v632_v23 }
  0x1a   :  { %568 = vmatprep.subr.bf16.mxu1 %v635_v26 }
  0x1b   :  { %547 = vmatpush3.bf16.msra.mxu0 %v634_v25 }
  0x1c   :  { %548 = vmatprep.subr.bf16.mxu0 %v637_v28 }
  0x1d   :  { %569 = vmatpush3.bf16.msra.mxu1 %v636_v27 }
  0x1e   :  { %570 = vmatprep.subr.bf16.mxu1 %v639_v30 }
  0x1f   :  { %549 = vmatpush3.bf16.msra.mxu0 %v638_v29 }
  0x20   :  { %587 = vmatprep.subr.bf16.mxu0 %v654_v35 }
  0x21   :  { %571 = vmatpush3.bf16.msra.mxu1 %v643_v34 }
  0x22   :  { %396 = vmatmul.mubr.bf16.vlgmr.msra.gmra.mxu0 %v489_v32 }
  0x23   :  { %588 = vmatpush3.bf16.msra.mxu0 %v646_v39  ;;  %603 = vmatprep.mubr.msk.bf16.mxu0 %vm655_vm0, %v654_v35 }
  0x24   :  { %436 = vmatmul.mubr.bf16.vlgmr.msra.gmra.mxu1 %v491_v37  ;;  %589 = vmatprep.subr.bf16.mxu0 %v654_v35 }
  0x27   :  { %590 = vmatpush3.bf16.msra.mxu0 %v647_v40 }
  0x28   :  { %591 = vmatprep.subr.bf16.mxu0 %v654_v35 }
  0x2b   :  { %592 = vmatpush3.bf16.msra.mxu0 %v648_v41 }
  0x2c   :  { %593 = vmatprep.subr.bf16.mxu0 %v654_v35 }
  0x2f   :  { %594 = vmatpush3.bf16.msra.mxu0 %v649_v42 }
  0x30   :  { %595 = vmatprep.subr.bf16.mxu0 %v654_v35 }
  0x33   :  { %596 = vmatpush3.bf16.msra.mxu0 %v650_v43 }
  0x34   :  { %597 = vmatprep.subr.bf16.mxu0 %v654_v35 }
  0x37   :  { %598 = vmatpush3.bf16.msra.mxu0 %v651_v44 }
  0x38   :  { %599 = vmatprep.subr.bf16.mxu0 %v654_v35 }
  0x3b   :  { %600 = vmatpush3.bf16.msra.mxu0 %v652_v45 }
  0x3c   :  { %601 = vmatprep.subr.bf16.mxu0 %v654_v35 }
  0x3f   :  { %602 = vmatpush3.bf16.msra.mxu0 %v653_v46 }
  0x42   :  { %604 = vmatmul.mubr.bf16.vlgmr.msra.gmra.mxu0 %v642_v47 }
  0xe2   :  { %v550_v48 = vpop.f32.mrf.mxu0 }
  0xe4   :  { %v551_v49 = vpop.f32.mrf.mxu0  ;;  %v572_v50 = vpop.f32.mrf.mxu1 }
  0xe5   :  { %v552_v56 = vadd.f32 %v551_v49, %v550_v48 }
  0xe6   :  { %v553_v51 = vpop.f32.mrf.mxu0  ;;  %v573_v52 = vpop.f32.mrf.mxu1 }
  0xe7   :  { %v398_v58 = vadd.f32 %v552_v56, %v488_v57  ;;  %v574_v59 = vadd.f32 %v573_v52, %v572_v50 }
  0xe8   :  { %v554_v53 = vpop.f32.mrf.mxu0  ;;  %v575_v54 = vpop.f32.mrf.mxu1 }
  0xe9   :  { %v438_v60 = vadd.f32 %v574_v59, %v398_v58 }
  0xea   :  { %v576_v55 = vpop.f32.mrf.mxu1 }
 0x102   :  { %v477_v61 = vpop.f32.mrf.mxu0 }
 0x103   :  { %v478_v62 = vadd.f32 %v477_v61, %v438_v60 }
 0x104   :  { %v605_v63 = vpop.f32.mrf.mxu0 }
 0x105   :  { %483 = vst [vmem:[%s814_s3] sm:$0xff] %v478_v62 }
 0x106   :  { %v480_v0 = vpop.f32.mrf.mxu0 }
 0x108   :  { %v606_v1 = vpop.f32.mrf.mxu0 }

// kernel: dis_tan_forward.15
= control target key start
LH: loop header
LB: loop body
LE: loop exit
PB: predicated region body
PF: predicated region fallthrough
CT: control target
= control target key end

     0   :  { %v181_v0 = vmov 0.0   ;;  %vm182_vm0 = vmmov 0   ;;  %s236_s1 = inlined_call_operand.vmem [shape: bf16[128,128], index: 1, kind: input, shape index: {}]   ;;  %s237_s0 = inlined_call_operand.vmem [shape: bf16[8,128], index: 0, kind: input, shape index: {}]   ;;  %s238_s2 = inlined_call_operand.vmem [shape: f32[1,128], index: 2, kind: input, shape index: {}]   ;;  %s239_s3 = inlined_call_operand.vmem [shape: f32[8,128], index: 3, kind: output, shape index: {}]  }
   0x1   :  { %151 = vmatprep.subr.bf16.mxu0 %v181_v0  ;;  %v173_v1 = vld [vmem:[%s236_s1 + $0x38] sm:$0xff]   ;;  %167 = vmatprep.mubr.msk.bf16.mxu0 %vm182_vm0, %v181_v0  ;;  %v174_v2 = vld [vmem:[%s236_s1 + $0x30] sm:$0xff]   ;;  %v175_v3 = vld [vmem:[%s236_s1 + $0x28] sm:$0xff]  }
   0x2   :  { %152 = vmatpush3.bf16.msra.mxu0 %v173_v1  ;;  %v176_v4 = vld [vmem:[%s236_s1 + $0x20] sm:$0xff]   ;;  %v177_v5 = vld [vmem:[%s236_s1 + $0x18] sm:$0xff]   ;;  %v178_v6 = vld [vmem:[%s236_s1 + $0x10] sm:$0xff]  }
   0x3   :  { %153 = vmatprep.subr.bf16.mxu0 %v181_v0  ;;  %v179_v7 = vld [vmem:[%s236_s1 + $0x8] sm:$0xff]   ;;  %v180_v8 = vld [vmem:[%s236_s1] sm:$0xff]  }
   0x4   :  { %v15_v9 = vld [vmem:[%s237_s0] sm:$0xf] }
   0x5   :  { %v133_v10 = vld [vmem:[%s238_s2] ss:$0 sm:$0xff] }
   0x6   :  { %154 = vmatpush3.bf16.msra.mxu0 %v174_v2 }
   0x7   :  { %155 = vmatprep.subr.bf16.mxu0 %v181_v0 }
   0xa   :  { %156 = vmatpush3.bf16.msra.mxu0 %v175_v3 }
   0xb   :  { %157 = vmatprep.subr.bf16.mxu0 %v181_v0 }
   0xe   :  { %158 = vmatpush3.bf16.msra.mxu0 %v176_v4 }
   0xf   :  { %159 = vmatprep.subr.bf16.mxu0 %v181_v0 }
  0x12   :  { %160 = vmatpush3.bf16.msra.mxu0 %v177_v5 }
  0x13   :  { %161 = vmatprep.subr.bf16.mxu0 %v181_v0 }
  0x16   :  { %162 = vmatpush3.bf16.msra.mxu0 %v178_v6 }
  0x17   :  { %163 = vmatprep.subr.bf16.mxu0 %v181_v0 }
  0x1a   :  { %164 = vmatpush3.bf16.msra.mxu0 %v179_v7 }
  0x1b   :  { %165 = vmatprep.subr.bf16.mxu0 %v181_v0 }
  0x1e   :  { %166 = vmatpush3.bf16.msra.mxu0 %v180_v8 }
  0x21   :  { %168 = vmatmul.mubr.bf16.vlgmr.msra.gmra.mxu0 %v15_v9 }
  0xe1   :  { %v121_v11 = vpop.f32.mrf.mxu0 }
  0xe2   :  { %v122_v12 = vadd.f32 %v133_v10, %v121_v11 }
  0xe3   :  { %v169_v13 = vpop.f32.mrf.mxu0 }
  0xe4   :  { %v127_v14 = vmax.f32 %v122_v12, 0.0 }
  0xe5   :  { %v124_v15 = vpop.f32.mrf.mxu0 }
  0xe6   :  { %128 = vst [vmem:[%s239_s3] sm:$0xff] %v127_v14 }
  0xe7   :  { %v170_v16 = vpop.f32.mrf.mxu0 }

// kernel: dis_tan_forward.17
= control target key start
LH: loop header
LB: loop body
LE: loop exit
PB: predicated region body
PF: predicated region fallthrough
CT: control target
= control target key end

     0   :  { %v180_v0 = vmov 0.0   ;;  %vm181_vm0 = vmmov 0   ;;  %s235_s1 = inlined_call_operand.vmem [shape: bf16[128,128], index: 1, kind: input, shape index: {}]   ;;  %s236_s0 = inlined_call_operand.vmem [shape: bf16[8,128], index: 0, kind: input, shape index: {}]   ;;  %s237_s2 = inlined_call_operand.vmem [shape: f32[1,128], index: 2, kind: input, shape index: {}]   ;;  %s238_s3 = inlined_call_operand.vmem [shape: f32[8,128], index: 3, kind: output, shape index: {}]  }
   0x1   :  { %150 = vmatprep.subr.bf16.mxu0 %v180_v0  ;;  %v172_v1 = vld [vmem:[%s235_s1 + $0x38] sm:$0xff]   ;;  %166 = vmatprep.mubr.msk.bf16.mxu0 %vm181_vm0, %v180_v0  ;;  %v173_v2 = vld [vmem:[%s235_s1 + $0x30] sm:$0xff]   ;;  %v174_v3 = vld [vmem:[%s235_s1 + $0x28] sm:$0xff]  }
   0x2   :  { %151 = vmatpush3.bf16.msra.mxu0 %v172_v1  ;;  %v175_v4 = vld [vmem:[%s235_s1 + $0x20] sm:$0xff]   ;;  %v176_v5 = vld [vmem:[%s235_s1 + $0x18] sm:$0xff]   ;;  %v177_v6 = vld [vmem:[%s235_s1 + $0x10] sm:$0xff]  }
   0x3   :  { %152 = vmatprep.subr.bf16.mxu0 %v180_v0  ;;  %v178_v7 = vld [vmem:[%s235_s1 + $0x8] sm:$0xff]   ;;  %v179_v8 = vld [vmem:[%s235_s1] sm:$0xff]  }
   0x4   :  { %v15_v9 = vld [vmem:[%s236_s0] sm:$0xf] }
   0x5   :  { %v132_v10 = vld [vmem:[%s237_s2] ss:$0 sm:$0xff] }
   0x6   :  { %153 = vmatpush3.bf16.msra.mxu0 %v173_v2 }
   0x7   :  { %154 = vmatprep.subr.bf16.mxu0 %v180_v0 }
   0xa   :  { %155 = vmatpush3.bf16.msra.mxu0 %v174_v3 }
   0xb   :  { %156 = vmatprep.subr.bf16.mxu0 %v180_v0 }
   0xe   :  { %157 = vmatpush3.bf16.msra.mxu0 %v175_v4 }
   0xf   :  { %158 = vmatprep.subr.bf16.mxu0 %v180_v0 }
  0x12   :  { %159 = vmatpush3.bf16.msra.mxu0 %v176_v5 }
  0x13   :  { %160 = vmatprep.subr.bf16.mxu0 %v180_v0 }
  0x16   :  { %161 = vmatpush3.bf16.msra.mxu0 %v177_v6 }
  0x17   :  { %162 = vmatprep.subr.bf16.mxu0 %v180_v0 }
  0x1a   :  { %163 = vmatpush3.bf16.msra.mxu0 %v178_v7 }
  0x1b   :  { %164 = vmatprep.subr.bf16.mxu0 %v180_v0 }
  0x1e   :  { %165 = vmatpush3.bf16.msra.mxu0 %v179_v8 }
  0x21   :  { %167 = vmatmul.mubr.bf16.vlgmr.msra.gmra.mxu0 %v15_v9 }
  0xe1   :  { %v121_v11 = vpop.f32.mrf.mxu0 }
  0xe2   :  { %v122_v12 = vadd.f32 %v132_v10, %v121_v11 }
  0xe3   :  { %v168_v13 = vpop.f32.mrf.mxu0 }
  0xe4   :  { %127 = vst [vmem:[%s238_s3] sm:$0xff] %v122_v12 }
  0xe5   :  { %v124_v14 = vpop.f32.mrf.mxu0 }
  0xe7   :  { %v169_v15 = vpop.f32.mrf.mxu0 }

</bundles_post_ra>
